<compile_context>
chip_gen: v7x
topology: tpu7x:2x2x1
jax: 0.10.0
libtpu: 0.0.40
codegen_flags: <defaults>
</compile_context>

<pallas_src>
import functools

import jax
import jax.numpy as jnp
from jax import lax
from jax.experimental import pallas as pl
from jax.experimental.pallas import tpu as pltpu

KSIZE = 5
PAD = 2
EPS = 1e-5


def _round_up(x, m):
    return (x + m - 1) // m * m


# ---------------- Pallas kernels ----------------

def _make_conv_stats_kernel(Cin, Cout, tq, Hp, Wp):
    # static flattened-offset table for the 5x5x5 stencil (kw fastest)
    offsets = []
    for kd in range(KSIZE):
        for kh in range(KSIZE):
            for kw in range(KSIZE):
                offsets.append(kd * Hp * Wp + kh * Wp + kw)

    def kernel(x2_ref, w_ref, m_ref, y_ref, s_ref, p_ref):
        # Build the im2col patch tile in VMEM.  Row (idx*Cin + ci) of p_ref is
        # the tq-wide window of flattened padded x (channel ci) shifted by the
        # static stencil offset; the tile position comes from the BlockSpec.
        for idx, off in enumerate(offsets):
            p_ref[idx * Cin:(idx + 1) * Cin, :] = x2_ref[0, 0, :, off:off + tq]

        # One bf16 MXU matmul per tile: (Cout, K) @ (K, tq) -> (Cout, tq) f32.
        y = jnp.dot(w_ref[...], p_ref[...], preferred_element_type=jnp.float32)

        # Fused per-tile batch-norm partial statistics (masked: halo/garbage
        # columns and the q >= Qc tail contribute nothing).
        m = m_ref[...]                                  # (1, tq), 1.0 on valid
        ym = y * m
        s0 = jnp.sum(ym, axis=1, keepdims=True)         # (Cout, 1) sum
        s1 = jnp.sum(ym * y, axis=1, keepdims=True)     # (Cout, 1) sum of sq
        s_ref[0, 0] = jnp.concatenate(
            [s0, s1, jnp.zeros((Cout, 126), jnp.float32)], axis=1)

        # y intermediate stored in bf16 (halves the conv->BN HBM traffic).
        y_ref[0] = y.astype(y_ref.dtype)

    return kernel


def _bn_kernel(y_ref, scale_ref, shift_ref, o_ref):
    # out = y * (gamma / sqrt(var+eps)) + (beta - mean * gamma / sqrt(var+eps))
    o_ref[0] = y_ref[0].astype(jnp.float32) * scale_ref[...] + shift_ref[...]


# ---------------- wrapper ----------------

@functools.partial(jax.jit, static_argnames=("tq_target",))
def input_transition(x, wconv, bconv, gamma, beta, *, tq_target=2048):
    """Forward of V-Net InputTransition: batch_norm(conv3d(x), training=True).

    `bconv` is accepted for API parity but unused: a per-channel conv bias
    cancels exactly under batch norm computed with batch statistics.
    """
    del bconv
    N, Cin, D, H, W = x.shape
    Cout = wconv.shape[0]
    assert wconv.shape == (Cout, Cin, KSIZE, KSIZE, KSIZE)
    assert Cout % 8 == 0, "Cout must be a multiple of 8 for this kernel"

    Hp, Wp = H + 2 * PAD, W + 2 * PAD
    Qc = D * Hp * Wp                                   # compute domain / batch
    span = (KSIZE - 1) * Hp * Wp + (KSIZE - 1) * Wp + (KSIZE - 1)  # max offset
    tq = min(tq_target, _round_up(Qc, 128))
    tq = max(tq, _round_up(span, 128), 128)            # window trick needs tq>=span
    # TODO(synk): for very large H*W (span >> tq_target) sub-tile the q axis
    # inside the kernel instead of growing tq.
    T = -(-Qc // tq)                                   # q-tiles per batch element
    Qc_pad = T * tq
    Lx = (T + 1) * tq                                  # flattened length + halo tail
    K = Cin * KSIZE ** 3

    # ---- cheap XLA-side layout prep (O(|x|), not O(125*|x|)) ----
    xpad = jnp.pad(x, ((0, 0), (0, 0), (PAD, PAD), (PAD, PAD), (PAD, PAD)))
    xflat = xpad.reshape(N, Cin, (D + 2 * PAD) * Hp * Wp).astype(jnp.bfloat16)
    xflat = jnp.pad(xflat, ((0, 0), (0, 0), (0, Lx - xflat.shape[-1])))
    # per-tile halo'd windows: x2[n, t, ci, j] = xflat[n, ci, t*tq + j], j<2*tq
    lo = xflat[:, :, :T * tq].reshape(N, Cin, T, tq)
    hi = xflat[:, :, tq:(T + 1) * tq].reshape(N, Cin, T, tq)
    x2 = jnp.transpose(jnp.concatenate([lo, hi], axis=-1), (0, 2, 1, 3))

    # weight matrix, column order (kd, kh, kw, ci) matching the patch rows
    w2 = jnp.transpose(wconv, (0, 2, 3, 4, 1)).reshape(Cout, K).astype(jnp.bfloat16)

    # validity mask over the flattened compute domain (h/w halo + tail -> 0)
    q = jnp.arange(Qc_pad)
    valid = (q < Qc) & (q % Wp < W) & ((q // Wp) % Hp < H)
    mask = valid.astype(jnp.float32).reshape(1, Qc_pad)

    grid = (N, T)
    conv_kernel = _make_conv_stats_kernel(Cin, Cout, tq, Hp, Wp)

    # ---- fused conv (im2col-in-VMEM matmul) + per-tile BN statistics ----
    y, stats = pl.pallas_call(
        conv_kernel,
        out_shape=(
            jax.ShapeDtypeStruct((N, Cout, Qc_pad), jnp.bfloat16),
            jax.ShapeDtypeStruct((N, T, Cout, 128), jnp.float32),
        ),
        grid_spec=pltpu.PrefetchScalarGridSpec(
            num_scalar_prefetch=0,
            grid=grid,
            in_specs=[
                pl.BlockSpec((1, 1, Cin, 2 * tq), lambda n, t: (n, t, 0, 0)),
                pl.BlockSpec((Cout, K), lambda n, t: (0, 0)),
                pl.BlockSpec((1, tq), lambda n, t: (0, t)),
            ],
            out_specs=(
                pl.BlockSpec((1, Cout, tq), lambda n, t: (n, 0, t)),
                pl.BlockSpec((1, 1, Cout, 128), lambda n, t: (n, t, 0, 0)),
            ),
            scratch_shapes=[pltpu.VMEM((K, tq), jnp.bfloat16)],
        ),
        compiler_params=pltpu.CompilerParams(
            dimension_semantics=("parallel", "parallel")),
    )(x2, w2, mask)

    # ---- finish the tiny statistics reduction in plain XLA ----
    count = jnp.float32(N * D * H * W)
    ssum = jnp.sum(stats[..., 0], axis=(0, 1))          # (Cout,)
    ssq = jnp.sum(stats[..., 1], axis=(0, 1))           # (Cout,)
    mean = ssum / count
    # NOTE: E[y^2]-E[y]^2 in f32 (sums accumulated in f32 in-kernel); switch to
    # a shifted / two-pass variance if tolerances tighten.
    var = ssq / count - mean * mean                     # biased (training=True)
    scale = (gamma.astype(jnp.float32) * lax.rsqrt(var + EPS)).reshape(Cout, 1)
    shift = beta.astype(jnp.float32).reshape(Cout, 1) - mean.reshape(Cout, 1) * scale

    # ---- normalize + affine: lane-dense channel-first elementwise pass ----
    out_flat = pl.pallas_call(
        _bn_kernel,
        out_shape=jax.ShapeDtypeStruct((N, Cout, Qc_pad), jnp.float32),
        grid_spec=pltpu.PrefetchScalarGridSpec(
            num_scalar_prefetch=0,
            grid=grid,
            in_specs=[
                pl.BlockSpec((1, Cout, tq), lambda n, t: (n, 0, t)),
                pl.BlockSpec((Cout, 1), lambda n, t: (0, 0)),
                pl.BlockSpec((Cout, 1), lambda n, t: (0, 0)),
            ],
            out_specs=pl.BlockSpec((1, Cout, tq), lambda n, t: (n, 0, t)),
        ),
        compiler_params=pltpu.CompilerParams(
            dimension_semantics=("parallel", "parallel")),
    )(y, scale, shift)

    # ---- NCDHW extraction: reshape + slice only, no full transpose ----
    out = out_flat[:, :, :Qc].reshape(N, Cout, D, Hp, Wp)[:, :, :, :H, :W]
    return out


# ---------------- pure-JAX reference (for verification) ----------------

def reference(x, wconv, bconv, gamma, beta):
    y = lax.conv_general_dilated(
        x, wconv,
        window_strides=(1, 1, 1),
        padding=((PAD, PAD), (PAD, PAD), (PAD, PAD)),
        dimension_numbers=("NCDHW", "OIDHW", "NCDHW"),
    ) + bconv.reshape(1, -1, 1, 1, 1)
    mean = jnp.mean(y, axis=(0, 2, 3, 4), keepdims=True)
    var = jnp.mean((y - mean) ** 2, axis=(0, 2, 3, 4), keepdims=True)
    return (y - mean) * lax.rsqrt(var + EPS) * gamma.reshape(1, -1, 1, 1, 1) \
        + beta.reshape(1, -1, 1, 1, 1)


if __name__ == "__main__":
    key = jax.random.PRNGKey(0)
    inChans, outChans = 2, 16
    N, D, H, W = 2, 8, 8, 8

    kx, kw, kb = jax.random.split(key, 3)
    x = jax.random.normal(kx, (N, inChans, D, H, W), jnp.float32)

    fan_in = inChans * KSIZE ** 3
    wconv = jax.random.normal(kw, (outChans, inChans, KSIZE, KSIZE, KSIZE),
                              jnp.float32) / jnp.sqrt(float(fan_in))
    bconv = 0.1 * jax.random.normal(kb, (outChans,), jnp.float32)
    gamma = jnp.ones((outChans,), jnp.float32)   # PyTorch BatchNorm default affine
    beta = jnp.zeros((outChans,), jnp.float32)

    out = jax.block_until_ready(input_transition(x, wconv, bconv, gamma, beta))
    ref = reference(x, wconv, bconv, gamma, beta)

    assert out.shape == (N, outChans, D, H, W)
    assert bool(jnp.all(jnp.isfinite(out)))
    max_err = float(jnp.max(jnp.abs(out - ref)))
    assert bool(jnp.allclose(out, ref, atol=5e-2, rtol=5e-2)), (
        f"Pallas output mismatch vs reference (bf16 streams), max abs err={max_err}")

    print("KERNEL_OK")
</pallas_src>

<mosaic_0001>
module attributes {stable_mosaic.version = 11 : i64} {
  func.func @kernel(%arg0: i32, %arg1: i32, %arg2: memref<1x1x2x2304xbf16, #tpu.memory_space<vmem>>, %arg3: memref<16x250xbf16, #tpu.memory_space<vmem>>, %arg4: memref<1x1152xf32, #tpu.memory_space<vmem>>, %arg5: memref<1x16x1152xbf16, #tpu.memory_space<vmem>>, %arg6: memref<1x1x16x128xf32, #tpu.memory_space<vmem>>, %arg7: memref<250x1152xbf16, #tpu.memory_space<vmem>>) attributes {dimension_semantics = [#tpu.dimension_semantics<parallel>, #tpu.dimension_semantics<parallel>], iteration_bounds = array<i64: 2, 1>, scalar_prefetch = 0 : i64, scratch_operands = 1 : i64, tpu.core_type = #tpu.core_type<tc>, window_params = [{transform_indices = @transform_0, window_bounds = array<i64: 1, 1, 2, 2304>}, {pipeline_mode = #tpu.pipeline_mode<synchronous>, transform_indices = @transform_1, window_bounds = array<i64: 16, 250>}, {transform_indices = @transform_2, window_bounds = array<i64: 1, 1152>}, {transform_indices = @transform_3, window_bounds = array<i64: 1, 16, 1152>}, {transform_indices = @transform_4, window_bounds = array<i64: 1, 1, 16, 128>}]} {
    %c0 = arith.constant 0 : index
    %c0_0 = arith.constant 0 : index
    %c0_1 = arith.constant 0 : index
    %c0_2 = arith.constant 0 : index
    %0 = vector.load %arg2[%c0, %c0_0, %c0_1, %c0_2] : memref<1x1x2x2304xbf16, #tpu.memory_space<vmem>>, vector<1x1x2x1152xbf16>
    %1 = vector.shape_cast %0 : vector<1x1x2x1152xbf16> to vector<2x1152xbf16>
    %c0_3 = arith.constant 0 : index
    %c0_4 = arith.constant 0 : index
    %2 = vector.load %arg7[%c0_3, %c0_4] : memref<250x1152xbf16, #tpu.memory_space<vmem>>, vector<2x1152xbf16>
    tpu.vector_store %arg7[%c0_3, %c0_4], %1 {strides = array<i32>} : memref<250x1152xbf16, #tpu.memory_space<vmem>>, vector<2x1152xbf16>,
    %c0_5 = arith.constant 0 : index
    %c0_6 = arith.constant 0 : index
    %c0_7 = arith.constant 0 : index
    %c1 = arith.constant 1 : index
    %3 = vector.load %arg2[%c0_5, %c0_6, %c0_7, %c1] : memref<1x1x2x2304xbf16, #tpu.memory_space<vmem>>, vector<1x1x2x1152xbf16>
    %4 = vector.shape_cast %3 : vector<1x1x2x1152xbf16> to vector<2x1152xbf16>
    %c2 = arith.constant 2 : index
    %c0_8 = arith.constant 0 : index
    %5 = vector.load %arg7[%c2, %c0_8] : memref<250x1152xbf16, #tpu.memory_space<vmem>>, vector<2x1152xbf16>
    tpu.vector_store %arg7[%c2, %c0_8], %4 {strides = array<i32>} : memref<250x1152xbf16, #tpu.memory_space<vmem>>, vector<2x1152xbf16>,
    %c0_9 = arith.constant 0 : index
    %c0_10 = arith.constant 0 : index
    %c0_11 = arith.constant 0 : index
    %c2_12 = arith.constant 2 : index
    %6 = vector.load %arg2[%c0_9, %c0_10, %c0_11, %c2_12] : memref<1x1x2x2304xbf16, #tpu.memory_space<vmem>>, vector<1x1x2x1152xbf16>
    %7 = vector.shape_cast %6 : vector<1x1x2x1152xbf16> to vector<2x1152xbf16>
    %c4 = arith.constant 4 : index
    %c0_13 = arith.constant 0 : index
    %8 = vector.load %arg7[%c4, %c0_13] : memref<250x1152xbf16, #tpu.memory_space<vmem>>, vector<2x1152xbf16>
    tpu.vector_store %arg7[%c4, %c0_13], %7 {strides = array<i32>} : memref<250x1152xbf16, #tpu.memory_space<vmem>>, vector<2x1152xbf16>,
    %c0_14 = arith.constant 0 : index
    %c0_15 = arith.constant 0 : index
    %c0_16 = arith.constant 0 : index
    %c3 = arith.constant 3 : index
    %9 = vector.load %arg2[%c0_14, %c0_15, %c0_16, %c3] : memref<1x1x2x2304xbf16, #tpu.memory_space<vmem>>, vector<1x1x2x1152xbf16>
    %10 = vector.shape_cast %9 : vector<1x1x2x1152xbf16> to vector<2x1152xbf16>
    %c6 = arith.constant 6 : index
    %c0_17 = arith.constant 0 : index
    %11 = vector.load %arg7[%c6, %c0_17] : memref<250x1152xbf16, #tpu.memory_space<vmem>>, vector<2x1152xbf16>
    tpu.vector_store %arg7[%c6, %c0_17], %10 {strides = array<i32>} : memref<250x1152xbf16, #tpu.memory_space<vmem>>, vector<2x1152xbf16>,
    %c0_18 = arith.constant 0 : index
    %c0_19 = arith.constant 0 : index
    %c0_20 = arith.constant 0 : index
    %c4_21 = arith.constant 4 : index
    %12 = vector.load %arg2[%c0_18, %c0_19, %c0_20, %c4_21] : memref<1x1x2x2304xbf16, #tpu.memory_space<vmem>>, vector<1x1x2x1152xbf16>
    %13 = vector.shape_cast %12 : vector<1x1x2x1152xbf16> to vector<2x1152xbf16>
    %c8 = arith.constant 8 : index
    %c0_22 = arith.constant 0 : index
    %14 = vector.load %arg7[%c8, %c0_22] : memref<250x1152xbf16, #tpu.memory_space<vmem>>, vector<2x1152xbf16>
    tpu.vector_store %arg7[%c8, %c0_22], %13 {strides = array<i32>} : memref<250x1152xbf16, #tpu.memory_space<vmem>>, vector<2x1152xbf16>,
    %c0_23 = arith.constant 0 : index
    %c0_24 = arith.constant 0 : index
    %c0_25 = arith.constant 0 : index
    %c12 = arith.constant 12 : index
    %15 = vector.load %arg2[%c0_23, %c0_24, %c0_25, %c12] : memref<1x1x2x2304xbf16, #tpu.memory_space<vmem>>, vector<1x1x2x1152xbf16>
    %16 = vector.shape_cast %15 : vector<1x1x2x1152xbf16> to vector<2x1152xbf16>
    %c10 = arith.constant 10 : index
    %c0_26 = arith.constant 0 : index
    %17 = vector.load %arg7[%c10, %c0_26] : memref<250x1152xbf16, #tpu.memory_space<vmem>>, vector<2x1152xbf16>
    tpu.vector_store %arg7[%c10, %c0_26], %16 {strides = array<i32>} : memref<250x1152xbf16, #tpu.memory_space<vmem>>, vector<2x1152xbf16>,
    %c0_27 = arith.constant 0 : index
    %c0_28 = arith.constant 0 : index
    %c0_29 = arith.constant 0 : index
    %c13 = arith.constant 13 : index
    %18 = vector.load %arg2[%c0_27, %c0_28, %c0_29, %c13] : memref<1x1x2x2304xbf16, #tpu.memory_space<vmem>>, vector<1x1x2x1152xbf16>
    %19 = vector.shape_cast %18 : vector<1x1x2x1152xbf16> to vector<2x1152xbf16>
    %c12_30 = arith.constant 12 : index
    %c0_31 = arith.constant 0 : index
    %20 = vector.load %arg7[%c12_30, %c0_31] : memref<250x1152xbf16, #tpu.memory_space<vmem>>, vector<2x1152xbf16>
    tpu.vector_store %arg7[%c12_30, %c0_31], %19 {strides = array<i32>} : memref<250x1152xbf16, #tpu.memory_space<vmem>>, vector<2x1152xbf16>,
    %c0_32 = arith.constant 0 : index
    %c0_33 = arith.constant 0 : index
    %c0_34 = arith.constant 0 : index
    %c14 = arith.constant 14 : index
    %21 = vector.load %arg2[%c0_32, %c0_33, %c0_34, %c14] : memref<1x1x2x2304xbf16, #tpu.memory_space<vmem>>, vector<1x1x2x1152xbf16>
    %22 = vector.shape_cast %21 : vector<1x1x2x1152xbf16> to vector<2x1152xbf16>
    %c14_35 = arith.constant 14 : index
    %c0_36 = arith.constant 0 : index
    %23 = vector.load %arg7[%c14_35, %c0_36] : memref<250x1152xbf16, #tpu.memory_space<vmem>>, vector<2x1152xbf16>
    tpu.vector_store %arg7[%c14_35, %c0_36], %22 {strides = array<i32>} : memref<250x1152xbf16, #tpu.memory_space<vmem>>, vector<2x1152xbf16>,
    %c0_37 = arith.constant 0 : index
    %c0_38 = arith.constant 0 : index
    %c0_39 = arith.constant 0 : index
    %c15 = arith.constant 15 : index
    %24 = vector.load %arg2[%c0_37, %c0_38, %c0_39, %c15] : memref<1x1x2x2304xbf16, #tpu.memory_space<vmem>>, vector<1x1x2x1152xbf16>
    %25 = vector.shape_cast %24 : vector<1x1x2x1152xbf16> to vector<2x1152xbf16>
    %c16 = arith.constant 16 : index
    %c0_40 = arith.constant 0 : index
    %26 = vector.load %arg7[%c16, %c0_40] : memref<250x1152xbf16, #tpu.memory_space<vmem>>, vector<2x1152xbf16>
    tpu.vector_store %arg7[%c16, %c0_40], %25 {strides = array<i32>} : memref<250x1152xbf16, #tpu.memory_space<vmem>>, vector<2x1152xbf16>,
    %c0_41 = arith.constant 0 : index
    %c0_42 = arith.constant 0 : index
    %c0_43 = arith.constant 0 : index
    %c16_44 = arith.constant 16 : index
    %27 = vector.load %arg2[%c0_41, %c0_42, %c0_43, %c16_44] : memref<1x1x2x2304xbf16, #tpu.memory_space<vmem>>, vector<1x1x2x1152xbf16>
    %28 = vector.shape_cast %27 : vector<1x1x2x1152xbf16> to vector<2x1152xbf16>
    %c18 = arith.constant 18 : index
    %c0_45 = arith.constant 0 : index
    %29 = vector.load %arg7[%c18, %c0_45] : memref<250x1152xbf16, #tpu.memory_space<vmem>>, vector<2x1152xbf16>
    tpu.vector_store %arg7[%c18, %c0_45], %28 {strides = array<i32>} : memref<250x1152xbf16, #tpu.memory_space<vmem>>, vector<2x1152xbf16>,
    %c0_46 = arith.constant 0 : index
    %c0_47 = arith.constant 0 : index
    %c0_48 = arith.constant 0 : index
    %c24 = arith.constant 24 : index
    %30 = vector.load %arg2[%c0_46, %c0_47, %c0_48, %c24] : memref<1x1x2x2304xbf16, #tpu.memory_space<vmem>>, vector<1x1x2x1152xbf16>
    %31 = vector.shape_cast %30 : vector<1x1x2x1152xbf16> to vector<2x1152xbf16>
    %c20 = arith.constant 20 : index
    %c0_49 = arith.constant 0 : index
    %32 = vector.load %arg7[%c20, %c0_49] : memref<250x1152xbf16, #tpu.memory_space<vmem>>, vector<2x1152xbf16>
    tpu.vector_store %arg7[%c20, %c0_49], %31 {strides = array<i32>} : memref<250x1152xbf16, #tpu.memory_space<vmem>>, vector<2x1152xbf16>,
    %c0_50 = arith.constant 0 : index
    %c0_51 = arith.constant 0 : index
    %c0_52 = arith.constant 0 : index
    %c25 = arith.constant 25 : index
    %33 = vector.load %arg2[%c0_50, %c0_51, %c0_52, %c25] : memref<1x1x2x2304xbf16, #tpu.memory_space<vmem>>, vector<1x1x2x1152xbf16>
    %34 = vector.shape_cast %33 : vector<1x1x2x1152xbf16> to vector<2x1152xbf16>
    %c22 = arith.constant 22 : index
    %c0_53 = arith.constant 0 : index
    %35 = vector.load %arg7[%c22, %c0_53] : memref<250x1152xbf16, #tpu.memory_space<vmem>>, vector<2x1152xbf16>
    tpu.vector_store %arg7[%c22, %c0_53], %34 {strides = array<i32>} : memref<250x1152xbf16, #tpu.memory_space<vmem>>, vector<2x1152xbf16>,
    %c0_54 = arith.constant 0 : index
    %c0_55 = arith.constant 0 : index
    %c0_56 = arith.constant 0 : index
    %c26 = arith.constant 26 : index
    %36 = vector.load %arg2[%c0_54, %c0_55, %c0_56, %c26] : memref<1x1x2x2304xbf16, #tpu.memory_space<vmem>>, vector<1x1x2x1152xbf16>
    %37 = vector.shape_cast %36 : vector<1x1x2x1152xbf16> to vector<2x1152xbf16>
    %c24_57 = arith.constant 24 : index
    %c0_58 = arith.constant 0 : index
    %38 = vector.load %arg7[%c24_57, %c0_58] : memref<250x1152xbf16, #tpu.memory_space<vmem>>, vector<2x1152xbf16>
    tpu.vector_store %arg7[%c24_57, %c0_58], %37 {strides = array<i32>} : memref<250x1152xbf16, #tpu.memory_space<vmem>>, vector<2x1152xbf16>,
    %c0_59 = arith.constant 0 : index
    %c0_60 = arith.constant 0 : index
    %c0_61 = arith.constant 0 : index
    %c27 = arith.constant 27 : index
    %39 = vector.load %arg2[%c0_59, %c0_60, %c0_61, %c27] : memref<1x1x2x2304xbf16, #tpu.memory_space<vmem>>, vector<1x1x2x1152xbf16>
    %40 = vector.shape_cast %39 : vector<1x1x2x1152xbf16> to vector<2x1152xbf16>
    %c26_62 = arith.constant 26 : index
    %c0_63 = arith.constant 0 : index
    %41 = vector.load %arg7[%c26_62, %c0_63] : memref<250x1152xbf16, #tpu.memory_space<vmem>>, vector<2x1152xbf16>
    tpu.vector_store %arg7[%c26_62, %c0_63], %40 {strides = array<i32>} : memref<250x1152xbf16, #tpu.memory_space<vmem>>, vector<2x1152xbf16>,
    %c0_64 = arith.constant 0 : index
    %c0_65 = arith.constant 0 : index
    %c0_66 = arith.constant 0 : index
    %c28 = arith.constant 28 : index
    %42 = vector.load %arg2[%c0_64, %c0_65, %c0_66, %c28] : memref<1x1x2x2304xbf16, #tpu.memory_space<vmem>>, vector<1x1x2x1152xbf16>
    %43 = vector.shape_cast %42 : vector<1x1x2x1152xbf16> to vector<2x1152xbf16>
    %c28_67 = arith.constant 28 : index
    %c0_68 = arith.constant 0 : index
    %44 = vector.load %arg7[%c28_67, %c0_68] : memref<250x1152xbf16, #tpu.memory_space<vmem>>, vector<2x1152xbf16>
    tpu.vector_store %arg7[%c28_67, %c0_68], %43 {strides = array<i32>} : memref<250x1152xbf16, #tpu.memory_space<vmem>>, vector<2x1152xbf16>,
    %c0_69 = arith.constant 0 : index
    %c0_70 = arith.constant 0 : index
    %c0_71 = arith.constant 0 : index
    %c36 = arith.constant 36 : index
    %45 = vector.load %arg2[%c0_69, %c0_70, %c0_71, %c36] : memref<1x1x2x2304xbf16, #tpu.memory_space<vmem>>, vector<1x1x2x1152xbf16>
    %46 = vector.shape_cast %45 : vector<1x1x2x1152xbf16> to vector<2x1152xbf16>
    %c30 = arith.constant 30 : index
    %c0_72 = arith.constant 0 : index
    %47 = vector.load %arg7[%c30, %c0_72] : memref<250x1152xbf16, #tpu.memory_space<vmem>>, vector<2x1152xbf16>
    tpu.vector_store %arg7[%c30, %c0_72], %46 {strides = array<i32>} : memref<250x1152xbf16, #tpu.memory_space<vmem>>, vector<2x1152xbf16>,
    %c0_73 = arith.constant 0 : index
    %c0_74 = arith.constant 0 : index
    %c0_75 = arith.constant 0 : index
    %c37 = arith.constant 37 : index
    %48 = vector.load %arg2[%c0_73, %c0_74, %c0_75, %c37] : memref<1x1x2x2304xbf16, #tpu.memory_space<vmem>>, vector<1x1x2x1152xbf16>
    %49 = vector.shape_cast %48 : vector<1x1x2x1152xbf16> to vector<2x1152xbf16>
    %c32 = arith.constant 32 : index
    %c0_76 = arith.constant 0 : index
    %50 = vector.load %arg7[%c32, %c0_76] : memref<250x1152xbf16, #tpu.memory_space<vmem>>, vector<2x1152xbf16>
    tpu.vector_store %arg7[%c32, %c0_76], %49 {strides = array<i32>} : memref<250x1152xbf16, #tpu.memory_space<vmem>>, vector<2x1152xbf16>,
    %c0_77 = arith.constant 0 : index
    %c0_78 = arith.constant 0 : index
    %c0_79 = arith.constant 0 : index
    %c38 = arith.constant 38 : index
    %51 = vector.load %arg2[%c0_77, %c0_78, %c0_79, %c38] : memref<1x1x2x2304xbf16, #tpu.memory_space<vmem>>, vector<1x1x2x1152xbf16>
    %52 = vector.shape_cast %51 : vector<1x1x2x1152xbf16> to vector<2x1152xbf16>
    %c34 = arith.constant 34 : index
    %c0_80 = arith.constant 0 : index
    %53 = vector.load %arg7[%c34, %c0_80] : memref<250x1152xbf16, #tpu.memory_space<vmem>>, vector<2x1152xbf16>
    tpu.vector_store %arg7[%c34, %c0_80], %52 {strides = array<i32>} : memref<250x1152xbf16, #tpu.memory_space<vmem>>, vector<2x1152xbf16>,
    %c0_81 = arith.constant 0 : index
    %c0_82 = arith.constant 0 : index
    %c0_83 = arith.constant 0 : index
    %c39 = arith.constant 39 : index
    %54 = vector.load %arg2[%c0_81, %c0_82, %c0_83, %c39] : memref<1x1x2x2304xbf16, #tpu.memory_space<vmem>>, vector<1x1x2x1152xbf16>
    %55 = vector.shape_cast %54 : vector<1x1x2x1152xbf16> to vector<2x1152xbf16>
    %c36_84 = arith.constant 36 : index
    %c0_85 = arith.constant 0 : index
    %56 = vector.load %arg7[%c36_84, %c0_85] : memref<250x1152xbf16, #tpu.memory_space<vmem>>, vector<2x1152xbf16>
    tpu.vector_store %arg7[%c36_84, %c0_85], %55 {strides = array<i32>} : memref<250x1152xbf16, #tpu.memory_space<vmem>>, vector<2x1152xbf16>,
    %c0_86 = arith.constant 0 : index
    %c0_87 = arith.constant 0 : index
    %c0_88 = arith.constant 0 : index
    %c40 = arith.constant 40 : index
    %57 = vector.load %arg2[%c0_86, %c0_87, %c0_88, %c40] : memref<1x1x2x2304xbf16, #tpu.memory_space<vmem>>, vector<1x1x2x1152xbf16>
    %58 = vector.shape_cast %57 : vector<1x1x2x1152xbf16> to vector<2x1152xbf16>
    %c38_89 = arith.constant 38 : index
    %c0_90 = arith.constant 0 : index
    %59 = vector.load %arg7[%c38_89, %c0_90] : memref<250x1152xbf16, #tpu.memory_space<vmem>>, vector<2x1152xbf16>
    tpu.vector_store %arg7[%c38_89, %c0_90], %58 {strides = array<i32>} : memref<250x1152xbf16, #tpu.memory_space<vmem>>, vector<2x1152xbf16>,
    %c0_91 = arith.constant 0 : index
    %c0_92 = arith.constant 0 : index
    %c0_93 = arith.constant 0 : index
    %c48 = arith.constant 48 : index
    %60 = vector.load %arg2[%c0_91, %c0_92, %c0_93, %c48] : memref<1x1x2x2304xbf16, #tpu.memory_space<vmem>>, vector<1x1x2x1152xbf16>
    %61 = vector.shape_cast %60 : vector<1x1x2x1152xbf16> to vector<2x1152xbf16>
    %c40_94 = arith.constant 40 : index
    %c0_95 = arith.constant 0 : index
    %62 = vector.load %arg7[%c40_94, %c0_95] : memref<250x1152xbf16, #tpu.memory_space<vmem>>, vector<2x1152xbf16>
    tpu.vector_store %arg7[%c40_94, %c0_95], %61 {strides = array<i32>} : memref<250x1152xbf16, #tpu.memory_space<vmem>>, vector<2x1152xbf16>,
    %c0_96 = arith.constant 0 : index
    %c0_97 = arith.constant 0 : index
    %c0_98 = arith.constant 0 : index
    %c49 = arith.constant 49 : index
    %63 = vector.load %arg2[%c0_96, %c0_97, %c0_98, %c49] : memref<1x1x2x2304xbf16, #tpu.memory_space<vmem>>, vector<1x1x2x1152xbf16>
    %64 = vector.shape_cast %63 : vector<1x1x2x1152xbf16> to vector<2x1152xbf16>
    %c42 = arith.constant 42 : index
    %c0_99 = arith.constant 0 : index
    %65 = vector.load %arg7[%c42, %c0_99] : memref<250x1152xbf16, #tpu.memory_space<vmem>>, vector<2x1152xbf16>
    tpu.vector_store %arg7[%c42, %c0_99], %64 {strides = array<i32>} : memref<250x1152xbf16, #tpu.memory_space<vmem>>, vector<2x1152xbf16>,
    %c0_100 = arith.constant 0 : index
    %c0_101 = arith.constant 0 : index
    %c0_102 = arith.constant 0 : index
    %c50 = arith.constant 50 : index
    %66 = vector.load %arg2[%c0_100, %c0_101, %c0_102, %c50] : memref<1x1x2x2304xbf16, #tpu.memory_space<vmem>>, vector<1x1x2x1152xbf16>
    %67 = vector.shape_cast %66 : vector<1x1x2x1152xbf16> to vector<2x1152xbf16>
    %c44 = arith.constant 44 : index
    %c0_103 = arith.constant 0 : index
    %68 = vector.load %arg7[%c44, %c0_103] : memref<250x1152xbf16, #tpu.memory_space<vmem>>, vector<2x1152xbf16>
    tpu.vector_store %arg7[%c44, %c0_103], %67 {strides = array<i32>} : memref<250x1152xbf16, #tpu.memory_space<vmem>>, vector<2x1152xbf16>,
    %c0_104 = arith.constant 0 : index
    %c0_105 = arith.constant 0 : index
    %c0_106 = arith.constant 0 : index
    %c51 = arith.constant 51 : index
    %69 = vector.load %arg2[%c0_104, %c0_105, %c0_106, %c51] : memref<1x1x2x2304xbf16, #tpu.memory_space<vmem>>, vector<1x1x2x1152xbf16>
    %70 = vector.shape_cast %69 : vector<1x1x2x1152xbf16> to vector<2x1152xbf16>
    %c46 = arith.constant 46 : index
    %c0_107 = arith.constant 0 : index
    %71 = vector.load %arg7[%c46, %c0_107] : memref<250x1152xbf16, #tpu.memory_space<vmem>>, vector<2x1152xbf16>
    tpu.vector_store %arg7[%c46, %c0_107], %70 {strides = array<i32>} : memref<250x1152xbf16, #tpu.memory_space<vmem>>, vector<2x1152xbf16>,
    %c0_108 = arith.constant 0 : index
    %c0_109 = arith.constant 0 : index
    %c0_110 = arith.constant 0 : index
    %c52 = arith.constant 52 : index
    %72 = vector.load %arg2[%c0_108, %c0_109, %c0_110, %c52] : memref<1x1x2x2304xbf16, #tpu.memory_space<vmem>>, vector<1x1x2x1152xbf16>
    %73 = vector.shape_cast %72 : vector<1x1x2x1152xbf16> to vector<2x1152xbf16>
    %c48_111 = arith.constant 48 : index
    %c0_112 = arith.constant 0 : index
    %74 = vector.load %arg7[%c48_111, %c0_112] : memref<250x1152xbf16, #tpu.memory_space<vmem>>, vector<2x1152xbf16>
    tpu.vector_store %arg7[%c48_111, %c0_112], %73 {strides = array<i32>} : memref<250x1152xbf16, #tpu.memory_space<vmem>>, vector<2x1152xbf16>,
    %c0_113 = arith.constant 0 : index
    %c0_114 = arith.constant 0 : index
    %c0_115 = arith.constant 0 : index
    %c144 = arith.constant 144 : index
    %75 = vector.load %arg2[%c0_113, %c0_114, %c0_115, %c144] : memref<1x1x2x2304xbf16, #tpu.memory_space<vmem>>, vector<1x1x2x1152xbf16>
    %76 = vector.shape_cast %75 : vector<1x1x2x1152xbf16> to vector<2x1152xbf16>
    %c50_116 = arith.constant 50 : index
    %c0_117 = arith.constant 0 : index
    %77 = vector.load %arg7[%c50_116, %c0_117] : memref<250x1152xbf16, #tpu.memory_space<vmem>>, vector<2x1152xbf16>
    tpu.vector_store %arg7[%c50_116, %c0_117], %76 {strides = array<i32>} : memref<250x1152xbf16, #tpu.memory_space<vmem>>, vector<2x1152xbf16>,
    %c0_118 = arith.constant 0 : index
    %c0_119 = arith.constant 0 : index
    %c0_120 = arith.constant 0 : index
    %c145 = arith.constant 145 : index
    %78 = vector.load %arg2[%c0_118, %c0_119, %c0_120, %c145] : memref<1x1x2x2304xbf16, #tpu.memory_space<vmem>>, vector<1x1x2x1152xbf16>
    %79 = vector.shape_cast %78 : vector<1x1x2x1152xbf16> to vector<2x1152xbf16>
    %c52_121 = arith.constant 52 : index
    %c0_122 = arith.constant 0 : index
    %80 = vector.load %arg7[%c52_121, %c0_122] : memref<250x1152xbf16, #tpu.memory_space<vmem>>, vector<2x1152xbf16>
    tpu.vector_store %arg7[%c52_121, %c0_122], %79 {strides = array<i32>} : memref<250x1152xbf16, #tpu.memory_space<vmem>>, vector<2x1152xbf16>,
    %c0_123 = arith.constant 0 : index
    %c0_124 = arith.constant 0 : index
    %c0_125 = arith.constant 0 : index
    %c146 = arith.constant 146 : index
    %81 = vector.load %arg2[%c0_123, %c0_124, %c0_125, %c146] : memref<1x1x2x2304xbf16, #tpu.memory_space<vmem>>, vector<1x1x2x1152xbf16>
    %82 = vector.shape_cast %81 : vector<1x1x2x1152xbf16> to vector<2x1152xbf16>
    %c54 = arith.constant 54 : index
    %c0_126 = arith.constant 0 : index
    %83 = vector.load %arg7[%c54, %c0_126] : memref<250x1152xbf16, #tpu.memory_space<vmem>>, vector<2x1152xbf16>
    tpu.vector_store %arg7[%c54, %c0_126], %82 {strides = array<i32>} : memref<250x1152xbf16, #tpu.memory_space<vmem>>, vector<2x1152xbf16>,
    %c0_127 = arith.constant 0 : index
    %c0_128 = arith.constant 0 : index
    %c0_129 = arith.constant 0 : index
    %c147 = arith.constant 147 : index
    %84 = vector.load %arg2[%c0_127, %c0_128, %c0_129, %c147] : memref<1x1x2x2304xbf16, #tpu.memory_space<vmem>>, vector<1x1x2x1152xbf16>
    %85 = vector.shape_cast %84 : vector<1x1x2x1152xbf16> to vector<2x1152xbf16>
    %c56 = arith.constant 56 : index
    %c0_130 = arith.constant 0 : index
    %86 = vector.load %arg7[%c56, %c0_130] : memref<250x1152xbf16, #tpu.memory_space<vmem>>, vector<2x1152xbf16>
    tpu.vector_store %arg7[%c56, %c0_130], %85 {strides = array<i32>} : memref<250x1152xbf16, #tpu.memory_space<vmem>>, vector<2x1152xbf16>,
    %c0_131 = arith.constant 0 : index
    %c0_132 = arith.constant 0 : index
    %c0_133 = arith.constant 0 : index
    %c148 = arith.constant 148 : index
    %87 = vector.load %arg2[%c0_131, %c0_132, %c0_133, %c148] : memref<1x1x2x2304xbf16, #tpu.memory_space<vmem>>, vector<1x1x2x1152xbf16>
    %88 = vector.shape_cast %87 : vector<1x1x2x1152xbf16> to vector<2x1152xbf16>
    %c58 = arith.constant 58 : index
    %c0_134 = arith.constant 0 : index
    %89 = vector.load %arg7[%c58, %c0_134] : memref<250x1152xbf16, #tpu.memory_space<vmem>>, vector<2x1152xbf16>
    tpu.vector_store %arg7[%c58, %c0_134], %88 {strides = array<i32>} : memref<250x1152xbf16, #tpu.memory_space<vmem>>, vector<2x1152xbf16>,
    %c0_135 = arith.constant 0 : index
    %c0_136 = arith.constant 0 : index
    %c0_137 = arith.constant 0 : index
    %c156 = arith.constant 156 : index
    %90 = vector.load %arg2[%c0_135, %c0_136, %c0_137, %c156] : memref<1x1x2x2304xbf16, #tpu.memory_space<vmem>>, vector<1x1x2x1152xbf16>
    %91 = vector.shape_cast %90 : vector<1x1x2x1152xbf16> to vector<2x1152xbf16>
    %c60 = arith.constant 60 : index
    %c0_138 = arith.constant 0 : index
    %92 = vector.load %arg7[%c60, %c0_138] : memref<250x1152xbf16, #tpu.memory_space<vmem>>, vector<2x1152xbf16>
    tpu.vector_store %arg7[%c60, %c0_138], %91 {strides = array<i32>} : memref<250x1152xbf16, #tpu.memory_space<vmem>>, vector<2x1152xbf16>,
    %c0_139 = arith.constant 0 : index
    %c0_140 = arith.constant 0 : index
    %c0_141 = arith.constant 0 : index
    %c157 = arith.constant 157 : index
    %93 = vector.load %arg2[%c0_139, %c0_140, %c0_141, %c157] : memref<1x1x2x2304xbf16, #tpu.memory_space<vmem>>, vector<1x1x2x1152xbf16>
    %94 = vector.shape_cast %93 : vector<1x1x2x1152xbf16> to vector<2x1152xbf16>
    %c62 = arith.constant 62 : index
    %c0_142 = arith.constant 0 : index
    %95 = vector.load %arg7[%c62, %c0_142] : memref<250x1152xbf16, #tpu.memory_space<vmem>>, vector<2x1152xbf16>
    tpu.vector_store %arg7[%c62, %c0_142], %94 {strides = array<i32>} : memref<250x1152xbf16, #tpu.memory_space<vmem>>, vector<2x1152xbf16>,
    %c0_143 = arith.constant 0 : index
    %c0_144 = arith.constant 0 : index
    %c0_145 = arith.constant 0 : index
    %c158 = arith.constant 158 : index
    %96 = vector.load %arg2[%c0_143, %c0_144, %c0_145, %c158] : memref<1x1x2x2304xbf16, #tpu.memory_space<vmem>>, vector<1x1x2x1152xbf16>
    %97 = vector.shape_cast %96 : vector<1x1x2x1152xbf16> to vector<2x1152xbf16>
    %c64 = arith.constant 64 : index
    %c0_146 = arith.constant 0 : index
    %98 = vector.load %arg7[%c64, %c0_146] : memref<250x1152xbf16, #tpu.memory_space<vmem>>, vector<2x1152xbf16>
    tpu.vector_store %arg7[%c64, %c0_146], %97 {strides = array<i32>} : memref<250x1152xbf16, #tpu.memory_space<vmem>>, vector<2x1152xbf16>,
    %c0_147 = arith.constant 0 : index
    %c0_148 = arith.constant 0 : index
    %c0_149 = arith.constant 0 : index
    %c159 = arith.constant 159 : index
    %99 = vector.load %arg2[%c0_147, %c0_148, %c0_149, %c159] : memref<1x1x2x2304xbf16, #tpu.memory_space<vmem>>, vector<1x1x2x1152xbf16>
    %100 = vector.shape_cast %99 : vector<1x1x2x1152xbf16> to vector<2x1152xbf16>
    %c66 = arith.constant 66 : index
    %c0_150 = arith.constant 0 : index
    %101 = vector.load %arg7[%c66, %c0_150] : memref<250x1152xbf16, #tpu.memory_space<vmem>>, vector<2x1152xbf16>
    tpu.vector_store %arg7[%c66, %c0_150], %100 {strides = array<i32>} : memref<250x1152xbf16, #tpu.memory_space<vmem>>, vector<2x1152xbf16>,
    %c0_151 = arith.constant 0 : index
    %c0_152 = arith.constant 0 : index
    %c0_153 = arith.constant 0 : index
    %c160 = arith.constant 160 : index
    %102 = vector.load %arg2[%c0_151, %c0_152, %c0_153, %c160] : memref<1x1x2x2304xbf16, #tpu.memory_space<vmem>>, vector<1x1x2x1152xbf16>
    %103 = vector.shape_cast %102 : vector<1x1x2x1152xbf16> to vector<2x1152xbf16>
    %c68 = arith.constant 68 : index
    %c0_154 = arith.constant 0 : index
    %104 = vector.load %arg7[%c68, %c0_154] : memref<250x1152xbf16, #tpu.memory_space<vmem>>, vector<2x1152xbf16>
    tpu.vector_store %arg7[%c68, %c0_154], %103 {strides = array<i32>} : memref<250x1152xbf16, #tpu.memory_space<vmem>>, vector<2x1152xbf16>,
    %c0_155 = arith.constant 0 : index
    %c0_156 = arith.constant 0 : index
    %c0_157 = arith.constant 0 : index
    %c168 = arith.constant 168 : index
    %105 = vector.load %arg2[%c0_155, %c0_156, %c0_157, %c168] : memref<1x1x2x2304xbf16, #tpu.memory_space<vmem>>, vector<1x1x2x1152xbf16>
    %106 = vector.shape_cast %105 : vector<1x1x2x1152xbf16> to vector<2x1152xbf16>
    %c70 = arith.constant 70 : index
    %c0_158 = arith.constant 0 : index
    %107 = vector.load %arg7[%c70, %c0_158] : memref<250x1152xbf16, #tpu.memory_space<vmem>>, vector<2x1152xbf16>
    tpu.vector_store %arg7[%c70, %c0_158], %106 {strides = array<i32>} : memref<250x1152xbf16, #tpu.memory_space<vmem>>, vector<2x1152xbf16>,
    %c0_159 = arith.constant 0 : index
    %c0_160 = arith.constant 0 : index
    %c0_161 = arith.constant 0 : index
    %c169 = arith.constant 169 : index
    %108 = vector.load %arg2[%c0_159, %c0_160, %c0_161, %c169] : memref<1x1x2x2304xbf16, #tpu.memory_space<vmem>>, vector<1x1x2x1152xbf16>
    %109 = vector.shape_cast %108 : vector<1x1x2x1152xbf16> to vector<2x1152xbf16>
    %c72 = arith.constant 72 : index
    %c0_162 = arith.constant 0 : index
    %110 = vector.load %arg7[%c72, %c0_162] : memref<250x1152xbf16, #tpu.memory_space<vmem>>, vector<2x1152xbf16>
    tpu.vector_store %arg7[%c72, %c0_162], %109 {strides = array<i32>} : memref<250x1152xbf16, #tpu.memory_space<vmem>>, vector<2x1152xbf16>,
    %c0_163 = arith.constant 0 : index
    %c0_164 = arith.constant 0 : index
    %c0_165 = arith.constant 0 : index
    %c170 = arith.constant 170 : index
    %111 = vector.load %arg2[%c0_163, %c0_164, %c0_165, %c170] : memref<1x1x2x2304xbf16, #tpu.memory_space<vmem>>, vector<1x1x2x1152xbf16>
    %112 = vector.shape_cast %111 : vector<1x1x2x1152xbf16> to vector<2x1152xbf16>
    %c74 = arith.constant 74 : index
    %c0_166 = arith.constant 0 : index
    %113 = vector.load %arg7[%c74, %c0_166] : memref<250x1152xbf16, #tpu.memory_space<vmem>>, vector<2x1152xbf16>
    tpu.vector_store %arg7[%c74, %c0_166], %112 {strides = array<i32>} : memref<250x1152xbf16, #tpu.memory_space<vmem>>, vector<2x1152xbf16>,
    %c0_167 = arith.constant 0 : index
    %c0_168 = arith.constant 0 : index
    %c0_169 = arith.constant 0 : index
    %c171 = arith.constant 171 : index
    %114 = vector.load %arg2[%c0_167, %c0_168, %c0_169, %c171] : memref<1x1x2x2304xbf16, #tpu.memory_space<vmem>>, vector<1x1x2x1152xbf16>
    %115 = vector.shape_cast %114 : vector<1x1x2x1152xbf16> to vector<2x1152xbf16>
    %c76 = arith.constant 76 : index
    %c0_170 = arith.constant 0 : index
    %116 = vector.load %arg7[%c76, %c0_170] : memref<250x1152xbf16, #tpu.memory_space<vmem>>, vector<2x1152xbf16>
    tpu.vector_store %arg7[%c76, %c0_170], %115 {strides = array<i32>} : memref<250x1152xbf16, #tpu.memory_space<vmem>>, vector<2x1152xbf16>,
    %c0_171 = arith.constant 0 : index
    %c0_172 = arith.constant 0 : index
    %c0_173 = arith.constant 0 : index
    %c172 = arith.constant 172 : index
    %117 = vector.load %arg2[%c0_171, %c0_172, %c0_173, %c172] : memref<1x1x2x2304xbf16, #tpu.memory_space<vmem>>, vector<1x1x2x1152xbf16>
    %118 = vector.shape_cast %117 : vector<1x1x2x1152xbf16> to vector<2x1152xbf16>
    %c78 = arith.constant 78 : index
    %c0_174 = arith.constant 0 : index
    %119 = vector.load %arg7[%c78, %c0_174] : memref<250x1152xbf16, #tpu.memory_space<vmem>>, vector<2x1152xbf16>
    tpu.vector_store %arg7[%c78, %c0_174], %118 {strides = array<i32>} : memref<250x1152xbf16, #tpu.memory_space<vmem>>, vector<2x1152xbf16>,
    %c0_175 = arith.constant 0 : index
    %c0_176 = arith.constant 0 : index
    %c0_177 = arith.constant 0 : index
    %c180 = arith.constant 180 : index
    %120 = vector.load %arg2[%c0_175, %c0_176, %c0_177, %c180] : memref<1x1x2x2304xbf16, #tpu.memory_space<vmem>>, vector<1x1x2x1152xbf16>
    %121 = vector.shape_cast %120 : vector<1x1x2x1152xbf16> to vector<2x1152xbf16>
    %c80 = arith.constant 80 : index
    %c0_178 = arith.constant 0 : index
    %122 = vector.load %arg7[%c80, %c0_178] : memref<250x1152xbf16, #tpu.memory_space<vmem>>, vector<2x1152xbf16>
    tpu.vector_store %arg7[%c80, %c0_178], %121 {strides = array<i32>} : memref<250x1152xbf16, #tpu.memory_space<vmem>>, vector<2x1152xbf16>,
    %c0_179 = arith.constant 0 : index
    %c0_180 = arith.constant 0 : index
    %c0_181 = arith.constant 0 : index
    %c181 = arith.constant 181 : index
    %123 = vector.load %arg2[%c0_179, %c0_180, %c0_181, %c181] : memref<1x1x2x2304xbf16, #tpu.memory_space<vmem>>, vector<1x1x2x1152xbf16>
    %124 = vector.shape_cast %123 : vector<1x1x2x1152xbf16> to vector<2x1152xbf16>
    %c82 = arith.constant 82 : index
    %c0_182 = arith.constant 0 : index
    %125 = vector.load %arg7[%c82, %c0_182] : memref<250x1152xbf16, #tpu.memory_space<vmem>>, vector<2x1152xbf16>
    tpu.vector_store %arg7[%c82, %c0_182], %124 {strides = array<i32>} : memref<250x1152xbf16, #tpu.memory_space<vmem>>, vector<2x1152xbf16>,
    %c0_183 = arith.constant 0 : index
    %c0_184 = arith.constant 0 : index
    %c0_185 = arith.constant 0 : index
    %c182 = arith.constant 182 : index
    %126 = vector.load %arg2[%c0_183, %c0_184, %c0_185, %c182] : memref<1x1x2x2304xbf16, #tpu.memory_space<vmem>>, vector<1x1x2x1152xbf16>
    %127 = vector.shape_cast %126 : vector<1x1x2x1152xbf16> to vector<2x1152xbf16>
    %c84 = arith.constant 84 : index
    %c0_186 = arith.constant 0 : index
    %128 = vector.load %arg7[%c84, %c0_186] : memref<250x1152xbf16, #tpu.memory_space<vmem>>, vector<2x1152xbf16>
    tpu.vector_store %arg7[%c84, %c0_186], %127 {strides = array<i32>} : memref<250x1152xbf16, #tpu.memory_space<vmem>>, vector<2x1152xbf16>,
    %c0_187 = arith.constant 0 : index
    %c0_188 = arith.constant 0 : index
    %c0_189 = arith.constant 0 : index
    %c183 = arith.constant 183 : index
    %129 = vector.load %arg2[%c0_187, %c0_188, %c0_189, %c183] : memref<1x1x2x2304xbf16, #tpu.memory_space<vmem>>, vector<1x1x2x1152xbf16>
    %130 = vector.shape_cast %129 : vector<1x1x2x1152xbf16> to vector<2x1152xbf16>
    %c86 = arith.constant 86 : index
    %c0_190 = arith.constant 0 : index
    %131 = vector.load %arg7[%c86, %c0_190] : memref<250x1152xbf16, #tpu.memory_space<vmem>>, vector<2x1152xbf16>
    tpu.vector_store %arg7[%c86, %c0_190], %130 {strides = array<i32>} : memref<250x1152xbf16, #tpu.memory_space<vmem>>, vector<2x1152xbf16>,
    %c0_191 = arith.constant 0 : index
    %c0_192 = arith.constant 0 : index
    %c0_193 = arith.constant 0 : index
    %c184 = arith.constant 184 : index
    %132 = vector.load %arg2[%c0_191, %c0_192, %c0_193, %c184] : memref<1x1x2x2304xbf16, #tpu.memory_space<vmem>>, vector<1x1x2x1152xbf16>
    %133 = vector.shape_cast %132 : vector<1x1x2x1152xbf16> to vector<2x1152xbf16>
    %c88 = arith.constant 88 : index
    %c0_194 = arith.constant 0 : index
    %134 = vector.load %arg7[%c88, %c0_194] : memref<250x1152xbf16, #tpu.memory_space<vmem>>, vector<2x1152xbf16>
    tpu.vector_store %arg7[%c88, %c0_194], %133 {strides = array<i32>} : memref<250x1152xbf16, #tpu.memory_space<vmem>>, vector<2x1152xbf16>,
    %c0_195 = arith.constant 0 : index
    %c0_196 = arith.constant 0 : index
    %c0_197 = arith.constant 0 : index
    %c192 = arith.constant 192 : index
    %135 = vector.load %arg2[%c0_195, %c0_196, %c0_197, %c192] : memref<1x1x2x2304xbf16, #tpu.memory_space<vmem>>, vector<1x1x2x1152xbf16>
    %136 = vector.shape_cast %135 : vector<1x1x2x1152xbf16> to vector<2x1152xbf16>
    %c90 = arith.constant 90 : index
    %c0_198 = arith.constant 0 : index
    %137 = vector.load %arg7[%c90, %c0_198] : memref<250x1152xbf16, #tpu.memory_space<vmem>>, vector<2x1152xbf16>
    tpu.vector_store %arg7[%c90, %c0_198], %136 {strides = array<i32>} : memref<250x1152xbf16, #tpu.memory_space<vmem>>, vector<2x1152xbf16>,
    %c0_199 = arith.constant 0 : index
    %c0_200 = arith.constant 0 : index
    %c0_201 = arith.constant 0 : index
    %c193 = arith.constant 193 : index
    %138 = vector.load %arg2[%c0_199, %c0_200, %c0_201, %c193] : memref<1x1x2x2304xbf16, #tpu.memory_space<vmem>>, vector<1x1x2x1152xbf16>
    %139 = vector.shape_cast %138 : vector<1x1x2x1152xbf16> to vector<2x1152xbf16>
    %c92 = arith.constant 92 : index
    %c0_202 = arith.constant 0 : index
    %140 = vector.load %arg7[%c92, %c0_202] : memref<250x1152xbf16, #tpu.memory_space<vmem>>, vector<2x1152xbf16>
    tpu.vector_store %arg7[%c92, %c0_202], %139 {strides = array<i32>} : memref<250x1152xbf16, #tpu.memory_space<vmem>>, vector<2x1152xbf16>,
    %c0_203 = arith.constant 0 : index
    %c0_204 = arith.constant 0 : index
    %c0_205 = arith.constant 0 : index
    %c194 = arith.constant 194 : index
    %141 = vector.load %arg2[%c0_203, %c0_204, %c0_205, %c194] : memref<1x1x2x2304xbf16, #tpu.memory_space<vmem>>, vector<1x1x2x1152xbf16>
    %142 = vector.shape_cast %141 : vector<1x1x2x1152xbf16> to vector<2x1152xbf16>
    %c94 = arith.constant 94 : index
    %c0_206 = arith.constant 0 : index
    %143 = vector.load %arg7[%c94, %c0_206] : memref<250x1152xbf16, #tpu.memory_space<vmem>>, vector<2x1152xbf16>
    tpu.vector_store %arg7[%c94, %c0_206], %142 {strides = array<i32>} : memref<250x1152xbf16, #tpu.memory_space<vmem>>, vector<2x1152xbf16>,
    %c0_207 = arith.constant 0 : index
    %c0_208 = arith.constant 0 : index
    %c0_209 = arith.constant 0 : index
    %c195 = arith.constant 195 : index
    %144 = vector.load %arg2[%c0_207, %c0_208, %c0_209, %c195] : memref<1x1x2x2304xbf16, #tpu.memory_space<vmem>>, vector<1x1x2x1152xbf16>
    %145 = vector.shape_cast %144 : vector<1x1x2x1152xbf16> to vector<2x1152xbf16>
    %c96 = arith.constant 96 : index
    %c0_210 = arith.constant 0 : index
    %146 = vector.load %arg7[%c96, %c0_210] : memref<250x1152xbf16, #tpu.memory_space<vmem>>, vector<2x1152xbf16>
    tpu.vector_store %arg7[%c96, %c0_210], %145 {strides = array<i32>} : memref<250x1152xbf16, #tpu.memory_space<vmem>>, vector<2x1152xbf16>,
    %c0_211 = arith.constant 0 : index
    %c0_212 = arith.constant 0 : index
    %c0_213 = arith.constant 0 : index
    %c196 = arith.constant 196 : index
    %147 = vector.load %arg2[%c0_211, %c0_212, %c0_213, %c196] : memref<1x1x2x2304xbf16, #tpu.memory_space<vmem>>, vector<1x1x2x1152xbf16>
    %148 = vector.shape_cast %147 : vector<1x1x2x1152xbf16> to vector<2x1152xbf16>
    %c98 = arith.constant 98 : index
    %c0_214 = arith.constant 0 : index
    %149 = vector.load %arg7[%c98, %c0_214] : memref<250x1152xbf16, #tpu.memory_space<vmem>>, vector<2x1152xbf16>
    tpu.vector_store %arg7[%c98, %c0_214], %148 {strides = array<i32>} : memref<250x1152xbf16, #tpu.memory_space<vmem>>, vector<2x1152xbf16>,
    %c0_215 = arith.constant 0 : index
    %c0_216 = arith.constant 0 : index
    %c0_217 = arith.constant 0 : index
    %c288 = arith.constant 288 : index
    %150 = vector.load %arg2[%c0_215, %c0_216, %c0_217, %c288] : memref<1x1x2x2304xbf16, #tpu.memory_space<vmem>>, vector<1x1x2x1152xbf16>
    %151 = vector.shape_cast %150 : vector<1x1x2x1152xbf16> to vector<2x1152xbf16>
    %c100 = arith.constant 100 : index
    %c0_218 = arith.constant 0 : index
    %152 = vector.load %arg7[%c100, %c0_218] : memref<250x1152xbf16, #tpu.memory_space<vmem>>, vector<2x1152xbf16>
    tpu.vector_store %arg7[%c100, %c0_218], %151 {strides = array<i32>} : memref<250x1152xbf16, #tpu.memory_space<vmem>>, vector<2x1152xbf16>,
    %c0_219 = arith.constant 0 : index
    %c0_220 = arith.constant 0 : index
    %c0_221 = arith.constant 0 : index
    %c289 = arith.constant 289 : index
    %153 = vector.load %arg2[%c0_219, %c0_220, %c0_221, %c289] : memref<1x1x2x2304xbf16, #tpu.memory_space<vmem>>, vector<1x1x2x1152xbf16>
    %154 = vector.shape_cast %153 : vector<1x1x2x1152xbf16> to vector<2x1152xbf16>
    %c102 = arith.constant 102 : index
    %c0_222 = arith.constant 0 : index
    %155 = vector.load %arg7[%c102, %c0_222] : memref<250x1152xbf16, #tpu.memory_space<vmem>>, vector<2x1152xbf16>
    tpu.vector_store %arg7[%c102, %c0_222], %154 {strides = array<i32>} : memref<250x1152xbf16, #tpu.memory_space<vmem>>, vector<2x1152xbf16>,
    %c0_223 = arith.constant 0 : index
    %c0_224 = arith.constant 0 : index
    %c0_225 = arith.constant 0 : index
    %c290 = arith.constant 290 : index
    %156 = vector.load %arg2[%c0_223, %c0_224, %c0_225, %c290] : memref<1x1x2x2304xbf16, #tpu.memory_space<vmem>>, vector<1x1x2x1152xbf16>
    %157 = vector.shape_cast %156 : vector<1x1x2x1152xbf16> to vector<2x1152xbf16>
    %c104 = arith.constant 104 : index
    %c0_226 = arith.constant 0 : index
    %158 = vector.load %arg7[%c104, %c0_226] : memref<250x1152xbf16, #tpu.memory_space<vmem>>, vector<2x1152xbf16>
    tpu.vector_store %arg7[%c104, %c0_226], %157 {strides = array<i32>} : memref<250x1152xbf16, #tpu.memory_space<vmem>>, vector<2x1152xbf16>,
    %c0_227 = arith.constant 0 : index
    %c0_228 = arith.constant 0 : index
    %c0_229 = arith.constant 0 : index
    %c291 = arith.constant 291 : index
    %159 = vector.load %arg2[%c0_227, %c0_228, %c0_229, %c291] : memref<1x1x2x2304xbf16, #tpu.memory_space<vmem>>, vector<1x1x2x1152xbf16>
    %160 = vector.shape_cast %159 : vector<1x1x2x1152xbf16> to vector<2x1152xbf16>
    %c106 = arith.constant 106 : index
    %c0_230 = arith.constant 0 : index
    %161 = vector.load %arg7[%c106, %c0_230] : memref<250x1152xbf16, #tpu.memory_space<vmem>>, vector<2x1152xbf16>
    tpu.vector_store %arg7[%c106, %c0_230], %160 {strides = array<i32>} : memref<250x1152xbf16, #tpu.memory_space<vmem>>, vector<2x1152xbf16>,
    %c0_231 = arith.constant 0 : index
    %c0_232 = arith.constant 0 : index
    %c0_233 = arith.constant 0 : index
    %c292 = arith.constant 292 : index
    %162 = vector.load %arg2[%c0_231, %c0_232, %c0_233, %c292] : memref<1x1x2x2304xbf16, #tpu.memory_space<vmem>>, vector<1x1x2x1152xbf16>
    %163 = vector.shape_cast %162 : vector<1x1x2x1152xbf16> to vector<2x1152xbf16>
    %c108 = arith.constant 108 : index
    %c0_234 = arith.constant 0 : index
    %164 = vector.load %arg7[%c108, %c0_234] : memref<250x1152xbf16, #tpu.memory_space<vmem>>, vector<2x1152xbf16>
    tpu.vector_store %arg7[%c108, %c0_234], %163 {strides = array<i32>} : memref<250x1152xbf16, #tpu.memory_space<vmem>>, vector<2x1152xbf16>,
    %c0_235 = arith.constant 0 : index
    %c0_236 = arith.constant 0 : index
    %c0_237 = arith.constant 0 : index
    %c300 = arith.constant 300 : index
    %165 = vector.load %arg2[%c0_235, %c0_236, %c0_237, %c300] : memref<1x1x2x2304xbf16, #tpu.memory_space<vmem>>, vector<1x1x2x1152xbf16>
    %166 = vector.shape_cast %165 : vector<1x1x2x1152xbf16> to vector<2x1152xbf16>
    %c110 = arith.constant 110 : index
    %c0_238 = arith.constant 0 : index
    %167 = vector.load %arg7[%c110, %c0_238] : memref<250x1152xbf16, #tpu.memory_space<vmem>>, vector<2x1152xbf16>
    tpu.vector_store %arg7[%c110, %c0_238], %166 {strides = array<i32>} : memref<250x1152xbf16, #tpu.memory_space<vmem>>, vector<2x1152xbf16>,
    %c0_239 = arith.constant 0 : index
    %c0_240 = arith.constant 0 : index
    %c0_241 = arith.constant 0 : index
    %c301 = arith.constant 301 : index
    %168 = vector.load %arg2[%c0_239, %c0_240, %c0_241, %c301] : memref<1x1x2x2304xbf16, #tpu.memory_space<vmem>>, vector<1x1x2x1152xbf16>
    %169 = vector.shape_cast %168 : vector<1x1x2x1152xbf16> to vector<2x1152xbf16>
    %c112 = arith.constant 112 : index
    %c0_242 = arith.constant 0 : index
    %170 = vector.load %arg7[%c112, %c0_242] : memref<250x1152xbf16, #tpu.memory_space<vmem>>, vector<2x1152xbf16>
    tpu.vector_store %arg7[%c112, %c0_242], %169 {strides = array<i32>} : memref<250x1152xbf16, #tpu.memory_space<vmem>>, vector<2x1152xbf16>,
    %c0_243 = arith.constant 0 : index
    %c0_244 = arith.constant 0 : index
    %c0_245 = arith.constant 0 : index
    %c302 = arith.constant 302 : index
    %171 = vector.load %arg2[%c0_243, %c0_244, %c0_245, %c302] : memref<1x1x2x2304xbf16, #tpu.memory_space<vmem>>, vector<1x1x2x1152xbf16>
    %172 = vector.shape_cast %171 : vector<1x1x2x1152xbf16> to vector<2x1152xbf16>
    %c114 = arith.constant 114 : index
    %c0_246 = arith.constant 0 : index
    %173 = vector.load %arg7[%c114, %c0_246] : memref<250x1152xbf16, #tpu.memory_space<vmem>>, vector<2x1152xbf16>
    tpu.vector_store %arg7[%c114, %c0_246], %172 {strides = array<i32>} : memref<250x1152xbf16, #tpu.memory_space<vmem>>, vector<2x1152xbf16>,
    %c0_247 = arith.constant 0 : index
    %c0_248 = arith.constant 0 : index
    %c0_249 = arith.constant 0 : index
    %c303 = arith.constant 303 : index
    %174 = vector.load %arg2[%c0_247, %c0_248, %c0_249, %c303] : memref<1x1x2x2304xbf16, #tpu.memory_space<vmem>>, vector<1x1x2x1152xbf16>
    %175 = vector.shape_cast %174 : vector<1x1x2x1152xbf16> to vector<2x1152xbf16>
    %c116 = arith.constant 116 : index
    %c0_250 = arith.constant 0 : index
    %176 = vector.load %arg7[%c116, %c0_250] : memref<250x1152xbf16, #tpu.memory_space<vmem>>, vector<2x1152xbf16>
    tpu.vector_store %arg7[%c116, %c0_250], %175 {strides = array<i32>} : memref<250x1152xbf16, #tpu.memory_space<vmem>>, vector<2x1152xbf16>,
    %c0_251 = arith.constant 0 : index
    %c0_252 = arith.constant 0 : index
    %c0_253 = arith.constant 0 : index
    %c304 = arith.constant 304 : index
    %177 = vector.load %arg2[%c0_251, %c0_252, %c0_253, %c304] : memref<1x1x2x2304xbf16, #tpu.memory_space<vmem>>, vector<1x1x2x1152xbf16>
    %178 = vector.shape_cast %177 : vector<1x1x2x1152xbf16> to vector<2x1152xbf16>
    %c118 = arith.constant 118 : index
    %c0_254 = arith.constant 0 : index
    %179 = vector.load %arg7[%c118, %c0_254] : memref<250x1152xbf16, #tpu.memory_space<vmem>>, vector<2x1152xbf16>
    tpu.vector_store %arg7[%c118, %c0_254], %178 {strides = array<i32>} : memref<250x1152xbf16, #tpu.memory_space<vmem>>, vector<2x1152xbf16>,
    %c0_255 = arith.constant 0 : index
    %c0_256 = arith.constant 0 : index
    %c0_257 = arith.constant 0 : index
    %c312 = arith.constant 312 : index
    %180 = vector.load %arg2[%c0_255, %c0_256, %c0_257, %c312] : memref<1x1x2x2304xbf16, #tpu.memory_space<vmem>>, vector<1x1x2x1152xbf16>
    %181 = vector.shape_cast %180 : vector<1x1x2x1152xbf16> to vector<2x1152xbf16>
    %c120 = arith.constant 120 : index
    %c0_258 = arith.constant 0 : index
    %182 = vector.load %arg7[%c120, %c0_258] : memref<250x1152xbf16, #tpu.memory_space<vmem>>, vector<2x1152xbf16>
    tpu.vector_store %arg7[%c120, %c0_258], %181 {strides = array<i32>} : memref<250x1152xbf16, #tpu.memory_space<vmem>>, vector<2x1152xbf16>,
    %c0_259 = arith.constant 0 : index
    %c0_260 = arith.constant 0 : index
    %c0_261 = arith.constant 0 : index
    %c313 = arith.constant 313 : index
    %183 = vector.load %arg2[%c0_259, %c0_260, %c0_261, %c313] : memref<1x1x2x2304xbf16, #tpu.memory_space<vmem>>, vector<1x1x2x1152xbf16>
    %184 = vector.shape_cast %183 : vector<1x1x2x1152xbf16> to vector<2x1152xbf16>
    %c122 = arith.constant 122 : index
    %c0_262 = arith.constant 0 : index
    %185 = vector.load %arg7[%c122, %c0_262] : memref<250x1152xbf16, #tpu.memory_space<vmem>>, vector<2x1152xbf16>
    tpu.vector_store %arg7[%c122, %c0_262], %184 {strides = array<i32>} : memref<250x1152xbf16, #tpu.memory_space<vmem>>, vector<2x1152xbf16>,
    %c0_263 = arith.constant 0 : index
    %c0_264 = arith.constant 0 : index
    %c0_265 = arith.constant 0 : index
    %c314 = arith.constant 314 : index
    %186 = vector.load %arg2[%c0_263, %c0_264, %c0_265, %c314] : memref<1x1x2x2304xbf16, #tpu.memory_space<vmem>>, vector<1x1x2x1152xbf16>
    %187 = vector.shape_cast %186 : vector<1x1x2x1152xbf16> to vector<2x1152xbf16>
    %c124 = arith.constant 124 : index
    %c0_266 = arith.constant 0 : index
    %188 = vector.load %arg7[%c124, %c0_266] : memref<250x1152xbf16, #tpu.memory_space<vmem>>, vector<2x1152xbf16>
    tpu.vector_store %arg7[%c124, %c0_266], %187 {strides = array<i32>} : memref<250x1152xbf16, #tpu.memory_space<vmem>>, vector<2x1152xbf16>,
    %c0_267 = arith.constant 0 : index
    %c0_268 = arith.constant 0 : index
    %c0_269 = arith.constant 0 : index
    %c315 = arith.constant 315 : index
    %189 = vector.load %arg2[%c0_267, %c0_268, %c0_269, %c315] : memref<1x1x2x2304xbf16, #tpu.memory_space<vmem>>, vector<1x1x2x1152xbf16>
    %190 = vector.shape_cast %189 : vector<1x1x2x1152xbf16> to vector<2x1152xbf16>
    %c126 = arith.constant 126 : index
    %c0_270 = arith.constant 0 : index
    %191 = vector.load %arg7[%c126, %c0_270] : memref<250x1152xbf16, #tpu.memory_space<vmem>>, vector<2x1152xbf16>
    tpu.vector_store %arg7[%c126, %c0_270], %190 {strides = array<i32>} : memref<250x1152xbf16, #tpu.memory_space<vmem>>, vector<2x1152xbf16>,
    %c0_271 = arith.constant 0 : index
    %c0_272 = arith.constant 0 : index
    %c0_273 = arith.constant 0 : index
    %c316 = arith.constant 316 : index
    %192 = vector.load %arg2[%c0_271, %c0_272, %c0_273, %c316] : memref<1x1x2x2304xbf16, #tpu.memory_space<vmem>>, vector<1x1x2x1152xbf16>
    %193 = vector.shape_cast %192 : vector<1x1x2x1152xbf16> to vector<2x1152xbf16>
    %c128 = arith.constant 128 : index
    %c0_274 = arith.constant 0 : index
    %194 = vector.load %arg7[%c128, %c0_274] : memref<250x1152xbf16, #tpu.memory_space<vmem>>, vector<2x1152xbf16>
    tpu.vector_store %arg7[%c128, %c0_274], %193 {strides = array<i32>} : memref<250x1152xbf16, #tpu.memory_space<vmem>>, vector<2x1152xbf16>,
    %c0_275 = arith.constant 0 : index
    %c0_276 = arith.constant 0 : index
    %c0_277 = arith.constant 0 : index
    %c324 = arith.constant 324 : index
    %195 = vector.load %arg2[%c0_275, %c0_276, %c0_277, %c324] : memref<1x1x2x2304xbf16, #tpu.memory_space<vmem>>, vector<1x1x2x1152xbf16>
    %196 = vector.shape_cast %195 : vector<1x1x2x1152xbf16> to vector<2x1152xbf16>
    %c130 = arith.constant 130 : index
    %c0_278 = arith.constant 0 : index
    %197 = vector.load %arg7[%c130, %c0_278] : memref<250x1152xbf16, #tpu.memory_space<vmem>>, vector<2x1152xbf16>
    tpu.vector_store %arg7[%c130, %c0_278], %196 {strides = array<i32>} : memref<250x1152xbf16, #tpu.memory_space<vmem>>, vector<2x1152xbf16>,
    %c0_279 = arith.constant 0 : index
    %c0_280 = arith.constant 0 : index
    %c0_281 = arith.constant 0 : index
    %c325 = arith.constant 325 : index
    %198 = vector.load %arg2[%c0_279, %c0_280, %c0_281, %c325] : memref<1x1x2x2304xbf16, #tpu.memory_space<vmem>>, vector<1x1x2x1152xbf16>
    %199 = vector.shape_cast %198 : vector<1x1x2x1152xbf16> to vector<2x1152xbf16>
    %c132 = arith.constant 132 : index
    %c0_282 = arith.constant 0 : index
    %200 = vector.load %arg7[%c132, %c0_282] : memref<250x1152xbf16, #tpu.memory_space<vmem>>, vector<2x1152xbf16>
    tpu.vector_store %arg7[%c132, %c0_282], %199 {strides = array<i32>} : memref<250x1152xbf16, #tpu.memory_space<vmem>>, vector<2x1152xbf16>,
    %c0_283 = arith.constant 0 : index
    %c0_284 = arith.constant 0 : index
    %c0_285 = arith.constant 0 : index
    %c326 = arith.constant 326 : index
    %201 = vector.load %arg2[%c0_283, %c0_284, %c0_285, %c326] : memref<1x1x2x2304xbf16, #tpu.memory_space<vmem>>, vector<1x1x2x1152xbf16>
    %202 = vector.shape_cast %201 : vector<1x1x2x1152xbf16> to vector<2x1152xbf16>
    %c134 = arith.constant 134 : index
    %c0_286 = arith.constant 0 : index
    %203 = vector.load %arg7[%c134, %c0_286] : memref<250x1152xbf16, #tpu.memory_space<vmem>>, vector<2x1152xbf16>
    tpu.vector_store %arg7[%c134, %c0_286], %202 {strides = array<i32>} : memref<250x1152xbf16, #tpu.memory_space<vmem>>, vector<2x1152xbf16>,
    %c0_287 = arith.constant 0 : index
    %c0_288 = arith.constant 0 : index
    %c0_289 = arith.constant 0 : index
    %c327 = arith.constant 327 : index
    %204 = vector.load %arg2[%c0_287, %c0_288, %c0_289, %c327] : memref<1x1x2x2304xbf16, #tpu.memory_space<vmem>>, vector<1x1x2x1152xbf16>
    %205 = vector.shape_cast %204 : vector<1x1x2x1152xbf16> to vector<2x1152xbf16>
    %c136 = arith.constant 136 : index
    %c0_290 = arith.constant 0 : index
    %206 = vector.load %arg7[%c136, %c0_290] : memref<250x1152xbf16, #tpu.memory_space<vmem>>, vector<2x1152xbf16>
    tpu.vector_store %arg7[%c136, %c0_290], %205 {strides = array<i32>} : memref<250x1152xbf16, #tpu.memory_space<vmem>>, vector<2x1152xbf16>,
    %c0_291 = arith.constant 0 : index
    %c0_292 = arith.constant 0 : index
    %c0_293 = arith.constant 0 : index
    %c328 = arith.constant 328 : index
    %207 = vector.load %arg2[%c0_291, %c0_292, %c0_293, %c328] : memref<1x1x2x2304xbf16, #tpu.memory_space<vmem>>, vector<1x1x2x1152xbf16>
    %208 = vector.shape_cast %207 : vector<1x1x2x1152xbf16> to vector<2x1152xbf16>
    %c138 = arith.constant 138 : index
    %c0_294 = arith.constant 0 : index
    %209 = vector.load %arg7[%c138, %c0_294] : memref<250x1152xbf16, #tpu.memory_space<vmem>>, vector<2x1152xbf16>
    tpu.vector_store %arg7[%c138, %c0_294], %208 {strides = array<i32>} : memref<250x1152xbf16, #tpu.memory_space<vmem>>, vector<2x1152xbf16>,
    %c0_295 = arith.constant 0 : index
    %c0_296 = arith.constant 0 : index
    %c0_297 = arith.constant 0 : index
    %c336 = arith.constant 336 : index
    %210 = vector.load %arg2[%c0_295, %c0_296, %c0_297, %c336] : memref<1x1x2x2304xbf16, #tpu.memory_space<vmem>>, vector<1x1x2x1152xbf16>
    %211 = vector.shape_cast %210 : vector<1x1x2x1152xbf16> to vector<2x1152xbf16>
    %c140 = arith.constant 140 : index
    %c0_298 = arith.constant 0 : index
    %212 = vector.load %arg7[%c140, %c0_298] : memref<250x1152xbf16, #tpu.memory_space<vmem>>, vector<2x1152xbf16>
    tpu.vector_store %arg7[%c140, %c0_298], %211 {strides = array<i32>} : memref<250x1152xbf16, #tpu.memory_space<vmem>>, vector<2x1152xbf16>,
    %c0_299 = arith.constant 0 : index
    %c0_300 = arith.constant 0 : index
    %c0_301 = arith.constant 0 : index
    %c337 = arith.constant 337 : index
    %213 = vector.load %arg2[%c0_299, %c0_300, %c0_301, %c337] : memref<1x1x2x2304xbf16, #tpu.memory_space<vmem>>, vector<1x1x2x1152xbf16>
    %214 = vector.shape_cast %213 : vector<1x1x2x1152xbf16> to vector<2x1152xbf16>
    %c142 = arith.constant 142 : index
    %c0_302 = arith.constant 0 : index
    %215 = vector.load %arg7[%c142, %c0_302] : memref<250x1152xbf16, #tpu.memory_space<vmem>>, vector<2x1152xbf16>
    tpu.vector_store %arg7[%c142, %c0_302], %214 {strides = array<i32>} : memref<250x1152xbf16, #tpu.memory_space<vmem>>, vector<2x1152xbf16>,
    %c0_303 = arith.constant 0 : index
    %c0_304 = arith.constant 0 : index
    %c0_305 = arith.constant 0 : index
    %c338 = arith.constant 338 : index
    %216 = vector.load %arg2[%c0_303, %c0_304, %c0_305, %c338] : memref<1x1x2x2304xbf16, #tpu.memory_space<vmem>>, vector<1x1x2x1152xbf16>
    %217 = vector.shape_cast %216 : vector<1x1x2x1152xbf16> to vector<2x1152xbf16>
    %c144_306 = arith.constant 144 : index
    %c0_307 = arith.constant 0 : index
    %218 = vector.load %arg7[%c144_306, %c0_307] : memref<250x1152xbf16, #tpu.memory_space<vmem>>, vector<2x1152xbf16>
    tpu.vector_store %arg7[%c144_306, %c0_307], %217 {strides = array<i32>} : memref<250x1152xbf16, #tpu.memory_space<vmem>>, vector<2x1152xbf16>,
    %c0_308 = arith.constant 0 : index
    %c0_309 = arith.constant 0 : index
    %c0_310 = arith.constant 0 : index
    %c339 = arith.constant 339 : index
    %219 = vector.load %arg2[%c0_308, %c0_309, %c0_310, %c339] : memref<1x1x2x2304xbf16, #tpu.memory_space<vmem>>, vector<1x1x2x1152xbf16>
    %220 = vector.shape_cast %219 : vector<1x1x2x1152xbf16> to vector<2x1152xbf16>
    %c146_311 = arith.constant 146 : index
    %c0_312 = arith.constant 0 : index
    %221 = vector.load %arg7[%c146_311, %c0_312] : memref<250x1152xbf16, #tpu.memory_space<vmem>>, vector<2x1152xbf16>
    tpu.vector_store %arg7[%c146_311, %c0_312], %220 {strides = array<i32>} : memref<250x1152xbf16, #tpu.memory_space<vmem>>, vector<2x1152xbf16>,
    %c0_313 = arith.constant 0 : index
    %c0_314 = arith.constant 0 : index
    %c0_315 = arith.constant 0 : index
    %c340 = arith.constant 340 : index
    %222 = vector.load %arg2[%c0_313, %c0_314, %c0_315, %c340] : memref<1x1x2x2304xbf16, #tpu.memory_space<vmem>>, vector<1x1x2x1152xbf16>
    %223 = vector.shape_cast %222 : vector<1x1x2x1152xbf16> to vector<2x1152xbf16>
    %c148_316 = arith.constant 148 : index
    %c0_317 = arith.constant 0 : index
    %224 = vector.load %arg7[%c148_316, %c0_317] : memref<250x1152xbf16, #tpu.memory_space<vmem>>, vector<2x1152xbf16>
    tpu.vector_store %arg7[%c148_316, %c0_317], %223 {strides = array<i32>} : memref<250x1152xbf16, #tpu.memory_space<vmem>>, vector<2x1152xbf16>,
    %c0_318 = arith.constant 0 : index
    %c0_319 = arith.constant 0 : index
    %c0_320 = arith.constant 0 : index
    %c432 = arith.constant 432 : index
    %225 = vector.load %arg2[%c0_318, %c0_319, %c0_320, %c432] : memref<1x1x2x2304xbf16, #tpu.memory_space<vmem>>, vector<1x1x2x1152xbf16>
    %226 = vector.shape_cast %225 : vector<1x1x2x1152xbf16> to vector<2x1152xbf16>
    %c150 = arith.constant 150 : index
    %c0_321 = arith.constant 0 : index
    %227 = vector.load %arg7[%c150, %c0_321] : memref<250x1152xbf16, #tpu.memory_space<vmem>>, vector<2x1152xbf16>
    tpu.vector_store %arg7[%c150, %c0_321], %226 {strides = array<i32>} : memref<250x1152xbf16, #tpu.memory_space<vmem>>, vector<2x1152xbf16>,
    %c0_322 = arith.constant 0 : index
    %c0_323 = arith.constant 0 : index
    %c0_324 = arith.constant 0 : index
    %c433 = arith.constant 433 : index
    %228 = vector.load %arg2[%c0_322, %c0_323, %c0_324, %c433] : memref<1x1x2x2304xbf16, #tpu.memory_space<vmem>>, vector<1x1x2x1152xbf16>
    %229 = vector.shape_cast %228 : vector<1x1x2x1152xbf16> to vector<2x1152xbf16>
    %c152 = arith.constant 152 : index
    %c0_325 = arith.constant 0 : index
    %230 = vector.load %arg7[%c152, %c0_325] : memref<250x1152xbf16, #tpu.memory_space<vmem>>, vector<2x1152xbf16>
    tpu.vector_store %arg7[%c152, %c0_325], %229 {strides = array<i32>} : memref<250x1152xbf16, #tpu.memory_space<vmem>>, vector<2x1152xbf16>,
    %c0_326 = arith.constant 0 : index
    %c0_327 = arith.constant 0 : index
    %c0_328 = arith.constant 0 : index
    %c434 = arith.constant 434 : index
    %231 = vector.load %arg2[%c0_326, %c0_327, %c0_328, %c434] : memref<1x1x2x2304xbf16, #tpu.memory_space<vmem>>, vector<1x1x2x1152xbf16>
    %232 = vector.shape_cast %231 : vector<1x1x2x1152xbf16> to vector<2x1152xbf16>
    %c154 = arith.constant 154 : index
    %c0_329 = arith.constant 0 : index
    %233 = vector.load %arg7[%c154, %c0_329] : memref<250x1152xbf16, #tpu.memory_space<vmem>>, vector<2x1152xbf16>
    tpu.vector_store %arg7[%c154, %c0_329], %232 {strides = array<i32>} : memref<250x1152xbf16, #tpu.memory_space<vmem>>, vector<2x1152xbf16>,
    %c0_330 = arith.constant 0 : index
    %c0_331 = arith.constant 0 : index
    %c0_332 = arith.constant 0 : index
    %c435 = arith.constant 435 : index
    %234 = vector.load %arg2[%c0_330, %c0_331, %c0_332, %c435] : memref<1x1x2x2304xbf16, #tpu.memory_space<vmem>>, vector<1x1x2x1152xbf16>
    %235 = vector.shape_cast %234 : vector<1x1x2x1152xbf16> to vector<2x1152xbf16>
    %c156_333 = arith.constant 156 : index
    %c0_334 = arith.constant 0 : index
    %236 = vector.load %arg7[%c156_333, %c0_334] : memref<250x1152xbf16, #tpu.memory_space<vmem>>, vector<2x1152xbf16>
    tpu.vector_store %arg7[%c156_333, %c0_334], %235 {strides = array<i32>} : memref<250x1152xbf16, #tpu.memory_space<vmem>>, vector<2x1152xbf16>,
    %c0_335 = arith.constant 0 : index
    %c0_336 = arith.constant 0 : index
    %c0_337 = arith.constant 0 : index
    %c436 = arith.constant 436 : index
    %237 = vector.load %arg2[%c0_335, %c0_336, %c0_337, %c436] : memref<1x1x2x2304xbf16, #tpu.memory_space<vmem>>, vector<1x1x2x1152xbf16>
    %238 = vector.shape_cast %237 : vector<1x1x2x1152xbf16> to vector<2x1152xbf16>
    %c158_338 = arith.constant 158 : index
    %c0_339 = arith.constant 0 : index
    %239 = vector.load %arg7[%c158_338, %c0_339] : memref<250x1152xbf16, #tpu.memory_space<vmem>>, vector<2x1152xbf16>
    tpu.vector_store %arg7[%c158_338, %c0_339], %238 {strides = array<i32>} : memref<250x1152xbf16, #tpu.memory_space<vmem>>, vector<2x1152xbf16>,
    %c0_340 = arith.constant 0 : index
    %c0_341 = arith.constant 0 : index
    %c0_342 = arith.constant 0 : index
    %c444 = arith.constant 444 : index
    %240 = vector.load %arg2[%c0_340, %c0_341, %c0_342, %c444] : memref<1x1x2x2304xbf16, #tpu.memory_space<vmem>>, vector<1x1x2x1152xbf16>
    %241 = vector.shape_cast %240 : vector<1x1x2x1152xbf16> to vector<2x1152xbf16>
    %c160_343 = arith.constant 160 : index
    %c0_344 = arith.constant 0 : index
    %242 = vector.load %arg7[%c160_343, %c0_344] : memref<250x1152xbf16, #tpu.memory_space<vmem>>, vector<2x1152xbf16>
    tpu.vector_store %arg7[%c160_343, %c0_344], %241 {strides = array<i32>} : memref<250x1152xbf16, #tpu.memory_space<vmem>>, vector<2x1152xbf16>,
    %c0_345 = arith.constant 0 : index
    %c0_346 = arith.constant 0 : index
    %c0_347 = arith.constant 0 : index
    %c445 = arith.constant 445 : index
    %243 = vector.load %arg2[%c0_345, %c0_346, %c0_347, %c445] : memref<1x1x2x2304xbf16, #tpu.memory_space<vmem>>, vector<1x1x2x1152xbf16>
    %244 = vector.shape_cast %243 : vector<1x1x2x1152xbf16> to vector<2x1152xbf16>
    %c162 = arith.constant 162 : index
    %c0_348 = arith.constant 0 : index
    %245 = vector.load %arg7[%c162, %c0_348] : memref<250x1152xbf16, #tpu.memory_space<vmem>>, vector<2x1152xbf16>
    tpu.vector_store %arg7[%c162, %c0_348], %244 {strides = array<i32>} : memref<250x1152xbf16, #tpu.memory_space<vmem>>, vector<2x1152xbf16>,
    %c0_349 = arith.constant 0 : index
    %c0_350 = arith.constant 0 : index
    %c0_351 = arith.constant 0 : index
    %c446 = arith.constant 446 : index
    %246 = vector.load %arg2[%c0_349, %c0_350, %c0_351, %c446] : memref<1x1x2x2304xbf16, #tpu.memory_space<vmem>>, vector<1x1x2x1152xbf16>
    %247 = vector.shape_cast %246 : vector<1x1x2x1152xbf16> to vector<2x1152xbf16>
    %c164 = arith.constant 164 : index
    %c0_352 = arith.constant 0 : index
    %248 = vector.load %arg7[%c164, %c0_352] : memref<250x1152xbf16, #tpu.memory_space<vmem>>, vector<2x1152xbf16>
    tpu.vector_store %arg7[%c164, %c0_352], %247 {strides = array<i32>} : memref<250x1152xbf16, #tpu.memory_space<vmem>>, vector<2x1152xbf16>,
    %c0_353 = arith.constant 0 : index
    %c0_354 = arith.constant 0 : index
    %c0_355 = arith.constant 0 : index
    %c447 = arith.constant 447 : index
    %249 = vector.load %arg2[%c0_353, %c0_354, %c0_355, %c447] : memref<1x1x2x2304xbf16, #tpu.memory_space<vmem>>, vector<1x1x2x1152xbf16>
    %250 = vector.shape_cast %249 : vector<1x1x2x1152xbf16> to vector<2x1152xbf16>
    %c166 = arith.constant 166 : index
    %c0_356 = arith.constant 0 : index
    %251 = vector.load %arg7[%c166, %c0_356] : memref<250x1152xbf16, #tpu.memory_space<vmem>>, vector<2x1152xbf16>
    tpu.vector_store %arg7[%c166, %c0_356], %250 {strides = array<i32>} : memref<250x1152xbf16, #tpu.memory_space<vmem>>, vector<2x1152xbf16>,
    %c0_357 = arith.constant 0 : index
    %c0_358 = arith.constant 0 : index
    %c0_359 = arith.constant 0 : index
    %c448 = arith.constant 448 : index
    %252 = vector.load %arg2[%c0_357, %c0_358, %c0_359, %c448] : memref<1x1x2x2304xbf16, #tpu.memory_space<vmem>>, vector<1x1x2x1152xbf16>
    %253 = vector.shape_cast %252 : vector<1x1x2x1152xbf16> to vector<2x1152xbf16>
    %c168_360 = arith.constant 168 : index
    %c0_361 = arith.constant 0 : index
    %254 = vector.load %arg7[%c168_360, %c0_361] : memref<250x1152xbf16, #tpu.memory_space<vmem>>, vector<2x1152xbf16>
    tpu.vector_store %arg7[%c168_360, %c0_361], %253 {strides = array<i32>} : memref<250x1152xbf16, #tpu.memory_space<vmem>>, vector<2x1152xbf16>,
    %c0_362 = arith.constant 0 : index
    %c0_363 = arith.constant 0 : index
    %c0_364 = arith.constant 0 : index
    %c456 = arith.constant 456 : index
    %255 = vector.load %arg2[%c0_362, %c0_363, %c0_364, %c456] : memref<1x1x2x2304xbf16, #tpu.memory_space<vmem>>, vector<1x1x2x1152xbf16>
    %256 = vector.shape_cast %255 : vector<1x1x2x1152xbf16> to vector<2x1152xbf16>
    %c170_365 = arith.constant 170 : index
    %c0_366 = arith.constant 0 : index
    %257 = vector.load %arg7[%c170_365, %c0_366] : memref<250x1152xbf16, #tpu.memory_space<vmem>>, vector<2x1152xbf16>
    tpu.vector_store %arg7[%c170_365, %c0_366], %256 {strides = array<i32>} : memref<250x1152xbf16, #tpu.memory_space<vmem>>, vector<2x1152xbf16>,
    %c0_367 = arith.constant 0 : index
    %c0_368 = arith.constant 0 : index
    %c0_369 = arith.constant 0 : index
    %c457 = arith.constant 457 : index
    %258 = vector.load %arg2[%c0_367, %c0_368, %c0_369, %c457] : memref<1x1x2x2304xbf16, #tpu.memory_space<vmem>>, vector<1x1x2x1152xbf16>
    %259 = vector.shape_cast %258 : vector<1x1x2x1152xbf16> to vector<2x1152xbf16>
    %c172_370 = arith.constant 172 : index
    %c0_371 = arith.constant 0 : index
    %260 = vector.load %arg7[%c172_370, %c0_371] : memref<250x1152xbf16, #tpu.memory_space<vmem>>, vector<2x1152xbf16>
    tpu.vector_store %arg7[%c172_370, %c0_371], %259 {strides = array<i32>} : memref<250x1152xbf16, #tpu.memory_space<vmem>>, vector<2x1152xbf16>,
    %c0_372 = arith.constant 0 : index
    %c0_373 = arith.constant 0 : index
    %c0_374 = arith.constant 0 : index
    %c458 = arith.constant 458 : index
    %261 = vector.load %arg2[%c0_372, %c0_373, %c0_374, %c458] : memref<1x1x2x2304xbf16, #tpu.memory_space<vmem>>, vector<1x1x2x1152xbf16>
    %262 = vector.shape_cast %261 : vector<1x1x2x1152xbf16> to vector<2x1152xbf16>
    %c174 = arith.constant 174 : index
    %c0_375 = arith.constant 0 : index
    %263 = vector.load %arg7[%c174, %c0_375] : memref<250x1152xbf16, #tpu.memory_space<vmem>>, vector<2x1152xbf16>
    tpu.vector_store %arg7[%c174, %c0_375], %262 {strides = array<i32>} : memref<250x1152xbf16, #tpu.memory_space<vmem>>, vector<2x1152xbf16>,
    %c0_376 = arith.constant 0 : index
    %c0_377 = arith.constant 0 : index
    %c0_378 = arith.constant 0 : index
    %c459 = arith.constant 459 : index
    %264 = vector.load %arg2[%c0_376, %c0_377, %c0_378, %c459] : memref<1x1x2x2304xbf16, #tpu.memory_space<vmem>>, vector<1x1x2x1152xbf16>
    %265 = vector.shape_cast %264 : vector<1x1x2x1152xbf16> to vector<2x1152xbf16>
    %c176 = arith.constant 176 : index
    %c0_379 = arith.constant 0 : index
    %266 = vector.load %arg7[%c176, %c0_379] : memref<250x1152xbf16, #tpu.memory_space<vmem>>, vector<2x1152xbf16>
    tpu.vector_store %arg7[%c176, %c0_379], %265 {strides = array<i32>} : memref<250x1152xbf16, #tpu.memory_space<vmem>>, vector<2x1152xbf16>,
    %c0_380 = arith.constant 0 : index
    %c0_381 = arith.constant 0 : index
    %c0_382 = arith.constant 0 : index
    %c460 = arith.constant 460 : index
    %267 = vector.load %arg2[%c0_380, %c0_381, %c0_382, %c460] : memref<1x1x2x2304xbf16, #tpu.memory_space<vmem>>, vector<1x1x2x1152xbf16>
    %268 = vector.shape_cast %267 : vector<1x1x2x1152xbf16> to vector<2x1152xbf16>
    %c178 = arith.constant 178 : index
    %c0_383 = arith.constant 0 : index
    %269 = vector.load %arg7[%c178, %c0_383] : memref<250x1152xbf16, #tpu.memory_space<vmem>>, vector<2x1152xbf16>
    tpu.vector_store %arg7[%c178, %c0_383], %268 {strides = array<i32>} : memref<250x1152xbf16, #tpu.memory_space<vmem>>, vector<2x1152xbf16>,
    %c0_384 = arith.constant 0 : index
    %c0_385 = arith.constant 0 : index
    %c0_386 = arith.constant 0 : index
    %c468 = arith.constant 468 : index
    %270 = vector.load %arg2[%c0_384, %c0_385, %c0_386, %c468] : memref<1x1x2x2304xbf16, #tpu.memory_space<vmem>>, vector<1x1x2x1152xbf16>
    %271 = vector.shape_cast %270 : vector<1x1x2x1152xbf16> to vector<2x1152xbf16>
    %c180_387 = arith.constant 180 : index
    %c0_388 = arith.constant 0 : index
    %272 = vector.load %arg7[%c180_387, %c0_388] : memref<250x1152xbf16, #tpu.memory_space<vmem>>, vector<2x1152xbf16>
    tpu.vector_store %arg7[%c180_387, %c0_388], %271 {strides = array<i32>} : memref<250x1152xbf16, #tpu.memory_space<vmem>>, vector<2x1152xbf16>,
    %c0_389 = arith.constant 0 : index
    %c0_390 = arith.constant 0 : index
    %c0_391 = arith.constant 0 : index
    %c469 = arith.constant 469 : index
    %273 = vector.load %arg2[%c0_389, %c0_390, %c0_391, %c469] : memref<1x1x2x2304xbf16, #tpu.memory_space<vmem>>, vector<1x1x2x1152xbf16>
    %274 = vector.shape_cast %273 : vector<1x1x2x1152xbf16> to vector<2x1152xbf16>
    %c182_392 = arith.constant 182 : index
    %c0_393 = arith.constant 0 : index
    %275 = vector.load %arg7[%c182_392, %c0_393] : memref<250x1152xbf16, #tpu.memory_space<vmem>>, vector<2x1152xbf16>
    tpu.vector_store %arg7[%c182_392, %c0_393], %274 {strides = array<i32>} : memref<250x1152xbf16, #tpu.memory_space<vmem>>, vector<2x1152xbf16>,
    %c0_394 = arith.constant 0 : index
    %c0_395 = arith.constant 0 : index
    %c0_396 = arith.constant 0 : index
    %c470 = arith.constant 470 : index
    %276 = vector.load %arg2[%c0_394, %c0_395, %c0_396, %c470] : memref<1x1x2x2304xbf16, #tpu.memory_space<vmem>>, vector<1x1x2x1152xbf16>
    %277 = vector.shape_cast %276 : vector<1x1x2x1152xbf16> to vector<2x1152xbf16>
    %c184_397 = arith.constant 184 : index
    %c0_398 = arith.constant 0 : index
    %278 = vector.load %arg7[%c184_397, %c0_398] : memref<250x1152xbf16, #tpu.memory_space<vmem>>, vector<2x1152xbf16>
    tpu.vector_store %arg7[%c184_397, %c0_398], %277 {strides = array<i32>} : memref<250x1152xbf16, #tpu.memory_space<vmem>>, vector<2x1152xbf16>,
    %c0_399 = arith.constant 0 : index
    %c0_400 = arith.constant 0 : index
    %c0_401 = arith.constant 0 : index
    %c471 = arith.constant 471 : index
    %279 = vector.load %arg2[%c0_399, %c0_400, %c0_401, %c471] : memref<1x1x2x2304xbf16, #tpu.memory_space<vmem>>, vector<1x1x2x1152xbf16>
    %280 = vector.shape_cast %279 : vector<1x1x2x1152xbf16> to vector<2x1152xbf16>
    %c186 = arith.constant 186 : index
    %c0_402 = arith.constant 0 : index
    %281 = vector.load %arg7[%c186, %c0_402] : memref<250x1152xbf16, #tpu.memory_space<vmem>>, vector<2x1152xbf16>
    tpu.vector_store %arg7[%c186, %c0_402], %280 {strides = array<i32>} : memref<250x1152xbf16, #tpu.memory_space<vmem>>, vector<2x1152xbf16>,
    %c0_403 = arith.constant 0 : index
    %c0_404 = arith.constant 0 : index
    %c0_405 = arith.constant 0 : index
    %c472 = arith.constant 472 : index
    %282 = vector.load %arg2[%c0_403, %c0_404, %c0_405, %c472] : memref<1x1x2x2304xbf16, #tpu.memory_space<vmem>>, vector<1x1x2x1152xbf16>
    %283 = vector.shape_cast %282 : vector<1x1x2x1152xbf16> to vector<2x1152xbf16>
    %c188 = arith.constant 188 : index
    %c0_406 = arith.constant 0 : index
    %284 = vector.load %arg7[%c188, %c0_406] : memref<250x1152xbf16, #tpu.memory_space<vmem>>, vector<2x1152xbf16>
    tpu.vector_store %arg7[%c188, %c0_406], %283 {strides = array<i32>} : memref<250x1152xbf16, #tpu.memory_space<vmem>>, vector<2x1152xbf16>,
    %c0_407 = arith.constant 0 : index
    %c0_408 = arith.constant 0 : index
    %c0_409 = arith.constant 0 : index
    %c480 = arith.constant 480 : index
    %285 = vector.load %arg2[%c0_407, %c0_408, %c0_409, %c480] : memref<1x1x2x2304xbf16, #tpu.memory_space<vmem>>, vector<1x1x2x1152xbf16>
    %286 = vector.shape_cast %285 : vector<1x1x2x1152xbf16> to vector<2x1152xbf16>
    %c190 = arith.constant 190 : index
    %c0_410 = arith.constant 0 : index
    %287 = vector.load %arg7[%c190, %c0_410] : memref<250x1152xbf16, #tpu.memory_space<vmem>>, vector<2x1152xbf16>
    tpu.vector_store %arg7[%c190, %c0_410], %286 {strides = array<i32>} : memref<250x1152xbf16, #tpu.memory_space<vmem>>, vector<2x1152xbf16>,
    %c0_411 = arith.constant 0 : index
    %c0_412 = arith.constant 0 : index
    %c0_413 = arith.constant 0 : index
    %c481 = arith.constant 481 : index
    %288 = vector.load %arg2[%c0_411, %c0_412, %c0_413, %c481] : memref<1x1x2x2304xbf16, #tpu.memory_space<vmem>>, vector<1x1x2x1152xbf16>
    %289 = vector.shape_cast %288 : vector<1x1x2x1152xbf16> to vector<2x1152xbf16>
    %c192_414 = arith.constant 192 : index
    %c0_415 = arith.constant 0 : index
    %290 = vector.load %arg7[%c192_414, %c0_415] : memref<250x1152xbf16, #tpu.memory_space<vmem>>, vector<2x1152xbf16>
    tpu.vector_store %arg7[%c192_414, %c0_415], %289 {strides = array<i32>} : memref<250x1152xbf16, #tpu.memory_space<vmem>>, vector<2x1152xbf16>,
    %c0_416 = arith.constant 0 : index
    %c0_417 = arith.constant 0 : index
    %c0_418 = arith.constant 0 : index
    %c482 = arith.constant 482 : index
    %291 = vector.load %arg2[%c0_416, %c0_417, %c0_418, %c482] : memref<1x1x2x2304xbf16, #tpu.memory_space<vmem>>, vector<1x1x2x1152xbf16>
    %292 = vector.shape_cast %291 : vector<1x1x2x1152xbf16> to vector<2x1152xbf16>
    %c194_419 = arith.constant 194 : index
    %c0_420 = arith.constant 0 : index
    %293 = vector.load %arg7[%c194_419, %c0_420] : memref<250x1152xbf16, #tpu.memory_space<vmem>>, vector<2x1152xbf16>
    tpu.vector_store %arg7[%c194_419, %c0_420], %292 {strides = array<i32>} : memref<250x1152xbf16, #tpu.memory_space<vmem>>, vector<2x1152xbf16>,
    %c0_421 = arith.constant 0 : index
    %c0_422 = arith.constant 0 : index
    %c0_423 = arith.constant 0 : index
    %c483 = arith.constant 483 : index
    %294 = vector.load %arg2[%c0_421, %c0_422, %c0_423, %c483] : memref<1x1x2x2304xbf16, #tpu.memory_space<vmem>>, vector<1x1x2x1152xbf16>
    %295 = vector.shape_cast %294 : vector<1x1x2x1152xbf16> to vector<2x1152xbf16>
    %c196_424 = arith.constant 196 : index
    %c0_425 = arith.constant 0 : index
    %296 = vector.load %arg7[%c196_424, %c0_425] : memref<250x1152xbf16, #tpu.memory_space<vmem>>, vector<2x1152xbf16>
    tpu.vector_store %arg7[%c196_424, %c0_425], %295 {strides = array<i32>} : memref<250x1152xbf16, #tpu.memory_space<vmem>>, vector<2x1152xbf16>,
    %c0_426 = arith.constant 0 : index
    %c0_427 = arith.constant 0 : index
    %c0_428 = arith.constant 0 : index
    %c484 = arith.constant 484 : index
    %297 = vector.load %arg2[%c0_426, %c0_427, %c0_428, %c484] : memref<1x1x2x2304xbf16, #tpu.memory_space<vmem>>, vector<1x1x2x1152xbf16>
    %298 = vector.shape_cast %297 : vector<1x1x2x1152xbf16> to vector<2x1152xbf16>
    %c198 = arith.constant 198 : index
    %c0_429 = arith.constant 0 : index
    %299 = vector.load %arg7[%c198, %c0_429] : memref<250x1152xbf16, #tpu.memory_space<vmem>>, vector<2x1152xbf16>
    tpu.vector_store %arg7[%c198, %c0_429], %298 {strides = array<i32>} : memref<250x1152xbf16, #tpu.memory_space<vmem>>, vector<2x1152xbf16>,
    %c0_430 = arith.constant 0 : index
    %c0_431 = arith.constant 0 : index
    %c0_432 = arith.constant 0 : index
    %c576 = arith.constant 576 : index
    %300 = vector.load %arg2[%c0_430, %c0_431, %c0_432, %c576] : memref<1x1x2x2304xbf16, #tpu.memory_space<vmem>>, vector<1x1x2x1152xbf16>
    %301 = vector.shape_cast %300 : vector<1x1x2x1152xbf16> to vector<2x1152xbf16>
    %c200 = arith.constant 200 : index
    %c0_433 = arith.constant 0 : index
    %302 = vector.load %arg7[%c200, %c0_433] : memref<250x1152xbf16, #tpu.memory_space<vmem>>, vector<2x1152xbf16>
    tpu.vector_store %arg7[%c200, %c0_433], %301 {strides = array<i32>} : memref<250x1152xbf16, #tpu.memory_space<vmem>>, vector<2x1152xbf16>,
    %c0_434 = arith.constant 0 : index
    %c0_435 = arith.constant 0 : index
    %c0_436 = arith.constant 0 : index
    %c577 = arith.constant 577 : index
    %303 = vector.load %arg2[%c0_434, %c0_435, %c0_436, %c577] : memref<1x1x2x2304xbf16, #tpu.memory_space<vmem>>, vector<1x1x2x1152xbf16>
    %304 = vector.shape_cast %303 : vector<1x1x2x1152xbf16> to vector<2x1152xbf16>
    %c202 = arith.constant 202 : index
    %c0_437 = arith.constant 0 : index
    %305 = vector.load %arg7[%c202, %c0_437] : memref<250x1152xbf16, #tpu.memory_space<vmem>>, vector<2x1152xbf16>
    tpu.vector_store %arg7[%c202, %c0_437], %304 {strides = array<i32>} : memref<250x1152xbf16, #tpu.memory_space<vmem>>, vector<2x1152xbf16>,
    %c0_438 = arith.constant 0 : index
    %c0_439 = arith.constant 0 : index
    %c0_440 = arith.constant 0 : index
    %c578 = arith.constant 578 : index
    %306 = vector.load %arg2[%c0_438, %c0_439, %c0_440, %c578] : memref<1x1x2x2304xbf16, #tpu.memory_space<vmem>>, vector<1x1x2x1152xbf16>
    %307 = vector.shape_cast %306 : vector<1x1x2x1152xbf16> to vector<2x1152xbf16>
    %c204 = arith.constant 204 : index
    %c0_441 = arith.constant 0 : index
    %308 = vector.load %arg7[%c204, %c0_441] : memref<250x1152xbf16, #tpu.memory_space<vmem>>, vector<2x1152xbf16>
    tpu.vector_store %arg7[%c204, %c0_441], %307 {strides = array<i32>} : memref<250x1152xbf16, #tpu.memory_space<vmem>>, vector<2x1152xbf16>,
    %c0_442 = arith.constant 0 : index
    %c0_443 = arith.constant 0 : index
    %c0_444 = arith.constant 0 : index
    %c579 = arith.constant 579 : index
    %309 = vector.load %arg2[%c0_442, %c0_443, %c0_444, %c579] : memref<1x1x2x2304xbf16, #tpu.memory_space<vmem>>, vector<1x1x2x1152xbf16>
    %310 = vector.shape_cast %309 : vector<1x1x2x1152xbf16> to vector<2x1152xbf16>
    %c206 = arith.constant 206 : index
    %c0_445 = arith.constant 0 : index
    %311 = vector.load %arg7[%c206, %c0_445] : memref<250x1152xbf16, #tpu.memory_space<vmem>>, vector<2x1152xbf16>
    tpu.vector_store %arg7[%c206, %c0_445], %310 {strides = array<i32>} : memref<250x1152xbf16, #tpu.memory_space<vmem>>, vector<2x1152xbf16>,
    %c0_446 = arith.constant 0 : index
    %c0_447 = arith.constant 0 : index
    %c0_448 = arith.constant 0 : index
    %c580 = arith.constant 580 : index
    %312 = vector.load %arg2[%c0_446, %c0_447, %c0_448, %c580] : memref<1x1x2x2304xbf16, #tpu.memory_space<vmem>>, vector<1x1x2x1152xbf16>
    %313 = vector.shape_cast %312 : vector<1x1x2x1152xbf16> to vector<2x1152xbf16>
    %c208 = arith.constant 208 : index
    %c0_449 = arith.constant 0 : index
    %314 = vector.load %arg7[%c208, %c0_449] : memref<250x1152xbf16, #tpu.memory_space<vmem>>, vector<2x1152xbf16>
    tpu.vector_store %arg7[%c208, %c0_449], %313 {strides = array<i32>} : memref<250x1152xbf16, #tpu.memory_space<vmem>>, vector<2x1152xbf16>,
    %c0_450 = arith.constant 0 : index
    %c0_451 = arith.constant 0 : index
    %c0_452 = arith.constant 0 : index
    %c588 = arith.constant 588 : index
    %315 = vector.load %arg2[%c0_450, %c0_451, %c0_452, %c588] : memref<1x1x2x2304xbf16, #tpu.memory_space<vmem>>, vector<1x1x2x1152xbf16>
    %316 = vector.shape_cast %315 : vector<1x1x2x1152xbf16> to vector<2x1152xbf16>
    %c210 = arith.constant 210 : index
    %c0_453 = arith.constant 0 : index
    %317 = vector.load %arg7[%c210, %c0_453] : memref<250x1152xbf16, #tpu.memory_space<vmem>>, vector<2x1152xbf16>
    tpu.vector_store %arg7[%c210, %c0_453], %316 {strides = array<i32>} : memref<250x1152xbf16, #tpu.memory_space<vmem>>, vector<2x1152xbf16>,
    %c0_454 = arith.constant 0 : index
    %c0_455 = arith.constant 0 : index
    %c0_456 = arith.constant 0 : index
    %c589 = arith.constant 589 : index
    %318 = vector.load %arg2[%c0_454, %c0_455, %c0_456, %c589] : memref<1x1x2x2304xbf16, #tpu.memory_space<vmem>>, vector<1x1x2x1152xbf16>
    %319 = vector.shape_cast %318 : vector<1x1x2x1152xbf16> to vector<2x1152xbf16>
    %c212 = arith.constant 212 : index
    %c0_457 = arith.constant 0 : index
    %320 = vector.load %arg7[%c212, %c0_457] : memref<250x1152xbf16, #tpu.memory_space<vmem>>, vector<2x1152xbf16>
    tpu.vector_store %arg7[%c212, %c0_457], %319 {strides = array<i32>} : memref<250x1152xbf16, #tpu.memory_space<vmem>>, vector<2x1152xbf16>,
    %c0_458 = arith.constant 0 : index
    %c0_459 = arith.constant 0 : index
    %c0_460 = arith.constant 0 : index
    %c590 = arith.constant 590 : index
    %321 = vector.load %arg2[%c0_458, %c0_459, %c0_460, %c590] : memref<1x1x2x2304xbf16, #tpu.memory_space<vmem>>, vector<1x1x2x1152xbf16>
    %322 = vector.shape_cast %321 : vector<1x1x2x1152xbf16> to vector<2x1152xbf16>
    %c214 = arith.constant 214 : index
    %c0_461 = arith.constant 0 : index
    %323 = vector.load %arg7[%c214, %c0_461] : memref<250x1152xbf16, #tpu.memory_space<vmem>>, vector<2x1152xbf16>
    tpu.vector_store %arg7[%c214, %c0_461], %322 {strides = array<i32>} : memref<250x1152xbf16, #tpu.memory_space<vmem>>, vector<2x1152xbf16>,
    %c0_462 = arith.constant 0 : index
    %c0_463 = arith.constant 0 : index
    %c0_464 = arith.constant 0 : index
    %c591 = arith.constant 591 : index
    %324 = vector.load %arg2[%c0_462, %c0_463, %c0_464, %c591] : memref<1x1x2x2304xbf16, #tpu.memory_space<vmem>>, vector<1x1x2x1152xbf16>
    %325 = vector.shape_cast %324 : vector<1x1x2x1152xbf16> to vector<2x1152xbf16>
    %c216 = arith.constant 216 : index
    %c0_465 = arith.constant 0 : index
    %326 = vector.load %arg7[%c216, %c0_465] : memref<250x1152xbf16, #tpu.memory_space<vmem>>, vector<2x1152xbf16>
    tpu.vector_store %arg7[%c216, %c0_465], %325 {strides = array<i32>} : memref<250x1152xbf16, #tpu.memory_space<vmem>>, vector<2x1152xbf16>,
    %c0_466 = arith.constant 0 : index
    %c0_467 = arith.constant 0 : index
    %c0_468 = arith.constant 0 : index
    %c592 = arith.constant 592 : index
    %327 = vector.load %arg2[%c0_466, %c0_467, %c0_468, %c592] : memref<1x1x2x2304xbf16, #tpu.memory_space<vmem>>, vector<1x1x2x1152xbf16>
    %328 = vector.shape_cast %327 : vector<1x1x2x1152xbf16> to vector<2x1152xbf16>
    %c218 = arith.constant 218 : index
    %c0_469 = arith.constant 0 : index
    %329 = vector.load %arg7[%c218, %c0_469] : memref<250x1152xbf16, #tpu.memory_space<vmem>>, vector<2x1152xbf16>
    tpu.vector_store %arg7[%c218, %c0_469], %328 {strides = array<i32>} : memref<250x1152xbf16, #tpu.memory_space<vmem>>, vector<2x1152xbf16>,
    %c0_470 = arith.constant 0 : index
    %c0_471 = arith.constant 0 : index
    %c0_472 = arith.constant 0 : index
    %c600 = arith.constant 600 : index
    %330 = vector.load %arg2[%c0_470, %c0_471, %c0_472, %c600] : memref<1x1x2x2304xbf16, #tpu.memory_space<vmem>>, vector<1x1x2x1152xbf16>
    %331 = vector.shape_cast %330 : vector<1x1x2x1152xbf16> to vector<2x1152xbf16>
    %c220 = arith.constant 220 : index
    %c0_473 = arith.constant 0 : index
    %332 = vector.load %arg7[%c220, %c0_473] : memref<250x1152xbf16, #tpu.memory_space<vmem>>, vector<2x1152xbf16>
    tpu.vector_store %arg7[%c220, %c0_473], %331 {strides = array<i32>} : memref<250x1152xbf16, #tpu.memory_space<vmem>>, vector<2x1152xbf16>,
    %c0_474 = arith.constant 0 : index
    %c0_475 = arith.constant 0 : index
    %c0_476 = arith.constant 0 : index
    %c601 = arith.constant 601 : index
    %333 = vector.load %arg2[%c0_474, %c0_475, %c0_476, %c601] : memref<1x1x2x2304xbf16, #tpu.memory_space<vmem>>, vector<1x1x2x1152xbf16>
    %334 = vector.shape_cast %333 : vector<1x1x2x1152xbf16> to vector<2x1152xbf16>
    %c222 = arith.constant 222 : index
    %c0_477 = arith.constant 0 : index
    %335 = vector.load %arg7[%c222, %c0_477] : memref<250x1152xbf16, #tpu.memory_space<vmem>>, vector<2x1152xbf16>
    tpu.vector_store %arg7[%c222, %c0_477], %334 {strides = array<i32>} : memref<250x1152xbf16, #tpu.memory_space<vmem>>, vector<2x1152xbf16>,
    %c0_478 = arith.constant 0 : index
    %c0_479 = arith.constant 0 : index
    %c0_480 = arith.constant 0 : index
    %c602 = arith.constant 602 : index
    %336 = vector.load %arg2[%c0_478, %c0_479, %c0_480, %c602] : memref<1x1x2x2304xbf16, #tpu.memory_space<vmem>>, vector<1x1x2x1152xbf16>
    %337 = vector.shape_cast %336 : vector<1x1x2x1152xbf16> to vector<2x1152xbf16>
    %c224 = arith.constant 224 : index
    %c0_481 = arith.constant 0 : index
    %338 = vector.load %arg7[%c224, %c0_481] : memref<250x1152xbf16, #tpu.memory_space<vmem>>, vector<2x1152xbf16>
    tpu.vector_store %arg7[%c224, %c0_481], %337 {strides = array<i32>} : memref<250x1152xbf16, #tpu.memory_space<vmem>>, vector<2x1152xbf16>,
    %c0_482 = arith.constant 0 : index
    %c0_483 = arith.constant 0 : index
    %c0_484 = arith.constant 0 : index
    %c603 = arith.constant 603 : index
    %339 = vector.load %arg2[%c0_482, %c0_483, %c0_484, %c603] : memref<1x1x2x2304xbf16, #tpu.memory_space<vmem>>, vector<1x1x2x1152xbf16>
    %340 = vector.shape_cast %339 : vector<1x1x2x1152xbf16> to vector<2x1152xbf16>
    %c226 = arith.constant 226 : index
    %c0_485 = arith.constant 0 : index
    %341 = vector.load %arg7[%c226, %c0_485] : memref<250x1152xbf16, #tpu.memory_space<vmem>>, vector<2x1152xbf16>
    tpu.vector_store %arg7[%c226, %c0_485], %340 {strides = array<i32>} : memref<250x1152xbf16, #tpu.memory_space<vmem>>, vector<2x1152xbf16>,
    %c0_486 = arith.constant 0 : index
    %c0_487 = arith.constant 0 : index
    %c0_488 = arith.constant 0 : index
    %c604 = arith.constant 604 : index
    %342 = vector.load %arg2[%c0_486, %c0_487, %c0_488, %c604] : memref<1x1x2x2304xbf16, #tpu.memory_space<vmem>>, vector<1x1x2x1152xbf16>
    %343 = vector.shape_cast %342 : vector<1x1x2x1152xbf16> to vector<2x1152xbf16>
    %c228 = arith.constant 228 : index
    %c0_489 = arith.constant 0 : index
    %344 = vector.load %arg7[%c228, %c0_489] : memref<250x1152xbf16, #tpu.memory_space<vmem>>, vector<2x1152xbf16>
    tpu.vector_store %arg7[%c228, %c0_489], %343 {strides = array<i32>} : memref<250x1152xbf16, #tpu.memory_space<vmem>>, vector<2x1152xbf16>,
    %c0_490 = arith.constant 0 : index
    %c0_491 = arith.constant 0 : index
    %c0_492 = arith.constant 0 : index
    %c612 = arith.constant 612 : index
    %345 = vector.load %arg2[%c0_490, %c0_491, %c0_492, %c612] : memref<1x1x2x2304xbf16, #tpu.memory_space<vmem>>, vector<1x1x2x1152xbf16>
    %346 = vector.shape_cast %345 : vector<1x1x2x1152xbf16> to vector<2x1152xbf16>
    %c230 = arith.constant 230 : index
    %c0_493 = arith.constant 0 : index
    %347 = vector.load %arg7[%c230, %c0_493] : memref<250x1152xbf16, #tpu.memory_space<vmem>>, vector<2x1152xbf16>
    tpu.vector_store %arg7[%c230, %c0_493], %346 {strides = array<i32>} : memref<250x1152xbf16, #tpu.memory_space<vmem>>, vector<2x1152xbf16>,
    %c0_494 = arith.constant 0 : index
    %c0_495 = arith.constant 0 : index
    %c0_496 = arith.constant 0 : index
    %c613 = arith.constant 613 : index
    %348 = vector.load %arg2[%c0_494, %c0_495, %c0_496, %c613] : memref<1x1x2x2304xbf16, #tpu.memory_space<vmem>>, vector<1x1x2x1152xbf16>
    %349 = vector.shape_cast %348 : vector<1x1x2x1152xbf16> to vector<2x1152xbf16>
    %c232 = arith.constant 232 : index
    %c0_497 = arith.constant 0 : index
    %350 = vector.load %arg7[%c232, %c0_497] : memref<250x1152xbf16, #tpu.memory_space<vmem>>, vector<2x1152xbf16>
    tpu.vector_store %arg7[%c232, %c0_497], %349 {strides = array<i32>} : memref<250x1152xbf16, #tpu.memory_space<vmem>>, vector<2x1152xbf16>,
    %c0_498 = arith.constant 0 : index
    %c0_499 = arith.constant 0 : index
    %c0_500 = arith.constant 0 : index
    %c614 = arith.constant 614 : index
    %351 = vector.load %arg2[%c0_498, %c0_499, %c0_500, %c614] : memref<1x1x2x2304xbf16, #tpu.memory_space<vmem>>, vector<1x1x2x1152xbf16>
    %352 = vector.shape_cast %351 : vector<1x1x2x1152xbf16> to vector<2x1152xbf16>
    %c234 = arith.constant 234 : index
    %c0_501 = arith.constant 0 : index
    %353 = vector.load %arg7[%c234, %c0_501] : memref<250x1152xbf16, #tpu.memory_space<vmem>>, vector<2x1152xbf16>
    tpu.vector_store %arg7[%c234, %c0_501], %352 {strides = array<i32>} : memref<250x1152xbf16, #tpu.memory_space<vmem>>, vector<2x1152xbf16>,
    %c0_502 = arith.constant 0 : index
    %c0_503 = arith.constant 0 : index
    %c0_504 = arith.constant 0 : index
    %c615 = arith.constant 615 : index
    %354 = vector.load %arg2[%c0_502, %c0_503, %c0_504, %c615] : memref<1x1x2x2304xbf16, #tpu.memory_space<vmem>>, vector<1x1x2x1152xbf16>
    %355 = vector.shape_cast %354 : vector<1x1x2x1152xbf16> to vector<2x1152xbf16>
    %c236 = arith.constant 236 : index
    %c0_505 = arith.constant 0 : index
    %356 = vector.load %arg7[%c236, %c0_505] : memref<250x1152xbf16, #tpu.memory_space<vmem>>, vector<2x1152xbf16>
    tpu.vector_store %arg7[%c236, %c0_505], %355 {strides = array<i32>} : memref<250x1152xbf16, #tpu.memory_space<vmem>>, vector<2x1152xbf16>,
    %c0_506 = arith.constant 0 : index
    %c0_507 = arith.constant 0 : index
    %c0_508 = arith.constant 0 : index
    %c616 = arith.constant 616 : index
    %357 = vector.load %arg2[%c0_506, %c0_507, %c0_508, %c616] : memref<1x1x2x2304xbf16, #tpu.memory_space<vmem>>, vector<1x1x2x1152xbf16>
    %358 = vector.shape_cast %357 : vector<1x1x2x1152xbf16> to vector<2x1152xbf16>
    %c238 = arith.constant 238 : index
    %c0_509 = arith.constant 0 : index
    %359 = vector.load %arg7[%c238, %c0_509] : memref<250x1152xbf16, #tpu.memory_space<vmem>>, vector<2x1152xbf16>
    tpu.vector_store %arg7[%c238, %c0_509], %358 {strides = array<i32>} : memref<250x1152xbf16, #tpu.memory_space<vmem>>, vector<2x1152xbf16>,
    %c0_510 = arith.constant 0 : index
    %c0_511 = arith.constant 0 : index
    %c0_512 = arith.constant 0 : index
    %c624 = arith.constant 624 : index
    %360 = vector.load %arg2[%c0_510, %c0_511, %c0_512, %c624] : memref<1x1x2x2304xbf16, #tpu.memory_space<vmem>>, vector<1x1x2x1152xbf16>
    %361 = vector.shape_cast %360 : vector<1x1x2x1152xbf16> to vector<2x1152xbf16>
    %c240 = arith.constant 240 : index
    %c0_513 = arith.constant 0 : index
    %362 = vector.load %arg7[%c240, %c0_513] : memref<250x1152xbf16, #tpu.memory_space<vmem>>, vector<2x1152xbf16>
    tpu.vector_store %arg7[%c240, %c0_513], %361 {strides = array<i32>} : memref<250x1152xbf16, #tpu.memory_space<vmem>>, vector<2x1152xbf16>,
    %c0_514 = arith.constant 0 : index
    %c0_515 = arith.constant 0 : index
    %c0_516 = arith.constant 0 : index
    %c625 = arith.constant 625 : index
    %363 = vector.load %arg2[%c0_514, %c0_515, %c0_516, %c625] : memref<1x1x2x2304xbf16, #tpu.memory_space<vmem>>, vector<1x1x2x1152xbf16>
    %364 = vector.shape_cast %363 : vector<1x1x2x1152xbf16> to vector<2x1152xbf16>
    %c242 = arith.constant 242 : index
    %c0_517 = arith.constant 0 : index
    %365 = vector.load %arg7[%c242, %c0_517] : memref<250x1152xbf16, #tpu.memory_space<vmem>>, vector<2x1152xbf16>
    tpu.vector_store %arg7[%c242, %c0_517], %364 {strides = array<i32>} : memref<250x1152xbf16, #tpu.memory_space<vmem>>, vector<2x1152xbf16>,
    %c0_518 = arith.constant 0 : index
    %c0_519 = arith.constant 0 : index
    %c0_520 = arith.constant 0 : index
    %c626 = arith.constant 626 : index
    %366 = vector.load %arg2[%c0_518, %c0_519, %c0_520, %c626] : memref<1x1x2x2304xbf16, #tpu.memory_space<vmem>>, vector<1x1x2x1152xbf16>
    %367 = vector.shape_cast %366 : vector<1x1x2x1152xbf16> to vector<2x1152xbf16>
    %c244 = arith.constant 244 : index
    %c0_521 = arith.constant 0 : index
    %368 = vector.load %arg7[%c244, %c0_521] : memref<250x1152xbf16, #tpu.memory_space<vmem>>, vector<2x1152xbf16>
    tpu.vector_store %arg7[%c244, %c0_521], %367 {strides = array<i32>} : memref<250x1152xbf16, #tpu.memory_space<vmem>>, vector<2x1152xbf16>,
    %c0_522 = arith.constant 0 : index
    %c0_523 = arith.constant 0 : index
    %c0_524 = arith.constant 0 : index
    %c627 = arith.constant 627 : index
    %369 = vector.load %arg2[%c0_522, %c0_523, %c0_524, %c627] : memref<1x1x2x2304xbf16, #tpu.memory_space<vmem>>, vector<1x1x2x1152xbf16>
    %370 = vector.shape_cast %369 : vector<1x1x2x1152xbf16> to vector<2x1152xbf16>
    %c246 = arith.constant 246 : index
    %c0_525 = arith.constant 0 : index
    %371 = vector.load %arg7[%c246, %c0_525] : memref<250x1152xbf16, #tpu.memory_space<vmem>>, vector<2x1152xbf16>
    tpu.vector_store %arg7[%c246, %c0_525], %370 {strides = array<i32>} : memref<250x1152xbf16, #tpu.memory_space<vmem>>, vector<2x1152xbf16>,
    %c0_526 = arith.constant 0 : index
    %c0_527 = arith.constant 0 : index
    %c0_528 = arith.constant 0 : index
    %c628 = arith.constant 628 : index
    %372 = vector.load %arg2[%c0_526, %c0_527, %c0_528, %c628] : memref<1x1x2x2304xbf16, #tpu.memory_space<vmem>>, vector<1x1x2x1152xbf16>
    %373 = vector.shape_cast %372 : vector<1x1x2x1152xbf16> to vector<2x1152xbf16>
    %c248 = arith.constant 248 : index
    %c0_529 = arith.constant 0 : index
    %374 = vector.load %arg7[%c248, %c0_529] : memref<250x1152xbf16, #tpu.memory_space<vmem>>, vector<2x1152xbf16>
    tpu.vector_store %arg7[%c248, %c0_529], %373 {strides = array<i32>} : memref<250x1152xbf16, #tpu.memory_space<vmem>>, vector<2x1152xbf16>,
    %c0_530 = arith.constant 0 : index
    %c0_531 = arith.constant 0 : index
    %375 = vector.load %arg3[%c0_530, %c0_531] : memref<16x250xbf16, #tpu.memory_space<vmem>>, vector<16x250xbf16>
    %c0_532 = arith.constant 0 : index
    %c0_533 = arith.constant 0 : index
    %376 = vector.load %arg7[%c0_532, %c0_533] : memref<250x1152xbf16, #tpu.memory_space<vmem>>, vector<250x1152xbf16>
    %cst = arith.constant dense<0.000000e+00> : vector<16x1152xf32>
    %377 = tpu.matmul %375, %376, %cst {dimension_numbers = #tpu.dot_dimension_numbers<[1], [0], [0], [1], [0, 0, 1, 1], [], []>} : vector<16x250xbf16>, vector<250x1152xbf16>, vector<16x1152xf32> -> vector<16x1152xf32>
    %c0_534 = arith.constant 0 : index
    %c0_535 = arith.constant 0 : index
    %378 = vector.load %arg4[%c0_534, %c0_535] : memref<1x1152xf32, #tpu.memory_space<vmem>>, vector<1x1152xf32>
    %379 = vector.broadcast %378 : vector<1x1152xf32> to vector<16x1152xf32>
    %380 = arith.mulf %377, %379 : vector<16x1152xf32>
    %cst_536 = arith.constant dense<0.000000e+00> : vector<16xf32>
    %381 = vector.multi_reduction <add>, %380, %cst_536 [1] : vector<16x1152xf32> to vector<16xf32>
    %382 = vector.shape_cast %381 : vector<16xf32> to vector<16x1xf32>
    %383 = arith.mulf %380, %377 : vector<16x1152xf32>
    %cst_537 = arith.constant dense<0.000000e+00> : vector<16xf32>
    %384 = vector.multi_reduction <add>, %383, %cst_537 [1] : vector<16x1152xf32> to vector<16xf32>
    %385 = vector.shape_cast %384 : vector<16xf32> to vector<16x1xf32>
    %cst_538 = arith.constant 0.000000e+00 : f32
    %386 = vector.broadcast %cst_538 : f32 to vector<16x126xf32>
    %387 = tpu.concatenate %382, %385, %386 in 1 : vector<16x1xf32>, vector<16x1xf32>, vector<16x126xf32> -> vector<16x128xf32>
    %c0_539 = arith.constant 0 : index
    %c0_540 = arith.constant 0 : index
    %c0_541 = arith.constant 0 : index
    %c0_542 = arith.constant 0 : index
    %388 = vector.load %arg6[%c0_539, %c0_540, %c0_541, %c0_542] : memref<1x1x16x128xf32, #tpu.memory_space<vmem>>, vector<1x1x16x128xf32>
    %389 = vector.shape_cast %388 : vector<1x1x16x128xf32> to vector<16x128xf32>
    %390 = vector.shape_cast %387 : vector<16x128xf32> to vector<1x1x16x128xf32>
    tpu.vector_store %arg6[%c0_539, %c0_540, %c0_541, %c0_542], %390 {strides = array<i32>} : memref<1x1x16x128xf32, #tpu.memory_space<vmem>>, vector<1x1x16x128xf32>,
    %391 = arith.truncf %377 : vector<16x1152xf32> to vector<16x1152xbf16>
    %c0_543 = arith.constant 0 : index
    %c0_544 = arith.constant 0 : index
    %c0_545 = arith.constant 0 : index
    %392 = vector.load %arg5[%c0_543, %c0_544, %c0_545] : memref<1x16x1152xbf16, #tpu.memory_space<vmem>>, vector<1x16x1152xbf16>
    %393 = vector.shape_cast %392 : vector<1x16x1152xbf16> to vector<16x1152xbf16>
    %394 = vector.shape_cast %391 : vector<16x1152xbf16> to vector<1x16x1152xbf16>
    tpu.vector_store %arg5[%c0_543, %c0_544, %c0_545], %394 {strides = array<i32>} : memref<1x16x1152xbf16, #tpu.memory_space<vmem>>, vector<1x16x1152xbf16>,
    return
  }
  func.func @transform_0(%arg0: i32, %arg1: i32) -> (i32, i32, i32, i32) {
    %c0_i32 = arith.constant 0 : i32
    %c0_i32_0 = arith.constant 0 : i32
    %c0_i32_1 = arith.constant 0 : i32
    return %arg0, %arg1, %c0_i32, %c0_i32_0 : i32, i32, i32, i32
  }
  func.func @transform_1(%arg0: i32, %arg1: i32) -> (i32, i32) {
    %c0_i32 = arith.constant 0 : i32
    %c0_i32_0 = arith.constant 0 : i32
    %c0_i32_1 = arith.constant 0 : i32
    return %c0_i32, %c0_i32_0 : i32, i32
  }
  func.func @transform_2(%arg0: i32, %arg1: i32) -> (i32, i32) {
    %c0_i32 = arith.constant 0 : i32
    %c0_i32_0 = arith.constant 0 : i32
    return %c0_i32, %arg1 : i32, i32
  }
  func.func @transform_3(%arg0: i32, %arg1: i32) -> (i32, i32, i32) {
    %c0_i32 = arith.constant 0 : i32
    %c0_i32_0 = arith.constant 0 : i32
    return %arg0, %c0_i32, %arg1 : i32, i32, i32
  }
  func.func @transform_4(%arg0: i32, %arg1: i32) -> (i32, i32, i32, i32) {
    %c0_i32 = arith.constant 0 : i32
    %c0_i32_0 = arith.constant 0 : i32
    %c0_i32_1 = arith.constant 0 : i32
    return %arg0, %arg1, %c0_i32, %c0_i32_0 : i32, i32, i32, i32
  }
}

module attributes {stable_mosaic.version = 11 : i64} {
  func.func @_bn_kernel(%arg0: i32, %arg1: i32, %arg2: memref<1x16x1152xbf16, #tpu.memory_space<vmem>>, %arg3: memref<16x1xf32, #tpu.memory_space<vmem>>, %arg4: memref<16x1xf32, #tpu.memory_space<vmem>>, %arg5: memref<1x16x1152xf32, #tpu.memory_space<vmem>>) attributes {dimension_semantics = [#tpu.dimension_semantics<parallel>, #tpu.dimension_semantics<parallel>], iteration_bounds = array<i64: 2, 1>, scalar_prefetch = 0 : i64, scratch_operands = 0 : i64, tpu.core_type = #tpu.core_type<tc>, window_params = [{transform_indices = @transform_0, window_bounds = array<i64: 1, 16, 1152>}, {pipeline_mode = #tpu.pipeline_mode<synchronous>, transform_indices = @transform_1, window_bounds = array<i64: 16, 1>}, {pipeline_mode = #tpu.pipeline_mode<synchronous>, transform_indices = @transform_2, window_bounds = array<i64: 16, 1>}, {transform_indices = @transform_3, window_bounds = array<i64: 1, 16, 1152>}]} {
    %c0 = arith.constant 0 : index
    %c0_0 = arith.constant 0 : index
    %c0_1 = arith.constant 0 : index
    %0 = vector.load %arg2[%c0, %c0_0, %c0_1] : memref<1x16x1152xbf16, #tpu.memory_space<vmem>>, vector<1x16x1152xbf16>
    %1 = vector.shape_cast %0 : vector<1x16x1152xbf16> to vector<16x1152xbf16>
    %2 = arith.extf %1 : vector<16x1152xbf16> to vector<16x1152xf32>
    %c0_2 = arith.constant 0 : index
    %c0_3 = arith.constant 0 : index
    %3 = vector.load %arg3[%c0_2, %c0_3] : memref<16x1xf32, #tpu.memory_space<vmem>>, vector<16x1xf32>
    %4 = vector.broadcast %3 : vector<16x1xf32> to vector<16x1152xf32>
    %5 = arith.mulf %2, %4 : vector<16x1152xf32>
    %c0_4 = arith.constant 0 : index
    %c0_5 = arith.constant 0 : index
    %6 = vector.load %arg4[%c0_4, %c0_5] : memref<16x1xf32, #tpu.memory_space<vmem>>, vector<16x1xf32>
    %7 = vector.broadcast %6 : vector<16x1xf32> to vector<16x1152xf32>
    %8 = arith.addf %5, %7 : vector<16x1152xf32>
    %c0_6 = arith.constant 0 : index
    %c0_7 = arith.constant 0 : index
    %c0_8 = arith.constant 0 : index
    %9 = vector.load %arg5[%c0_6, %c0_7, %c0_8] : memref<1x16x1152xf32, #tpu.memory_space<vmem>>, vector<1x16x1152xf32>
    %10 = vector.shape_cast %9 : vector<1x16x1152xf32> to vector<16x1152xf32>
    %11 = vector.shape_cast %8 : vector<16x1152xf32> to vector<1x16x1152xf32>
    tpu.vector_store %arg5[%c0_6, %c0_7, %c0_8], %11 {strides = array<i32>} : memref<1x16x1152xf32, #tpu.memory_space<vmem>>, vector<1x16x1152xf32>,
    return
  }
  func.func @transform_0(%arg0: i32, %arg1: i32) -> (i32, i32, i32) {
    %c0_i32 = arith.constant 0 : i32
    %c0_i32_0 = arith.constant 0 : i32
    return %arg0, %c0_i32, %arg1 : i32, i32, i32
  }
  func.func @transform_1(%arg0: i32, %arg1: i32) -> (i32, i32) {
    %c0_i32 = arith.constant 0 : i32
    %c0_i32_0 = arith.constant 0 : i32
    %c0_i32_1 = arith.constant 0 : i32
    return %c0_i32, %c0_i32_0 : i32, i32
  }
  func.func @transform_2(%arg0: i32, %arg1: i32) -> (i32, i32) {
    %c0_i32 = arith.constant 0 : i32
    %c0_i32_0 = arith.constant 0 : i32
    %c0_i32_1 = arith.constant 0 : i32
    return %c0_i32, %c0_i32_0 : i32, i32
  }
  func.func @transform_3(%arg0: i32, %arg1: i32) -> (i32, i32, i32) {
    %c0_i32 = arith.constant 0 : i32
    %c0_i32_0 = arith.constant 0 : i32
    return %arg0, %c0_i32, %arg1 : i32, i32, i32
  }
}

</mosaic_0001>

<bundles_post_ra>
// kernel: input_transition.3
= control target key start
LH: loop header
LB: loop body
LE: loop exit
PB: predicated region body
PF: predicated region fallthrough
CT: control target
= control target key end

     0   :  { %s486_s12 = smov 0   ;;  %s488_s13 = smov 0   ;;  %s559_s0 = inlined_call_operand.vmem [shape: bf16[2,16,1152], index: 0, kind: input, shape index: {}]   ;;  %s560_s1 = inlined_call_operand.vmem [shape: f32[16,1], index: 1, kind: input, shape index: {}]   ;;  %s561_s2 = inlined_call_operand.vmem [shape: f32[16,1], index: 2, kind: input, shape index: {}]   ;;  %s562_s3 = inlined_call_operand.vmem [shape: f32[2,16,1152], index: 3, kind: output, shape index: {}]  }
   0x1   :  { %s490_s14 = smov 0  }
   0x2 LB: > { %s25_s15 = sadd.s32 1, %s459_s13  ;;  %p407_p0 = scmp.ge.s32.totalorder %s463_s14, 1  ;;  %s463_s14 = sphi %s490_s14, %s13_s14   ;;  %s459_s13 = sphi %s488_s13, %s564_s13   ;;  %s455_s12 = sphi %s486_s12, %s563_s12  }
   0x3   : > { %p27_p1 = scmp.ge.s32.totalorder %s25_s15, 2  ;;  %p158_p2 = scmp.lt.s32.totalorder %s463_s14, 3 }
   0x5   : > { %s566_s15 = smov (%p27_p1, %s25_s15), 0  ;;  %p159_p3 = pnand %p407_p0, %p158_p2 }
   0x6   : > { %v268_v0 = vld [vmem:[%s561_s2] sm:$0xff] (!%p159_p3)  ;;  %v465_v2 = vmov (!%p159_p3), 0   ;;  %v269_v3 = vld [vmem:[%s561_s2 + $0x8] sm:$0xff] (!%p159_p3)  ;;  %p191_p4 = scmp.lt.s32.totalorder (!%p159_p3), %s455_s12, 1 }
   0x7   : > { %162 = sbr.rel (%p159_p3) target bundleno = 150 (0x96), region = 32  ;;  %v238_v1 = vld [vmem:[%s560_s1] sm:$0xff] (!%p159_p3)  ;;  %440 = vset.pattern.permute.xlu1 (!%p159_p3), %v465_v2  ;;  %439 = vset.pattern.permute.xlu0 (!%p159_p3), %v465_v2  ;;  %v239_v4 = vld [vmem:[%s560_s1 + $0x8] sm:$0xff] (!%p159_p3) }
   0x8   : > { %272 = vperm.xlu1 (!%p159_p3), %440, %v268_v0   ;;  %242 = vperm.xlu0 (!%p159_p3), %439, %v238_v1  }
   0xc   : > { %277 = vperm.xlu1 (!%p159_p3), %440, %v269_v3   ;;  %247 = vperm.xlu0 (!%p159_p3), %439, %v239_v4  }
   0xe   : > { %s568_s12 = smov (!%p191_p4, %s455_s12), 1 }
   0xf   : > { %s412_s24 = smul.u32 72, %s568_s12 }
  0x10   : > { %s413_s28 = smul.u32 144, %s568_s12 }
  0x11   : > { %s198_s27 = scalar_lea.vmem %s559_s0, %s412_s24 }
  0x12   : > { %v210_v5 = vld [vmem:[%s198_s27] sm:$0xff]  ;;  %v211_v6 = vld [vmem:[%s198_s27 + $0x8] sm:$0xff]  ;;  %v212_v7 = vld [vmem:[%s198_s27 + $0x10] sm:$0xff]  ;;  %s530_s4 = scalar_lea.vmem %s562_s3, %s413_s28 }
  0x13   : > { %v213_v8 = vld [vmem:[%s198_s27 + $0x18] sm:$0xff]  ;;  %v522_v9 = vld [vmem:[%s198_s27 + $0x20] ss:$36 sps:$4 sm:$0xff]   ;;  %v220_v11 = vunpack.c.l.bf16 %v210_v5  ;;  %v221_v12 = vunpack.c.h.bf16 %v210_v5  ;;  %v216_v13 = vld [vmem:[%s198_s27 + $0x2c] sm:$0xff]  ;;  %v222_v15 = vunpack.c.l.bf16 %v211_v6  ;;  %v223_v16 = vunpack.c.h.bf16 %v211_v6 }
  0x14   : > { %v215_v10 = vld [vmem:[%s198_s27 + $0x24] sm:$0xff]  ;;  %v217_v14 = vld [vmem:[%s198_s27 + $0x34] sm:$0xff]  ;;  %v224_v17 = vunpack.c.l.bf16 %v212_v7  ;;  %v225_v18 = vunpack.c.h.bf16 %v212_v7  ;;  %v218_v19 = vld [vmem:[%s198_s27 + $0x3c] sm:$0xff]  ;;  %v226_v20 = vunpack.c.l.bf16 %v213_v8  ;;  %v227_v21 = vunpack.c.h.bf16 %v213_v8 }
  0x15   : > { %v228_v22 = vunpack.c.l.bf16 %v522_v9  ;;  %v229_v23 = vunpack.c.l.bf16 %v215_v10  ;;  %v230_v24 = vunpack.c.h.bf16 %v215_v10  ;;  %v231_v25 = vunpack.c.l.bf16 %v216_v13 }
  0x16   : > { %v232_v26 = vunpack.c.h.bf16 %v216_v13  ;;  %v233_v27 = vunpack.c.l.bf16 %v217_v14  ;;  %v234_v30 = vunpack.c.h.bf16 %v217_v14  ;;  %v235_v31 = vunpack.c.l.bf16 %v218_v19 }
  0x17   : > { %v236_v32 = vunpack.c.h.bf16 %v218_v19  ;;  %v237_v33 = vunpack.c.h.bf16 %v522_v9 }
  0x87   : > { %v273_v28 = vpop.permute.xlu1 %272  ;;  %v243_v29 = vpop.permute.xlu0 %242 }
  0x88   : > { %v250_v34 = vmul.f32 %v243_v29, %v220_v11  ;;  %v251_v35 = vmul.f32 %v243_v29, %v221_v12  ;;  %v252_v36 = vmul.f32 %v243_v29, %v222_v15  ;;  %v253_v37 = vmul.f32 %v243_v29, %v223_v16 }
  0x89   : > { %v254_v38 = vmul.f32 %v243_v29, %v224_v17  ;;  %v255_v39 = vmul.f32 %v243_v29, %v225_v18  ;;  %v256_v40 = vmul.f32 %v243_v29, %v226_v20  ;;  %v257_v41 = vmul.f32 %v243_v29, %v227_v21 }
  0x8a   : > { %v258_v42 = vmul.f32 %v243_v29, %v228_v22  ;;  %v280_v43 = vadd.f32 %v273_v28, %v250_v34  ;;  %v281_v44 = vadd.f32 %v273_v28, %v251_v35  ;;  %v282_v45 = vadd.f32 %v273_v28, %v252_v36 }
  0x8b   : > { %v283_v46 = vadd.f32 %v273_v28, %v253_v37  ;;  %v284_v47 = vadd.f32 %v273_v28, %v254_v38  ;;  %v285_v48 = vadd.f32 %v273_v28, %v255_v39  ;;  %v286_v49 = vadd.f32 %v273_v28, %v256_v40  ;;  %v248_v50 = vpop.permute.xlu0 %247  ;;  %v278_v55 = vpop.permute.xlu1 %277 }
  0x8c   : > { %v287_v51 = vadd.f32 %v273_v28, %v257_v41  ;;  %v288_v52 = vadd.f32 %v273_v28, %v258_v42  ;;  %298 = vst [vmem:[%s530_s4] sm:$0xff] %v280_v43  ;;  %299 = vst [vmem:[%s530_s4 + $0x8] sm:$0xff] %v281_v44  ;;  %v259_v53 = vmul.f32 %v248_v50, %v229_v23 }
  0x8d   : > { %300 = vst [vmem:[%s530_s4 + $0x10] sm:$0xff] %v282_v45  ;;  %v260_v54 = vmul.f32 %v248_v50, %v230_v24  ;;  %301 = vst [vmem:[%s530_s4 + $0x18] sm:$0xff] %v283_v46  ;;  %v261_v56 = vmul.f32 %v248_v50, %v231_v25  ;;  %v262_v57 = vmul.f32 %v248_v50, %v232_v26 }
  0x8e   : > { %302 = vst [vmem:[%s530_s4 + $0x20] sm:$0xff] %v284_v47  ;;  %303 = vst [vmem:[%s530_s4 + $0x28] sm:$0xff] %v285_v48  ;;  %v263_v58 = vmul.f32 %v248_v50, %v233_v27  ;;  %v264_v59 = vmul.f32 %v248_v50, %v234_v30  ;;  %v265_v60 = vmul.f32 %v248_v50, %v235_v31 }
  0x8f   : > { %304 = vst [vmem:[%s530_s4 + $0x30] sm:$0xff] %v286_v49  ;;  %305 = vst [vmem:[%s530_s4 + $0x38] sm:$0xff] %v287_v51  ;;  %v266_v61 = vmul.f32 %v248_v50, %v236_v32  ;;  %v267_v62 = vmul.f32 %v248_v50, %v237_v33  ;;  %v289_v63 = vadd.f32 %v278_v55, %v259_v53 }
  0x90   : > { %306 = vst [vmem:[%s530_s4 + $0x40] sm:$0xff] %v288_v52  ;;  %v290_v0 = vadd.f32 %v278_v55, %v260_v54  ;;  %v291_v1 = vadd.f32 %v278_v55, %v261_v56  ;;  %v292_v2 = vadd.f32 %v278_v55, %v262_v57  ;;  %v293_v3 = vadd.f32 %v278_v55, %v263_v58 }
  0x91   : > { %v294_v4 = vadd.f32 %v278_v55, %v264_v59  ;;  %v295_v5 = vadd.f32 %v278_v55, %v265_v60  ;;  %v296_v6 = vadd.f32 %v278_v55, %v266_v61  ;;  %v297_v7 = vadd.f32 %v278_v55, %v267_v62  ;;  %307 = vst [vmem:[%s530_s4 + $0x48] sm:$0xff] %v289_v63 }
  0x92   : > { %308 = vst [vmem:[%s530_s4 + $0x50] sm:$0xff] %v290_v0  ;;  %309 = vst [vmem:[%s530_s4 + $0x58] sm:$0xff] %v291_v1 }
  0x93   : > { %310 = vst [vmem:[%s530_s4 + $0x60] sm:$0xff] %v292_v2  ;;  %311 = vst [vmem:[%s530_s4 + $0x68] sm:$0xff] %v293_v3 }
  0x94   : > { %312 = vst [vmem:[%s530_s4 + $0x70] sm:$0xff] %v294_v4  ;;  %313 = vst [vmem:[%s530_s4 + $0x78] sm:$0xff] %v295_v5 }
  0x95   : > { %314 = vst [vmem:[%s530_s4 + $0x80] sm:$0xff] %v296_v6  ;;  %315 = vst [vmem:[%s530_s4 + $0x88] sm:$0xff] %v297_v7 }
  0x96 PF: > { %s13_s14 = sadd.s32 1, %s463_s14   ;;  %s563_s12 = smov %s459_s13 }
  0x97   : > { %p10_p5 = scmp.ge.s32.totalorder %s13_s14, 4   ;;  %s564_s13 = smov %s566_s15 }
  0x99   :  { %12 = sbr.rel (!%p10_p5) target bundleno = 2 (0x2), region = 62 }

// kernel: input_transition.2
= control target key start
LH: loop header
LB: loop body
LE: loop exit
PB: predicated region body
PF: predicated region fallthrough
CT: control target
= control target key end

     0   :  { %s14938_s15 = smov 0   ;;  %s14940_s16 = smov 0   ;;  %s19103_s0 = inlined_call_operand.vmem [shape: bf16[2,1,2,2304], index: 0, kind: input, shape index: {}]   ;;  %s19104_s1 = inlined_call_operand.vmem [shape: bf16[16,250], index: 1, kind: input, shape index: {}]   ;;  %s19105_s2 = inlined_call_operand.vmem [shape: f32[1,1152], index: 2, kind: input, shape index: {}]   ;;  %s19106_s3 = inlined_call_operand.vmem [shape: bf16[2,16,1152], index: 3, kind: output, shape index: {0}]   ;;  %s19107_s4 = inlined_call_operand.vmem [shape: f32[2,1,16,128], index: 4, kind: output, shape index: {1}]  }
   0x1   :  { %19408 = sst [smem:[#allocation17_spill]] %s19103_s0  ;;  %s14942_s17 = smov 0  }
   0x2   :  { %19409 = sst [smem:[#allocation18_spill]] %s19105_s2 }
   0x3   :  { %19410 = sst [smem:[#allocation19_spill]] %s19106_s3 }
   0x4   :  { %19411 = sst [smem:[#allocation20_spill]] %s19107_s4 }
   0x5 LB: > { %19412 = sst [smem:[#allocation3_spill]] %s14810_s16  ;;  %s27_s18 = sadd.s32 1, %s14810_s16  ;;  %s14814_s17 = sphi %s14942_s17, %s15_s17   ;;  %s14810_s16 = sphi %s14940_s16, %s19785_s16   ;;  %s14806_s15 = sphi %s14938_s15, %s19784_s15  }
   0x6   : > { %19413 = sst [smem:[#allocation4_spill]] %s14814_s17  ;;  %p14096_p0 = scmp.ge.s32.totalorder %s14814_s17, 1 }
   0x7   : > { %p29_p1 = scmp.ge.s32.totalorder %s27_s18, 2  ;;  %p196_p2 = scmp.lt.s32.totalorder %s14814_s17, 3 }
   0x9   : > { %s19787_s18 = smov (%p29_p1, %s27_s18), 0  ;;  %p197_p3 = pnand %p14096_p0, %p196_p2 }
   0xa   : > { %19414 = sst [smem:[#allocation5_spill]] %s19787_s18 }
   0xb   : > { %200 = sbr.rel (%p197_p3) target bundleno = 1774 (0x6ee), region = 32 }
  0x12   : > { %p242_p4 = scmp.lt.s32.totalorder %s14806_s15, 1  ;;  %v283_v0 = vlaneseq  ;;  %v14816_v1 = vmov 1935823168   ;;  %s19417_s0 = sld [smem:[#allocation17_spill]]  ;;  %vm429_vm0 = vcmask 1039360   ;;  %vm427_vm1 = vcmask 1043456  }
  0x13   : > { %v281_v2 = vunpack.c.l.s4 %v14816_v1  ;;  %s14817_s23 = smov 126   ;;  %s14818_s24 = smov 127   ;;  %vm528_vm2 = vcmask 1031168   ;;  %vm628_vm3 = vcmask 1022976   ;;  %vm726_vm4 = vcmask 1014784  }
  0x14   : > { %s19789_s15 = smov (!%p242_p4, %s14806_s15), 1  ;;  %v14958_v3 = vshrl.u32 %v283_v0, 7  ;;  %s14819_s25 = smov 125   ;;  %vm825_vm5 = vcmask 949248   ;;  %vm924_vm6 = vcmask 941056   ;;  %vm1024_vm7 = vcmask 932864  }
  0x15   : > { %19415 = sst [smem:[#allocation6_spill]] %s19789_s15  ;;  %v282_v4 = vunpack.c.0.s8 %v281_v2  ;;  %s14370_s19 = smul.u32 18, %s19789_s15  ;;  %vm1122_vm8 = vcmask 924672   ;;  %vm1221_vm9 = vcmask 916480   ;;  %vm1320_vm10 = vcmask 850944  }
  0x16   : > { %19416 = vst [vmem:[#allocation7_spill] sm:$0xff] %v14958_v3  ;;  %s14820_s26 = smov 124   ;;  %s14821_s27 = smov 116   ;;  %vm1420_vm11 = vcmask 842752   ;;  %vm1518_vm12 = vcmask 834560   ;;  %vm1617_vm13 = vcmask 826368  }
  0x17   : > { %v14962_v5 = vsub.s32 %v282_v4, %v14958_v3  ;;  %s14822_s28 = smov 115   ;;  %s14823_s29 = smov 114   ;;  %vm1716_vm14 = vcmask 818176   ;;  %vm1816_vm15 = vcmask 752640  }
  0x18   : > { %s14967_s22 = scalar_lea.vmem %s19417_s0, %s14370_s19  ;;  %s14824_s30 = smov 113  }
  0x19   : > { %v448_v6 = vld [vmem:[%s14967_s22] sm:$0xff]  ;;  %v14971_v7 = vld.sshfl [vmem:[%s14967_s22 + $0x8] sm:$0x5 pattern:$0x73625140]  ;;  %s14825_s5 = smov 112  }
  0x1a   : > { %v466_v8 = vrot.slane %v448_v6, %v14962_v5  ;;  %v452_v9 = vcombine.low %v448_v6, %v448_v6  ;;  %v352_v10 = vcombine.high %v448_v6, %v448_v6  ;;  %v404_v11 = vcombine.low %v14971_v7, %v14971_v7  ;;  %v14495_v17 = vld [vmem:[%s14967_s22 + $0x8] ss:$0 sps:$4 sm:$0x33]   ;;  %v15012_v27 = vld [vmem:[%s14967_s22] sm:$0xff]  ;;  %s14826_s6 = smov 104   ;;  %s14827_s7 = smov 103  }
  0x1b   : > { %v504_v22 = vrot.slane %v14495_v17, %v14962_v5  ;;  %v15016_v28 = vrot.slane %v15012_v27, %v14962_v5  ;;  %v14496_v32 = vld [vmem:[%s14967_s22 + $0x8] ss:$0 sps:$4 sm:$0x33]   ;;  %v279_v33 = vcombine.high %v15012_v27, %v15012_v27  ;;  %v15067_v44 = vrot.slane %v14971_v7, %v14962_v5  ;;  %s14828_s8 = smov 102   ;;  %s14829_s9 = smov 101  }
  0x1c   : > { %v14977_v12 = vrot.slane %v466_v8, %v14962_v5  ;;  %v366_v13 = vrot.slane %v352_v10, %v14962_v5  ;;  %v367_v14 = vcombine.low %v466_v8, %v466_v8  ;;  %v14985_v15 = vrot.slane %v404_v11, %v14962_v5  ;;  %v14100_v41 = vld.sshfl [vmem:[%s14967_s22 + $0x8] sm:$0x1 pattern:$0x73625140]  ;;  %s14830_s10 = smov 100   ;;  %s14831_s11 = smov 92  }
  0x1d   : > { %v459_v16 = vrot.slane %v452_v9, %v14962_v5  ;;  %v468_v19 = vcombine.high %v466_v8, %v466_v8  ;;  %v511_v24 = vrot.slane %v504_v22, %v14962_v5  ;;  %14101 = vst.sshfl [vmem:[#allocation2] sm:$0x5 pattern:$0x75316420] %v15016_v28  ;;  %v15033_v34 = vcombine.high %v15016_v28, %v15016_v28  ;;  %s14832_s12 = smov 91   ;;  %s14833_s13 = smov 90  }
  0x1e   : > { %516 = vrot.lane.b32.xlu1 %v14977_v12, %s14817_s23  ;;  %414 = vrot.lane.b32.xlu0 %v14977_v12, %s14818_s24  ;;  %v14990_v18 = vrot.slane %v366_v13, %v14962_v5  ;;  %v14997_v20 = vrot.slane %v367_v14, %v14962_v5  ;;  %v368_v26 = vcombine.low %v366_v13, %v366_v13  ;;  %v14497_v45 = vld [vmem:[%s14967_s22 + $0x8] ss:$0 sps:$4 sm:$0x33]   ;;  %s14834_s14 = smov 89   ;;  %s14835_s19 = smov 88  }
  0x1f   : > { %v15000_v21 = vrot.slane %v459_v16, %v14962_v5  ;;  %v15004_v23 = vrot.slane %v468_v19, %v14962_v5  ;;  %v467_v25 = vcombine.high %v459_v16, %v459_v16  ;;  %v566_v31 = vcombine.low %v459_v16, %v459_v16  ;;  %14102 = vst.sshfl [vmem:[#allocation2 + $0x8] sm:$0x5 pattern:$0x75316420] %v15033_v34  ;;  %s14836_s20 = smov 80   ;;  %s14837_s21 = smov 79  }
  0x20   : > { %v15025_v30 = vrot.slane %v368_v26, %v14962_v5  ;;  %v15036_v35 = vrot.slane %v279_v33, %v14962_v5  ;;  %v603_v37 = vrot.slane %v14496_v32, %v14962_v5  ;;  %14105 = vst.sshfl [vmem:[#allocation2 + $0x20] sm:$0x1 pattern:$0x75316420] %v14100_v41  ;;  %v667_v42 = vcombine.high %v366_v13, %v366_v13  ;;  %s19440_s0 = smov 14   ;;  %s19442_s18 = smov 13  }
  0x21   : > { %v15022_v29 = vrot.slane %v467_v25, %v14962_v5  ;;  %v15043_v36 = vrot.slane %v566_v31, %v14962_v5  ;;  %v900_v46 = vrot.slane %v14497_v45, %v14962_v5  ;;  %v14498_v48 = vld [vmem:[%s14967_s22 + $0x8] ss:$0 sps:$4 sm:$0x33]   ;;  %s19443_s16 = smov 12   ;;  %s19445_s17 = smov 77  }
  0x22   : > { %420 = vrot.lane.b32.xlu0 %v14985_v15, %s14818_s24  ;;  %418 = vrot.lane.b32.xlu1 %v14990_v18, %s14818_s24  ;;  %14103 = vst.sshfl [vmem:[#allocation2 + $0x10] sm:$0x5 pattern:$0x75316420] %v15036_v35  ;;  %v15050_v38 = vcombine.high %v15036_v35, %v15036_v35  ;;  %v604_v39 = vcombine.low %v603_v37, %v603_v37  ;;  %s19446_s4 = smov 76   ;;  %s19448_s3 = smov 68  }
  0x23   : > { %v15063_v43 = vrot.slane %v667_v42, %v14962_v5  ;;  %v907_v47 = vrot.slane %v900_v46, %v14962_v5  ;;  %v999_v49 = vrot.slane %v14498_v48, %v14962_v5  ;;  %v14499_v52 = vld [vmem:[%s14967_s22 + $0x8] ss:$0 sps:$4 sm:$0x33]   ;;  %s19449_s2 = smov 67   ;;  %s19451_s15 = smov 66  }
  0x24   : > { %14104 = vst.sshfl [vmem:[#allocation2 + $0x18] sm:$0x5 pattern:$0x75316420] %v15050_v38  ;;  %v611_v40 = vrot.slane %v604_v39, %v14962_v5  ;;  %v1296_v53 = vrot.slane %v14499_v52, %v14962_v5 }
  0x25   : > { %v1000_v50 = vcombine.low %v999_v49, %v999_v49  ;;  %v14500_v55 = vld [vmem:[%s14967_s22 + $0x8] ss:$0 sps:$4 sm:$0x33]  }
  0x26   : > { %412 = vrot.lane.b32.xlu0 %v14997_v20, %s14818_s24  ;;  %512 = vrot.lane.b32.xlu1 %v15000_v21, %s14817_s23  ;;  %v1303_v54 = vrot.slane %v1296_v53, %v14962_v5  ;;  %v1395_v56 = vrot.slane %v14500_v55, %v14962_v5  ;;  %v14501_v10 = vld [vmem:[%s14967_s22 + $0x8] ss:$0 sps:$4 sm:$0x33]  }
  0x27   : > { %v1007_v51 = vrot.slane %v1000_v50, %v14962_v5  ;;  %v14502_v46 = vld [vmem:[%s14967_s22 + $0x8] ss:$0 sps:$4 sm:$0x33]  }
  0x28   : > { %v1396_v57 = vcombine.low %v1395_v56, %v1395_v56 }
  0x2a   : > { %518 = vrot.lane.b32.xlu0 %v15004_v23, %s14817_s23  ;;  %520 = vrot.lane.b32.xlu1 %v511_v24, %s14817_s23  ;;  %v1403_v58 = vrot.slane %v1396_v57, %v14962_v5  ;;  %v1692_v24 = vrot.slane %v14501_v10, %v14962_v5 }
  0x2c   : > { %v1699_v45 = vrot.slane %v1692_v24, %v14962_v5 }
  0x2e   : > { %514 = vrot.lane.b32.xlu0 %v15022_v29, %s14817_s23  ;;  %416 = vrot.lane.b32.xlu1 %v15025_v30, %s14818_s24  ;;  %s14838_s23 = smov 78   ;;  %s19161_s24 = smov 77  }
  0x32   : > { %612 = vrot.lane.b32.xlu0 %v15043_v36, %s14819_s25  ;;  %614 = vrot.lane.b32.xlu1 %v15000_v21, %s14819_s25 }
  0x36   : > { %616 = vrot.lane.b32.xlu0 %v14997_v20, %s14819_s25  ;;  %618 = vrot.lane.b32.xlu1 %v14977_v12, %s14819_s25 }
  0x3a   : > { %620 = vrot.lane.b32.xlu0 %v611_v40, %s14819_s25  ;;  %710 = vrot.lane.b32.xlu1 %v14977_v12, %s14820_s26  ;;  %s19247_s25 = smov 76  }
  0x3e   : > { %712 = vrot.lane.b32.xlu0 %v15004_v23, %s14820_s26  ;;  %714 = vrot.lane.b32.xlu1 %v14990_v18, %s14820_s26 }
  0x42   : > { %716 = vrot.lane.b32.xlu0 %v15063_v43, %s14820_s26  ;;  %718 = vrot.lane.b32.xlu1 %v15067_v44, %s14820_s26  ;;  %s14841_s26 = smov 111  }
  0x46   : > { %809 = vrot.lane.b32.xlu0 %v14997_v20, %s14821_s27  ;;  %811 = vrot.lane.b32.xlu1 %v14977_v12, %s14821_s27 }
  0x4a   : > { %813 = vrot.lane.b32.xlu0 %v15025_v30, %s14821_s27  ;;  %815 = vrot.lane.b32.xlu1 %v14990_v18, %s14821_s27 }
  0x4e   : > { %817 = vrot.lane.b32.xlu0 %v14985_v15, %s14821_s27  ;;  %908 = vrot.lane.b32.xlu1 %v15000_v21, %s14822_s28  ;;  %s14842_s27 = smov 110  }
  0x52   : > { %910 = vrot.lane.b32.xlu0 %v15022_v29, %s14822_s28  ;;  %912 = vrot.lane.b32.xlu1 %v14977_v12, %s14822_s28 }
  0x56   : > { %914 = vrot.lane.b32.xlu0 %v15004_v23, %s14822_s28  ;;  %916 = vrot.lane.b32.xlu1 %v907_v47, %s14822_s28  ;;  %s14843_s28 = smov 109  }
  0x5a   : > { %1008 = vrot.lane.b32.xlu0 %v15043_v36, %s14823_s29  ;;  %1010 = vrot.lane.b32.xlu1 %v15000_v21, %s14823_s29 }
  0x5e   : > { %1012 = vrot.lane.b32.xlu0 %v14997_v20, %s14823_s29  ;;  %1014 = vrot.lane.b32.xlu1 %v14977_v12, %s14823_s29 }
  0x62   : > { %1016 = vrot.lane.b32.xlu0 %v1007_v51, %s14823_s29  ;;  %1106 = vrot.lane.b32.xlu1 %v14977_v12, %s14824_s30  ;;  %s14844_s29 = smov 108  }
  0x66   : > { %1108 = vrot.lane.b32.xlu0 %v15004_v23, %s14824_s30  ;;  %1110 = vrot.lane.b32.xlu1 %v14990_v18, %s14824_s30 }
  0x6a   : > { %1112 = vrot.lane.b32.xlu0 %v15063_v43, %s14824_s30  ;;  %1114 = vrot.lane.b32.xlu1 %v15067_v44, %s14824_s30  ;;  %s14845_s30 = smov 99  }
  0x6e   : > { %1205 = vrot.lane.b32.xlu0 %v14997_v20, %s14825_s5  ;;  %1207 = vrot.lane.b32.xlu1 %v14977_v12, %s14825_s5 }
  0x72   : > { %1209 = vrot.lane.b32.xlu0 %v15025_v30, %s14825_s5  ;;  %1211 = vrot.lane.b32.xlu1 %v14990_v18, %s14825_s5 }
  0x76   : > { %1213 = vrot.lane.b32.xlu0 %v14985_v15, %s14825_s5  ;;  %1304 = vrot.lane.b32.xlu1 %v15000_v21, %s14826_s6 }
  0x7a   : > { %1306 = vrot.lane.b32.xlu0 %v15022_v29, %s14826_s6  ;;  %1308 = vrot.lane.b32.xlu1 %v14977_v12, %s14826_s6 }
  0x7e   : > { %1310 = vrot.lane.b32.xlu0 %v15004_v23, %s14826_s6  ;;  %1312 = vrot.lane.b32.xlu1 %v1303_v54, %s14826_s6  ;;  %s14847_s6 = smov 97  }
  0x82   : > { %1404 = vrot.lane.b32.xlu0 %v15043_v36, %s14827_s7  ;;  %1406 = vrot.lane.b32.xlu1 %v15000_v21, %s14827_s7 }
  0x86   : > { %1408 = vrot.lane.b32.xlu0 %v14997_v20, %s14827_s7  ;;  %1410 = vrot.lane.b32.xlu1 %v14977_v12, %s14827_s7 }
  0x8a   : > { %1412 = vrot.lane.b32.xlu0 %v1403_v58, %s14827_s7  ;;  %1502 = vrot.lane.b32.xlu1 %v14977_v12, %s14828_s8  ;;  %s14848_s7 = smov 96  }
  0x8e   : > { %1504 = vrot.lane.b32.xlu0 %v15004_v23, %s14828_s8  ;;  %1506 = vrot.lane.b32.xlu1 %v14990_v18, %s14828_s8 }
  0x90   : > { %v517_v59 = vpop.permute.xlu1 %516  ;;  %v415_v60 = vpop.permute.xlu0 %414 }
  0x91   : > { %v423_v8 = vrot.slane %v415_v60, 4  ;;  %v524_v17 = vrot.slane %v517_v59, 4 }
  0x92   : > { %1508 = vrot.lane.b32.xlu0 %v15063_v43, %s14828_s8  ;;  %1510 = vrot.lane.b32.xlu1 %v15067_v44, %s14828_s8  ;;  %s14849_s8 = smov 87  }
  0x94   : > { %v421_v61 = vpop.permute.xlu0 %420  ;;  %v419_v62 = vpop.permute.xlu1 %418 }
  0x95   : > { %v426_v63 = vrot.slane %v421_v61, 4  ;;  %v425_v0 = vrot.slane %v419_v62, 4 }
  0x96   : > { %1601 = vrot.lane.b32.xlu0 %v14997_v20, %s14829_s9  ;;  %1603 = vrot.lane.b32.xlu1 %v14977_v12, %s14829_s9 }
  0x97   : > { %v437_v1 = vsel %vm429_vm0, %v421_v61, %v426_v63  ;;  %v435_v2 = vsel %vm427_vm1, %v425_v0, %v426_v63 }
  0x98   : > { %447 = vst [vmem:[#allocation2 + $0x20] sm:$0x2] %v437_v1  ;;  %v436_v4 = vsel %vm429_vm0, %v419_v62, %v435_v2  ;;  %v413_v6 = vpop.permute.xlu0 %412  ;;  %v513_v7 = vpop.permute.xlu1 %512 }
  0x99   : > { %446 = vst [vmem:[#allocation2 + $0x18] sm:$0x22] %v436_v4  ;;  %v422_v9 = vrot.slane %v413_v6, 4  ;;  %v522_v40 = vrot.slane %v513_v7, 4 }
  0x9a   : > { %1605 = vrot.lane.b32.xlu0 %v15025_v30, %s14829_s9  ;;  %1607 = vrot.lane.b32.xlu1 %v14990_v18, %s14829_s9 }
  0x9b   : > { %v428_v11 = vsel %vm427_vm1, %v422_v9, %v423_v8 }
  0x9c   : > { %v430_v13 = vsel %vm429_vm0, %v413_v6, %v428_v11  ;;  %v519_v14 = vpop.permute.xlu0 %518  ;;  %v521_v16 = vpop.permute.xlu1 %520 }
  0x9d   : > { %443 = vst [vmem:[#allocation2] sm:$0x22] %v430_v13  ;;  %v525_v19 = vrot.slane %v519_v14, 4  ;;  %v526_v22 = vrot.slane %v521_v16, 4 }
  0x9e   : > { %1609 = vrot.lane.b32.xlu0 %v14985_v15, %s14829_s9  ;;  %1700 = vrot.lane.b32.xlu1 %v15000_v21, %s14830_s10  ;;  %s14850_s9 = smov 86  }
  0x9f   : > { %v532_v25 = vsel %vm427_vm1, %v524_v17, %v525_v19  ;;  %v534_v26 = vsel %vm427_vm1, %v525_v19, %v526_v22  ;;  %v536_v31 = vsel %vm528_vm2, %v521_v16, %v526_v22 }
  0xa0   : > { %v533_v32 = vsel %vm528_vm2, %v517_v59, %v532_v25  ;;  %v535_v33 = vsel %vm528_vm2, %v519_v14, %v534_v26  ;;  %546 = vst [vmem:[#allocation2 + $0x20] sm:$0x4] %v536_v31  ;;  %v515_v37 = vpop.permute.xlu0 %514  ;;  %v417_v39 = vpop.permute.xlu1 %416  ;;  %v1791_v59 = vrot.slane %v14502_v46, %v14962_v5 }
  0xa1   : > { %544 = vst [vmem:[#allocation2 + $0x10] sm:$0x44] %v533_v32  ;;  %545 = vst [vmem:[#allocation2 + $0x18] sm:$0x44] %v535_v33  ;;  %v523_v41 = vrot.slane %v515_v37, 4  ;;  %v424_v42 = vrot.slane %v417_v39, 4 }
  0xa2   : > { %1702 = vrot.lane.b32.xlu0 %v15022_v29, %s14830_s10  ;;  %1704 = vrot.lane.b32.xlu1 %v14977_v12, %s14830_s10  ;;  %v1792_v2 = vcombine.low %v1791_v59, %v1791_v59 }
  0xa3   : > { %v527_v47 = vsel %vm427_vm1, %v522_v40, %v523_v41  ;;  %v530_v48 = vsel %vm427_vm1, %v523_v41, %v524_v17  ;;  %v431_v49 = vsel %vm427_vm1, %v423_v8, %v424_v42  ;;  %v433_v50 = vsel %vm427_vm1, %v424_v42, %v425_v0 }
  0xa4   : > { %v529_v51 = vsel %vm528_vm2, %v513_v7, %v527_v47  ;;  %v531_v52 = vsel %vm528_vm2, %v515_v37, %v530_v48  ;;  %v432_v53 = vsel %vm429_vm0, %v415_v60, %v431_v49  ;;  %v434_v54 = vsel %vm429_vm0, %v417_v39, %v433_v50  ;;  %v613_v55 = vpop.permute.xlu0 %612  ;;  %v615_v56 = vpop.permute.xlu1 %614 }
  0xa5   : > { %542 = vst [vmem:[#allocation2] sm:$0x44] %v529_v51  ;;  %543 = vst [vmem:[#allocation2 + $0x8] sm:$0x44] %v531_v52  ;;  %v622_v57 = vrot.slane %v613_v55, 4  ;;  %v623_v58 = vrot.slane %v615_v56, 4 }
  0xa6   : > { %444 = vst [vmem:[#allocation2 + $0x8] sm:$0x22] %v432_v53  ;;  %445 = vst [vmem:[#allocation2 + $0x10] sm:$0x22] %v434_v54  ;;  %1706 = vrot.lane.b32.xlu0 %v15004_v23, %s14830_s10  ;;  %1708 = vrot.lane.b32.xlu1 %v1699_v45, %s14830_s10  ;;  %vm1914_vm0 = vcmask 744448   ;;  %vm2013_vm2 = vcmask 736256  }
  0xa7   : > { %v627_v60 = vsel %vm427_vm1, %v622_v57, %v623_v58 }
  0xa8   : > { %v617_v61 = vpop.permute.xlu0 %616  ;;  %v619_v62 = vpop.permute.xlu1 %618  ;;  %v629_v63 = vsel %vm628_vm3, %v613_v55, %v627_v60 }
  0xa9   : > { %v624_v0 = vrot.slane %v617_v61, 4  ;;  %v625_v1 = vrot.slane %v619_v62, 4  ;;  %642 = vst [vmem:[#allocation2] sm:$0x88] %v629_v63 }
  0xaa   : > { %1800 = vrot.lane.b32.xlu0 %v15043_v36, %s14831_s11  ;;  %1802 = vrot.lane.b32.xlu1 %v15000_v21, %s14831_s11  ;;  %v1799_v36 = vrot.slane %v1792_v2, %v14962_v5 }
  0xab   : > { %v630_v4 = vsel %vm427_vm1, %v623_v58, %v624_v0  ;;  %v632_v6 = vsel %vm427_vm1, %v624_v0, %v625_v1  ;;  %v2135_v0 = vcombine.low %v15012_v27, %v15012_v27 }
  0xac   : > { %v621_v7 = vpop.permute.xlu0 %620  ;;  %v631_v8 = vsel %vm628_vm3, %v615_v56, %v630_v4  ;;  %v633_v9 = vsel %vm628_vm3, %v617_v61, %v632_v6  ;;  %v711_v10 = vpop.permute.xlu1 %710 }
  0xad   : > { %v626_v11 = vrot.slane %v621_v7, 4  ;;  %643 = vst [vmem:[#allocation2 + $0x8] sm:$0x88] %v631_v8  ;;  %644 = vst [vmem:[#allocation2 + $0x10] sm:$0x88] %v633_v9  ;;  %v720_v22 = vrot.slane %v711_v10, 4  ;;  %v15211_v27 = vrot.slane %v2135_v0, %v14962_v5 }
  0xae   : > { %1804 = vrot.lane.b32.xlu0 %v14997_v20, %s14831_s11  ;;  %1806 = vrot.lane.b32.xlu1 %v14977_v12, %s14831_s11 }
  0xaf   : > { %v634_v13 = vsel %vm427_vm1, %v625_v1, %v626_v11  ;;  %v636_v14 = vsel %vm628_vm3, %v621_v7, %v626_v11 }
  0xb0   : > { %v635_v16 = vsel %vm628_vm3, %v619_v62, %v634_v13  ;;  %646 = vst [vmem:[#allocation2 + $0x20] sm:$0x8] %v636_v14  ;;  %v713_v17 = vpop.permute.xlu0 %712  ;;  %v715_v19 = vpop.permute.xlu1 %714  ;;  %vm2112_vm3 = vcmask 728064  }
  0xb1   : > { %645 = vst [vmem:[#allocation2 + $0x18] sm:$0x88] %v635_v16  ;;  %v721_v24 = vrot.slane %v713_v17, 4  ;;  %v722_v25 = vrot.slane %v715_v19, 4 }
  0xb2   : > { %1808 = vrot.lane.b32.xlu0 %v1799_v36, %s14831_s11  ;;  %1898 = vrot.lane.b32.xlu1 %v14977_v12, %s14832_s12 }
  0xb3   : > { %v725_v26 = vsel %vm427_vm1, %v720_v22, %v721_v24  ;;  %v728_v31 = vsel %vm427_vm1, %v721_v24, %v722_v25  ;;  %v14505_v22 = vld [vmem:[%s14967_s22 + $0x8] ss:$0 sps:$4 sm:$0x33]  }
  0xb4   : > { %v717_v32 = vpop.permute.xlu0 %716  ;;  %v727_v33 = vsel %vm726_vm4, %v711_v10, %v725_v26  ;;  %v729_v37 = vsel %vm726_vm4, %v713_v17, %v728_v31  ;;  %v719_v39 = vpop.permute.xlu1 %718 }
  0xb5   : > { %v723_v40 = vrot.slane %v717_v32, 4  ;;  %740 = vst [vmem:[#allocation2 + $0x24] sm:$0x11] %v727_v33  ;;  %741 = vst [vmem:[#allocation2 + $0x2c] sm:$0x11] %v729_v37  ;;  %v724_v41 = vrot.slane %v719_v39, 4 }
  0xb6   : > { %1900 = vrot.lane.b32.xlu0 %v15004_v23, %s14832_s12  ;;  %1902 = vrot.lane.b32.xlu1 %v14990_v18, %s14832_s12 }
  0xb7   : > { %v730_v42 = vsel %vm427_vm1, %v722_v25, %v723_v40  ;;  %v732_v45 = vsel %vm427_vm1, %v723_v40, %v724_v41  ;;  %v734_v46 = vsel %vm726_vm4, %v719_v39, %v724_v41  ;;  %v15242_v40 = vrot.slane %v15211_v27, %v14962_v5 }
  0xb8   : > { %v731_v47 = vsel %vm726_vm4, %v715_v19, %v730_v42  ;;  %v733_v48 = vsel %vm726_vm4, %v717_v32, %v732_v45  ;;  %744 = vst [vmem:[#allocation2 + $0x44] sm:$0x1] %v734_v46  ;;  %v810_v49 = vpop.permute.xlu0 %809  ;;  %v812_v50 = vpop.permute.xlu1 %811  ;;  %v2151_v41 = vcombine.low %v15016_v28, %v15016_v28  ;;  %v2187_v42 = vrot.slane %v14505_v22, %v14962_v5 }
  0xb9   : > { %742 = vst [vmem:[#allocation2 + $0x34] sm:$0x11] %v731_v47  ;;  %743 = vst [vmem:[#allocation2 + $0x3c] sm:$0x11] %v733_v48  ;;  %v819_v51 = vrot.slane %v810_v49, 4  ;;  %v820_v52 = vrot.slane %v812_v50, 4 }
  0xba   : > { %1904 = vrot.lane.b32.xlu0 %v15063_v43, %s14832_s12  ;;  %1906 = vrot.lane.b32.xlu1 %v15067_v44, %s14832_s12  ;;  %vm2212_vm4 = vcmask 719872   ;;  %s14852_s12 = smov 84  }
  0xbb   : > { %v824_v53 = vsel %vm427_vm1, %v819_v51, %v820_v52  ;;  %v15258_v51 = vrot.slane %v15016_v28, %v14962_v5 }
  0xbc   : > { %v814_v54 = vpop.permute.xlu0 %813  ;;  %v816_v55 = vpop.permute.xlu1 %815  ;;  %v826_v56 = vsel %vm825_vm5, %v810_v49, %v824_v53 }
  0xbd   : > { %v821_v57 = vrot.slane %v814_v54, 4  ;;  %v822_v58 = vrot.slane %v816_v55, 4  ;;  %839 = vst [vmem:[#allocation2 + $0x24] sm:$0x22] %v826_v56 }
  0xbe   : > { %1997 = vrot.lane.b32.xlu0 %v14997_v20, %s14833_s13  ;;  %1999 = vrot.lane.b32.xlu1 %v14977_v12, %s14833_s13  ;;  %v14503_v20 = vld [vmem:[%s14967_s22 + $0x8] ss:$0 sps:$4 sm:$0x33]  }
  0xbf   : > { %v827_v59 = vsel %vm427_vm1, %v820_v52, %v821_v57  ;;  %v829_v43 = vsel %vm427_vm1, %v821_v57, %v822_v58  ;;  %v2188_v52 = vcombine.low %v2187_v42, %v2187_v42 }
  0xc0   : > { %v818_v44 = vpop.permute.xlu0 %817  ;;  %v828_v60 = vsel %vm825_vm5, %v812_v50, %v827_v59  ;;  %v830_v61 = vsel %vm825_vm5, %v814_v54, %v829_v43  ;;  %v909_v62 = vpop.permute.xlu1 %908 }
  0xc1   : > { %v823_v63 = vrot.slane %v818_v44, 4  ;;  %840 = vst [vmem:[#allocation2 + $0x2c] sm:$0x22] %v828_v60  ;;  %841 = vst [vmem:[#allocation2 + $0x34] sm:$0x22] %v830_v61  ;;  %v918_v8 = vrot.slane %v909_v62, 4  ;;  %v2195_v28 = vrot.slane %v2188_v52, %v14962_v5 }
  0xc2   : > { %2001 = vrot.lane.b32.xlu0 %v15025_v30, %s14833_s13  ;;  %2003 = vrot.lane.b32.xlu1 %v14990_v18, %s14833_s13  ;;  %v2088_v18 = vrot.slane %v14503_v20, %v14962_v5 }
  0xc3   : > { %v831_v1 = vsel %vm427_vm1, %v822_v58, %v823_v63  ;;  %v833_v2 = vsel %vm825_vm5, %v818_v44, %v823_v63 }
  0xc4   : > { %v832_v4 = vsel %vm825_vm5, %v816_v55, %v831_v1  ;;  %843 = vst [vmem:[#allocation2 + $0x44] sm:$0x2] %v833_v2  ;;  %v911_v6 = vpop.permute.xlu0 %910  ;;  %v913_v7 = vpop.permute.xlu1 %912  ;;  %v2095_v19 = vrot.slane %v2088_v18, %v14962_v5  ;;  %vm2310_vm5 = vcmask 654336  }
  0xc5   : > { %842 = vst [vmem:[#allocation2 + $0x3c] sm:$0x22] %v832_v4  ;;  %v919_v9 = vrot.slane %v911_v6, 4  ;;  %v920_v10 = vrot.slane %v913_v7, 4  ;;  %v15277_v4 = vrot.slane %v15033_v34, %v14962_v5 }
  0xc6   : > { %2005 = vrot.lane.b32.xlu0 %v14985_v15, %s14833_s13  ;;  %2096 = vrot.lane.b32.xlu1 %v15000_v21, %s14834_s14  ;;  %v2150_v21 = vcombine.low %v15211_v27, %v15211_v27  ;;  %s14853_s13 = smov 75  }
  0xc7   : > { %v923_v30 = vsel %vm427_vm1, %v918_v8, %v919_v9  ;;  %v926_v11 = vsel %vm427_vm1, %v919_v9, %v920_v10  ;;  %v14115_v9 = vld.sshfl [vmem:[%s14967_s22 + $0x8] sm:$0x5 pattern:$0x73625140] }
  0xc8   : > { %v915_v36 = vpop.permute.xlu0 %914  ;;  %v925_v13 = vsel %vm924_vm6, %v909_v62, %v923_v30  ;;  %v927_v14 = vsel %vm924_vm6, %v911_v6, %v926_v11  ;;  %v917_v16 = vpop.permute.xlu1 %916  ;;  %v15235_v39 = vrot.slane %v2150_v21, %v14962_v5  ;;  %v15281_v6 = vrot.slane %v15036_v35, %v14962_v5 }
  0xc9   : > { %v921_v17 = vrot.slane %v915_v36, 4  ;;  %938 = vst [vmem:[#allocation2 + $0x24] sm:$0x44] %v925_v13  ;;  %939 = vst [vmem:[#allocation2 + $0x2c] sm:$0x44] %v927_v14  ;;  %v922_v15 = vrot.slane %v917_v16, 4 }
  0xca   : > { %2098 = vrot.lane.b32.xlu0 %v15022_v29, %s14834_s14  ;;  %2100 = vrot.lane.b32.xlu1 %v14977_v12, %s14834_s14 }
  0xcb   : > { %v928_v24 = vsel %vm427_vm1, %v920_v10, %v921_v17  ;;  %v930_v25 = vsel %vm427_vm1, %v921_v17, %v922_v15  ;;  %v932_v26 = vsel %vm924_vm6, %v917_v16, %v922_v15  ;;  %v15294_v16 = vrot.slane %v15050_v38, %v14962_v5 }
  0xcc   : > { %v929_v31 = vsel %vm924_vm6, %v913_v7, %v928_v24  ;;  %v931_v32 = vsel %vm924_vm6, %v915_v36, %v930_v25  ;;  %942 = vst [vmem:[#allocation2 + $0x44] sm:$0x4] %v932_v26  ;;  %v1009_v33 = vpop.permute.xlu0 %1008  ;;  %v1011_v37 = vpop.permute.xlu1 %1010  ;;  %v15297_v17 = vrot.slane %v14115_v9, %v14962_v5  ;;  %vm2409_vm6 = vcmask 646144  }
  0xcd   : > { %940 = vst [vmem:[#allocation2 + $0x34] sm:$0x44] %v929_v31  ;;  %941 = vst [vmem:[#allocation2 + $0x3c] sm:$0x44] %v931_v32  ;;  %v1018_v29 = vrot.slane %v1009_v33, 4  ;;  %v1019_v12 = vrot.slane %v1011_v37, 4  ;;  %v2349_v32 = vcombine.low %v15036_v35, %v15036_v35  ;;  %v2385_v35 = vcombine.low %v14115_v9, %v14115_v9 }
  0xce   : > { %2102 = vrot.lane.b32.xlu0 %v15004_v23, %s14834_s14  ;;  %2104 = vrot.lane.b32.xlu1 %v2095_v19, %s14834_s14  ;;  %v15254_v23 = vrot.slane %v2151_v41, %v14962_v5  ;;  %s14854_s14 = smov 74  }
  0xcf   : > { %v1023_v45 = vsel %vm427_vm1, %v1018_v29, %v1019_v12 }
  0xd0   : > { %v1013_v46 = vpop.permute.xlu0 %1012  ;;  %v1015_v47 = vpop.permute.xlu1 %1014  ;;  %v1025_v48 = vsel %vm1024_vm7, %v1009_v33, %v1023_v45  ;;  %v2370_v45 = vrot.slane %v2349_v32, %v14962_v5 }
  0xd1   : > { %v1020_v49 = vrot.slane %v1013_v46, 4  ;;  %v1021_v50 = vrot.slane %v1015_v47, 4  ;;  %1038 = vst [vmem:[#allocation2 + $0x24] sm:$0x88] %v1025_v48 }
  0xd2   : > { %2196 = vrot.lane.b32.xlu0 %v15235_v39, %s14835_s19  ;;  %2198 = vrot.lane.b32.xlu1 %v15242_v40, %s14835_s19 }
  0xd3   : > { %v1026_v53 = vsel %vm427_vm1, %v1019_v12, %v1020_v49  ;;  %v1028_v54 = vsel %vm427_vm1, %v1020_v49, %v1021_v50 }
  0xd4   : > { %v1017_v55 = vpop.permute.xlu0 %1016  ;;  %v1027_v56 = vsel %vm1024_vm7, %v1011_v37, %v1026_v53  ;;  %v1029_v57 = vsel %vm1024_vm7, %v1013_v46, %v1028_v54  ;;  %v1107_v58 = vpop.permute.xlu1 %1106  ;;  %v2392_v54 = vrot.slane %v2385_v35, %v14962_v5 }
  0xd5   : > { %v1022_v59 = vrot.slane %v1017_v55, 4  ;;  %1039 = vst [vmem:[#allocation2 + $0x2c] sm:$0x88] %v1027_v56  ;;  %1040 = vst [vmem:[#allocation2 + $0x34] sm:$0x88] %v1029_v57  ;;  %v1116_v20 = vrot.slane %v1107_v58, 4 }
  0xd6   : > { %2200 = vrot.lane.b32.xlu0 %v15254_v23, %s14835_s19  ;;  %2202 = vrot.lane.b32.xlu1 %v15258_v51, %s14835_s19  ;;  %v14513_v56 = vld [vmem:[%s14967_s22 + $0x8] ss:$0 sps:$4 sm:$0x33]  }
  0xd7   : > { %v1030_v43 = vsel %vm427_vm1, %v1021_v50, %v1022_v59  ;;  %v1032_v44 = vsel %vm1024_vm7, %v1017_v55, %v1022_v59  ;;  %v2447_v55 = vcombine.high %v15211_v27, %v15211_v27 }
  0xd8   : > { %v1031_v60 = vsel %vm1024_vm7, %v1015_v47, %v1030_v43  ;;  %1042 = vst [vmem:[#allocation2 + $0x44] sm:$0x8] %v1032_v44  ;;  %v1109_v61 = vpop.permute.xlu0 %1108  ;;  %v1111_v62 = vpop.permute.xlu1 %1110  ;;  %v14507_v63 = vld [vmem:[#allocation2 + $0x4] ss:$36 sps:$4 sm:$0xff]   ;;  %vm2508_vm7 = vcmask 637952  }
  0xd9   : > { %v14509_v0 = vld [vmem:[#allocation2] ss:$36 sps:$4 sm:$0xff]   ;;  %1041 = vst [vmem:[#allocation2 + $0x3c] sm:$0x88] %v1031_v60  ;;  %v1117_v1 = vrot.slane %v1109_v61, 4  ;;  %v1118_v2 = vrot.slane %v1111_v62, 4  ;;  %13527 = vmatprep.subr.bf16.mxu0 %v14507_v63  ;;  %v2462_v27 = vrot.slane %v2447_v55, %v14962_v5 }
  0xda   : > { %2204 = vrot.lane.b32.xlu0 %v2195_v28, %s14835_s19  ;;  %2294 = vrot.lane.b32.xlu1 %v15258_v51, %s14836_s20 }
  0xdb   : > { %v1121_v7 = vsel %vm427_vm1, %v1116_v20, %v1117_v1  ;;  %v1124_v8 = vsel %vm427_vm1, %v1117_v1, %v1118_v2  ;;  %13528 = vmatpush1.bf16.msra.mxu0 %v14509_v0 }
  0xdc   : > { %v1113_v10 = vpop.permute.xlu0 %1112  ;;  %v1123_v18 = vsel %vm1122_vm8, %v1107_v58, %v1121_v7  ;;  %v1125_v30 = vsel %vm1122_vm8, %v1109_v61, %v1124_v8  ;;  %v1115_v11 = vpop.permute.xlu1 %1114  ;;  %v14510_v36 = vld [vmem:[#allocation2 + $0xc] ss:$36 sps:$4 sm:$0xff]  }
  0xdd   : > { %v14512_v34 = vld [vmem:[#allocation2 + $0x8] ss:$36 sps:$4 sm:$0xff]   ;;  %v1119_v13 = vrot.slane %v1113_v10, 4  ;;  %1136 = vst [vmem:[#allocation2 + $0x48] sm:$0x11] %v1123_v18  ;;  %v1120_v14 = vrot.slane %v1115_v11, 4  ;;  %13570 = vmatprep.subr.bf16.mxu1 %v14510_v36 }
  0xde   : > { %1137 = vst [vmem:[#allocation2 + $0x50] sm:$0x11] %v1125_v30  ;;  %2296 = vrot.lane.b32.xlu0 %v15277_v4, %s14836_s20  ;;  %2298 = vrot.lane.b32.xlu1 %v15281_v6, %s14836_s20  ;;  %v14514_v18 = vld [vmem:[%s14967_s22 + $0x8] ss:$0 sps:$4 sm:$0x33]  }
  0xdf   : > { %v1126_v15 = vsel %vm427_vm1, %v1118_v2, %v1119_v13  ;;  %v1128_v21 = vsel %vm427_vm1, %v1119_v13, %v1120_v14  ;;  %v1130_v19 = vsel %vm1122_vm8, %v1115_v11, %v1120_v14  ;;  %13571 = vmatpush1.bf16.msra.mxu1 %v14512_v34 }
  0xe0   : > { %v1127_v22 = vsel %vm1122_vm8, %v1111_v62, %v1126_v15  ;;  %v1129_v24 = vsel %vm1122_vm8, %v1113_v10, %v1128_v21  ;;  %1140 = vst [vmem:[#allocation2 + $0x68] sm:$0x1] %v1130_v19  ;;  %v1206_v25 = vpop.permute.xlu0 %1205  ;;  %v1208_v26 = vpop.permute.xlu1 %1207  ;;  %v2484_v62 = vrot.slane %v14513_v56, %v14962_v5  ;;  %vm2608_vm8 = vcmask 629760  }
  0xe1   : > { %1138 = vst [vmem:[#allocation2 + $0x58] sm:$0x11] %v1127_v22  ;;  %1139 = vst [vmem:[#allocation2 + $0x60] sm:$0x11] %v1129_v24  ;;  %v1215_v38 = vrot.slane %v1206_v25, 4  ;;  %v1216_v31 = vrot.slane %v1208_v26, 4  ;;  %v2583_v22 = vrot.slane %v14514_v18, %v14962_v5 }
  0xe2   : > { %2300 = vrot.lane.b32.xlu0 %v15294_v16, %s14836_s20  ;;  %2302 = vrot.lane.b32.xlu1 %v15297_v17, %s14836_s20  ;;  %v2491_v10 = vrot.slane %v2484_v62, %v14962_v5 }
  0xe3   : > { %v1220_v33 = vsel %vm427_vm1, %v1215_v38, %v1216_v31 }
  0xe4   : > { %v1222_v37 = vsel %vm1221_vm9, %v1206_v25, %v1220_v33  ;;  %v1210_v29 = vpop.permute.xlu0 %1209  ;;  %v1212_v12 = vpop.permute.xlu1 %1211  ;;  %v2584_v33 = vcombine.low %v2583_v22, %v2583_v22 }
  0xe5   : > { %1235 = vst [vmem:[#allocation2 + $0x48] sm:$0x22] %v1222_v37  ;;  %v1217_v41 = vrot.slane %v1210_v29, 4  ;;  %v1218_v42 = vrot.slane %v1212_v12, 4 }
  0xe6   : > { %2393 = vrot.lane.b32.xlu0 %v15254_v23, %s14837_s21  ;;  %2395 = vrot.lane.b32.xlu1 %v15258_v51, %s14837_s21 }
  0xe7   : > { %v1223_v46 = vsel %vm427_vm1, %v1216_v31, %v1217_v41  ;;  %v1225_v47 = vsel %vm427_vm1, %v1217_v41, %v1218_v42 }
  0xe8   : > { %v1224_v48 = vsel %vm1221_vm9, %v1208_v26, %v1223_v46  ;;  %v1226_v49 = vsel %vm1221_vm9, %v1210_v29, %v1225_v47  ;;  %v1214_v50 = vpop.permute.xlu0 %1213  ;;  %v1305_v52 = vpop.permute.xlu1 %1304  ;;  %v2725_v47 = vld [vmem:[%s14967_s22 + $0x1] sm:$0xff] }
  0xe9   : > { %1236 = vst [vmem:[#allocation2 + $0x50] sm:$0x22] %v1224_v48  ;;  %1237 = vst [vmem:[#allocation2 + $0x58] sm:$0x22] %v1226_v49  ;;  %v1219_v53 = vrot.slane %v1214_v50, 4  ;;  %v1314_v44 = vrot.slane %v1305_v52, 4  ;;  %v15377_v55 = vrot.slane %v2725_v47, %v14962_v5 }
  0xea   : > { %2397 = vrot.lane.b32.xlu0 %v2370_v45, %s14837_s21  ;;  %2399 = vrot.lane.b32.xlu1 %v15281_v6, %s14837_s21 }
  0xeb   : > { %v1227_v57 = vsel %vm427_vm1, %v1218_v42, %v1219_v53  ;;  %v1229_v58 = vsel %vm1221_vm9, %v1214_v50, %v1219_v53 }
  0xec   : > { %v1228_v59 = vsel %vm1221_vm9, %v1212_v12, %v1227_v57  ;;  %1239 = vst [vmem:[#allocation2 + $0x68] sm:$0x2] %v1229_v58  ;;  %v1307_v28 = vpop.permute.xlu0 %1306  ;;  %v1309_v43 = vpop.permute.xlu1 %1308 }
  0xed   : > { %1238 = vst [vmem:[#allocation2 + $0x60] sm:$0x22] %v1228_v59  ;;  %v1315_v60 = vrot.slane %v1307_v28, 4  ;;  %v1316_v61 = vrot.slane %v1309_v43, 4 }
  0xee   : > { %2401 = vrot.lane.b32.xlu0 %v2392_v54, %s14837_s21  ;;  %2492 = vrot.lane.b32.xlu1 %v15242_v40, %s14838_s23  ;;  %v2729_v54 = vcombine.high %v2725_v47, %v2725_v47 }
  0xef   : > { %v1319_v63 = vsel %vm427_vm1, %v1314_v44, %v1315_v60  ;;  %v1322_v0 = vsel %vm427_vm1, %v1315_v60, %v1316_v61 }
  0xf0   : > { %v1311_v20 = vpop.permute.xlu0 %1310  ;;  %v1321_v1 = vsel %vm1320_vm10, %v1305_v52, %v1319_v63  ;;  %v1323_v2 = vsel %vm1320_vm10, %v1307_v28, %v1322_v0  ;;  %v1313_v7 = vpop.permute.xlu1 %1312 }
  0xf1   : > { %v1317_v8 = vrot.slane %v1311_v20, 4  ;;  %1334 = vst [vmem:[#allocation2 + $0x48] sm:$0x44] %v1321_v1  ;;  %1335 = vst [vmem:[#allocation2 + $0x50] sm:$0x44] %v1323_v2  ;;  %v1318_v9 = vrot.slane %v1313_v7, 4 }
  0xf2   : > { %2494 = vrot.lane.b32.xlu0 %v2462_v27, %s14838_s23  ;;  %2496 = vrot.lane.b32.xlu1 %v15258_v51, %s14838_s23 }
  0xf3   : > { %v1324_v30 = vsel %vm427_vm1, %v1316_v61, %v1317_v8  ;;  %v1326_v11 = vsel %vm427_vm1, %v1317_v8, %v1318_v9  ;;  %v1328_v36 = vsel %vm1320_vm10, %v1313_v7, %v1318_v9  ;;  %v15384_v61 = vrot.slane %v2729_v54, %v14962_v5 }
  0xf4   : > { %v1325_v34 = vsel %vm1320_vm10, %v1309_v43, %v1324_v30  ;;  %v1327_v13 = vsel %vm1320_vm10, %v1311_v20, %v1326_v11  ;;  %1338 = vst [vmem:[#allocation2 + $0x68] sm:$0x4] %v1328_v36  ;;  %v1405_v14 = vpop.permute.xlu0 %1404  ;;  %v1407_v15 = vpop.permute.xlu1 %1406  ;;  %v15408_v9 = vrot.slane %v15377_v55, %v14962_v5  ;;  %v15412_v30 = vld.sshfl [vmem:[%s14967_s22 + $0x9] sm:$0x5 pattern:$0x73625140] }
  0xf5   : > { %1336 = vst [vmem:[#allocation2 + $0x58] sm:$0x44] %v1325_v34  ;;  %1337 = vst [vmem:[#allocation2 + $0x60] sm:$0x44] %v1327_v13  ;;  %v1414_v21 = vrot.slane %v1405_v14, 4  ;;  %v1415_v19 = vrot.slane %v1407_v15, 4  ;;  %v2745_v7 = vcombine.low %v15384_v61, %v15384_v61 }
  0xf6   : > { %2498 = vrot.lane.b32.xlu0 %v15277_v4, %s14838_s23  ;;  %2500 = vrot.lane.b32.xlu1 %v2491_v10, %s14838_s23  ;;  %v2827_v10 = vcombine.low %v2725_v47, %v2725_v47  ;;  %vm19297_vm10 = vcmask 621568  }
  0xf7   : > { %v1419_v24 = vsel %vm427_vm1, %v1414_v21, %v1415_v19 }
  0xf8   : > { %v1409_v25 = vpop.permute.xlu0 %1408  ;;  %v1411_v26 = vpop.permute.xlu1 %1410  ;;  %v1421_v38 = vsel %vm1420_vm11, %v1405_v14, %v1419_v24  ;;  %v15424_v14 = vrot.slane %v15384_v61, %v14962_v5  ;;  %v15429_v21 = vrot.slane %v2827_v10, %v14962_v5 }
  0xf9   : > { %v1416_v31 = vrot.slane %v1409_v25, 4  ;;  %v1417_v32 = vrot.slane %v1411_v26, 4  ;;  %1434 = vst [vmem:[#allocation2 + $0x48] sm:$0x88] %v1421_v38 }
  0xfa   : > { %2592 = vrot.lane.b32.xlu0 %v15235_v39, %s19161_s24  ;;  %2594 = vrot.lane.b32.xlu1 %v15242_v40, %s19161_s24  ;;  %v2591_v39 = vrot.slane %v2584_v33, %v14962_v5  ;;  %v15444_v33 = vrot.slane %v15429_v21, %v14962_v5 }
  0xfb   : > { %v1422_v37 = vsel %vm427_vm1, %v1415_v19, %v1416_v31  ;;  %v1424_v29 = vsel %vm427_vm1, %v1416_v31, %v1417_v32 }
  0xfc   : > { %v1413_v12 = vpop.permute.xlu0 %1412  ;;  %v1423_v41 = vsel %vm1420_vm11, %v1407_v15, %v1422_v37  ;;  %v1425_v42 = vsel %vm1420_vm11, %v1409_v25, %v1424_v29  ;;  %v1503_v45 = vpop.permute.xlu1 %1502  ;;  %v2781_v15 = vcombine.low %v15412_v30, %v15412_v30  ;;  %v2842_v37 = vcombine.high %v15429_v21, %v15429_v21  ;;  %v14517_v29 = vld [vmem:[%s14967_s22 + $0x9] ss:$0 sps:$4 sm:$0x33]  }
  0xfd   : > { %v1418_v35 = vrot.slane %v1413_v12, 4  ;;  %1435 = vst [vmem:[#allocation2 + $0x50] sm:$0x88] %v1423_v41  ;;  %1436 = vst [vmem:[#allocation2 + $0x58] sm:$0x88] %v1425_v42  ;;  %v1512_v52 = vrot.slane %v1503_v45, 4 }
  0xfe   : > { %2596 = vrot.lane.b32.xlu0 %v15254_v23, %s19161_s24  ;;  %2598 = vrot.lane.b32.xlu1 %v15258_v51, %s19161_s24  ;;  %v15457_v47 = vrot.slane %v2842_v37, %v14962_v5 }
  0xff   : > { %v1426_v40 = vsel %vm427_vm1, %v1417_v32, %v1418_v35  ;;  %v1428_v46 = vsel %vm1420_vm11, %v1413_v12, %v1418_v35  ;;  %v15440_v32 = vrot.slane %v2781_v15, %v14962_v5 }
 0x100   : > { %v1427_v48 = vsel %vm1420_vm11, %v1411_v26, %v1426_v40  ;;  %1438 = vst [vmem:[#allocation2 + $0x68] sm:$0x8] %v1428_v46  ;;  %v1505_v49 = vpop.permute.xlu0 %1504  ;;  %v1507_v50 = vpop.permute.xlu1 %1506  ;;  %vm2903_vm11 = vcmask 908288  }
 0x101   : > { %1437 = vst [vmem:[#allocation2 + $0x60] sm:$0x88] %v1427_v48  ;;  %v1513_v53 = vrot.slane %v1505_v49, 4  ;;  %v1514_v23 = vrot.slane %v1507_v50, 4  ;;  %v2843_v48 = vcombine.high %v15377_v55, %v15377_v55 }
 0x102   : > { %2600 = vrot.lane.b32.xlu0 %v2591_v39, %s19161_s24  ;;  %2690 = vrot.lane.b32.xlu1 %v15258_v51, %s19247_s25  ;;  %v2744_v51 = vcombine.low %v15377_v55, %v15377_v55 }
 0x103   : > { %v1517_v56 = vsel %vm427_vm1, %v1512_v52, %v1513_v53  ;;  %v1520_v57 = vsel %vm427_vm1, %v1513_v53, %v1514_v23  ;;  %v15471_v55 = vrot.slane %v2843_v48, %v14962_v5 }
 0x104   : > { %v1509_v58 = vpop.permute.xlu0 %1508  ;;  %v1519_v59 = vsel %vm1518_vm12, %v1503_v45, %v1517_v56  ;;  %v1521_v28 = vsel %vm1518_vm12, %v1505_v49, %v1520_v57  ;;  %v1511_v43 = vpop.permute.xlu1 %1510  ;;  %v15404_v8 = vrot.slane %v2744_v51, %v14962_v5  ;;  %v2879_v49 = vrot.slane %v14517_v29, %v14962_v5 }
 0x105   : > { %v1515_v44 = vrot.slane %v1509_v58, 4  ;;  %1532 = vst [vmem:[#allocation2 + $0x6c] sm:$0x11] %v1519_v59  ;;  %1533 = vst [vmem:[#allocation2 + $0x74] sm:$0x11] %v1521_v28  ;;  %v1516_v60 = vrot.slane %v1511_v43, 4  ;;  %v2941_v28 = vcombine.low %v15429_v21, %v15429_v21 }
 0x106   : > { %2692 = vrot.lane.b32.xlu0 %v15277_v4, %s19247_s25  ;;  %2694 = vrot.lane.b32.xlu1 %v15281_v6, %s19247_s25  ;;  %v2886_v59 = vrot.slane %v2879_v49, %v14962_v5 }
 0x107   : > { %v1522_v27 = vsel %vm427_vm1, %v1514_v23, %v1515_v44  ;;  %v1524_v62 = vsel %vm427_vm1, %v1515_v44, %v1516_v60  ;;  %v1526_v63 = vsel %vm1518_vm12, %v1511_v43, %v1516_v60  ;;  %v14518_v43 = vld [vmem:[%s14967_s22 + $0x9] ss:$0 sps:$4 sm:$0x33]  }
 0x108   : > { %v1523_v0 = vsel %vm1518_vm12, %v1507_v50, %v1522_v27  ;;  %v1525_v20 = vsel %vm1518_vm12, %v1509_v58, %v1524_v62  ;;  %1536 = vst [vmem:[#allocation2 + $0x8c] sm:$0x1] %v1526_v63  ;;  %v1602_v1 = vpop.permute.xlu0 %1601  ;;  %v1604_v4 = vpop.permute.xlu1 %1603  ;;  %vm3101_vm12 = vcmask 891904  }
 0x109   : > { %1534 = vst [vmem:[#allocation2 + $0x7c] sm:$0x11] %v1523_v0  ;;  %1535 = vst [vmem:[#allocation2 + $0x84] sm:$0x11] %v1525_v20  ;;  %v1611_v6 = vrot.slane %v1602_v1, 4  ;;  %v1612_v2 = vrot.slane %v1604_v4, 4 }
 0x10a   : > { %2696 = vrot.lane.b32.xlu0 %v15294_v16, %s19247_s25  ;;  %2698 = vrot.lane.b32.xlu1 %v15297_v17, %s19247_s25  ;;  %v15416_v17 = vrot.slane %v2745_v7, %v14962_v5 }
 0x10b   : > { %v1616_v18 = vsel %vm427_vm1, %v1611_v6, %v1612_v2  ;;  %v2978_v6 = vrot.slane %v14518_v43, %v14962_v5 }
 0x10c   : > { %v1606_v11 = vpop.permute.xlu0 %1605  ;;  %v1608_v36 = vpop.permute.xlu1 %1607  ;;  %v1618_v34 = vsel %vm1617_vm13, %v1602_v1, %v1616_v18 }
 0x10d   : > { %v1613_v16 = vrot.slane %v1606_v11, 4  ;;  %v1614_v13 = vrot.slane %v1608_v36, 4  ;;  %1631 = vst [vmem:[#allocation2 + $0x6c] sm:$0x22] %v1618_v34  ;;  %v2979_v34 = vcombine.low %v2978_v6, %v2978_v6 }
 0x10e   : > { %2789 = vrot.lane.b32.xlu0 %v15404_v8, %s14825_s5  ;;  %2791 = vrot.lane.b32.xlu1 %v15408_v9, %s14825_s5 }
 0x10f   : > { %v1619_v19 = vsel %vm427_vm1, %v1612_v2, %v1613_v16  ;;  %v1621_v22 = vsel %vm427_vm1, %v1613_v16, %v1614_v13 }
 0x110   : > { %v1610_v24 = vpop.permute.xlu0 %1609  ;;  %v1620_v25 = vsel %vm1617_vm13, %v1604_v4, %v1619_v19  ;;  %v1622_v26 = vsel %vm1617_vm13, %v1606_v11, %v1621_v22  ;;  %v1701_v38 = vpop.permute.xlu1 %1700  ;;  %v15486_v4 = vrot.slane %v2941_v28, %v14962_v5 }
 0x111   : > { %v1615_v31 = vrot.slane %v1610_v24, 4  ;;  %1632 = vst [vmem:[#allocation2 + $0x74] sm:$0x22] %v1620_v25  ;;  %1633 = vst [vmem:[#allocation2 + $0x7c] sm:$0x22] %v1622_v26  ;;  %v1710_v39 = vrot.slane %v1701_v38, 4  ;;  %v2986_v25 = vrot.slane %v2979_v34, %v14962_v5 }
 0x112   : > { %2793 = vrot.lane.b32.xlu0 %v15416_v17, %s14825_s5  ;;  %2795 = vrot.lane.b32.xlu1 %v15424_v14, %s14825_s5 }
 0x113   : > { %v1623_v12 = vsel %vm427_vm1, %v1614_v13, %v1615_v31  ;;  %v1625_v41 = vsel %vm1617_vm13, %v1610_v24, %v1615_v31 }
 0x114   : > { %v1624_v42 = vsel %vm1617_vm13, %v1608_v36, %v1623_v12  ;;  %1635 = vst [vmem:[#allocation2 + $0x8c] sm:$0x2] %v1625_v41  ;;  %v1703_v45 = vpop.permute.xlu0 %1702  ;;  %v1705_v35 = vpop.permute.xlu1 %1704  ;;  %vm3200_vm13 = vcmask 883712  }
 0x115   : > { %1634 = vst [vmem:[#allocation2 + $0x84] sm:$0x22] %v1624_v42  ;;  %v1711_v40 = vrot.slane %v1703_v45, 4  ;;  %v1712_v46 = vrot.slane %v1705_v35, 4 }
 0x116   : > { %2797 = vrot.lane.b32.xlu0 %v15440_v32, %s14825_s5  ;;  %2887 = vrot.lane.b32.xlu1 %v15444_v33, %s14841_s26  ;;  %s14846_s5 = smov 98  }
 0x117   : > { %v1715_v50 = vsel %vm427_vm1, %v1710_v39, %v1711_v40  ;;  %v1718_v52 = vsel %vm427_vm1, %v1711_v40, %v1712_v46  ;;  %v3042_v39 = vcombine.high %v15384_v61, %v15384_v61 }
 0x118   : > { %v1717_v53 = vsel %vm1716_vm14, %v1701_v38, %v1715_v50  ;;  %v1719_v23 = vsel %vm1716_vm14, %v1703_v45, %v1718_v52  ;;  %v1707_v54 = vpop.permute.xlu0 %1706  ;;  %v1709_v56 = vpop.permute.xlu1 %1708 }
 0x119   : > { %1730 = vst [vmem:[#allocation2 + $0x6c] sm:$0x44] %v1717_v53  ;;  %1731 = vst [vmem:[#allocation2 + $0x74] sm:$0x44] %v1719_v23  ;;  %v1713_v57 = vrot.slane %v1707_v54, 4  ;;  %v1714_v58 = vrot.slane %v1709_v56, 4  ;;  %v15516_v61 = vrot.slane %v3042_v39, %v14962_v5 }
 0x11a   : > { %2889 = vrot.lane.b32.xlu0 %v15457_v47, %s14841_s26  ;;  %2891 = vrot.lane.b32.xlu1 %v15408_v9, %s14841_s26 }
 0x11b   : > { %v1720_v44 = vsel %vm427_vm1, %v1712_v46, %v1713_v57  ;;  %v1722_v60 = vsel %vm427_vm1, %v1713_v57, %v1714_v58  ;;  %v1724_v51 = vsel %vm1716_vm14, %v1709_v56, %v1714_v58  ;;  %v15520_v57 = vrot.slane %v15412_v30, %v14962_v5 }
 0x11c   : > { %v1721_v27 = vsel %vm1716_vm14, %v1705_v35, %v1720_v44  ;;  %v1723_v62 = vsel %vm1716_vm14, %v1707_v54, %v1722_v60  ;;  %1734 = vst [vmem:[#allocation2 + $0x8c] sm:$0x4] %v1724_v51  ;;  %v1801_v63 = vpop.permute.xlu0 %1800  ;;  %v1803_v0 = vpop.permute.xlu1 %1802 }
 0x11d   : > { %1732 = vst [vmem:[#allocation2 + $0x7c] sm:$0x44] %v1721_v27  ;;  %1733 = vst [vmem:[#allocation2 + $0x84] sm:$0x44] %v1723_v62  ;;  %v1810_v20 = vrot.slane %v1801_v63, 4  ;;  %v1811_v1 = vrot.slane %v1803_v0, 4 }
 0x11e   : > { %2893 = vrot.lane.b32.xlu0 %v15471_v55, %s14841_s26  ;;  %2895 = vrot.lane.b32.xlu1 %v2886_v59, %s14841_s26  ;;  %s14856_s26 = smov 72  }
 0x11f   : > { %v1815_v2 = vsel %vm427_vm1, %v1810_v20, %v1811_v1 }
 0x120   : > { %v1817_v7 = vsel %vm1816_vm15, %v1801_v63, %v1815_v2  ;;  %v1805_v10 = vpop.permute.xlu0 %1804  ;;  %v1807_v18 = vpop.permute.xlu1 %1806 }
 0x121   : > { %1830 = vst [vmem:[#allocation2 + $0x6c] sm:$0x88] %v1817_v7  ;;  %v1812_v11 = vrot.slane %v1805_v10, 4  ;;  %v1813_v36 = vrot.slane %v1807_v18, 4 }
 0x122   : > { %2987 = vrot.lane.b32.xlu0 %v15486_v4, %s14842_s27  ;;  %2989 = vrot.lane.b32.xlu1 %v15444_v33, %s14842_s27 }
 0x123   : > { %v1818_v16 = vsel %vm427_vm1, %v1811_v1, %v1812_v11  ;;  %v1820_v13 = vsel %vm427_vm1, %v1812_v11, %v1813_v36 }
 0x124   : > { %v1819_v15 = vsel %vm1816_vm15, %v1803_v0, %v1818_v16  ;;  %v1821_v21 = vsel %vm1816_vm15, %v1805_v10, %v1820_v13  ;;  %v1809_v19 = vpop.permute.xlu0 %1808  ;;  %v1899_v22 = vpop.permute.xlu1 %1898  ;;  %v14525_v16 = vld [vmem:[%s14967_s22 + $0x9] ss:$0 sps:$4 sm:$0x33]  }
 0x125   : > { %1831 = vst [vmem:[#allocation2 + $0x74] sm:$0x88] %v1819_v15  ;;  %1832 = vst [vmem:[#allocation2 + $0x7c] sm:$0x88] %v1821_v21  ;;  %v1814_v24 = vrot.slane %v1809_v19, 4  ;;  %v1908_v42 = vrot.slane %v1899_v22, 4 }
 0x126   : > { %2991 = vrot.lane.b32.xlu0 %v15404_v8, %s14842_s27  ;;  %2993 = vrot.lane.b32.xlu1 %v15408_v9, %s14842_s27 }
 0x127   : > { %v1822_v26 = vsel %vm427_vm1, %v1813_v36, %v1814_v24  ;;  %v1824_v38 = vsel %vm1816_vm15, %v1809_v19, %v1814_v24 }
 0x128   : > { %v1823_v31 = vsel %vm1816_vm15, %v1807_v18, %v1822_v26  ;;  %1834 = vst [vmem:[#allocation2 + $0x8c] sm:$0x8] %v1824_v38  ;;  %v1901_v37 = vpop.permute.xlu0 %1900  ;;  %v1903_v29 = vpop.permute.xlu1 %1902  ;;  %v14519_v12 = vld [vmem:[#allocation2 + $0x4c] ss:$36 sps:$4 sm:$0xff]   ;;  %v3275_v38 = vrot.slane %v14525_v16, %v14962_v5 }
 0x129   : > { %v14521_v41 = vld [vmem:[#allocation2 + $0x48] ss:$36 sps:$4 sm:$0xff]   ;;  %1833 = vst [vmem:[#allocation2 + $0x84] sm:$0x88] %v1823_v31  ;;  %v1909_v45 = vrot.slane %v1901_v37, 4  ;;  %v1910_v35 = vrot.slane %v1903_v29, 4  ;;  %13529 = vmatprep.subr.bf16.mxu0 %v14519_v12 }
 0x12a   : > { %2995 = vrot.lane.b32.xlu0 %v2986_v25, %s14842_s27  ;;  %3085 = vrot.lane.b32.xlu1 %v15408_v9, %s14843_s28  ;;  %v3282_v39 = vrot.slane %v3275_v38, %v14962_v5  ;;  %s19222_s27 = smov 64  }
 0x12b   : > { %v1913_v40 = vsel %vm427_vm1, %v1908_v42, %v1909_v45  ;;  %v1916_v46 = vsel %vm427_vm1, %v1909_v45, %v1910_v35  ;;  %13530 = vmatpush1.bf16.msra.mxu0 %v14521_v41 }
 0x12c   : > { %v1905_v48 = vpop.permute.xlu0 %1904  ;;  %v1915_v49 = vsel %vm1914_vm0, %v1899_v22, %v1913_v40  ;;  %v1917_v50 = vsel %vm1914_vm0, %v1901_v37, %v1916_v46  ;;  %v1907_v52 = vpop.permute.xlu1 %1906  ;;  %v14522_v53 = vld [vmem:[#allocation2 + $0x54] ss:$36 sps:$4 sm:$0xff]   ;;  %v14526_v40 = vld [vmem:[%s14967_s22 + $0x9] ss:$0 sps:$4 sm:$0x33]  }
 0x12d   : > { %v14524_v23 = vld [vmem:[#allocation2 + $0x50] ss:$36 sps:$4 sm:$0xff]   ;;  %v1911_v54 = vrot.slane %v1905_v48, 4  ;;  %1928 = vst [vmem:[#allocation2 + $0x90] sm:$0x11] %v1915_v49  ;;  %v1912_v56 = vrot.slane %v1907_v52, 4  ;;  %13572 = vmatprep.subr.bf16.mxu1 %v14522_v53 }
 0x12e   : > { %1929 = vst [vmem:[#allocation2 + $0x98] sm:$0x11] %v1917_v50  ;;  %3087 = vrot.lane.b32.xlu0 %v15471_v55, %s14843_s28  ;;  %3089 = vrot.lane.b32.xlu1 %v15424_v14, %s14843_s28 }
 0x12f   : > { %v1918_v58 = vsel %vm427_vm1, %v1910_v35, %v1911_v54  ;;  %v1920_v59 = vsel %vm427_vm1, %v1911_v54, %v1912_v56  ;;  %v1922_v28 = vsel %vm1914_vm0, %v1907_v52, %v1912_v56  ;;  %13573 = vmatpush1.bf16.msra.mxu1 %v14524_v23 }
 0x130   : > { %v1919_v43 = vsel %vm1914_vm0, %v1903_v29, %v1918_v58  ;;  %v1921_v44 = vsel %vm1914_vm0, %v1905_v48, %v1920_v59  ;;  %1932 = vst [vmem:[#allocation2 + $0xb0] sm:$0x1] %v1922_v28  ;;  %v1998_v60 = vpop.permute.xlu0 %1997  ;;  %v2000_v51 = vpop.permute.xlu1 %1999  ;;  %v3373_v58 = vrot.slane %v14526_v40, %v14962_v5  ;;  %vm3398_vm0 = vcmask 809984  }
 0x131   : > { %1930 = vst [vmem:[#allocation2 + $0xa0] sm:$0x11] %v1919_v43  ;;  %1931 = vst [vmem:[#allocation2 + $0xa8] sm:$0x11] %v1921_v44  ;;  %v2007_v27 = vrot.slane %v1998_v60, 4  ;;  %v2008_v30 = vrot.slane %v2000_v51, 4 }
 0x132   : > { %3091 = vrot.lane.b32.xlu0 %v15516_v61, %s14843_s28  ;;  %3093 = vrot.lane.b32.xlu1 %v15520_v57, %s14843_s28  ;;  %s19203_s28 = smov 63  }
 0x133   : > { %v2012_v62 = vsel %vm427_vm1, %v2007_v27, %v2008_v30  ;;  %v3374_v27 = vcombine.low %v3373_v58, %v3373_v58 }
 0x134   : > { %v2002_v63 = vpop.permute.xlu0 %2001  ;;  %v2004_v0 = vpop.permute.xlu1 %2003  ;;  %v2014_v20 = vsel %vm2013_vm2, %v1998_v60, %v2012_v62 }
 0x135   : > { %v2009_v1 = vrot.slane %v2002_v63, 4  ;;  %v2010_v6 = vrot.slane %v2004_v0, 4  ;;  %2027 = vst [vmem:[#allocation2 + $0x90] sm:$0x22] %v2014_v20 }
 0x136   : > { %3184 = vrot.lane.b32.xlu0 %v15404_v8, %s14844_s29  ;;  %3186 = vrot.lane.b32.xlu1 %v15408_v9, %s14844_s29 }
 0x137   : > { %v2015_v2 = vsel %vm427_vm1, %v2008_v30, %v2009_v1  ;;  %v2017_v7 = vsel %vm427_vm1, %v2009_v1, %v2010_v6 }
 0x138   : > { %v2006_v10 = vpop.permute.xlu0 %2005  ;;  %v2016_v18 = vsel %vm2013_vm2, %v2000_v51, %v2015_v2  ;;  %v2018_v11 = vsel %vm2013_vm2, %v2002_v63, %v2017_v7  ;;  %v2097_v36 = vpop.permute.xlu1 %2096  ;;  %v3381_v2 = vrot.slane %v3374_v27, %v14962_v5 }
 0x139   : > { %v2011_v34 = vrot.slane %v2006_v10, 4  ;;  %2028 = vst [vmem:[#allocation2 + $0x98] sm:$0x22] %v2016_v18  ;;  %2029 = vst [vmem:[#allocation2 + $0xa0] sm:$0x22] %v2018_v11  ;;  %v2106_v24 = vrot.slane %v2097_v36, 4 }
 0x13a   : > { %3188 = vrot.lane.b32.xlu0 %v15416_v17, %s14844_s29  ;;  %3190 = vrot.lane.b32.xlu1 %v15424_v14, %s14844_s29 }
 0x13b   : > { %v2019_v13 = vsel %vm427_vm1, %v2010_v6, %v2011_v34  ;;  %v2021_v15 = vsel %vm2013_vm2, %v2006_v10, %v2011_v34 }
 0x13c   : > { %v2020_v21 = vsel %vm2013_vm2, %v2004_v0, %v2019_v13  ;;  %2031 = vst [vmem:[#allocation2 + $0xb0] sm:$0x2] %v2021_v15  ;;  %v2099_v19 = vpop.permute.xlu0 %2098  ;;  %v2101_v22 = vpop.permute.xlu1 %2100  ;;  %vm3595_vm2 = vcmask 793600  }
 0x13d   : > { %2030 = vst [vmem:[#allocation2 + $0xa8] sm:$0x22] %v2020_v21  ;;  %v2107_v25 = vrot.slane %v2099_v19, 4  ;;  %v2108_v26 = vrot.slane %v2101_v22, 4 }
 0x13e   : > { %3192 = vrot.lane.b32.xlu0 %v15440_v32, %s14844_s29  ;;  %3283 = vrot.lane.b32.xlu1 %v15444_v33, %s14830_s10  ;;  %s19206_s29 = smov 62  }
 0x13f   : > { %v2111_v31 = vsel %vm427_vm1, %v2106_v24, %v2107_v25  ;;  %v2114_v37 = vsel %vm427_vm1, %v2107_v25, %v2108_v26 }
 0x140   : > { %v2103_v29 = vpop.permute.xlu0 %2102  ;;  %v2113_v12 = vsel %vm2112_vm3, %v2097_v36, %v2111_v31  ;;  %v2115_v41 = vsel %vm2112_vm3, %v2099_v19, %v2114_v37  ;;  %v2105_v42 = vpop.permute.xlu1 %2104 }
 0x141   : > { %v2109_v45 = vrot.slane %v2103_v29, 4  ;;  %2126 = vst [vmem:[#allocation2 + $0x90] sm:$0x44] %v2113_v12  ;;  %2127 = vst [vmem:[#allocation2 + $0x98] sm:$0x44] %v2115_v41  ;;  %v2110_v35 = vrot.slane %v2105_v42, 4 }
 0x142   : > { %3285 = vrot.lane.b32.xlu0 %v15457_v47, %s14830_s10  ;;  %3287 = vrot.lane.b32.xlu1 %v15408_v9, %s14830_s10 }
 0x143   : > { %v2116_v46 = vsel %vm427_vm1, %v2108_v26, %v2109_v45  ;;  %v2118_v48 = vsel %vm427_vm1, %v2109_v45, %v2110_v35  ;;  %v2120_v49 = vsel %vm2112_vm3, %v2105_v42, %v2110_v35 }
 0x144   : > { %v2117_v50 = vsel %vm2112_vm3, %v2101_v22, %v2116_v46  ;;  %v2119_v52 = vsel %vm2112_vm3, %v2103_v29, %v2118_v48  ;;  %2130 = vst [vmem:[#allocation2 + $0xb0] sm:$0x4] %v2120_v49  ;;  %v2197_v53 = vpop.permute.xlu0 %2196  ;;  %v2199_v23 = vpop.permute.xlu1 %2198  ;;  %vm3694_vm3 = vcmask 785408  }
 0x145   : > { %2128 = vst [vmem:[#allocation2 + $0xa0] sm:$0x44] %v2117_v50  ;;  %2129 = vst [vmem:[#allocation2 + $0xa8] sm:$0x44] %v2119_v52  ;;  %v2206_v54 = vrot.slane %v2197_v53, 4  ;;  %v2207_v56 = vrot.slane %v2199_v23, 4 }
 0x146   : > { %3289 = vrot.lane.b32.xlu0 %v15471_v55, %s14830_s10  ;;  %3291 = vrot.lane.b32.xlu1 %v3282_v39, %s14830_s10  ;;  %s14851_s10 = smov 85  }
 0x147   : > { %v2211_v59 = vsel %vm427_vm1, %v2206_v54, %v2207_v56 }
 0x148   : > { %v2213_v28 = vsel %vm2212_vm4, %v2197_v53, %v2211_v59  ;;  %v2201_v43 = vpop.permute.xlu0 %2200  ;;  %v2203_v44 = vpop.permute.xlu1 %2202 }
 0x149   : > { %2226 = vst [vmem:[#allocation2 + $0x90] sm:$0x88] %v2213_v28  ;;  %v2208_v60 = vrot.slane %v2201_v43, 4  ;;  %v2209_v51 = vrot.slane %v2203_v44, 4 }
 0x14a   : > { %3382 = vrot.lane.b32.xlu0 %v15486_v4, %s14845_s30  ;;  %3384 = vrot.lane.b32.xlu1 %v15444_v33, %s14845_s30 }
 0x14b   : > { %v2214_v30 = vsel %vm427_vm1, %v2207_v56, %v2208_v60  ;;  %v2216_v62 = vsel %vm427_vm1, %v2208_v60, %v2209_v51 }
 0x14c   : > { %v2215_v63 = vsel %vm2212_vm4, %v2199_v23, %v2214_v30  ;;  %v2217_v0 = vsel %vm2212_vm4, %v2201_v43, %v2216_v62  ;;  %v2205_v20 = vpop.permute.xlu0 %2204  ;;  %v2295_v1 = vpop.permute.xlu1 %2294  ;;  %v14527_v43 = vld [vmem:[%s14967_s22 + $0x9] ss:$0 sps:$4 sm:$0x33]  }
 0x14d   : > { %2227 = vst [vmem:[#allocation2 + $0x98] sm:$0x88] %v2215_v63  ;;  %2228 = vst [vmem:[#allocation2 + $0xa0] sm:$0x88] %v2217_v0  ;;  %v2210_v6 = vrot.slane %v2205_v20, 4  ;;  %v2304_v34 = vrot.slane %v2295_v1, 4 }
 0x14e   : > { %3386 = vrot.lane.b32.xlu0 %v15404_v8, %s14845_s30  ;;  %3388 = vrot.lane.b32.xlu1 %v15408_v9, %s14845_s30 }
 0x14f   : > { %v2218_v7 = vsel %vm427_vm1, %v2209_v51, %v2210_v6  ;;  %v2220_v10 = vsel %vm2212_vm4, %v2205_v20, %v2210_v6 }
 0x150   : > { %v2219_v18 = vsel %vm2212_vm4, %v2203_v44, %v2218_v7  ;;  %2230 = vst [vmem:[#allocation2 + $0xb0] sm:$0x8] %v2220_v10  ;;  %v2297_v11 = vpop.permute.xlu0 %2296  ;;  %v2299_v36 = vpop.permute.xlu1 %2298 }
 0x151   : > { %2229 = vst [vmem:[#allocation2 + $0xa8] sm:$0x88] %v2219_v18  ;;  %v2305_v16 = vrot.slane %v2297_v11, 4  ;;  %v2306_v13 = vrot.slane %v2299_v36, 4 }
 0x152   : > { %3390 = vrot.lane.b32.xlu0 %v3381_v2, %s14845_s30  ;;  %3480 = vrot.lane.b32.xlu1 %v15408_v9, %s14846_s5  ;;  %s19120_s30 = smov 61  }
 0x153   : > { %v2309_v15 = vsel %vm427_vm1, %v2304_v34, %v2305_v16  ;;  %v2312_v21 = vsel %vm427_vm1, %v2305_v16, %v2306_v13 }
 0x154   : > { %v2311_v19 = vsel %vm2310_vm5, %v2295_v1, %v2309_v15  ;;  %v2313_v22 = vsel %vm2310_vm5, %v2297_v11, %v2312_v21  ;;  %v2301_v24 = vpop.permute.xlu0 %2300  ;;  %v2303_v25 = vpop.permute.xlu1 %2302 }
 0x155   : > { %2324 = vst [vmem:[#allocation2 + $0xb4] sm:$0x11] %v2311_v19  ;;  %2325 = vst [vmem:[#allocation2 + $0xbc] sm:$0x11] %v2313_v22  ;;  %v2307_v26 = vrot.slane %v2301_v24, 4  ;;  %v2308_v38 = vrot.slane %v2303_v25, 4 }
 0x156   : > { %3482 = vrot.lane.b32.xlu0 %v15471_v55, %s14846_s5  ;;  %3484 = vrot.lane.b32.xlu1 %v15424_v14, %s14846_s5 }
 0x157   : > { %v2314_v31 = vsel %vm427_vm1, %v2306_v13, %v2307_v26  ;;  %v2316_v37 = vsel %vm427_vm1, %v2307_v26, %v2308_v38  ;;  %v2318_v29 = vsel %vm2310_vm5, %v2303_v25, %v2308_v38 }
 0x158   : > { %v2315_v12 = vsel %vm2310_vm5, %v2299_v36, %v2314_v31  ;;  %v2317_v41 = vsel %vm2310_vm5, %v2301_v24, %v2316_v37  ;;  %2328 = vst [vmem:[#allocation2 + $0xd4] sm:$0x1] %v2318_v29  ;;  %v2394_v42 = vpop.permute.xlu0 %2393  ;;  %v2396_v45 = vpop.permute.xlu1 %2395  ;;  %v14528_v36 = vld [vmem:[%s14967_s22 + $0x9] ss:$0 sps:$4 sm:$0x33]  }
 0x159   : > { %2326 = vst [vmem:[#allocation2 + $0xc4] sm:$0x11] %v2315_v12  ;;  %2327 = vst [vmem:[#allocation2 + $0xcc] sm:$0x11] %v2317_v41  ;;  %v2403_v35 = vrot.slane %v2394_v42, 4  ;;  %v2404_v39 = vrot.slane %v2396_v45, 4  ;;  %v3769_v25 = vrot.slane %v14528_v36, %v14962_v5 }
 0x15a   : > { %3486 = vrot.lane.b32.xlu0 %v15516_v61, %s14846_s5  ;;  %3488 = vrot.lane.b32.xlu1 %v15520_v57, %s14846_s5  ;;  %s19122_s5 = smov 60  }
 0x15b   : > { %v2408_v40 = vsel %vm427_vm1, %v2403_v35, %v2404_v39  ;;  %v3770_v41 = vcombine.low %v3769_v25, %v3769_v25 }
 0x15c   : > { %v2410_v46 = vsel %vm2409_vm6, %v2394_v42, %v2408_v40  ;;  %v2398_v48 = vpop.permute.xlu0 %2397  ;;  %v2400_v49 = vpop.permute.xlu1 %2399 }
 0x15d   : > { %2423 = vst [vmem:[#allocation2 + $0xb4] sm:$0x22] %v2410_v46  ;;  %v2405_v50 = vrot.slane %v2398_v48, 4  ;;  %v2406_v52 = vrot.slane %v2400_v49, 4 }
 0x15e   : > { %3579 = vrot.lane.b32.xlu0 %v15404_v8, %s14847_s6  ;;  %3581 = vrot.lane.b32.xlu1 %v15408_v9, %s14847_s6 }
 0x15f   : > { %v2411_v53 = vsel %vm427_vm1, %v2404_v39, %v2405_v50  ;;  %v2413_v23 = vsel %vm427_vm1, %v2405_v50, %v2406_v52 }
 0x160   : > { %v2412_v54 = vsel %vm2409_vm6, %v2396_v45, %v2411_v53  ;;  %v2414_v56 = vsel %vm2409_vm6, %v2398_v48, %v2413_v23  ;;  %v2402_v58 = vpop.permute.xlu0 %2401  ;;  %v2493_v59 = vpop.permute.xlu1 %2492 }
 0x161   : > { %2424 = vst [vmem:[#allocation2 + $0xbc] sm:$0x22] %v2412_v54  ;;  %2425 = vst [vmem:[#allocation2 + $0xc4] sm:$0x22] %v2414_v56  ;;  %v2407_v28 = vrot.slane %v2402_v58, 4  ;;  %v2502_v62 = vrot.slane %v2493_v59, 4 }
 0x162   : > { %3583 = vrot.lane.b32.xlu0 %v15416_v17, %s14847_s6  ;;  %3585 = vrot.lane.b32.xlu1 %v15424_v14, %s14847_s6  ;;  %v3670_v17 = vrot.slane %v14527_v43, %v14962_v5 }
 0x163   : > { %v2415_v44 = vsel %vm427_vm1, %v2406_v52, %v2407_v28  ;;  %v2417_v60 = vsel %vm2409_vm6, %v2402_v58, %v2407_v28 }
 0x164   : > { %v2416_v51 = vsel %vm2409_vm6, %v2400_v49, %v2415_v44  ;;  %2427 = vst [vmem:[#allocation2 + $0xd4] sm:$0x2] %v2417_v60  ;;  %v2495_v27 = vpop.permute.xlu0 %2494  ;;  %v2497_v30 = vpop.permute.xlu1 %2496  ;;  %v3677_v11 = vrot.slane %v3670_v17, %v14962_v5 }
 0x165   : > { %2426 = vst [vmem:[#allocation2 + $0xcc] sm:$0x22] %v2416_v51  ;;  %v2503_v63 = vrot.slane %v2495_v27, 4  ;;  %v2504_v0 = vrot.slane %v2497_v30, 4 }
 0x166   : > { %3587 = vrot.lane.b32.xlu0 %v15440_v32, %s14847_s6  ;;  %3678 = vrot.lane.b32.xlu1 %v15444_v33, %s14848_s7  ;;  %s14862_s6 = smov 95  }
 0x167   : > { %v2507_v20 = vsel %vm427_vm1, %v2502_v62, %v2503_v63  ;;  %v2510_v1 = vsel %vm427_vm1, %v2503_v63, %v2504_v0 }
 0x168   : > { %v2509_v6 = vsel %vm2508_vm7, %v2493_v59, %v2507_v20  ;;  %v2511_v2 = vsel %vm2508_vm7, %v2495_v27, %v2510_v1  ;;  %v2499_v7 = vpop.permute.xlu0 %2498  ;;  %v2501_v10 = vpop.permute.xlu1 %2500 }
 0x169   : > { %2522 = vst [vmem:[#allocation2 + $0xb4] sm:$0x44] %v2509_v6  ;;  %2523 = vst [vmem:[#allocation2 + $0xbc] sm:$0x44] %v2511_v2  ;;  %v2505_v32 = vrot.slane %v2499_v7, 4  ;;  %v2506_v18 = vrot.slane %v2501_v10, 4 }
 0x16a   : > { %3680 = vrot.lane.b32.xlu0 %v15457_v47, %s14848_s7  ;;  %3682 = vrot.lane.b32.xlu1 %v15408_v9, %s14848_s7 }
 0x16b   : > { %v2512_v34 = vsel %vm427_vm1, %v2504_v0, %v2505_v32  ;;  %v2514_v16 = vsel %vm427_vm1, %v2505_v32, %v2506_v18  ;;  %v2516_v13 = vsel %vm2508_vm7, %v2501_v10, %v2506_v18 }
 0x16c   : > { %v2513_v15 = vsel %vm2508_vm7, %v2497_v30, %v2512_v34  ;;  %v2515_v21 = vsel %vm2508_vm7, %v2499_v7, %v2514_v16  ;;  %2526 = vst [vmem:[#allocation2 + $0xd4] sm:$0x4] %v2516_v13  ;;  %v2593_v19 = vpop.permute.xlu0 %2592  ;;  %v2595_v22 = vpop.permute.xlu1 %2594 }
 0x16d   : > { %2524 = vst [vmem:[#allocation2 + $0xc4] sm:$0x44] %v2513_v15  ;;  %2525 = vst [vmem:[#allocation2 + $0xcc] sm:$0x44] %v2515_v21  ;;  %v2602_v47 = vrot.slane %v2593_v19, 4  ;;  %v2603_v24 = vrot.slane %v2595_v22, 4 }
 0x16e   : > { %3684 = vrot.lane.b32.xlu0 %v15471_v55, %s14848_s7  ;;  %3686 = vrot.lane.b32.xlu1 %v3677_v11, %s14848_s7  ;;  %v15698_v21 = vld.sshfl [vmem:[%s14967_s22 + $0x9] sm:$0x5 pattern:$0x73625140] }
 0x16f   : > { %v2607_v26 = vsel %vm427_vm1, %v2602_v47, %v2603_v24 }
 0x170   : > { %v2609_v38 = vsel %vm2608_vm8, %v2593_v19, %v2607_v26  ;;  %v2597_v31 = vpop.permute.xlu0 %2596  ;;  %v2599_v37 = vpop.permute.xlu1 %2598  ;;  %v3966_v26 = vcombine.low %v15698_v21, %v15698_v21 }
 0x171   : > { %2622 = vst [vmem:[#allocation2 + $0xb4] sm:$0x88] %v2609_v38  ;;  %v2604_v29 = vrot.slane %v2597_v31, 4  ;;  %v2605_v12 = vrot.slane %v2599_v37, 4 }
 0x172   : > { %3778 = vrot.lane.b32.xlu0 %v15486_v4, %s14835_s19  ;;  %3780 = vrot.lane.b32.xlu1 %v15444_v33, %s14835_s19  ;;  %v3777_v33 = vrot.slane %v3770_v41, %v14962_v5  ;;  %v15649_v4 = vld [vmem:[%s14967_s22 + $0x1] sm:$0xff] }
 0x173   : > { %v2610_v42 = vsel %vm427_vm1, %v2603_v24, %v2604_v29  ;;  %v2612_v45 = vsel %vm427_vm1, %v2604_v29, %v2605_v12  ;;  %v15656_v28 = vrot.slane %v15649_v4, %v14962_v5  ;;  %v3914_v43 = vcombine.high %v15649_v4, %v15649_v4 }
 0x174   : > { %v2611_v35 = vsel %vm2608_vm8, %v2595_v22, %v2610_v42  ;;  %v2613_v39 = vsel %vm2608_vm8, %v2597_v31, %v2612_v45  ;;  %v2601_v40 = vpop.permute.xlu0 %2600  ;;  %v2691_v46 = vpop.permute.xlu1 %2690  ;;  %v4013_v13 = vcombine.low %v15649_v4, %v15649_v4 }
 0x175   : > { %2623 = vst [vmem:[#allocation2 + $0xbc] sm:$0x88] %v2611_v35  ;;  %2624 = vst [vmem:[#allocation2 + $0xc4] sm:$0x88] %v2613_v39  ;;  %v2606_v48 = vrot.slane %v2601_v40, 4  ;;  %v3929_v20 = vcombine.low %v15656_v28, %v15656_v28  ;;  %v15674_v1 = vrot.slane %v3914_v43, %v14962_v5  ;;  %v15690_v34 = vrot.slane %v15656_v28, %v14962_v5 }
 0x176   : > { %3782 = vrot.lane.b32.xlu0 %v15404_v8, %s14835_s19  ;;  %3784 = vrot.lane.b32.xlu1 %v15408_v9, %s14835_s19  ;;  %v2700_v8 = vrot.slane %v2691_v46, 4  ;;  %v15715_v38 = vrot.slane %v4013_v13, %v14962_v5  ;;  %v15726_v35 = vrot.slane %v3966_v26, %v14962_v5 }
 0x177   : > { %v2614_v49 = vsel %vm427_vm1, %v2605_v12, %v2606_v48  ;;  %v2616_v50 = vsel %vm2608_vm8, %v2601_v40, %v2606_v48  ;;  %v15682_v36 = vrot.slane %v3929_v20, %v14962_v5  ;;  %v3930_v16 = vcombine.low %v15674_v1, %v15674_v1 }
 0x178   : > { %v2615_v52 = vsel %vm2608_vm8, %v2599_v37, %v2614_v49  ;;  %2626 = vst [vmem:[#allocation2 + $0xd4] sm:$0x8] %v2616_v50  ;;  %v2693_v53 = vpop.permute.xlu0 %2692  ;;  %v2695_v23 = vpop.permute.xlu1 %2694  ;;  %v14529_v54 = vld [vmem:[#allocation2 + $0x94] ss:$36 sps:$4 sm:$0xff]   ;;  %v15703_v24 = vrot.slane %v15674_v1, %v14962_v5  ;;  %v15730_v39 = vrot.slane %v15715_v38, %v14962_v5  ;;  %v4028_v40 = vcombine.high %v15715_v38, %v15715_v38 }
 0x179   : > { %v14531_v56 = vld [vmem:[#allocation2 + $0x90] ss:$36 sps:$4 sm:$0xff]   ;;  %2625 = vst [vmem:[#allocation2 + $0xcc] sm:$0x88] %v2615_v52  ;;  %v2701_v58 = vrot.slane %v2693_v53, 4  ;;  %v2702_v59 = vrot.slane %v2695_v23, 4  ;;  %13531 = vmatprep.subr.bf16.mxu0 %v14529_v54  ;;  %v15710_v25 = vrot.slane %v3930_v16, %v14962_v5 }
 0x17a   : > { %3786 = vrot.lane.b32.xlu0 %v3777_v33, %s14835_s19  ;;  %3875 = vrot.lane.b32.xlu1 %v15408_v9, %s14849_s8  ;;  %v15743_v54 = vrot.slane %v4028_v40, %v14962_v5  ;;  %s14855_s19 = smov 73  }
 0x17b   : > { %v2705_v44 = vsel %vm427_vm1, %v2700_v8, %v2701_v58  ;;  %v2708_v60 = vsel %vm427_vm1, %v2701_v58, %v2702_v59  ;;  %13532 = vmatpush1.bf16.msra.mxu0 %v14531_v56  ;;  %v4029_v56 = vcombine.high %v15656_v28, %v15656_v28 }
 0x17c   : > { %v2707_v51 = vsel %vm19297_vm10, %v2691_v46, %v2705_v44  ;;  %v2709_v27 = vsel %vm19297_vm10, %v2693_v53, %v2708_v60  ;;  %v2697_v30 = vpop.permute.xlu0 %2696  ;;  %v2699_v62 = vpop.permute.xlu1 %2698  ;;  %v14532_v63 = vld [vmem:[#allocation2 + $0x9c] ss:$36 sps:$4 sm:$0xff]   ;;  %v14537_v46 = vld [vmem:[%s14967_s22 + $0x9] ss:$0 sps:$4 sm:$0x33]  }
 0x17d   : > { %v14534_v0 = vld [vmem:[#allocation2 + $0x98] ss:$36 sps:$4 sm:$0xff]   ;;  %2720 = vst [vmem:[#allocation2 + $0xd8] sm:$0x11] %v2707_v51  ;;  %2721 = vst [vmem:[#allocation2 + $0xe0] sm:$0x11] %v2709_v27  ;;  %13574 = vmatprep.subr.bf16.mxu1 %v14532_v63  ;;  %v4065_v8 = vrot.slane %v14537_v46, %v14962_v5  ;;  %v15757_v28 = vrot.slane %v4029_v56, %v14962_v5  ;;  %v4127_v63 = vcombine.low %v15715_v38, %v15715_v38 }
 0x17e   : > { %v2703_v9 = vrot.slane %v2697_v30, 4  ;;  %v2704_v17 = vrot.slane %v2699_v62, 4  ;;  %3877 = vrot.lane.b32.xlu0 %v15471_v55, %s14849_s8  ;;  %3879 = vrot.lane.b32.xlu1 %v15424_v14, %s14849_s8 }
 0x17f   : > { %13575 = vmatpush1.bf16.msra.mxu1 %v14534_v0  ;;  %v14538_v0 = vld [vmem:[%s14967_s22 + $0x9] ss:$0 sps:$4 sm:$0x33]  }
 0x180   : > { %v2710_v6 = vsel %vm427_vm1, %v2702_v59, %v2703_v9  ;;  %v2712_v2 = vsel %vm427_vm1, %v2703_v9, %v2704_v17  ;;  %v2714_v7 = vsel %vm19297_vm10, %v2699_v62, %v2704_v17  ;;  %v2790_v55 = vpop.permute.xlu0 %2789  ;;  %v2792_v18 = vpop.permute.xlu1 %2791  ;;  %v4072_v62 = vrot.slane %v4065_v8, %v14962_v5 }
 0x181   : > { %v2711_v10 = vsel %vm19297_vm10, %v2695_v23, %v2710_v6  ;;  %v2713_v32 = vsel %vm19297_vm10, %v2697_v30, %v2712_v2  ;;  %2724 = vst [vmem:[#allocation2 + $0xf8] sm:$0x1] %v2714_v7  ;;  %v2799_v14 = vrot.slane %v2790_v55, 4  ;;  %v2800_v11 = vrot.slane %v2792_v18, 4 }
 0x182   : > { %2722 = vst [vmem:[#allocation2 + $0xe8] sm:$0x11] %v2711_v10  ;;  %2723 = vst [vmem:[#allocation2 + $0xf0] sm:$0x11] %v2713_v32  ;;  %3881 = vrot.lane.b32.xlu0 %v15516_v61, %s14849_s8  ;;  %3883 = vrot.lane.b32.xlu1 %v15520_v57, %s14849_s8  ;;  %s14864_s8 = smov 93  }
 0x183   : > { %v2804_v15 = vsel %vm427_vm1, %v2799_v14, %v2800_v11  ;;  %v4164_v14 = vrot.slane %v14538_v0, %v14962_v5 }
 0x184   : > { %v2805_v19 = vsel %vm1221_vm9, %v2790_v55, %v2804_v15  ;;  %v2794_v61 = vpop.permute.xlu0 %2793  ;;  %v2796_v22 = vpop.permute.xlu1 %2795 }
 0x185   : > { %2818 = vst [vmem:[#allocation2 + $0xd8] sm:$0x22] %v2805_v19  ;;  %v2801_v57 = vrot.slane %v2794_v61, 4  ;;  %v2802_v47 = vrot.slane %v2796_v22, 4 }
 0x186   : > { %3974 = vrot.lane.b32.xlu0 %v15682_v36, %s14850_s9  ;;  %3976 = vrot.lane.b32.xlu1 %v15690_v34, %s14850_s9 }
 0x187   : > { %v2806_v31 = vsel %vm427_vm1, %v2800_v11, %v2801_v57  ;;  %v2808_v37 = vsel %vm427_vm1, %v2801_v57, %v2802_v47 }
 0x188   : > { %v2807_v29 = vsel %vm1221_vm9, %v2792_v18, %v2806_v31  ;;  %v2809_v12 = vsel %vm1221_vm9, %v2794_v61, %v2808_v37  ;;  %v2798_v41 = vpop.permute.xlu0 %2797  ;;  %v2888_v42 = vpop.permute.xlu1 %2887  ;;  %v15772_v18 = vrot.slane %v4127_v63, %v14962_v5 }
 0x189   : > { %2819 = vst [vmem:[#allocation2 + $0xe0] sm:$0x22] %v2807_v29  ;;  %2820 = vst [vmem:[#allocation2 + $0xe8] sm:$0x22] %v2809_v12  ;;  %v2803_v45 = vrot.slane %v2798_v41, 4  ;;  %v2897_v52 = vrot.slane %v2888_v42, 4 }
 0x18a   : > { %3978 = vrot.lane.b32.xlu0 %v15710_v25, %s14850_s9  ;;  %3980 = vrot.lane.b32.xlu1 %v15703_v24, %s14850_s9 }
 0x18b   : > { %v2810_v48 = vsel %vm427_vm1, %v2802_v47, %v2803_v45  ;;  %v2812_v33 = vsel %vm1221_vm9, %v2798_v41, %v2803_v45 }
 0x18c   : > { %v2811_v4 = vsel %vm1221_vm9, %v2796_v22, %v2810_v48  ;;  %2822 = vst [vmem:[#allocation2 + $0xf8] sm:$0x2] %v2812_v33  ;;  %v2890_v49 = vpop.permute.xlu0 %2889  ;;  %v2892_v50 = vpop.permute.xlu1 %2891  ;;  %vm3003_vm9 = vcmask 900096   ;;  %v4165_v22 = vcombine.low %v4164_v14, %v4164_v14 }
 0x18d   : > { %2821 = vst [vmem:[#allocation2 + $0xf0] sm:$0x22] %v2811_v4  ;;  %v2898_v53 = vrot.slane %v2890_v49, 4  ;;  %v2899_v23 = vrot.slane %v2892_v50, 4 }
 0x18e   : > { %3982 = vrot.lane.b32.xlu0 %v15726_v35, %s14850_s9  ;;  %4073 = vrot.lane.b32.xlu1 %v15730_v39, %s14851_s10  ;;  %v4172_v12 = vrot.slane %v4165_v22, %v14962_v5  ;;  %s14866_s9 = smov 82  }
 0x18f   : > { %v2902_v58 = vsel %vm427_vm1, %v2897_v52, %v2898_v53  ;;  %v2905_v59 = vsel %vm427_vm1, %v2898_v53, %v2899_v23 }
 0x190   : > { %v2894_v43 = vpop.permute.xlu0 %2893  ;;  %v2904_v44 = vsel %vm2903_vm11, %v2888_v42, %v2902_v58  ;;  %v2906_v60 = vsel %vm2903_vm11, %v2890_v49, %v2905_v59  ;;  %v2896_v51 = vpop.permute.xlu1 %2895  ;;  %v4228_v49 = vcombine.high %v15674_v1, %v15674_v1 }
 0x191   : > { %v2900_v27 = vrot.slane %v2894_v43, 4  ;;  %2917 = vst [vmem:[#allocation2 + $0xd8] sm:$0x44] %v2904_v44  ;;  %2918 = vst [vmem:[#allocation2 + $0xe0] sm:$0x44] %v2906_v60  ;;  %v2901_v30 = vrot.slane %v2896_v51, 4 }
 0x192   : > { %4075 = vrot.lane.b32.xlu0 %v15743_v54, %s14851_s10  ;;  %4077 = vrot.lane.b32.xlu1 %v15690_v34, %s14851_s10  ;;  %v15807_v1 = vrot.slane %v4228_v49, %v14962_v5 }
 0x193   : > { %v2907_v9 = vsel %vm427_vm1, %v2899_v23, %v2900_v27  ;;  %v2909_v17 = vsel %vm427_vm1, %v2900_v27, %v2901_v30  ;;  %v2911_v20 = vsel %vm2903_vm11, %v2896_v51, %v2901_v30 }
 0x194   : > { %v2908_v6 = vsel %vm2903_vm11, %v2892_v50, %v2907_v9  ;;  %v2910_v2 = vsel %vm2903_vm11, %v2894_v43, %v2909_v17  ;;  %2921 = vst [vmem:[#allocation2 + $0xf8] sm:$0x4] %v2911_v20  ;;  %v2988_v7 = vpop.permute.xlu0 %2987  ;;  %v2990_v10 = vpop.permute.xlu1 %2989  ;;  %v15811_v43 = vrot.slane %v15698_v21, %v14962_v5  ;;  %vm3891_vm11 = vcmask 711680  }
 0x195   : > { %2919 = vst [vmem:[#allocation2 + $0xe8] sm:$0x44] %v2908_v6  ;;  %2920 = vst [vmem:[#allocation2 + $0xf0] sm:$0x44] %v2910_v2  ;;  %v2997_v32 = vrot.slane %v2988_v7, 4  ;;  %v2998_v55 = vrot.slane %v2990_v10, 4 }
 0x196   : > { %4079 = vrot.lane.b32.xlu0 %v15757_v28, %s14851_s10  ;;  %4081 = vrot.lane.b32.xlu1 %v4072_v62, %s14851_s10  ;;  %s14867_s10 = smov 81  }
 0x197   : > { %v3002_v11 = vsel %vm427_vm1, %v2997_v32, %v2998_v55 }
 0x198   : > { %v2992_v16 = vpop.permute.xlu0 %2991  ;;  %v2994_v13 = vpop.permute.xlu1 %2993  ;;  %v3004_v15 = vsel %vm3003_vm9, %v2988_v7, %v3002_v11 }
 0x199   : > { %v2999_v19 = vrot.slane %v2992_v16, 4  ;;  %v3000_v61 = vrot.slane %v2994_v13, 4  ;;  %3017 = vst [vmem:[#allocation2 + $0xd8] sm:$0x88] %v3004_v15 }
 0x19a   : > { %4173 = vrot.lane.b32.xlu0 %v15772_v18, %s14852_s12  ;;  %4175 = vrot.lane.b32.xlu1 %v15730_v39, %s14852_s12  ;;  %v14539_v15 = vld [vmem:[%s14967_s22 + $0x9] ss:$0 sps:$4 sm:$0x33]  }
 0x19b   : > { %v3005_v57 = vsel %vm427_vm1, %v2998_v55, %v2999_v19  ;;  %v3007_v47 = vsel %vm427_vm1, %v2999_v19, %v3000_v61 }
 0x19c   : > { %v2996_v26 = vpop.permute.xlu0 %2995  ;;  %v3006_v38 = vsel %vm3003_vm9, %v2990_v10, %v3005_v57  ;;  %v3008_v31 = vsel %vm3003_vm9, %v2992_v16, %v3007_v47  ;;  %v3086_v37 = vpop.permute.xlu1 %3085 }
 0x19d   : > { %v3001_v29 = vrot.slane %v2996_v26, 4  ;;  %3018 = vst [vmem:[#allocation2 + $0xe0] sm:$0x88] %v3006_v38  ;;  %3019 = vst [vmem:[#allocation2 + $0xe8] sm:$0x88] %v3008_v31  ;;  %v3095_v48 = vrot.slane %v3086_v37, 4 }
 0x19e   : > { %4177 = vrot.lane.b32.xlu0 %v15682_v36, %s14852_s12  ;;  %4179 = vrot.lane.b32.xlu1 %v15690_v34, %s14852_s12 }
 0x19f   : > { %v3009_v41 = vsel %vm427_vm1, %v3000_v61, %v3001_v29  ;;  %v3011_v42 = vsel %vm3003_vm9, %v2996_v26, %v3001_v29 }
 0x1a0   : > { %v3010_v45 = vsel %vm3003_vm9, %v2994_v13, %v3009_v41  ;;  %3021 = vst [vmem:[#allocation2 + $0xf8] sm:$0x8] %v3011_v42  ;;  %v3088_v40 = vpop.permute.xlu0 %3087  ;;  %v3090_v46 = vpop.permute.xlu1 %3089  ;;  %vm4089_vm9 = vcmask 695296  }
 0x1a1   : > { %3020 = vst [vmem:[#allocation2 + $0xf0] sm:$0x88] %v3010_v45  ;;  %v3096_v33 = vrot.slane %v3088_v40, 4  ;;  %v3097_v4 = vrot.slane %v3090_v46, 4 }
 0x1a2   : > { %4181 = vrot.lane.b32.xlu0 %v4172_v12, %s14852_s12  ;;  %4271 = vrot.lane.b32.xlu1 %v15690_v34, %s19247_s25 }
 0x1a3   : > { %v3100_v50 = vsel %vm427_vm1, %v3095_v48, %v3096_v33  ;;  %v3103_v52 = vsel %vm427_vm1, %v3096_v33, %v3097_v4 }
 0x1a4   : > { %v3092_v53 = vpop.permute.xlu0 %3091  ;;  %v3102_v23 = vsel %vm3101_vm12, %v3086_v37, %v3100_v50  ;;  %v3104_v56 = vsel %vm3101_vm12, %v3088_v40, %v3103_v52  ;;  %v3094_v8 = vpop.permute.xlu1 %3093  ;;  %v4460_v37 = vrot.slane %v14539_v15, %v14962_v5 }
 0x1a5   : > { %v3098_v58 = vrot.slane %v3092_v53, 4  ;;  %3115 = vst [vmem:[#allocation2 + $0xfc] sm:$0x11] %v3102_v23  ;;  %3116 = vst [vmem:[#allocation2 + $0x104] sm:$0x11] %v3104_v56  ;;  %v3099_v59 = vrot.slane %v3094_v8, 4 }
 0x1a6   : > { %4273 = vrot.lane.b32.xlu0 %v15757_v28, %s19247_s25  ;;  %4275 = vrot.lane.b32.xlu1 %v15703_v24, %s19247_s25  ;;  %v4467_v33 = vrot.slane %v4460_v37, %v14962_v5 }
 0x1a7   : > { %v3105_v44 = vsel %vm427_vm1, %v3097_v4, %v3098_v58  ;;  %v3107_v60 = vsel %vm427_vm1, %v3098_v58, %v3099_v59  ;;  %v3109_v51 = vsel %vm3101_vm12, %v3094_v8, %v3099_v59  ;;  %v14540_v4 = vld [vmem:[%s14967_s22 + $0x9] ss:$0 sps:$4 sm:$0x33]  }
 0x1a8   : > { %v3106_v27 = vsel %vm3101_vm12, %v3090_v46, %v3105_v44  ;;  %v3108_v30 = vsel %vm3101_vm12, %v3092_v53, %v3107_v60  ;;  %3119 = vst [vmem:[#allocation2 + $0x11c] sm:$0x1] %v3109_v51  ;;  %v3185_v62 = vpop.permute.xlu0 %3184  ;;  %v3187_v63 = vpop.permute.xlu1 %3186  ;;  %v4559_v44 = vrot.slane %v14540_v4, %v14962_v5  ;;  %vm4189_vm12 = vcmask 687104  }
 0x1a9   : > { %3117 = vst [vmem:[#allocation2 + $0x10c] sm:$0x11] %v3106_v27  ;;  %3118 = vst [vmem:[#allocation2 + $0x114] sm:$0x11] %v3108_v30  ;;  %v3194_v0 = vrot.slane %v3185_v62, 4  ;;  %v3195_v9 = vrot.slane %v3187_v63, 4 }
 0x1aa   : > { %4277 = vrot.lane.b32.xlu0 %v15807_v1, %s19247_s25  ;;  %4279 = vrot.lane.b32.xlu1 %v15811_v43, %s19247_s25 }
 0x1ab   : > { %v3199_v21 = vsel %vm427_vm1, %v3194_v0, %v3195_v9  ;;  %v4560_v0 = vcombine.low %v4559_v44, %v4559_v44 }
 0x1ac   : > { %v3189_v17 = vpop.permute.xlu0 %3188  ;;  %v3191_v20 = vpop.permute.xlu1 %3190  ;;  %v3201_v6 = vsel %vm3200_vm13, %v3185_v62, %v3199_v21 }
 0x1ad   : > { %v3196_v2 = vrot.slane %v3189_v17, 4  ;;  %v3197_v7 = vrot.slane %v3191_v20, 4  ;;  %3214 = vst [vmem:[#allocation2 + $0xfc] sm:$0x22] %v3201_v6 }
 0x1ae   : > { %4369 = vrot.lane.b32.xlu0 %v15682_v36, %s14853_s13  ;;  %4371 = vrot.lane.b32.xlu1 %v15690_v34, %s14853_s13 }
 0x1af   : > { %v3202_v10 = vsel %vm427_vm1, %v3195_v9, %v3196_v2  ;;  %v3204_v32 = vsel %vm427_vm1, %v3196_v2, %v3197_v7 }
 0x1b0   : > { %v3193_v55 = vpop.permute.xlu0 %3192  ;;  %v3203_v14 = vsel %vm3200_vm13, %v3187_v63, %v3202_v10  ;;  %v3205_v11 = vsel %vm3200_vm13, %v3189_v17, %v3204_v32  ;;  %v3284_v16 = vpop.permute.xlu1 %3283  ;;  %v4567_v10 = vrot.slane %v4560_v0, %v14962_v5  ;;  %v14547_v0 = vld [vmem:[%s14967_s22 + $0x9] ss:$0 sps:$4 sm:$0x33]  }
 0x1b1   : > { %v3198_v13 = vrot.slane %v3193_v55, 4  ;;  %3215 = vst [vmem:[#allocation2 + $0x104] sm:$0x22] %v3203_v14  ;;  %3216 = vst [vmem:[#allocation2 + $0x10c] sm:$0x22] %v3205_v11  ;;  %v3293_v26 = vrot.slane %v3284_v16, 4 }
 0x1b2   : > { %4373 = vrot.lane.b32.xlu0 %v15710_v25, %s14853_s13  ;;  %4375 = vrot.lane.b32.xlu1 %v15703_v24, %s14853_s13 }
 0x1b3   : > { %v3206_v19 = vsel %vm427_vm1, %v3197_v7, %v3198_v13  ;;  %v3208_v61 = vsel %vm3200_vm13, %v3193_v55, %v3198_v13 }
 0x1b4   : > { %v3207_v22 = vsel %vm3200_vm13, %v3191_v20, %v3206_v19  ;;  %3218 = vst [vmem:[#allocation2 + $0x11c] sm:$0x2] %v3208_v61  ;;  %v3286_v57 = vpop.permute.xlu0 %3285  ;;  %v3288_v47 = vpop.permute.xlu1 %3287  ;;  %vm4385_vm13 = vcmask 613376  }
 0x1b5   : > { %3217 = vst [vmem:[#allocation2 + $0x114] sm:$0x22] %v3207_v22  ;;  %v3294_v38 = vrot.slane %v3286_v57, 4  ;;  %v3295_v31 = vrot.slane %v3288_v47, 4 }
 0x1b6   : > { %4377 = vrot.lane.b32.xlu0 %v15726_v35, %s14853_s13  ;;  %4468 = vrot.lane.b32.xlu1 %v15730_v39, %s14854_s14  ;;  %s14869_s13 = smov 70  }
 0x1b7   : > { %v3298_v29 = vsel %vm427_vm1, %v3293_v26, %v3294_v38  ;;  %v3300_v12 = vsel %vm427_vm1, %v3294_v38, %v3295_v31 }
 0x1b8   : > { %v3299_v41 = vsel %vm1716_vm14, %v3284_v16, %v3298_v29  ;;  %v3301_v42 = vsel %vm1716_vm14, %v3286_v57, %v3300_v12  ;;  %v3290_v45 = vpop.permute.xlu0 %3289  ;;  %v3292_v40 = vpop.permute.xlu1 %3291 }
 0x1b9   : > { %3312 = vst [vmem:[#allocation2 + $0xfc] sm:$0x44] %v3299_v41  ;;  %3313 = vst [vmem:[#allocation2 + $0x104] sm:$0x44] %v3301_v42  ;;  %v3296_v46 = vrot.slane %v3290_v45, 4  ;;  %v3297_v48 = vrot.slane %v3292_v40, 4 }
 0x1ba   : > { %4470 = vrot.lane.b32.xlu0 %v15743_v54, %s14854_s14  ;;  %4472 = vrot.lane.b32.xlu1 %v15690_v34, %s14854_s14 }
 0x1bb   : > { %v3302_v49 = vsel %vm427_vm1, %v3295_v31, %v3296_v46  ;;  %v3304_v50 = vsel %vm427_vm1, %v3296_v46, %v3297_v48  ;;  %v3306_v52 = vsel %vm1716_vm14, %v3292_v40, %v3297_v48 }
 0x1bc   : > { %v3303_v53 = vsel %vm1716_vm14, %v3288_v47, %v3302_v49  ;;  %v3305_v23 = vsel %vm1716_vm14, %v3290_v45, %v3304_v50  ;;  %3316 = vst [vmem:[#allocation2 + $0x11c] sm:$0x4] %v3306_v52  ;;  %v3383_v56 = vpop.permute.xlu0 %3382  ;;  %v3385_v8 = vpop.permute.xlu1 %3384  ;;  %vm3496_vm14 = vcmask 801792  }
 0x1bd   : > { %3314 = vst [vmem:[#allocation2 + $0x10c] sm:$0x44] %v3303_v53  ;;  %3315 = vst [vmem:[#allocation2 + $0x114] sm:$0x44] %v3305_v23  ;;  %v3392_v58 = vrot.slane %v3383_v56, 4  ;;  %v3393_v59 = vrot.slane %v3385_v8, 4 }
 0x1be   : > { %4474 = vrot.lane.b32.xlu0 %v15757_v28, %s14854_s14  ;;  %4476 = vrot.lane.b32.xlu1 %v4467_v33, %s14854_s14  ;;  %s14870_s14 = smov 69  }
 0x1bf   : > { %v3397_v60 = vsel %vm427_vm1, %v3392_v58, %v3393_v59 }
 0x1c0   : > { %v3387_v51 = vpop.permute.xlu0 %3386  ;;  %v3389_v27 = vpop.permute.xlu1 %3388  ;;  %v3399_v30 = vsel %vm3398_vm0, %v3383_v56, %v3397_v60 }
 0x1c1   : > { %v3394_v62 = vrot.slane %v3387_v51, 4  ;;  %v3395_v63 = vrot.slane %v3389_v27, 4  ;;  %3412 = vst [vmem:[#allocation2 + $0xfc] sm:$0x88] %v3399_v30 }
 0x1c2   : > { %4568 = vrot.lane.b32.xlu0 %v15772_v18, %s14855_s19  ;;  %4570 = vrot.lane.b32.xlu1 %v15730_v39, %s14855_s19 }
 0x1c3   : > { %v3400_v9 = vsel %vm427_vm1, %v3393_v59, %v3394_v62  ;;  %v3402_v21 = vsel %vm427_vm1, %v3394_v62, %v3395_v63 }
 0x1c4   : > { %v3391_v17 = vpop.permute.xlu0 %3390  ;;  %v3401_v20 = vsel %vm3398_vm0, %v3385_v8, %v3400_v9  ;;  %v3403_v6 = vsel %vm3398_vm0, %v3387_v51, %v3402_v21  ;;  %v3481_v2 = vpop.permute.xlu1 %3480 }
 0x1c5   : > { %v3396_v7 = vrot.slane %v3391_v17, 4  ;;  %3413 = vst [vmem:[#allocation2 + $0x104] sm:$0x88] %v3401_v20  ;;  %3414 = vst [vmem:[#allocation2 + $0x10c] sm:$0x88] %v3403_v6  ;;  %v3490_v19 = vrot.slane %v3481_v2, 4 }
 0x1c6   : > { %4572 = vrot.lane.b32.xlu0 %v15682_v36, %s14855_s19  ;;  %4574 = vrot.lane.b32.xlu1 %v15690_v34, %s14855_s19 }
 0x1c7   : > { %v3404_v32 = vsel %vm427_vm1, %v3395_v63, %v3396_v7  ;;  %v3406_v55 = vsel %vm3398_vm0, %v3391_v17, %v3396_v7 }
 0x1c8   : > { %v3405_v14 = vsel %vm3398_vm0, %v3389_v27, %v3404_v32  ;;  %3416 = vst [vmem:[#allocation2 + $0x11c] sm:$0x8] %v3406_v55  ;;  %v3483_v11 = vpop.permute.xlu0 %3482  ;;  %v3485_v16 = vpop.permute.xlu1 %3484  ;;  %v14541_v13 = vld [vmem:[#allocation2 + $0xdc] ss:$36 sps:$4 sm:$0xff]   ;;  %vm4484_vm0 = vcmask 605184  }
 0x1c9   : > { %v14543_v15 = vld [vmem:[#allocation2 + $0xd8] ss:$36 sps:$4 sm:$0xff]   ;;  %3415 = vst [vmem:[#allocation2 + $0x114] sm:$0x88] %v3405_v14  ;;  %v3491_v61 = vrot.slane %v3483_v11, 4  ;;  %v3492_v22 = vrot.slane %v3485_v16, 4  ;;  %13533 = vmatprep.subr.bf16.mxu0 %v14541_v13 }
 0x1ca   : > { %4576 = vrot.lane.b32.xlu0 %v4567_v10, %s14855_s19  ;;  %4666 = vrot.lane.b32.xlu1 %v15690_v34, %s14856_s26  ;;  %s19245_s19 = smov 68  }
 0x1cb   : > { %v3495_v57 = vsel %vm427_vm1, %v3490_v19, %v3491_v61  ;;  %v3498_v47 = vsel %vm427_vm1, %v3491_v61, %v3492_v22  ;;  %13534 = vmatpush1.bf16.msra.mxu0 %v14543_v15  ;;  %v14548_v61 = vld [vmem:[%s14967_s22 + $0x9] ss:$0 sps:$4 sm:$0x33]  }
 0x1cc   : > { %v3487_v26 = vpop.permute.xlu0 %3486  ;;  %v3497_v38 = vsel %vm3496_vm14, %v3481_v2, %v3495_v57  ;;  %v3499_v31 = vsel %vm3496_vm14, %v3483_v11, %v3498_v47  ;;  %v3489_v37 = vpop.permute.xlu1 %3488  ;;  %v14544_v29 = vld [vmem:[#allocation2 + $0xe4] ss:$36 sps:$4 sm:$0xff]  }
 0x1cd   : > { %v14546_v12 = vld [vmem:[#allocation2 + $0xe0] ss:$36 sps:$4 sm:$0xff]   ;;  %v3493_v41 = vrot.slane %v3487_v26, 4  ;;  %3510 = vst [vmem:[#allocation2 + $0x120] sm:$0x11] %v3497_v38  ;;  %v3494_v42 = vrot.slane %v3489_v37, 4  ;;  %13576 = vmatprep.subr.bf16.mxu1 %v14544_v29 }
 0x1ce   : > { %3511 = vst [vmem:[#allocation2 + $0x128] sm:$0x11] %v3499_v31  ;;  %4668 = vrot.lane.b32.xlu0 %v15757_v28, %s14856_s26  ;;  %4670 = vrot.lane.b32.xlu1 %v15703_v24, %s14856_s26 }
 0x1cf   : > { %v3500_v45 = vsel %vm427_vm1, %v3492_v22, %v3493_v41  ;;  %v3502_v40 = vsel %vm427_vm1, %v3493_v41, %v3494_v42  ;;  %v3504_v46 = vsel %vm3496_vm14, %v3489_v37, %v3494_v42  ;;  %13577 = vmatpush1.bf16.msra.mxu1 %v14546_v12  ;;  %v4955_v12 = vrot.slane %v14548_v61, %v14962_v5 }
 0x1d0   : > { %v3501_v48 = vsel %vm3496_vm14, %v3485_v16, %v3500_v45  ;;  %v3503_v33 = vsel %vm3496_vm14, %v3487_v26, %v3502_v40  ;;  %3514 = vst [vmem:[#allocation2 + $0x140] sm:$0x1] %v3504_v46  ;;  %v3580_v4 = vpop.permute.xlu0 %3579  ;;  %v3582_v49 = vpop.permute.xlu1 %3581  ;;  %vm4584_vm14 = vcmask 596992  }
 0x1d1   : > { %3512 = vst [vmem:[#allocation2 + $0x130] sm:$0x11] %v3501_v48  ;;  %3513 = vst [vmem:[#allocation2 + $0x138] sm:$0x11] %v3503_v33  ;;  %v3589_v50 = vrot.slane %v3580_v4, 4  ;;  %v3590_v52 = vrot.slane %v3582_v49, 4  ;;  %v4956_v33 = vcombine.low %v4955_v12, %v4955_v12 }
 0x1d2   : > { %4672 = vrot.lane.b32.xlu0 %v15807_v1, %s14856_s26  ;;  %4674 = vrot.lane.b32.xlu1 %v15811_v43, %s14856_s26 }
 0x1d3   : > { %v3594_v53 = vsel %vm427_vm1, %v3589_v50, %v3590_v52 }
 0x1d4   : > { %v3584_v23 = vpop.permute.xlu0 %3583  ;;  %v3586_v56 = vpop.permute.xlu1 %3585  ;;  %v3596_v8 = vsel %vm3595_vm2, %v3580_v4, %v3594_v53 }
 0x1d5   : > { %v3591_v58 = vrot.slane %v3584_v23, 4  ;;  %v3592_v59 = vrot.slane %v3586_v56, 4  ;;  %3609 = vst [vmem:[#allocation2 + $0x120] sm:$0x22] %v3596_v8 }
 0x1d6   : > { %4765 = vrot.lane.b32.xlu0 %v15682_v36, %s19222_s27  ;;  %4767 = vrot.lane.b32.xlu1 %v15690_v34, %s19222_s27 }
 0x1d7   : > { %v3597_v44 = vsel %vm427_vm1, %v3590_v52, %v3591_v58  ;;  %v3599_v60 = vsel %vm427_vm1, %v3591_v58, %v3592_v59  ;;  %v5097_v58 = vld [vmem:[%s14967_s22 + $0x1] sm:$0xff] }
 0x1d8   : > { %v3588_v51 = vpop.permute.xlu0 %3587  ;;  %v3598_v27 = vsel %vm3595_vm2, %v3582_v49, %v3597_v44  ;;  %v3600_v30 = vsel %vm3595_vm2, %v3584_v23, %v3599_v60  ;;  %v3679_v62 = vpop.permute.xlu1 %3678 }
 0x1d9   : > { %v3593_v63 = vrot.slane %v3588_v51, 4  ;;  %3610 = vst [vmem:[#allocation2 + $0x128] sm:$0x22] %v3598_v27  ;;  %3611 = vst [vmem:[#allocation2 + $0x130] sm:$0x22] %v3600_v30  ;;  %v3688_v2 = vrot.slane %v3679_v62, 4  ;;  %v5101_v30 = vcombine.high %v5097_v58, %v5097_v58 }
 0x1da   : > { %4769 = vrot.lane.b32.xlu0 %v15710_v25, %s19222_s27  ;;  %4771 = vrot.lane.b32.xlu1 %v15703_v24, %s19222_s27  ;;  %v4856_v25 = vrot.slane %v14547_v0, %v14962_v5 }
 0x1db   : > { %v3601_v9 = vsel %vm427_vm1, %v3592_v59, %v3593_v63  ;;  %v3603_v21 = vsel %vm3595_vm2, %v3588_v51, %v3593_v63 }
 0x1dc   : > { %v3602_v17 = vsel %vm3595_vm2, %v3586_v56, %v3601_v9  ;;  %3613 = vst [vmem:[#allocation2 + $0x140] sm:$0x2] %v3603_v21  ;;  %v3681_v20 = vpop.permute.xlu0 %3680  ;;  %v3683_v6 = vpop.permute.xlu1 %3682  ;;  %v4863_v19 = vrot.slane %v4856_v25, %v14962_v5  ;;  %vm4682_vm2 = vcmask 588800  }
 0x1dd   : > { %3612 = vst [vmem:[#allocation2 + $0x138] sm:$0x22] %v3602_v17  ;;  %v3689_v7 = vrot.slane %v3681_v20, 4  ;;  %v3690_v10 = vrot.slane %v3683_v6, 4 }
 0x1de   : > { %4773 = vrot.lane.b32.xlu0 %v15726_v35, %s19222_s27  ;;  %4864 = vrot.lane.b32.xlu1 %v15730_v39, %s19203_s28 }
 0x1df   : > { %v3693_v32 = vsel %vm427_vm1, %v3688_v2, %v3689_v7  ;;  %v3696_v55 = vsel %vm427_vm1, %v3689_v7, %v3690_v10  ;;  %v5115_v7 = vrot.slane %v5101_v30, %v14962_v5 }
 0x1e0   : > { %v3695_v14 = vsel %vm3694_vm3, %v3679_v62, %v3693_v32  ;;  %v3697_v11 = vsel %vm3694_vm3, %v3681_v20, %v3696_v55  ;;  %v3685_v16 = vpop.permute.xlu0 %3684  ;;  %v3687_v13 = vpop.permute.xlu1 %3686  ;;  %v5108_v62 = vrot.slane %v5097_v58, %v14962_v5  ;;  %v15970_v55 = vld [vmem:[%s14967_s22 + $0x2] sm:$0xff] }
 0x1e1   : > { %3708 = vst [vmem:[#allocation2 + $0x120] sm:$0x44] %v3695_v14  ;;  %3709 = vst [vmem:[#allocation2 + $0x128] sm:$0x44] %v3697_v11  ;;  %v3691_v35 = vrot.slane %v3685_v16, 4  ;;  %v3692_v15 = vrot.slane %v3687_v13, 4  ;;  %v5200_v61 = vcombine.low %v15970_v55, %v15970_v55 }
 0x1e2   : > { %4866 = vrot.lane.b32.xlu0 %v15743_v54, %s19203_s28  ;;  %4868 = vrot.lane.b32.xlu1 %v15690_v34, %s19203_s28 }
 0x1e3   : > { %v3698_v22 = vsel %vm427_vm1, %v3690_v10, %v3691_v35  ;;  %v3700_v57 = vsel %vm427_vm1, %v3691_v35, %v3692_v15  ;;  %v3702_v47 = vsel %vm3694_vm3, %v3687_v13, %v3692_v15  ;;  %v5117_v35 = vcombine.low %v5115_v7, %v5115_v7 }
 0x1e4   : > { %v3699_v26 = vsel %vm3694_vm3, %v3683_v6, %v3698_v22  ;;  %v3701_v38 = vsel %vm3694_vm3, %v3685_v16, %v3700_v57  ;;  %3712 = vst [vmem:[#allocation2 + $0x140] sm:$0x4] %v3702_v47  ;;  %v3779_v31 = vpop.permute.xlu0 %3778  ;;  %v3781_v37 = vpop.permute.xlu1 %3780  ;;  %v14130_v57 = vld.sshfl [vmem:[%s14967_s22 + $0x9] sm:$0x5 pattern:$0x73625140] }
 0x1e5   : > { %3710 = vst [vmem:[#allocation2 + $0x130] sm:$0x44] %v3699_v26  ;;  %3711 = vst [vmem:[#allocation2 + $0x138] sm:$0x44] %v3701_v38  ;;  %v3788_v54 = vrot.slane %v3779_v31, 4  ;;  %v3789_v29 = vrot.slane %v3781_v37, 4 }
 0x1e6   : > { %4870 = vrot.lane.b32.xlu0 %v15757_v28, %s19203_s28  ;;  %4872 = vrot.lane.b32.xlu1 %v4863_v19, %s19203_s28  ;;  %v5131_v19 = vrot.slane %v5108_v62, %v14962_v5 }
 0x1e7   : > { %v3793_v41 = vsel %vm427_vm1, %v3788_v54, %v3789_v29  ;;  %v5153_v54 = vcombine.low %v14130_v57, %v14130_v57 }
 0x1e8   : > { %v3794_v42 = vsel %vm2212_vm4, %v3779_v31, %v3793_v41  ;;  %v3783_v45 = vpop.permute.xlu0 %3782  ;;  %v3785_v40 = vpop.permute.xlu1 %3784 }
 0x1e9   : > { %3807 = vst [vmem:[#allocation2 + $0x120] sm:$0x88] %v3794_v42  ;;  %v3790_v46 = vrot.slane %v3783_v45, 4  ;;  %v3791_v48 = vrot.slane %v3785_v40, 4 }
 0x1ea   : > { %4964 = vrot.lane.b32.xlu0 %v15772_v18, %s19206_s29  ;;  %4966 = vrot.lane.b32.xlu1 %v15730_v39, %s19206_s29  ;;  %v4963_v39 = vrot.slane %v4956_v33, %v14962_v5 }
 0x1eb   : > { %v3795_v4 = vsel %vm427_vm1, %v3789_v29, %v3790_v46  ;;  %v3797_v49 = vsel %vm427_vm1, %v3790_v46, %v3791_v48  ;;  %v15990_v29 = vrot.slane %v5200_v61, %v14962_v5 }
 0x1ec   : > { %v3796_v50 = vsel %vm2212_vm4, %v3781_v37, %v3795_v4  ;;  %v3798_v52 = vsel %vm2212_vm4, %v3783_v45, %v3797_v49  ;;  %v3787_v53 = vpop.permute.xlu0 %3786  ;;  %v3876_v23 = vpop.permute.xlu1 %3875  ;;  %v5160_v4 = vrot.slane %v5153_v54, %v14962_v5 }
 0x1ed   : > { %3808 = vst [vmem:[#allocation2 + $0x128] sm:$0x88] %v3796_v50  ;;  %3809 = vst [vmem:[#allocation2 + $0x130] sm:$0x88] %v3798_v52  ;;  %v3792_v56 = vrot.slane %v3787_v53, 4  ;;  %v3885_v51 = vrot.slane %v3876_v23, 4  ;;  %v5215_v33 = vcombine.high %v15990_v29, %v15990_v29  ;;  %v16003_v49 = vrot.slane %v15990_v29, %v14962_v5 }
 0x1ee   : > { %4968 = vrot.lane.b32.xlu0 %v15682_v36, %s19206_s29  ;;  %4970 = vrot.lane.b32.xlu1 %v15690_v34, %s19206_s29  ;;  %v16007_v50 = vrot.slane %v15970_v55, %v14962_v5  ;;  %v14551_v52 = vld [vmem:[%s14967_s22 + $0xa] ss:$0 sps:$4 sm:$0x33]  }
 0x1ef   : > { %v3799_v18 = vsel %vm427_vm1, %v3791_v48, %v3792_v56  ;;  %v3801_v8 = vsel %vm2212_vm4, %v3787_v53, %v3792_v56 }
 0x1f0   : > { %v3800_v59 = vsel %vm2212_vm4, %v3785_v40, %v3799_v18  ;;  %3811 = vst [vmem:[#allocation2 + $0x140] sm:$0x8] %v3801_v8  ;;  %v3878_v44 = vpop.permute.xlu0 %3877  ;;  %v3880_v60 = vpop.permute.xlu1 %3879  ;;  %vm3990_vm4 = vcmask 703488  }
 0x1f1   : > { %3810 = vst [vmem:[#allocation2 + $0x138] sm:$0x88] %v3800_v59  ;;  %v3886_v27 = vrot.slane %v3878_v44, 4  ;;  %v3887_v36 = vrot.slane %v3880_v60, 4 }
 0x1f2   : > { %4972 = vrot.lane.b32.xlu0 %v4963_v39, %s19206_s29  ;;  %5062 = vrot.lane.b32.xlu1 %v15690_v34, %s19120_s30  ;;  %v5116_v34 = vcombine.low %v5108_v62, %v5108_v62 }
 0x1f3   : > { %v3890_v63 = vsel %vm427_vm1, %v3885_v51, %v3886_v27  ;;  %v3893_v0 = vsel %vm427_vm1, %v3886_v27, %v3887_v36  ;;  %v5216_v51 = vcombine.high %v16007_v50, %v16007_v50  ;;  %v5252_v27 = vrot.slane %v14551_v52, %v14962_v5 }
 0x1f4   : > { %v3882_v9 = vpop.permute.xlu0 %3881  ;;  %v3892_v21 = vsel %vm3891_vm11, %v3876_v23, %v3890_v63  ;;  %v3894_v17 = vsel %vm3891_vm11, %v3878_v44, %v3893_v0  ;;  %v3884_v20 = vpop.permute.xlu1 %3883  ;;  %v5124_v15 = vrot.slane %v5116_v34, %v14962_v5  ;;  %v16014_v44 = vrot.slane %v5215_v33, %v14962_v5 }
 0x1f5   : > { %v3888_v6 = vrot.slane %v3882_v9, 4  ;;  %3905 = vst [vmem:[#allocation2 + $0x144] sm:$0x11] %v3892_v21  ;;  %3906 = vst [vmem:[#allocation2 + $0x14c] sm:$0x11] %v3894_v17  ;;  %v3889_v2 = vrot.slane %v3884_v20, 4 }
 0x1f6   : > { %5064 = vrot.lane.b32.xlu0 %v15757_v28, %s19120_s30  ;;  %5066 = vrot.lane.b32.xlu1 %v15703_v24, %s19120_s30 }
 0x1f7   : > { %v3895_v10 = vsel %vm427_vm1, %v3887_v36, %v3888_v6  ;;  %v3897_v25 = vsel %vm427_vm1, %v3888_v6, %v3889_v2  ;;  %v3899_v32 = vsel %vm3891_vm11, %v3884_v20, %v3889_v2  ;;  %v16035_v20 = vrot.slane %v5216_v51, %v14962_v5 }
 0x1f8   : > { %v3896_v14 = vsel %vm3891_vm11, %v3880_v60, %v3895_v10  ;;  %v3898_v11 = vsel %vm3891_vm11, %v3882_v9, %v3897_v25  ;;  %3909 = vst [vmem:[#allocation2 + $0x164] sm:$0x1] %v3899_v32  ;;  %v3975_v16 = vpop.permute.xlu0 %3974  ;;  %v3977_v28 = vpop.permute.xlu1 %3976  ;;  %v16021_v60 = vrot.slane %v16007_v50, %v14962_v5  ;;  %v5259_v6 = vrot.slane %v5252_v27, %v14962_v5 }
 0x1f9   : > { %3907 = vst [vmem:[#allocation2 + $0x154] sm:$0x11] %v3896_v14  ;;  %3908 = vst [vmem:[#allocation2 + $0x15c] sm:$0x11] %v3898_v11  ;;  %v3984_v24 = vrot.slane %v3975_v16, 4  ;;  %v3985_v13 = vrot.slane %v3977_v28, 4  ;;  %v5313_v2 = vcombine.low %v15990_v29, %v15990_v29 }
 0x1fa   : > { %5068 = vrot.lane.b32.xlu0 %v15807_v1, %s19120_s30  ;;  %5070 = vrot.lane.b32.xlu1 %v15811_v43, %s19120_s30  ;;  %v5138_v1 = vrot.slane %v5117_v35, %v14962_v5  ;;  %v5145_v43 = vrot.slane %v5115_v7, %v14962_v5  ;;  %v14552_v7 = vld [vmem:[%s14967_s22 + $0xa] ss:$0 sps:$4 sm:$0x33]   ;;  %v5314_v35 = vcombine.low %v16007_v50, %v16007_v50  ;;  %vm4781_vm11 = vcmask 523264  }
 0x1fb   : > { %v3989_v22 = vsel %vm427_vm1, %v3984_v24, %v3985_v13 }
 0x1fc   : > { %v3979_v47 = vpop.permute.xlu0 %3978  ;;  %v3981_v26 = vpop.permute.xlu1 %3980  ;;  %v3991_v38 = vsel %vm3990_vm4, %v3975_v16, %v3989_v22 }
 0x1fd   : > { %v3986_v31 = vrot.slane %v3979_v47, 4  ;;  %v3987_v37 = vrot.slane %v3981_v26, 4  ;;  %4004 = vst [vmem:[#allocation2 + $0x144] sm:$0x22] %v3991_v38  ;;  %v16062_v38 = vrot.slane %v5314_v35, %v14962_v5 }
 0x1fe   : > { %5161 = vrot.lane.b32.xlu0 %v5124_v15, %s19122_s5  ;;  %5163 = vrot.lane.b32.xlu1 %v5131_v19, %s19122_s5  ;;  %v5350_v15 = vrot.slane %v14552_v7, %v14962_v5 }
 0x1ff   : > { %v3992_v12 = vsel %vm427_vm1, %v3985_v13, %v3986_v31  ;;  %v3994_v41 = vsel %vm427_vm1, %v3986_v31, %v3987_v37  ;;  %v16050_v13 = vrot.slane %v5313_v2, %v14962_v5 }
 0x200   : > { %v3983_v42 = vpop.permute.xlu0 %3982  ;;  %v3993_v45 = vsel %vm3990_vm4, %v3977_v28, %v3992_v12  ;;  %v3995_v40 = vsel %vm3990_vm4, %v3979_v47, %v3994_v41  ;;  %v4074_v46 = vpop.permute.xlu1 %4073  ;;  %v5351_v31 = vcombine.low %v5350_v15, %v5350_v15 }
 0x201   : > { %v3988_v48 = vrot.slane %v3983_v42, 4  ;;  %4005 = vst [vmem:[#allocation2 + $0x14c] sm:$0x22] %v3993_v45  ;;  %4006 = vst [vmem:[#allocation2 + $0x154] sm:$0x22] %v3995_v40  ;;  %v4083_v8 = vrot.slane %v4074_v46, 4 }
 0x202   : > { %5165 = vrot.lane.b32.xlu0 %v5138_v1, %s19122_s5  ;;  %5167 = vrot.lane.b32.xlu1 %v5145_v43, %s19122_s5 }
 0x203   : > { %v3996_v53 = vsel %vm427_vm1, %v3987_v37, %v3988_v48  ;;  %v3998_v23 = vsel %vm3990_vm4, %v3983_v42, %v3988_v48  ;;  %v5398_v37 = vcombine.high %v15970_v55, %v15970_v55  ;;  %v5358_v55 = vrot.slane %v5351_v31, %v14962_v5 }
 0x204   : > { %v3997_v56 = vsel %vm3990_vm4, %v3981_v26, %v3996_v53  ;;  %4008 = vst [vmem:[#allocation2 + $0x164] sm:$0x2] %v3998_v23  ;;  %v4076_v39 = vpop.permute.xlu0 %4075  ;;  %v4078_v18 = vpop.permute.xlu1 %4077  ;;  %vm4880_vm4 = vcmask 515072  }
 0x205   : > { %4007 = vst [vmem:[#allocation2 + $0x15c] sm:$0x22] %v3997_v56  ;;  %v4084_v58 = vrot.slane %v4076_v39, 4  ;;  %v4085_v59 = vrot.slane %v4078_v18, 4  ;;  %v16076_v45 = vrot.slane %v5398_v37, %v14962_v5 }
 0x206   : > { %5169 = vrot.lane.b32.xlu0 %v5160_v4, %s19122_s5  ;;  %5260 = vrot.lane.b32.xlu1 %v16003_v49, %s14848_s7 }
 0x207   : > { %v4088_v36 = vsel %vm427_vm1, %v4083_v8, %v4084_v58  ;;  %v4091_v30 = vsel %vm427_vm1, %v4084_v58, %v4085_v59 }
 0x208   : > { %v4080_v62 = vpop.permute.xlu0 %4079  ;;  %v4090_v63 = vsel %vm4089_vm9, %v4074_v46, %v4088_v36  ;;  %v4092_v0 = vsel %vm4089_vm9, %v4076_v39, %v4091_v30  ;;  %v4082_v9 = vpop.permute.xlu1 %4081  ;;  %v16086_v39 = vrot.slane %v16076_v45, %v14962_v5 }
 0x209   : > { %v4086_v21 = vrot.slane %v4080_v62, 4  ;;  %4103 = vst [vmem:[#allocation2 + $0x144] sm:$0x44] %v4090_v63  ;;  %4104 = vst [vmem:[#allocation2 + $0x14c] sm:$0x44] %v4092_v0  ;;  %v4087_v17 = vrot.slane %v4082_v9, 4 }
 0x20a   : > { %5262 = vrot.lane.b32.xlu0 %v16014_v44, %s14848_s7  ;;  %5264 = vrot.lane.b32.xlu1 %v16021_v60, %s14848_s7 }
 0x20b   : > { %v4093_v34 = vsel %vm427_vm1, %v4085_v59, %v4086_v21  ;;  %v4095_v10 = vsel %vm427_vm1, %v4086_v21, %v4087_v17  ;;  %v4097_v25 = vsel %vm4089_vm9, %v4082_v9, %v4087_v17  ;;  %v14131_v59 = vld.sshfl [vmem:[%s14967_s22 + $0xa] sm:$0x5 pattern:$0x73625140] }
 0x20c   : > { %v4094_v32 = vsel %vm4089_vm9, %v4078_v18, %v4093_v34  ;;  %v4096_v14 = vsel %vm4089_vm9, %v4080_v62, %v4095_v10  ;;  %4107 = vst [vmem:[#allocation2 + $0x164] sm:$0x4] %v4097_v25  ;;  %v4174_v11 = vpop.permute.xlu0 %4173  ;;  %v4176_v16 = vpop.permute.xlu1 %4175  ;;  %v5414_v18 = vcombine.high %v16076_v45, %v16076_v45  ;;  %v16103_v17 = vrot.slane %v14131_v59, %v14962_v5 }
 0x20d   : > { %4105 = vst [vmem:[#allocation2 + $0x154] sm:$0x44] %v4094_v32  ;;  %4106 = vst [vmem:[#allocation2 + $0x15c] sm:$0x44] %v4096_v14  ;;  %v4183_v28 = vrot.slane %v4174_v11, 4  ;;  %v4184_v24 = vrot.slane %v4176_v16, 4 }
 0x20e   : > { %5266 = vrot.lane.b32.xlu0 %v16035_v20, %s14848_s7  ;;  %5268 = vrot.lane.b32.xlu1 %v5259_v6, %s14848_s7  ;;  %s14863_s7 = smov 94   ;;  %v16100_v21 = vrot.slane %v5414_v18, %v14962_v5  ;;  %vm4980_vm9 = vcmask 506880  }
 0x20f   : > { %v4188_v19 = vsel %vm427_vm1, %v4183_v28, %v4184_v24 }
 0x210   : > { %v4190_v61 = vsel %vm4189_vm12, %v4174_v11, %v4188_v19  ;;  %v4178_v22 = vpop.permute.xlu0 %4177  ;;  %v4180_v57 = vpop.permute.xlu1 %4179 }
 0x211   : > { %4203 = vst [vmem:[#allocation2 + $0x144] sm:$0x88] %v4190_v61  ;;  %v4185_v47 = vrot.slane %v4178_v22, 4  ;;  %v4186_v26 = vrot.slane %v4180_v57, 4 }
 0x212   : > { %5359 = vrot.lane.b32.xlu0 %v16050_v13, %s14862_s6  ;;  %5361 = vrot.lane.b32.xlu1 %v16003_v49, %s14862_s6 }
 0x213   : > { %v4191_v1 = vsel %vm427_vm1, %v4184_v24, %v4185_v47  ;;  %v4193_v43 = vsel %vm427_vm1, %v4185_v47, %v4186_v26 }
 0x214   : > { %v4192_v54 = vsel %vm4189_vm12, %v4176_v16, %v4191_v1  ;;  %v4194_v29 = vsel %vm4189_vm12, %v4178_v22, %v4193_v43  ;;  %v4182_v12 = vpop.permute.xlu0 %4181  ;;  %v4272_v41 = vpop.permute.xlu1 %4271  ;;  %v5512_v16 = vcombine.low %v16076_v45, %v16076_v45 }
 0x215   : > { %4204 = vst [vmem:[#allocation2 + $0x14c] sm:$0x88] %v4192_v54  ;;  %4205 = vst [vmem:[#allocation2 + $0x154] sm:$0x88] %v4194_v29  ;;  %v4187_v42 = vrot.slane %v4182_v12, 4  ;;  %v4281_v53 = vrot.slane %v4272_v41, 4 }
 0x216   : > { %5363 = vrot.lane.b32.xlu0 %v16062_v38, %s14862_s6  ;;  %5365 = vrot.lane.b32.xlu1 %v16021_v60, %s14862_s6  ;;  %v16121_v22 = vrot.slane %v5512_v16, %v14962_v5 }
 0x217   : > { %v4195_v40 = vsel %vm427_vm1, %v4186_v26, %v4187_v42  ;;  %v4197_v46 = vsel %vm4189_vm12, %v4182_v12, %v4187_v42  ;;  %v14560_v12 = vld [vmem:[%s14967_s22 + $0xa] ss:$0 sps:$4 sm:$0x33]  }
 0x218   : > { %v4196_v48 = vsel %vm4189_vm12, %v4180_v57, %v4195_v40  ;;  %4207 = vst [vmem:[#allocation2 + $0x164] sm:$0x8] %v4197_v46  ;;  %v4274_v33 = vpop.permute.xlu0 %4273  ;;  %v4276_v4 = vpop.permute.xlu1 %4275  ;;  %v14553_v50 = vld [vmem:[#allocation2 + $0x124] ss:$36 sps:$4 sm:$0xff]   ;;  %v5548_v57 = vcombine.low %v14131_v59, %v14131_v59 }
 0x219   : > { %v14555_v52 = vld [vmem:[#allocation2 + $0x120] ss:$36 sps:$4 sm:$0xff]   ;;  %4206 = vst [vmem:[#allocation2 + $0x15c] sm:$0x88] %v4196_v48  ;;  %v4282_v23 = vrot.slane %v4274_v33, 4  ;;  %v4283_v56 = vrot.slane %v4276_v4, 4  ;;  %13535 = vmatprep.subr.bf16.mxu0 %v14553_v50 }
 0x21a   : > { %5367 = vrot.lane.b32.xlu0 %v5358_v55, %s14862_s6  ;;  %5457 = vrot.lane.b32.xlu1 %v16021_v60, %s14863_s7  ;;  %v16130_v29 = vrot.slane %v5548_v57, %v14962_v5  ;;  %s14873_s6 = smov 58  }
 0x21b   : > { %v4286_v8 = vsel %vm427_vm1, %v4281_v53, %v4282_v23  ;;  %v4288_v58 = vsel %vm427_vm1, %v4282_v23, %v4283_v56  ;;  %13536 = vmatpush1.bf16.msra.mxu0 %v14555_v52 }
 0x21c   : > { %v4287_v51 = vsel %vm19297_vm10, %v4272_v41, %v4286_v8  ;;  %v4289_v27 = vsel %vm19297_vm10, %v4274_v33, %v4288_v58  ;;  %v4278_v36 = vpop.permute.xlu0 %4277  ;;  %v4280_v30 = vpop.permute.xlu1 %4279  ;;  %v14557_v62 = vld [vmem:[#allocation2 + $0x12c] ss:$36 sps:$4 sm:$0xff]  }
 0x21d   : > { %v14559_v63 = vld [vmem:[#allocation2 + $0x128] ss:$36 sps:$4 sm:$0xff]   ;;  %4300 = vst [vmem:[#allocation2 + $0x168] sm:$0x11] %v4287_v51  ;;  %4301 = vst [vmem:[#allocation2 + $0x170] sm:$0x11] %v4289_v27  ;;  %13578 = vmatprep.subr.bf16.mxu1 %v14557_v62 }
 0x21e   : > { %v4284_v0 = vrot.slane %v4278_v36, 4  ;;  %v4285_v9 = vrot.slane %v4280_v30, 4  ;;  %5459 = vrot.lane.b32.xlu0 %v16035_v20, %s14863_s7  ;;  %5461 = vrot.lane.b32.xlu1 %v16086_v39, %s14863_s7  ;;  %v14561_v51 = vld [vmem:[%s14967_s22 + $0xa] ss:$0 sps:$4 sm:$0x33]  }
 0x21f   : > { %13579 = vmatpush1.bf16.msra.mxu1 %v14559_v63 }
 0x220   : > { %v4290_v6 = vsel %vm427_vm1, %v4283_v56, %v4284_v0  ;;  %v4292_v2 = vsel %vm427_vm1, %v4284_v0, %v4285_v9  ;;  %v4294_v7 = vsel %vm19297_vm10, %v4280_v30, %v4285_v9  ;;  %v4370_v25 = vpop.permute.xlu0 %4369  ;;  %v4372_v32 = vpop.permute.xlu1 %4371 }
 0x221   : > { %v4291_v34 = vsel %vm19297_vm10, %v4276_v4, %v4290_v6  ;;  %v4293_v10 = vsel %vm19297_vm10, %v4278_v36, %v4292_v2  ;;  %4304 = vst [vmem:[#allocation2 + $0x188] sm:$0x1] %v4294_v7  ;;  %v4379_v14 = vrot.slane %v4370_v25, 4  ;;  %v4380_v11 = vrot.slane %v4372_v32, 4 }
 0x222   : > { %4302 = vst [vmem:[#allocation2 + $0x178] sm:$0x11] %v4291_v34  ;;  %4303 = vst [vmem:[#allocation2 + $0x180] sm:$0x11] %v4293_v10  ;;  %5463 = vrot.lane.b32.xlu0 %v16100_v21, %s14863_s7  ;;  %5465 = vrot.lane.b32.xlu1 %v16103_v17, %s14863_s7  ;;  %v5647_v4 = vrot.slane %v14560_v12, %v14962_v5  ;;  %v5745_v7 = vrot.slane %v14561_v51, %v14962_v5  ;;  %s14874_s7 = smov 57  }
 0x223   : > { %v4384_v28 = vsel %vm427_vm1, %v4379_v14, %v4380_v11 }
 0x224   : > { %v4374_v24 = vpop.permute.xlu0 %4373  ;;  %v4376_v35 = vpop.permute.xlu1 %4375  ;;  %v4386_v15 = vsel %vm4385_vm13, %v4370_v25, %v4384_v28  ;;  %v5654_v59 = vrot.slane %v5647_v4, %v14962_v5  ;;  %v5746_v16 = vcombine.low %v5745_v7, %v5745_v7 }
 0x225   : > { %v4381_v19 = vrot.slane %v4374_v24, 4  ;;  %v4382_v61 = vrot.slane %v4376_v35, 4  ;;  %4399 = vst [vmem:[#allocation2 + $0x168] sm:$0x22] %v4386_v15 }
 0x226   : > { %5556 = vrot.lane.b32.xlu0 %v16062_v38, %s14864_s8  ;;  %5558 = vrot.lane.b32.xlu1 %v16021_v60, %s14864_s8 }
 0x227   : > { %v4387_v47 = vsel %vm427_vm1, %v4380_v11, %v4381_v19  ;;  %v4389_v26 = vsel %vm427_vm1, %v4381_v19, %v4382_v61 }
 0x228   : > { %v4378_v31 = vpop.permute.xlu0 %4377  ;;  %v4388_v37 = vsel %vm4385_vm13, %v4372_v32, %v4387_v47  ;;  %v4390_v1 = vsel %vm4385_vm13, %v4374_v24, %v4389_v26  ;;  %v4469_v43 = vpop.permute.xlu1 %4468  ;;  %v5753_v47 = vrot.slane %v5746_v16, %v14962_v5 }
 0x229   : > { %v4383_v54 = vrot.slane %v4378_v31, 4  ;;  %4400 = vst [vmem:[#allocation2 + $0x170] sm:$0x22] %v4388_v37  ;;  %4401 = vst [vmem:[#allocation2 + $0x178] sm:$0x22] %v4390_v1  ;;  %v4478_v46 = vrot.slane %v4469_v43, 4 }
 0x22a   : > { %5560 = vrot.lane.b32.xlu0 %v16121_v22, %s14864_s8  ;;  %5562 = vrot.lane.b32.xlu1 %v16086_v39, %s14864_s8 }
 0x22b   : > { %v4391_v41 = vsel %vm427_vm1, %v4382_v61, %v4383_v54  ;;  %v4393_v42 = vsel %vm4385_vm13, %v4378_v31, %v4383_v54 }
 0x22c   : > { %v4392_v55 = vsel %vm4385_vm13, %v4376_v35, %v4391_v41  ;;  %4403 = vst [vmem:[#allocation2 + $0x188] sm:$0x2] %v4393_v42  ;;  %v4471_v45 = vpop.permute.xlu0 %4470  ;;  %v4473_v40 = vpop.permute.xlu1 %4472  ;;  %vm19199_vm13 = vcmask 498688  }
 0x22d   : > { %4402 = vst [vmem:[#allocation2 + $0x180] sm:$0x22] %v4392_v55  ;;  %v4479_v48 = vrot.slane %v4471_v45, 4  ;;  %v4480_v33 = vrot.slane %v4473_v40, 4 }
 0x22e   : > { %5564 = vrot.lane.b32.xlu0 %v16130_v29, %s14864_s8  ;;  %5655 = vrot.lane.b32.xlu1 %v16003_v49, %s14831_s11  ;;  %s19215_s8 = smov 56  }
 0x22f   : > { %v4483_v50 = vsel %vm427_vm1, %v4478_v46, %v4479_v48  ;;  %v4486_v52 = vsel %vm427_vm1, %v4479_v48, %v4480_v33 }
 0x230   : > { %v4475_v53 = vpop.permute.xlu0 %4474  ;;  %v4485_v23 = vsel %vm4484_vm0, %v4469_v43, %v4483_v50  ;;  %v4487_v56 = vsel %vm4484_vm0, %v4471_v45, %v4486_v52  ;;  %v4477_v18 = vpop.permute.xlu1 %4476 }
 0x231   : > { %v4481_v8 = vrot.slane %v4475_v53, 4  ;;  %4498 = vst [vmem:[#allocation2 + $0x168] sm:$0x44] %v4485_v23  ;;  %4499 = vst [vmem:[#allocation2 + $0x170] sm:$0x44] %v4487_v56  ;;  %v4482_v58 = vrot.slane %v4477_v18, 4 }
 0x232   : > { %5657 = vrot.lane.b32.xlu0 %v16014_v44, %s14831_s11  ;;  %5659 = vrot.lane.b32.xlu1 %v16021_v60, %s14831_s11 }
 0x233   : > { %v4488_v27 = vsel %vm427_vm1, %v4480_v33, %v4481_v8  ;;  %v4490_v36 = vsel %vm427_vm1, %v4481_v8, %v4482_v58  ;;  %v4492_v30 = vsel %vm4484_vm0, %v4477_v18, %v4482_v58 }
 0x234   : > { %v4489_v62 = vsel %vm4484_vm0, %v4473_v40, %v4488_v27  ;;  %v4491_v63 = vsel %vm4484_vm0, %v4475_v53, %v4490_v36  ;;  %4502 = vst [vmem:[#allocation2 + $0x188] sm:$0x4] %v4492_v30  ;;  %v4569_v0 = vpop.permute.xlu0 %4568  ;;  %v4571_v9 = vpop.permute.xlu1 %4570  ;;  %vm19195_vm0 = vcmask 490496  }
 0x235   : > { %4500 = vst [vmem:[#allocation2 + $0x178] sm:$0x44] %v4489_v62  ;;  %4501 = vst [vmem:[#allocation2 + $0x180] sm:$0x44] %v4491_v63  ;;  %v4578_v6 = vrot.slane %v4569_v0, 4  ;;  %v4579_v2 = vrot.slane %v4571_v9, 4 }
 0x236   : > { %5661 = vrot.lane.b32.xlu0 %v16035_v20, %s14831_s11  ;;  %5663 = vrot.lane.b32.xlu1 %v5654_v59, %s14831_s11  ;;  %s14865_s11 = smov 83  }
 0x237   : > { %v4583_v34 = vsel %vm427_vm1, %v4578_v6, %v4579_v2 }
 0x238   : > { %v4573_v10 = vpop.permute.xlu0 %4572  ;;  %v4575_v25 = vpop.permute.xlu1 %4574  ;;  %v4585_v32 = vsel %vm4584_vm14, %v4569_v0, %v4583_v34 }
 0x239   : > { %v4580_v14 = vrot.slane %v4573_v10, 4  ;;  %v4581_v11 = vrot.slane %v4575_v25, 4  ;;  %4598 = vst [vmem:[#allocation2 + $0x168] sm:$0x88] %v4585_v32 }
 0x23a   : > { %5754 = vrot.lane.b32.xlu0 %v16050_v13, %s14852_s12  ;;  %5756 = vrot.lane.b32.xlu1 %v16003_v49, %s14852_s12 }
 0x23b   : > { %v4586_v28 = vsel %vm427_vm1, %v4579_v2, %v4580_v14  ;;  %v4588_v24 = vsel %vm427_vm1, %v4580_v14, %v4581_v11 }
 0x23c   : > { %v4577_v35 = vpop.permute.xlu0 %4576  ;;  %v4587_v15 = vsel %vm4584_vm14, %v4571_v9, %v4586_v28  ;;  %v4589_v19 = vsel %vm4584_vm14, %v4573_v10, %v4588_v24  ;;  %v4667_v61 = vpop.permute.xlu1 %4666 }
 0x23d   : > { %v4582_v57 = vrot.slane %v4577_v35, 4  ;;  %4599 = vst [vmem:[#allocation2 + $0x170] sm:$0x88] %v4587_v15  ;;  %4600 = vst [vmem:[#allocation2 + $0x178] sm:$0x88] %v4589_v19  ;;  %v4676_v54 = vrot.slane %v4667_v61, 4 }
 0x23e   : > { %5758 = vrot.lane.b32.xlu0 %v16062_v38, %s14852_s12  ;;  %5760 = vrot.lane.b32.xlu1 %v16021_v60, %s14852_s12 }
 0x23f   : > { %v4590_v26 = vsel %vm427_vm1, %v4581_v11, %v4582_v57  ;;  %v4592_v31 = vsel %vm4584_vm14, %v4577_v35, %v4582_v57 }
 0x240   : > { %v4591_v37 = vsel %vm4584_vm14, %v4575_v25, %v4590_v26  ;;  %4602 = vst [vmem:[#allocation2 + $0x188] sm:$0x8] %v4592_v31  ;;  %v4669_v1 = vpop.permute.xlu0 %4668  ;;  %v4671_v43 = vpop.permute.xlu1 %4670  ;;  %v14562_v25 = vld [vmem:[%s14967_s22 + $0xa] ss:$0 sps:$4 sm:$0x33]   ;;  %vm5375_vm14 = vcmask 777216  }
 0x241   : > { %4601 = vst [vmem:[#allocation2 + $0x180] sm:$0x88] %v4591_v37  ;;  %v4677_v12 = vrot.slane %v4669_v1, 4  ;;  %v4678_v41 = vrot.slane %v4671_v43, 4 }
 0x242   : > { %5762 = vrot.lane.b32.xlu0 %v5753_v47, %s14852_s12  ;;  %5851 = vrot.lane.b32.xlu1 %v16021_v60, %s14865_s11  ;;  %s14868_s12 = smov 71  }
 0x243   : > { %v4681_v42 = vsel %vm427_vm1, %v4676_v54, %v4677_v12  ;;  %v4684_v55 = vsel %vm427_vm1, %v4677_v12, %v4678_v41  ;;  %v14563_v54 = vld [vmem:[%s14967_s22 + $0xa] ss:$0 sps:$4 sm:$0x33]  }
 0x244   : > { %v4683_v45 = vsel %vm4682_vm2, %v4667_v61, %v4681_v42  ;;  %v4685_v40 = vsel %vm4682_vm2, %v4669_v1, %v4684_v55  ;;  %v4673_v46 = vpop.permute.xlu0 %4672  ;;  %v4675_v48 = vpop.permute.xlu1 %4674 }
 0x245   : > { %4696 = vst [vmem:[#allocation2 + $0x18c] sm:$0x11] %v4683_v45  ;;  %4697 = vst [vmem:[#allocation2 + $0x194] sm:$0x11] %v4685_v40  ;;  %v4679_v33 = vrot.slane %v4673_v46, 4  ;;  %v4680_v4 = vrot.slane %v4675_v48, 4 }
 0x246   : > { %5853 = vrot.lane.b32.xlu0 %v16035_v20, %s14865_s11  ;;  %5855 = vrot.lane.b32.xlu1 %v16086_v39, %s14865_s11 }
 0x247   : > { %v4686_v50 = vsel %vm427_vm1, %v4678_v41, %v4679_v33  ;;  %v4688_v52 = vsel %vm427_vm1, %v4679_v33, %v4680_v4  ;;  %v4690_v53 = vsel %vm4682_vm2, %v4675_v48, %v4680_v4  ;;  %v6140_v33 = vrot.slane %v14563_v54, %v14962_v5 }
 0x248   : > { %v4687_v23 = vsel %vm4682_vm2, %v4671_v43, %v4686_v50  ;;  %v4689_v56 = vsel %vm4682_vm2, %v4673_v46, %v4688_v52  ;;  %4700 = vst [vmem:[#allocation2 + $0x1ac] sm:$0x1] %v4690_v53  ;;  %v4766_v18 = vpop.permute.xlu0 %4765  ;;  %v4768_v8 = vpop.permute.xlu1 %4767 }
 0x249   : > { %4698 = vst [vmem:[#allocation2 + $0x19c] sm:$0x11] %v4687_v23  ;;  %4699 = vst [vmem:[#allocation2 + $0x1a4] sm:$0x11] %v4689_v56  ;;  %v4775_v58 = vrot.slane %v4766_v18, 4  ;;  %v4776_v59 = vrot.slane %v4768_v8, 4 }
 0x24a   : > { %5857 = vrot.lane.b32.xlu0 %v16100_v21, %s14865_s11  ;;  %5859 = vrot.lane.b32.xlu1 %v16103_v17, %s14865_s11  ;;  %s19126_s11 = smov 48  }
 0x24b   : > { %v4780_v51 = vsel %vm427_vm1, %v4775_v58, %v4776_v59 }
 0x24c   : > { %v4782_v27 = vsel %vm4781_vm11, %v4766_v18, %v4780_v51  ;;  %v4770_v36 = vpop.permute.xlu0 %4769  ;;  %v4772_v30 = vpop.permute.xlu1 %4771  ;;  %v6141_v18 = vcombine.low %v6140_v33, %v6140_v33 }
 0x24d   : > { %4795 = vst [vmem:[#allocation2 + $0x18c] sm:$0x22] %v4782_v27  ;;  %v4777_v62 = vrot.slane %v4770_v36, 4  ;;  %v4778_v63 = vrot.slane %v4772_v30, 4 }
 0x24e   : > { %5950 = vrot.lane.b32.xlu0 %v16062_v38, %s14866_s9  ;;  %5952 = vrot.lane.b32.xlu1 %v16021_v60, %s14866_s9 }
 0x24f   : > { %v4783_v0 = vsel %vm427_vm1, %v4776_v59, %v4777_v62  ;;  %v4785_v9 = vsel %vm427_vm1, %v4777_v62, %v4778_v63 }
 0x250   : > { %v4784_v6 = vsel %vm4781_vm11, %v4768_v8, %v4783_v0  ;;  %v4786_v2 = vsel %vm4781_vm11, %v4770_v36, %v4785_v9  ;;  %v4774_v7 = vpop.permute.xlu0 %4773  ;;  %v4865_v34 = vpop.permute.xlu1 %4864 }
 0x251   : > { %4796 = vst [vmem:[#allocation2 + $0x194] sm:$0x22] %v4784_v6  ;;  %4797 = vst [vmem:[#allocation2 + $0x19c] sm:$0x22] %v4786_v2  ;;  %v4779_v10 = vrot.slane %v4774_v7, 4  ;;  %v4874_v24 = vrot.slane %v4865_v34, 4 }
 0x252   : > { %5954 = vrot.lane.b32.xlu0 %v16121_v22, %s14866_s9  ;;  %5956 = vrot.lane.b32.xlu1 %v16086_v39, %s14866_s9  ;;  %v6041_v22 = vrot.slane %v14562_v25, %v14962_v5 }
 0x253   : > { %v4787_v32 = vsel %vm427_vm1, %v4778_v63, %v4779_v10  ;;  %v4789_v14 = vsel %vm4781_vm11, %v4774_v7, %v4779_v10 }
 0x254   : > { %v4788_v11 = vsel %vm4781_vm11, %v4772_v30, %v4787_v32  ;;  %4799 = vst [vmem:[#allocation2 + $0x1ac] sm:$0x2] %v4789_v14  ;;  %v4867_v16 = vpop.permute.xlu0 %4866  ;;  %v4869_v28 = vpop.permute.xlu1 %4868  ;;  %v6048_v43 = vrot.slane %v6041_v22, %v14962_v5 }
 0x255   : > { %4798 = vst [vmem:[#allocation2 + $0x1a4] sm:$0x22] %v4788_v11  ;;  %v4875_v35 = vrot.slane %v4867_v16, 4  ;;  %v4876_v15 = vrot.slane %v4869_v28, 4 }
 0x256   : > { %5958 = vrot.lane.b32.xlu0 %v16130_v29, %s14866_s9  ;;  %6049 = vrot.lane.b32.xlu1 %v16003_v49, %s14867_s10  ;;  %s14877_s9 = smov 47  }
 0x257   : > { %v4879_v19 = vsel %vm427_vm1, %v4874_v24, %v4875_v35  ;;  %v4882_v61 = vsel %vm427_vm1, %v4875_v35, %v4876_v15 }
 0x258   : > { %v4881_v57 = vsel %vm4880_vm4, %v4865_v34, %v4879_v19  ;;  %v4883_v47 = vsel %vm4880_vm4, %v4867_v16, %v4882_v61  ;;  %v4871_v26 = vpop.permute.xlu0 %4870  ;;  %v4873_v31 = vpop.permute.xlu1 %4872 }
 0x259   : > { %4894 = vst [vmem:[#allocation2 + $0x18c] sm:$0x44] %v4881_v57  ;;  %4895 = vst [vmem:[#allocation2 + $0x194] sm:$0x44] %v4883_v47  ;;  %v4877_v37 = vrot.slane %v4871_v26, 4  ;;  %v4878_v1 = vrot.slane %v4873_v31, 4 }
 0x25a   : > { %6051 = vrot.lane.b32.xlu0 %v16014_v44, %s14867_s10  ;;  %6053 = vrot.lane.b32.xlu1 %v16021_v60, %s14867_s10 }
 0x25b   : > { %v4884_v12 = vsel %vm427_vm1, %v4876_v15, %v4877_v37  ;;  %v4886_v41 = vsel %vm427_vm1, %v4877_v37, %v4878_v1  ;;  %v4888_v42 = vsel %vm4880_vm4, %v4873_v31, %v4878_v1 }
 0x25c   : > { %v4885_v55 = vsel %vm4880_vm4, %v4869_v28, %v4884_v12  ;;  %v4887_v45 = vsel %vm4880_vm4, %v4871_v26, %v4886_v41  ;;  %4898 = vst [vmem:[#allocation2 + $0x1ac] sm:$0x4] %v4888_v42  ;;  %v4965_v40 = vpop.permute.xlu0 %4964  ;;  %v4967_v46 = vpop.permute.xlu1 %4966 }
 0x25d   : > { %4896 = vst [vmem:[#allocation2 + $0x19c] sm:$0x44] %v4885_v55  ;;  %4897 = vst [vmem:[#allocation2 + $0x1a4] sm:$0x44] %v4887_v45  ;;  %v4974_v44 = vrot.slane %v4965_v40, 4  ;;  %v4975_v48 = vrot.slane %v4967_v46, 4 }
 0x25e   : > { %6055 = vrot.lane.b32.xlu0 %v16035_v20, %s14867_s10  ;;  %6057 = vrot.lane.b32.xlu1 %v6048_v43, %s14867_s10  ;;  %s14878_s10 = smov 46  }
 0x25f   : > { %v4979_v4 = vsel %vm427_vm1, %v4974_v44, %v4975_v48 }
 0x260   : > { %v4981_v50 = vsel %vm4980_vm9, %v4965_v40, %v4979_v4  ;;  %v4969_v52 = vpop.permute.xlu0 %4968  ;;  %v4971_v53 = vpop.permute.xlu1 %4970 }
 0x261   : > { %4994 = vst [vmem:[#allocation2 + $0x18c] sm:$0x88] %v4981_v50  ;;  %v4976_v23 = vrot.slane %v4969_v52, 4  ;;  %v4977_v56 = vrot.slane %v4971_v53, 4 }
 0x262   : > { %6149 = vrot.lane.b32.xlu0 %v16050_v13, %s14836_s20  ;;  %6151 = vrot.lane.b32.xlu1 %v16003_v49, %s14836_s20  ;;  %v6148_v49 = vrot.slane %v6141_v18, %v14962_v5  ;;  %v16245_v13 = vld [vmem:[%s14967_s22 + $0x2] sm:$0xff] }
 0x263   : > { %v4982_v8 = vsel %vm427_vm1, %v4975_v48, %v4976_v23  ;;  %v4984_v58 = vsel %vm427_vm1, %v4976_v23, %v4977_v56  ;;  %v16252_v25 = vrot.slane %v16245_v13, %v14962_v5  ;;  %v6284_v32 = vcombine.high %v16245_v13, %v16245_v13 }
 0x264   : > { %v4983_v59 = vsel %vm4980_vm9, %v4967_v46, %v4982_v8  ;;  %v4985_v51 = vsel %vm4980_vm9, %v4969_v52, %v4984_v58  ;;  %v4973_v27 = vpop.permute.xlu0 %4972  ;;  %v5063_v36 = vpop.permute.xlu1 %5062  ;;  %v6383_v55 = vcombine.low %v16245_v13, %v16245_v13 }
 0x265   : > { %4995 = vst [vmem:[#allocation2 + $0x194] sm:$0x88] %v4983_v59  ;;  %4996 = vst [vmem:[#allocation2 + $0x19c] sm:$0x88] %v4985_v51  ;;  %v4978_v30 = vrot.slane %v4973_v27, 4  ;;  %v6299_v61 = vcombine.low %v16252_v25, %v16252_v25  ;;  %v16270_v57 = vrot.slane %v6284_v32, %v14962_v5  ;;  %v16286_v41 = vrot.slane %v16252_v25, %v14962_v5 }
 0x266   : > { %6153 = vrot.lane.b32.xlu0 %v16062_v38, %s14836_s20  ;;  %6155 = vrot.lane.b32.xlu1 %v16021_v60, %s14836_s20  ;;  %v5072_v38 = vrot.slane %v5063_v36, 4  ;;  %v16304_v4 = vrot.slane %v6383_v55, %v14962_v5  ;;  %v14572_v51 = vld [vmem:[%s14967_s22 + $0xa] ss:$0 sps:$4 sm:$0x33]  }
 0x267   : > { %v4986_v62 = vsel %vm427_vm1, %v4977_v56, %v4978_v30  ;;  %v4988_v63 = vsel %vm4980_vm9, %v4973_v27, %v4978_v30  ;;  %v16278_v12 = vrot.slane %v6299_v61, %v14962_v5  ;;  %v6300_v42 = vcombine.low %v16270_v57, %v16270_v57 }
 0x268   : > { %v4987_v0 = vsel %vm4980_vm9, %v4971_v53, %v4986_v62  ;;  %4998 = vst [vmem:[#allocation2 + $0x1ac] sm:$0x8] %v4988_v63  ;;  %v5065_v9 = vpop.permute.xlu0 %5064  ;;  %v5067_v6 = vpop.permute.xlu1 %5066  ;;  %v14564_v2 = vld [vmem:[#allocation2 + $0x16c] ss:$36 sps:$4 sm:$0xff]   ;;  %v16301_v33 = vrot.slane %v16270_v57, %v14962_v5  ;;  %v16314_v58 = vrot.slane %v16304_v4, %v14962_v5  ;;  %v6398_v59 = vcombine.high %v16304_v4, %v16304_v4 }
 0x269   : > { %v14566_v7 = vld [vmem:[#allocation2 + $0x168] ss:$36 sps:$4 sm:$0xff]   ;;  %4997 = vst [vmem:[#allocation2 + $0x1a4] sm:$0x88] %v4987_v0  ;;  %v5073_v34 = vrot.slane %v5065_v9, 4  ;;  %v5074_v10 = vrot.slane %v5067_v6, 4  ;;  %13537 = vmatprep.subr.bf16.mxu0 %v14564_v2  ;;  %v6435_v2 = vrot.slane %v14572_v51, %v14962_v5 }
 0x26a   : > { %6157 = vrot.lane.b32.xlu0 %v6148_v49, %s14836_s20  ;;  %6246 = vrot.lane.b32.xlu1 %v16021_v60, %s14856_s26 }
 0x26b   : > { %v5077_v14 = vsel %vm427_vm1, %v5072_v38, %v5073_v34  ;;  %v5080_v11 = vsel %vm427_vm1, %v5073_v34, %v5074_v10  ;;  %13538 = vmatpush1.bf16.msra.mxu0 %v14566_v7 }
 0x26c   : > { %v5079_v16 = vsel %vm19199_vm13, %v5063_v36, %v5077_v14  ;;  %v5081_v28 = vsel %vm19199_vm13, %v5065_v9, %v5080_v11  ;;  %v5069_v24 = vpop.permute.xlu0 %5068  ;;  %v5071_v35 = vpop.permute.xlu1 %5070  ;;  %v14567_v15 = vld [vmem:[#allocation2 + $0x174] ss:$36 sps:$4 sm:$0xff]   ;;  %v16326_v9 = vrot.slane %v6398_v59, %v14962_v5 }
 0x26d   : > { %v14569_v22 = vld [vmem:[#allocation2 + $0x170] ss:$36 sps:$4 sm:$0xff]   ;;  %5092 = vst [vmem:[#allocation2 + $0x1b0] sm:$0x11] %v5079_v16  ;;  %5093 = vst [vmem:[#allocation2 + $0x1b8] sm:$0x11] %v5081_v28  ;;  %13580 = vmatprep.subr.bf16.mxu1 %v14567_v15  ;;  %v6442_v16 = vrot.slane %v6435_v2, %v14962_v5  ;;  %v6497_v28 = vcombine.low %v16304_v4, %v16304_v4 }
 0x26e   : > { %v5075_v60 = vrot.slane %v5069_v24, 4  ;;  %v5076_v19 = vrot.slane %v5071_v35, 4  ;;  %6248 = vrot.lane.b32.xlu0 %v16035_v20, %s14856_s26  ;;  %6250 = vrot.lane.b32.xlu1 %v16086_v39, %s14856_s26 }
 0x26f   : > { %13581 = vmatpush1.bf16.msra.mxu1 %v14569_v22 }
 0x270   : > { %v5082_v47 = vsel %vm427_vm1, %v5074_v10, %v5075_v60  ;;  %v5084_v26 = vsel %vm427_vm1, %v5075_v60, %v5076_v19  ;;  %v5086_v31 = vsel %vm19199_vm13, %v5071_v35, %v5076_v19  ;;  %v5162_v43 = vpop.permute.xlu0 %5161  ;;  %v5164_v20 = vpop.permute.xlu1 %5163 }
 0x271   : > { %v5083_v37 = vsel %vm19199_vm13, %v5067_v6, %v5082_v47  ;;  %v5085_v1 = vsel %vm19199_vm13, %v5069_v24, %v5084_v26  ;;  %5096 = vst [vmem:[#allocation2 + $0x1d0] sm:$0x1] %v5086_v31  ;;  %v5171_v39 = vrot.slane %v5162_v43, 4  ;;  %v5172_v54 = vrot.slane %v5164_v20, 4 }
 0x272   : > { %5094 = vst [vmem:[#allocation2 + $0x1c0] sm:$0x11] %v5083_v37  ;;  %5095 = vst [vmem:[#allocation2 + $0x1c8] sm:$0x11] %v5085_v1  ;;  %6252 = vrot.lane.b32.xlu0 %v16100_v21, %s14856_s26  ;;  %6254 = vrot.lane.b32.xlu1 %v16103_v17, %s14856_s26  ;;  %v16297_v17 = vrot.slane %v6300_v42, %v14962_v5  ;;  %v6399_v6 = vcombine.high %v16252_v25, %v16252_v25  ;;  %s14872_s26 = smov 59  }
 0x273   : > { %v5176_v45 = vsel %vm427_vm1, %v5171_v39, %v5172_v54  ;;  %v14573_v24 = vld [vmem:[%s14967_s22 + $0xa] ss:$0 sps:$4 sm:$0x33]   ;;  %v16355_v37 = vrot.slane %v6497_v28, %v14962_v5 }
 0x274   : > { %v5178_v40 = vsel %vm19195_vm0, %v5162_v43, %v5176_v45  ;;  %v5166_v46 = vpop.permute.xlu0 %5165  ;;  %v5168_v44 = vpop.permute.xlu1 %5167  ;;  %v16340_v25 = vrot.slane %v6399_v6, %v14962_v5  ;;  %v6534_v1 = vrot.slane %v14573_v24, %v14962_v5 }
 0x275   : > { %5191 = vst [vmem:[#allocation2 + $0x1b0] sm:$0x22] %v5178_v40  ;;  %v5173_v21 = vrot.slane %v5166_v46, 4  ;;  %v5174_v48 = vrot.slane %v5168_v44, 4 }
 0x276   : > { %6344 = vrot.lane.b32.xlu0 %v16278_v12, %s14868_s12  ;;  %6346 = vrot.lane.b32.xlu1 %v16286_v41, %s14868_s12  ;;  %v6535_v45 = vcombine.low %v6534_v1, %v6534_v1 }
 0x277   : > { %v5179_v50 = vsel %vm427_vm1, %v5172_v54, %v5173_v21  ;;  %v5181_v52 = vsel %vm427_vm1, %v5173_v21, %v5174_v48 }
 0x278   : > { %v5180_v53 = vsel %vm19195_vm0, %v5164_v20, %v5179_v50  ;;  %v5182_v23 = vsel %vm19195_vm0, %v5166_v46, %v5181_v52  ;;  %v5170_v56 = vpop.permute.xlu0 %5169  ;;  %v5261_v18 = vpop.permute.xlu1 %5260  ;;  %v6542_v52 = vrot.slane %v6535_v45, %v14962_v5 }
 0x279   : > { %5192 = vst [vmem:[#allocation2 + $0x1b8] sm:$0x22] %v5180_v53  ;;  %5193 = vst [vmem:[#allocation2 + $0x1c0] sm:$0x22] %v5182_v23  ;;  %v5175_v8 = vrot.slane %v5170_v56, 4  ;;  %v5270_v62 = vrot.slane %v5261_v18, 4 }
 0x27a   : > { %6348 = vrot.lane.b32.xlu0 %v16297_v17, %s14868_s12  ;;  %6350 = vrot.lane.b32.xlu1 %v16301_v33, %s14868_s12 }
 0x27b   : > { %v5183_v27 = vsel %vm427_vm1, %v5174_v48, %v5175_v8  ;;  %v5185_v36 = vsel %vm19195_vm0, %v5170_v56, %v5175_v8 }
 0x27c   : > { %v5184_v30 = vsel %vm19195_vm0, %v5168_v44, %v5183_v27  ;;  %5195 = vst [vmem:[#allocation2 + $0x1d0] sm:$0x2] %v5185_v36  ;;  %v5263_v49 = vpop.permute.xlu0 %5262  ;;  %v5265_v13 = vpop.permute.xlu1 %5264  ;;  %v6598_v36 = vcombine.high %v16270_v57, %v16270_v57 }
 0x27d   : > { %5194 = vst [vmem:[#allocation2 + $0x1c8] sm:$0x22] %v5184_v30  ;;  %v5271_v63 = vrot.slane %v5263_v49, 4  ;;  %v5272_v0 = vrot.slane %v5265_v13, 4 }
 0x27e   : > { %6352 = vrot.lane.b32.xlu0 %v16130_v29, %s14868_s12  ;;  %6443 = vrot.lane.b32.xlu1 %v16314_v58, %s14869_s13  ;;  %v16386_v57 = vrot.slane %v6598_v36, %v14962_v5  ;;  %s14879_s12 = smov 45  }
 0x27f   : > { %v5275_v7 = vsel %vm427_vm1, %v5270_v62, %v5271_v63  ;;  %v5277_v38 = vsel %vm427_vm1, %v5271_v63, %v5272_v0 }
 0x280   : > { %v5276_v34 = vsel %vm3694_vm3, %v5261_v18, %v5275_v7  ;;  %v5278_v29 = vsel %vm3694_vm3, %v5263_v49, %v5277_v38  ;;  %v5267_v10 = vpop.permute.xlu0 %5266  ;;  %v5269_v32 = vpop.permute.xlu1 %5268 }
 0x281   : > { %5289 = vst [vmem:[#allocation2 + $0x1b0] sm:$0x44] %v5276_v34  ;;  %5290 = vst [vmem:[#allocation2 + $0x1b8] sm:$0x44] %v5278_v29  ;;  %v5273_v14 = vrot.slane %v5267_v10, 4  ;;  %v5274_v11 = vrot.slane %v5269_v32, 4 }
 0x282   : > { %6445 = vrot.lane.b32.xlu0 %v16326_v9, %s14869_s13  ;;  %6447 = vrot.lane.b32.xlu1 %v16286_v41, %s14869_s13 }
 0x283   : > { %v5279_v35 = vsel %vm427_vm1, %v5272_v0, %v5273_v14  ;;  %v5281_v15 = vsel %vm427_vm1, %v5273_v14, %v5274_v11  ;;  %v5283_v22 = vsel %vm3694_vm3, %v5269_v32, %v5274_v11 }
 0x284   : > { %v5280_v60 = vsel %vm3694_vm3, %v5265_v13, %v5279_v35  ;;  %v5282_v19 = vsel %vm3694_vm3, %v5267_v10, %v5281_v15  ;;  %5293 = vst [vmem:[#allocation2 + $0x1d0] sm:$0x4] %v5283_v22  ;;  %v5360_v61 = vpop.permute.xlu0 %5359  ;;  %v5362_v47 = vpop.permute.xlu1 %5361  ;;  %vm5473_vm3 = vcmask 769024  }
 0x285   : > { %5291 = vst [vmem:[#allocation2 + $0x1c0] sm:$0x44] %v5280_v60  ;;  %5292 = vst [vmem:[#allocation2 + $0x1c8] sm:$0x44] %v5282_v19  ;;  %v5369_v26 = vrot.slane %v5360_v61, 4  ;;  %v5370_v31 = vrot.slane %v5362_v47, 4 }
 0x286   : > { %6449 = vrot.lane.b32.xlu0 %v16340_v25, %s14869_s13  ;;  %6451 = vrot.lane.b32.xlu1 %v6442_v16, %s14869_s13  ;;  %v14137_v13 = vld.sshfl [vmem:[%s14967_s22 + $0xa] sm:$0x5 pattern:$0x73625140]  ;;  %s19177_s13 = smov 44  }
 0x287   : > { %v5374_v43 = vsel %vm427_vm1, %v5369_v26, %v5370_v31  ;;  %v16389_v38 = vrot.slane %v14137_v13, %v14962_v5 }
 0x288   : > { %v5364_v20 = vpop.permute.xlu0 %5363  ;;  %v5366_v39 = vpop.permute.xlu1 %5365  ;;  %v5376_v54 = vsel %vm5375_vm14, %v5360_v61, %v5374_v43 }
 0x289   : > { %v5371_v42 = vrot.slane %v5364_v20, 4  ;;  %v5372_v55 = vrot.slane %v5366_v39, 4  ;;  %5389 = vst [vmem:[#allocation2 + $0x1b0] sm:$0x88] %v5376_v54 }
 0x28a   : > { %6543 = vrot.lane.b32.xlu0 %v16355_v37, %s14870_s14  ;;  %6545 = vrot.lane.b32.xlu1 %v16314_v58, %s14870_s14 }
 0x28b   : > { %v5377_v40 = vsel %vm427_vm1, %v5370_v31, %v5371_v42  ;;  %v5379_v46 = vsel %vm427_vm1, %v5371_v42, %v5372_v55 }
 0x28c   : > { %v5368_v44 = vpop.permute.xlu0 %5367  ;;  %v5378_v21 = vsel %vm5375_vm14, %v5362_v47, %v5377_v40  ;;  %v5380_v48 = vsel %vm5375_vm14, %v5364_v20, %v5379_v46  ;;  %v5458_v4 = vpop.permute.xlu1 %5457  ;;  %v6732_v47 = vcombine.low %v14137_v13, %v14137_v13 }
 0x28d   : > { %v5373_v50 = vrot.slane %v5368_v44, 4  ;;  %5390 = vst [vmem:[#allocation2 + $0x1b8] sm:$0x88] %v5378_v21  ;;  %5391 = vst [vmem:[#allocation2 + $0x1c0] sm:$0x88] %v5380_v48  ;;  %v5467_v59 = vrot.slane %v5458_v4, 4 }
 0x28e   : > { %6547 = vrot.lane.b32.xlu0 %v16278_v12, %s14870_s14  ;;  %6549 = vrot.lane.b32.xlu1 %v16286_v41, %s14870_s14  ;;  %v16415_v42 = vrot.slane %v6732_v47, %v14962_v5 }
 0x28f   : > { %v5381_v53 = vsel %vm427_vm1, %v5372_v55, %v5373_v50  ;;  %v5383_v23 = vsel %vm5375_vm14, %v5368_v44, %v5373_v50  ;;  %v14574_v55 = vld [vmem:[%s14967_s22 + $0xa] ss:$0 sps:$4 sm:$0x33]  }
 0x290   : > { %v5382_v56 = vsel %vm5375_vm14, %v5366_v39, %v5381_v53  ;;  %5393 = vst [vmem:[#allocation2 + $0x1d0] sm:$0x8] %v5383_v23  ;;  %v5460_v18 = vpop.permute.xlu0 %5459  ;;  %v5462_v8 = vpop.permute.xlu1 %5461  ;;  %vm5572_vm14 = vcmask 760832  }
 0x291   : > { %5392 = vst [vmem:[#allocation2 + $0x1c8] sm:$0x88] %v5382_v56  ;;  %v5468_v51 = vrot.slane %v5460_v18, 4  ;;  %v5469_v27 = vrot.slane %v5462_v8, 4 }
 0x292   : > { %6551 = vrot.lane.b32.xlu0 %v6542_v52, %s14870_s14  ;;  %6641 = vrot.lane.b32.xlu1 %v16286_v41, %s19245_s19  ;;  %v6830_v52 = vrot.slane %v14574_v55, %v14962_v5  ;;  %s19191_s14 = smov 55  }
 0x293   : > { %v5472_v30 = vsel %vm427_vm1, %v5467_v59, %v5468_v51  ;;  %v5475_v49 = vsel %vm427_vm1, %v5468_v51, %v5469_v27 }
 0x294   : > { %v5464_v62 = vpop.permute.xlu0 %5463  ;;  %v5474_v63 = vsel %vm5473_vm3, %v5458_v4, %v5472_v30  ;;  %v5476_v0 = vsel %vm5473_vm3, %v5460_v18, %v5475_v49  ;;  %v5466_v6 = vpop.permute.xlu1 %5465  ;;  %v6837_v36 = vrot.slane %v6830_v52, %v14962_v5  ;;  %v14575_v30 = vld [vmem:[%s14967_s22 + $0xa] ss:$0 sps:$4 sm:$0x33]  }
 0x295   : > { %v5470_v2 = vrot.slane %v5464_v62, 4  ;;  %5487 = vst [vmem:[#allocation2 + $0x1d4] sm:$0x11] %v5474_v63  ;;  %5488 = vst [vmem:[#allocation2 + $0x1dc] sm:$0x11] %v5476_v0  ;;  %v5471_v7 = vrot.slane %v5466_v6, 4 }
 0x296   : > { %6643 = vrot.lane.b32.xlu0 %v16340_v25, %s19245_s19  ;;  %6645 = vrot.lane.b32.xlu1 %v16301_v33, %s19245_s19 }
 0x297   : > { %v5477_v34 = vsel %vm427_vm1, %v5469_v27, %v5470_v2  ;;  %v5479_v29 = vsel %vm427_vm1, %v5470_v2, %v5471_v7  ;;  %v5481_v10 = vsel %vm5473_vm3, %v5466_v6, %v5471_v7 }
 0x298   : > { %v5478_v32 = vsel %vm5473_vm3, %v5462_v8, %v5477_v34  ;;  %v5480_v14 = vsel %vm5473_vm3, %v5464_v62, %v5479_v29  ;;  %5491 = vst [vmem:[#allocation2 + $0x1f4] sm:$0x1] %v5481_v10  ;;  %v5557_v11 = vpop.permute.xlu0 %5556  ;;  %v5559_v16 = vpop.permute.xlu1 %5558  ;;  %v6929_v29 = vrot.slane %v14575_v30, %v14962_v5  ;;  %vm6065_vm3 = vcmask 662528  }
 0x299   : > { %5489 = vst [vmem:[#allocation2 + $0x1e4] sm:$0x11] %v5478_v32  ;;  %5490 = vst [vmem:[#allocation2 + $0x1ec] sm:$0x11] %v5480_v14  ;;  %v5566_v28 = vrot.slane %v5557_v11, 4  ;;  %v5567_v24 = vrot.slane %v5559_v16, 4 }
 0x29a   : > { %6647 = vrot.lane.b32.xlu0 %v16386_v57, %s19245_s19  ;;  %6649 = vrot.lane.b32.xlu1 %v16389_v38, %s19245_s19 }
 0x29b   : > { %v5571_v35 = vsel %vm427_vm1, %v5566_v28, %v5567_v24 }
 0x29c   : > { %v5561_v15 = vpop.permute.xlu0 %5560  ;;  %v5563_v22 = vpop.permute.xlu1 %5562  ;;  %v5573_v60 = vsel %vm5572_vm14, %v5557_v11, %v5571_v35 }
 0x29d   : > { %v5568_v19 = vrot.slane %v5561_v15, 4  ;;  %v5569_v61 = vrot.slane %v5563_v22, 4  ;;  %5586 = vst [vmem:[#allocation2 + $0x1d4] sm:$0x22] %v5573_v60 }
 0x29e   : > { %6740 = vrot.lane.b32.xlu0 %v16278_v12, %s19122_s5  ;;  %6742 = vrot.lane.b32.xlu1 %v16286_v41, %s19122_s5 }
 0x29f   : > { %v5574_v26 = vsel %vm427_vm1, %v5567_v24, %v5568_v19  ;;  %v5576_v31 = vsel %vm427_vm1, %v5568_v19, %v5569_v61  ;;  %v6930_v24 = vcombine.low %v6929_v29, %v6929_v29 }
 0x2a0   : > { %v5565_v1 = vpop.permute.xlu0 %5564  ;;  %v5575_v43 = vsel %vm5572_vm14, %v5559_v16, %v5574_v26  ;;  %v5577_v20 = vsel %vm5572_vm14, %v5561_v15, %v5576_v31  ;;  %v5656_v39 = vpop.permute.xlu1 %5655 }
 0x2a1   : > { %v5570_v54 = vrot.slane %v5565_v1, 4  ;;  %5587 = vst [vmem:[#allocation2 + $0x1dc] sm:$0x22] %v5575_v43  ;;  %5588 = vst [vmem:[#allocation2 + $0x1e4] sm:$0x22] %v5577_v20  ;;  %v5665_v48 = vrot.slane %v5656_v39, 4  ;;  %v6937_v26 = vrot.slane %v6930_v24, %v14962_v5 }
 0x2a2   : > { %6744 = vrot.lane.b32.xlu0 %v16297_v17, %s19122_s5  ;;  %6746 = vrot.lane.b32.xlu1 %v16301_v33, %s19122_s5  ;;  %v14582_v24 = vld [vmem:[%s14967_s22 + $0xa] ss:$0 sps:$4 sm:$0x33]  }
 0x2a3   : > { %v5578_v45 = vsel %vm427_vm1, %v5569_v61, %v5570_v54  ;;  %v5580_v40 = vsel %vm5572_vm14, %v5565_v1, %v5570_v54 }
 0x2a4   : > { %v5579_v46 = vsel %vm5572_vm14, %v5563_v22, %v5578_v45  ;;  %5590 = vst [vmem:[#allocation2 + $0x1f4] sm:$0x2] %v5580_v40  ;;  %v5658_v44 = vpop.permute.xlu0 %5657  ;;  %v5660_v21 = vpop.permute.xlu1 %5659  ;;  %vm6360_vm14 = vcmask 580608  }
 0x2a5   : > { %5589 = vst [vmem:[#allocation2 + $0x1ec] sm:$0x22] %v5579_v46  ;;  %v5666_v4 = vrot.slane %v5658_v44, 4  ;;  %v5667_v50 = vrot.slane %v5660_v21, 4 }
 0x2a6   : > { %6748 = vrot.lane.b32.xlu0 %v16415_v42, %s19122_s5  ;;  %6838 = vrot.lane.b32.xlu1 %v16314_v58, %s14872_s26 }
 0x2a7   : > { %v5670_v53 = vsel %vm427_vm1, %v5665_v48, %v5666_v4  ;;  %v5672_v23 = vsel %vm427_vm1, %v5666_v4, %v5667_v50 }
 0x2a8   : > { %v5671_v56 = vsel %vm1816_vm15, %v5656_v39, %v5670_v53  ;;  %v5673_v18 = vsel %vm1816_vm15, %v5658_v44, %v5672_v23  ;;  %v5662_v8 = vpop.permute.xlu0 %5661  ;;  %v5664_v59 = vpop.permute.xlu1 %5663 }
 0x2a9   : > { %5684 = vst [vmem:[#allocation2 + $0x1d4] sm:$0x44] %v5671_v56  ;;  %5685 = vst [vmem:[#allocation2 + $0x1dc] sm:$0x44] %v5673_v18  ;;  %v5668_v51 = vrot.slane %v5662_v8, 4  ;;  %v5669_v27 = vrot.slane %v5664_v59, 4 }
 0x2aa   : > { %6840 = vrot.lane.b32.xlu0 %v16326_v9, %s14872_s26  ;;  %6842 = vrot.lane.b32.xlu1 %v16286_v41, %s14872_s26 }
 0x2ab   : > { %v5674_v49 = vsel %vm427_vm1, %v5667_v50, %v5668_v51  ;;  %v5676_v13 = vsel %vm427_vm1, %v5668_v51, %v5669_v27  ;;  %v5678_v62 = vsel %vm1816_vm15, %v5664_v59, %v5669_v27 }
 0x2ac   : > { %v5675_v63 = vsel %vm1816_vm15, %v5660_v21, %v5674_v49  ;;  %v5677_v0 = vsel %vm1816_vm15, %v5662_v8, %v5676_v13  ;;  %5688 = vst [vmem:[#allocation2 + $0x1f4] sm:$0x4] %v5678_v62  ;;  %v5755_v6 = vpop.permute.xlu0 %5754  ;;  %v5757_v2 = vpop.permute.xlu1 %5756  ;;  %vm5867_vm15 = vcmask 678912  }
 0x2ad   : > { %5686 = vst [vmem:[#allocation2 + $0x1e4] sm:$0x44] %v5675_v63  ;;  %5687 = vst [vmem:[#allocation2 + $0x1ec] sm:$0x44] %v5677_v0  ;;  %v5764_v7 = vrot.slane %v5755_v6, 4  ;;  %v5765_v34 = vrot.slane %v5757_v2, 4 }
 0x2ae   : > { %6844 = vrot.lane.b32.xlu0 %v16340_v25, %s14872_s26  ;;  %6846 = vrot.lane.b32.xlu1 %v6837_v36, %s14872_s26  ;;  %s19186_s26 = smov 54  }
 0x2af   : > { %v5769_v10 = vsel %vm427_vm1, %v5764_v7, %v5765_v34 }
 0x2b0   : > { %v5770_v32 = vsel %vm4189_vm12, %v5755_v6, %v5769_v10  ;;  %v5759_v14 = vpop.permute.xlu0 %5758  ;;  %v5761_v11 = vpop.permute.xlu1 %5760 }
 0x2b1   : > { %5783 = vst [vmem:[#allocation2 + $0x1d4] sm:$0x88] %v5770_v32  ;;  %v5766_v16 = vrot.slane %v5759_v14, 4  ;;  %v5767_v28 = vrot.slane %v5761_v11, 4 }
 0x2b2   : > { %6938 = vrot.lane.b32.xlu0 %v16355_v37, %s14873_s6  ;;  %6940 = vrot.lane.b32.xlu1 %v16314_v58, %s14873_s6 }
 0x2b3   : > { %v5771_v35 = vsel %vm427_vm1, %v5765_v34, %v5766_v16  ;;  %v5773_v15 = vsel %vm427_vm1, %v5766_v16, %v5767_v28 }
 0x2b4   : > { %v5772_v22 = vsel %vm4189_vm12, %v5757_v2, %v5771_v35  ;;  %v5774_v60 = vsel %vm4189_vm12, %v5759_v14, %v5773_v15  ;;  %v5763_v19 = vpop.permute.xlu0 %5762  ;;  %v5852_v61 = vpop.permute.xlu1 %5851 }
 0x2b5   : > { %5784 = vst [vmem:[#allocation2 + $0x1dc] sm:$0x88] %v5772_v22  ;;  %5785 = vst [vmem:[#allocation2 + $0x1e4] sm:$0x88] %v5774_v60  ;;  %v5768_v47 = vrot.slane %v5763_v19, 4  ;;  %v5861_v45 = vrot.slane %v5852_v61, 4 }
 0x2b6   : > { %6942 = vrot.lane.b32.xlu0 %v16278_v12, %s14873_s6  ;;  %6944 = vrot.lane.b32.xlu1 %v16286_v41, %s14873_s6 }
 0x2b7   : > { %v5775_v31 = vsel %vm427_vm1, %v5767_v28, %v5768_v47  ;;  %v5777_v1 = vsel %vm4189_vm12, %v5763_v19, %v5768_v47 }
 0x2b8   : > { %v5776_v43 = vsel %vm4189_vm12, %v5761_v11, %v5775_v31  ;;  %5787 = vst [vmem:[#allocation2 + $0x1f4] sm:$0x8] %v5777_v1  ;;  %v5854_v20 = vpop.permute.xlu0 %5853  ;;  %v5856_v39 = vpop.permute.xlu1 %5855  ;;  %v14576_v54 = vld [vmem:[#allocation2 + $0x1b4] ss:$36 sps:$4 sm:$0xff]   ;;  %vm5966_vm12 = vcmask 670720  }
 0x2b9   : > { %v14578_v55 = vld [vmem:[#allocation2 + $0x1b0] ss:$36 sps:$4 sm:$0xff]   ;;  %5786 = vst [vmem:[#allocation2 + $0x1ec] sm:$0x88] %v5776_v43  ;;  %v5862_v40 = vrot.slane %v5854_v20, 4  ;;  %v5863_v46 = vrot.slane %v5856_v39, 4  ;;  %13539 = vmatprep.subr.bf16.mxu0 %v14576_v54 }
 0x2ba   : > { %6946 = vrot.lane.b32.xlu0 %v6937_v26, %s14873_s6  ;;  %7036 = vrot.lane.b32.xlu1 %v16286_v41, %s14874_s7  ;;  %s19184_s6 = smov 53  }
 0x2bb   : > { %v5866_v44 = vsel %vm427_vm1, %v5861_v45, %v5862_v40  ;;  %v5869_v21 = vsel %vm427_vm1, %v5862_v40, %v5863_v46  ;;  %13540 = vmatpush1.bf16.msra.mxu0 %v14578_v55 }
 0x2bc   : > { %v5858_v48 = vpop.permute.xlu0 %5857  ;;  %v5868_v4 = vsel %vm5867_vm15, %v5852_v61, %v5866_v44  ;;  %v5870_v50 = vsel %vm5867_vm15, %v5854_v20, %v5869_v21  ;;  %v5860_v52 = vpop.permute.xlu1 %5859  ;;  %v14579_v53 = vld [vmem:[#allocation2 + $0x1bc] ss:$36 sps:$4 sm:$0xff]  }
 0x2bd   : > { %v14581_v23 = vld [vmem:[#allocation2 + $0x1b8] ss:$36 sps:$4 sm:$0xff]   ;;  %v5864_v56 = vrot.slane %v5858_v48, 4  ;;  %5881 = vst [vmem:[#allocation2 + $0x1f8] sm:$0x11] %v5868_v4  ;;  %v5865_v18 = vrot.slane %v5860_v52, 4  ;;  %13582 = vmatprep.subr.bf16.mxu1 %v14579_v53 }
 0x2be   : > { %5882 = vst [vmem:[#allocation2 + $0x200] sm:$0x11] %v5870_v50  ;;  %7038 = vrot.lane.b32.xlu0 %v16340_v25, %s14874_s7  ;;  %7040 = vrot.lane.b32.xlu1 %v16301_v33, %s14874_s7 }
 0x2bf   : > { %v5871_v8 = vsel %vm427_vm1, %v5863_v46, %v5864_v56  ;;  %v5873_v59 = vsel %vm427_vm1, %v5864_v56, %v5865_v18  ;;  %v5875_v51 = vsel %vm5867_vm15, %v5860_v52, %v5865_v18  ;;  %13583 = vmatpush1.bf16.msra.mxu1 %v14581_v23  ;;  %v14583_v46 = vld [vmem:[%s14967_s22 + $0xa] ss:$0 sps:$4 sm:$0x33]  }
 0x2c0   : > { %v5872_v27 = vsel %vm5867_vm15, %v5856_v39, %v5871_v8  ;;  %v5874_v36 = vsel %vm5867_vm15, %v5858_v48, %v5873_v59  ;;  %5885 = vst [vmem:[#allocation2 + $0x218] sm:$0x1] %v5875_v51  ;;  %v5951_v30 = vpop.permute.xlu0 %5950  ;;  %v5953_v49 = vpop.permute.xlu1 %5952  ;;  %v7325_v56 = vrot.slane %v14583_v46, %v14962_v5  ;;  %vm6559_vm15 = vcmask 564224  }
 0x2c1   : > { %5883 = vst [vmem:[#allocation2 + $0x208] sm:$0x11] %v5872_v27  ;;  %5884 = vst [vmem:[#allocation2 + $0x210] sm:$0x11] %v5874_v36  ;;  %v5960_v13 = vrot.slane %v5951_v30, 4  ;;  %v5961_v62 = vrot.slane %v5953_v49, 4 }
 0x2c2   : > { %7042 = vrot.lane.b32.xlu0 %v16386_v57, %s14874_s7  ;;  %7044 = vrot.lane.b32.xlu1 %v16389_v38, %s14874_s7  ;;  %s19210_s7 = smov 52  }
 0x2c3   : > { %v5965_v63 = vsel %vm427_vm1, %v5960_v13, %v5961_v62 }
 0x2c4   : > { %v5955_v0 = vpop.permute.xlu0 %5954  ;;  %v5957_v6 = vpop.permute.xlu1 %5956  ;;  %v5967_v2 = vsel %vm5966_vm12, %v5951_v30, %v5965_v63  ;;  %v7326_v30 = vcombine.low %v7325_v56, %v7325_v56  ;;  %v16571_v56 = vld [vmem:[%s14967_s22 + $0x3] sm:$0xff] }
 0x2c5   : > { %v5962_v7 = vrot.slane %v5955_v0, 4  ;;  %v5963_v34 = vrot.slane %v5957_v6, 4  ;;  %5980 = vst [vmem:[#allocation2 + $0x1f8] sm:$0x22] %v5967_v2 }
 0x2c6   : > { %7135 = vrot.lane.b32.xlu0 %v16278_v12, %s19215_s8  ;;  %7137 = vrot.lane.b32.xlu1 %v16286_v41, %s19215_s8 }
 0x2c7   : > { %v5968_v29 = vsel %vm427_vm1, %v5961_v62, %v5962_v7  ;;  %v5970_v10 = vsel %vm427_vm1, %v5962_v7, %v5963_v34 }
 0x2c8   : > { %v5959_v32 = vpop.permute.xlu0 %5958  ;;  %v5969_v14 = vsel %vm5966_vm12, %v5953_v49, %v5968_v29  ;;  %v5971_v11 = vsel %vm5966_vm12, %v5955_v0, %v5970_v10  ;;  %v6050_v16 = vpop.permute.xlu1 %6049 }
 0x2c9   : > { %v5964_v28 = vrot.slane %v5959_v32, 4  ;;  %5981 = vst [vmem:[#allocation2 + $0x200] sm:$0x22] %v5969_v14  ;;  %5982 = vst [vmem:[#allocation2 + $0x208] sm:$0x22] %v5971_v11  ;;  %v6059_v61 = vrot.slane %v6050_v16, 4 }
 0x2ca   : > { %7139 = vrot.lane.b32.xlu0 %v16297_v17, %s19215_s8  ;;  %7141 = vrot.lane.b32.xlu1 %v16301_v33, %s19215_s8  ;;  %v7226_v17 = vrot.slane %v14582_v24, %v14962_v5 }
 0x2cb   : > { %v5972_v35 = vsel %vm427_vm1, %v5963_v34, %v5964_v28  ;;  %v5974_v15 = vsel %vm5966_vm12, %v5959_v32, %v5964_v28  ;;  %v7467_v34 = vld [vmem:[%s14967_s22 + $0x2] sm:$0xff] }
 0x2cc   : > { %v5973_v22 = vsel %vm5966_vm12, %v5957_v6, %v5972_v35  ;;  %5984 = vst [vmem:[#allocation2 + $0x218] sm:$0x2] %v5974_v15  ;;  %v6052_v60 = vpop.permute.xlu0 %6051  ;;  %v6054_v19 = vpop.permute.xlu1 %6053  ;;  %v7233_v40 = vrot.slane %v7226_v17, %v14962_v5  ;;  %v7471_v28 = vcombine.high %v7467_v34, %v7467_v34  ;;  %v7570_v46 = vcombine.low %v7467_v34, %v7467_v34 }
 0x2cd   : > { %5983 = vst [vmem:[#allocation2 + $0x210] sm:$0x22] %v5973_v22  ;;  %v6060_v47 = vrot.slane %v6052_v60, 4  ;;  %v6061_v26 = vrot.slane %v6054_v19, 4  ;;  %vm19294_vm12 = vcmask 556032  }
 0x2ce   : > { %7143 = vrot.lane.b32.xlu0 %v16415_v42, %s19215_s8  ;;  %7234 = vrot.lane.b32.xlu1 %v16314_v58, %s19126_s11 }
 0x2cf   : > { %v6064_v31 = vsel %vm427_vm1, %v6059_v61, %v6060_v47  ;;  %v6067_v1 = vsel %vm427_vm1, %v6060_v47, %v6061_v26 }
 0x2d0   : > { %v6056_v43 = vpop.permute.xlu0 %6055  ;;  %v6066_v20 = vsel %vm6065_vm3, %v6050_v16, %v6064_v31  ;;  %v6068_v39 = vsel %vm6065_vm3, %v6052_v60, %v6067_v1  ;;  %v6058_v54 = vpop.permute.xlu1 %6057 }
 0x2d1   : > { %v6062_v55 = vrot.slane %v6056_v43, 4  ;;  %6079 = vst [vmem:[#allocation2 + $0x1f8] sm:$0x44] %v6066_v20  ;;  %6080 = vst [vmem:[#allocation2 + $0x200] sm:$0x44] %v6068_v39  ;;  %v6063_v45 = vrot.slane %v6058_v54, 4 }
 0x2d2   : > { %7236 = vrot.lane.b32.xlu0 %v16326_v9, %s19126_s11  ;;  %7238 = vrot.lane.b32.xlu1 %v16286_v41, %s19126_s11 }
 0x2d3   : > { %v6069_v44 = vsel %vm427_vm1, %v6061_v26, %v6062_v55  ;;  %v6071_v21 = vsel %vm427_vm1, %v6062_v55, %v6063_v45  ;;  %v6073_v48 = vsel %vm6065_vm3, %v6058_v54, %v6063_v45  ;;  %v7485_v26 = vrot.slane %v7471_v28, %v14962_v5 }
 0x2d4   : > { %v6070_v4 = vsel %vm6065_vm3, %v6054_v19, %v6069_v44  ;;  %v6072_v50 = vsel %vm6065_vm3, %v6056_v43, %v6071_v21  ;;  %6083 = vst [vmem:[#allocation2 + $0x218] sm:$0x4] %v6073_v48  ;;  %v6150_v52 = vpop.permute.xlu0 %6149  ;;  %v6152_v53 = vpop.permute.xlu1 %6151  ;;  %vm6854_vm3 = vcmask 482304  }
 0x2d5   : > { %6081 = vst [vmem:[#allocation2 + $0x208] sm:$0x44] %v6070_v4  ;;  %6082 = vst [vmem:[#allocation2 + $0x210] sm:$0x44] %v6072_v50  ;;  %v6159_v9 = vrot.slane %v6150_v52, 4  ;;  %v6160_v23 = vrot.slane %v6152_v53, 4 }
 0x2d6   : > { %7240 = vrot.lane.b32.xlu0 %v16340_v25, %s19126_s11  ;;  %7242 = vrot.lane.b32.xlu1 %v7233_v40, %s19126_s11  ;;  %v7487_v40 = vcombine.low %v7485_v26, %v7485_v26 }
 0x2d7   : > { %v6164_v18 = vsel %vm427_vm1, %v6159_v9, %v6160_v23 }
 0x2d8   : > { %v6165_v8 = vsel %vm2310_vm5, %v6150_v52, %v6164_v18  ;;  %v6154_v59 = vpop.permute.xlu0 %6153  ;;  %v6156_v51 = vpop.permute.xlu1 %6155 }
 0x2d9   : > { %6178 = vst [vmem:[#allocation2 + $0x1f8] sm:$0x88] %v6165_v8  ;;  %v6161_v27 = vrot.slane %v6154_v59, 4  ;;  %v6162_v36 = vrot.slane %v6156_v51, 4 }
 0x2da   : > { %7334 = vrot.lane.b32.xlu0 %v16355_v37, %s14877_s9  ;;  %7336 = vrot.lane.b32.xlu1 %v16314_v58, %s14877_s9  ;;  %v7333_v58 = vrot.slane %v7326_v30, %v14962_v5 }
 0x2db   : > { %v6166_v49 = vsel %vm427_vm1, %v6160_v23, %v6161_v27  ;;  %v6168_v13 = vsel %vm427_vm1, %v6161_v27, %v6162_v36 }
 0x2dc   : > { %v6167_v62 = vsel %vm2310_vm5, %v6152_v53, %v6166_v49  ;;  %v6169_v63 = vsel %vm2310_vm5, %v6154_v59, %v6168_v13  ;;  %v6158_v0 = vpop.permute.xlu0 %6157  ;;  %v6247_v6 = vpop.permute.xlu1 %6246  ;;  %v7577_v53 = vrot.slane %v7570_v46, %v14962_v5  ;;  %v14586_v49 = vld [vmem:[%s14967_s22 + $0xa] ss:$0 sps:$4 sm:$0x33]   ;;  %v7669_v13 = vcombine.low %v16571_v56, %v16571_v56 }
 0x2dd   : > { %6179 = vst [vmem:[#allocation2 + $0x200] sm:$0x88] %v6167_v62  ;;  %6180 = vst [vmem:[#allocation2 + $0x208] sm:$0x88] %v6169_v63  ;;  %v6163_v2 = vrot.slane %v6158_v0, 4  ;;  %v6256_v14 = vrot.slane %v6247_v6, 4 }
 0x2de   : > { %7338 = vrot.lane.b32.xlu0 %v16278_v12, %s14877_s9  ;;  %7340 = vrot.lane.b32.xlu1 %v16286_v41, %s14877_s9  ;;  %v16533_v12 = vrot.slane %v7467_v34, %v14962_v5  ;;  %v7593_v30 = vrot.slane %v7577_v53, %v14962_v5 }
 0x2df   : > { %v6170_v37 = vsel %vm427_vm1, %v6162_v36, %v6163_v2  ;;  %v6172_v7 = vsel %vm2310_vm5, %v6158_v0, %v6163_v2  ;;  %v7585_v36 = vcombine.high %v7577_v53, %v7577_v53 }
 0x2e0   : > { %v6171_v29 = vsel %vm2310_vm5, %v6156_v51, %v6170_v37  ;;  %6182 = vst [vmem:[#allocation2 + $0x218] sm:$0x8] %v6172_v7  ;;  %v6249_v10 = vpop.permute.xlu0 %6248  ;;  %v6251_v32 = vpop.permute.xlu1 %6250  ;;  %v16553_v55 = vrot.slane %v16533_v12, %v14962_v5 }
 0x2e1   : > { %6181 = vst [vmem:[#allocation2 + $0x210] sm:$0x88] %v6171_v29  ;;  %v6257_v11 = vrot.slane %v6249_v10, 4  ;;  %v6258_v16 = vrot.slane %v6251_v32, 4  ;;  %v7600_v34 = vrot.slane %v7585_v36, %v14962_v5  ;;  %v7586_v29 = vcombine.high %v16533_v12, %v16533_v12 }
 0x2e2   : > { %7342 = vrot.lane.b32.xlu0 %v7333_v58, %s14877_s9  ;;  %7432 = vrot.lane.b32.xlu1 %v16286_v41, %s14878_s10  ;;  %v7486_v41 = vcombine.low %v16533_v12, %v16533_v12  ;;  %s19112_s9 = smov 43  }
 0x2e3   : > { %v6261_v24 = vsel %vm427_vm1, %v6256_v14, %v6257_v11  ;;  %v6263_v35 = vsel %vm427_vm1, %v6257_v11, %v6258_v16 }
 0x2e4   : > { %v6262_v15 = vsel %vm4682_vm2, %v6247_v6, %v6261_v24  ;;  %v6264_v22 = vsel %vm4682_vm2, %v6249_v10, %v6263_v35  ;;  %v6253_v60 = vpop.permute.xlu0 %6252  ;;  %v6255_v19 = vpop.permute.xlu1 %6254  ;;  %v7494_v45 = vrot.slane %v7486_v41, %v14962_v5  ;;  %v7622_v10 = vrot.slane %v14586_v49, %v14962_v5 }
 0x2e5   : > { %6275 = vst [vmem:[#allocation2 + $0x21c] sm:$0x11] %v6262_v15  ;;  %6276 = vst [vmem:[#allocation2 + $0x224] sm:$0x11] %v6264_v22  ;;  %v6259_v61 = vrot.slane %v6253_v60, 4  ;;  %v6260_v47 = vrot.slane %v6255_v19, 4  ;;  %v16600_v15 = vrot.slane %v16571_v56, %v14962_v5  ;;  %v7614_v22 = vrot.slane %v7586_v29, %v14962_v5 }
 0x2e6   : > { %7434 = vrot.lane.b32.xlu0 %v16340_v25, %s14878_s10  ;;  %7436 = vrot.lane.b32.xlu1 %v16301_v33, %s14878_s10 }
 0x2e7   : > { %v6265_v17 = vsel %vm427_vm1, %v6258_v16, %v6259_v61  ;;  %v6267_v31 = vsel %vm427_vm1, %v6259_v61, %v6260_v47  ;;  %v6269_v1 = vsel %vm4682_vm2, %v6255_v19, %v6260_v47  ;;  %v14588_v61 = vld [vmem:[%s14967_s22 + $0xb] ss:$0 sps:$4 sm:$0x33]  }
 0x2e8   : > { %v6266_v43 = vsel %vm4682_vm2, %v6251_v32, %v6265_v17  ;;  %v6268_v20 = vsel %vm4682_vm2, %v6253_v60, %v6267_v31  ;;  %6279 = vst [vmem:[#allocation2 + $0x23c] sm:$0x1] %v6269_v1  ;;  %v6345_v25 = vpop.permute.xlu0 %6344  ;;  %v6347_v39 = vpop.permute.xlu1 %6346  ;;  %vm6459_vm2 = vcmask 572416   ;;  %v16592_v32 = vrot.slane %v7669_v13, %v14962_v5 }
 0x2e9   : > { %6277 = vst [vmem:[#allocation2 + $0x22c] sm:$0x11] %v6266_v43  ;;  %6278 = vst [vmem:[#allocation2 + $0x234] sm:$0x11] %v6268_v20  ;;  %v6354_v33 = vrot.slane %v6345_v25, 4  ;;  %v6355_v54 = vrot.slane %v6347_v39, 4  ;;  %v7629_v60 = vrot.slane %v7622_v10, %v14962_v5 }
 0x2ea   : > { %7438 = vrot.lane.b32.xlu0 %v16386_v57, %s14878_s10  ;;  %7440 = vrot.lane.b32.xlu1 %v16389_v38, %s14878_s10  ;;  %v7508_v57 = vrot.slane %v7487_v40, %v14962_v5  ;;  %v7515_v38 = vrot.slane %v7485_v26, %v14962_v5  ;;  %v7684_v19 = vcombine.low %v16592_v32, %v16592_v32  ;;  %s19108_s10 = smov 42  }
 0x2eb   : > { %v6359_v44 = vsel %vm427_vm1, %v6354_v33, %v6355_v54 }
 0x2ec   : > { %v6349_v21 = vpop.permute.xlu0 %6348  ;;  %v6351_v48 = vpop.permute.xlu1 %6350  ;;  %v6361_v4 = vsel %vm6360_vm14, %v6345_v25, %v6359_v44  ;;  %v16620_v33 = vrot.slane %v7684_v19, %v14962_v5 }
 0x2ed   : > { %v6356_v50 = vrot.slane %v6349_v21, 4  ;;  %v6357_v52 = vrot.slane %v6351_v48, 4  ;;  %6374 = vst [vmem:[#allocation2 + $0x21c] sm:$0x22] %v6361_v4 }
 0x2ee   : > { %7531 = vrot.lane.b32.xlu0 %v7494_v45, %s14879_s12  ;;  %7533 = vrot.lane.b32.xlu1 %v16553_v55, %s14879_s12 }
 0x2ef   : > { %v6362_v9 = vsel %vm427_vm1, %v6355_v54, %v6356_v50  ;;  %v6364_v23 = vsel %vm427_vm1, %v6356_v50, %v6357_v52  ;;  %v16624_v54 = vrot.slane %v16592_v32, %v14962_v5  ;;  %v16638_v50 = vrot.slane %v16600_v15, %v14962_v5 }
 0x2f0   : > { %v6353_v18 = vpop.permute.xlu0 %6352  ;;  %v6363_v8 = vsel %vm6360_vm14, %v6347_v39, %v6362_v9  ;;  %v6365_v59 = vsel %vm6360_vm14, %v6349_v21, %v6364_v23  ;;  %v6444_v51 = vpop.permute.xlu1 %6443  ;;  %v7685_v39 = vcombine.low %v16600_v15, %v16600_v15 }
 0x2f1   : > { %v6358_v27 = vrot.slane %v6353_v18, 4  ;;  %6375 = vst [vmem:[#allocation2 + $0x224] sm:$0x22] %v6363_v8  ;;  %6376 = vst [vmem:[#allocation2 + $0x22c] sm:$0x22] %v6365_v59  ;;  %v6453_v58 = vrot.slane %v6444_v51, 4 }
 0x2f2   : > { %7535 = vrot.lane.b32.xlu0 %v7508_v57, %s14879_s12  ;;  %7537 = vrot.lane.b32.xlu1 %v7515_v38, %s14879_s12  ;;  %v16630_v4 = vrot.slane %v7685_v39, %v14962_v5  ;;  %v7768_v57 = vcombine.high %v16571_v56, %v16571_v56 }
 0x2f3   : > { %v6366_v62 = vsel %vm427_vm1, %v6357_v52, %v6358_v27  ;;  %v6368_v63 = vsel %vm6360_vm14, %v6353_v18, %v6358_v27 }
 0x2f4   : > { %v6367_v0 = vsel %vm6360_vm14, %v6351_v48, %v6366_v62  ;;  %6378 = vst [vmem:[#allocation2 + $0x23c] sm:$0x2] %v6368_v63  ;;  %v6446_v6 = vpop.permute.xlu0 %6445  ;;  %v6448_v2 = vpop.permute.xlu1 %6447  ;;  %v16654_v27 = vrot.slane %v7768_v57, %v14962_v5  ;;  %vm6954_vm14 = vcmask 474112  }
 0x2f5   : > { %6377 = vst [vmem:[#allocation2 + $0x234] sm:$0x22] %v6367_v0  ;;  %v6454_v37 = vrot.slane %v6446_v6, 4  ;;  %v6455_v7 = vrot.slane %v6448_v2, 4 }
 0x2f6   : > { %7539 = vrot.lane.b32.xlu0 %v16415_v42, %s14879_s12  ;;  %7630 = vrot.lane.b32.xlu1 %v7593_v30, %s19177_s13  ;;  %s19110_s12 = smov 41  }
 0x2f7   : > { %v6458_v14 = vsel %vm427_vm1, %v6453_v58, %v6454_v37  ;;  %v6461_v11 = vsel %vm427_vm1, %v6454_v37, %v6455_v7 }
 0x2f8   : > { %v6450_v16 = vpop.permute.xlu0 %6449  ;;  %v6460_v28 = vsel %vm6459_vm2, %v6444_v51, %v6458_v14  ;;  %v6462_v42 = vsel %vm6459_vm2, %v6446_v6, %v6461_v11  ;;  %v6452_v24 = vpop.permute.xlu1 %6451  ;;  %v7783_v51 = vcombine.high %v16600_v15, %v16600_v15  ;;  %v14143_v14 = vld.sshfl [vmem:[%s14967_s22 + $0xb] sm:$0x5 pattern:$0x73625140] }
 0x2f9   : > { %v6456_v35 = vrot.slane %v6450_v16, 4  ;;  %6473 = vst [vmem:[#allocation2 + $0x21c] sm:$0x44] %v6460_v28  ;;  %6474 = vst [vmem:[#allocation2 + $0x224] sm:$0x44] %v6462_v42  ;;  %v6457_v12 = vrot.slane %v6452_v24, 4 }
 0x2fa   : > { %7632 = vrot.lane.b32.xlu0 %v7600_v34, %s19177_s13  ;;  %7634 = vrot.lane.b32.xlu1 %v16553_v55, %s19177_s13  ;;  %v7721_v55 = vrot.slane %v14588_v61, %v14962_v5  ;;  %v16663_v37 = vrot.slane %v7783_v51, %v14962_v5  ;;  %v7784_v34 = vcombine.high %v16654_v27, %v16654_v27 }
 0x2fb   : > { %v6463_v47 = vsel %vm427_vm1, %v6455_v7, %v6456_v35  ;;  %v6465_v41 = vsel %vm427_vm1, %v6456_v35, %v6457_v12  ;;  %v6467_v26 = vsel %vm6459_vm2, %v6452_v24, %v6457_v12  ;;  %v7805_v7 = vrot.slane %v16654_v27, %v14962_v5 }
 0x2fc   : > { %v6464_v17 = vsel %vm6459_vm2, %v6448_v2, %v6463_v47  ;;  %v6466_v31 = vsel %vm6459_vm2, %v6450_v16, %v6465_v41  ;;  %6477 = vst [vmem:[#allocation2 + $0x23c] sm:$0x4] %v6467_v26  ;;  %v6544_v1 = vpop.permute.xlu0 %6543  ;;  %v6546_v43 = vpop.permute.xlu1 %6545  ;;  %v7722_v52 = vcombine.low %v7721_v55, %v7721_v55  ;;  %vm7052_vm2 = vcmask 465920  }
 0x2fd   : > { %6475 = vst [vmem:[#allocation2 + $0x22c] sm:$0x44] %v6464_v17  ;;  %6476 = vst [vmem:[#allocation2 + $0x234] sm:$0x44] %v6466_v31  ;;  %v6553_v20 = vrot.slane %v6544_v1, 4  ;;  %v6554_v25 = vrot.slane %v6546_v43, 4 }
 0x2fe   : > { %7636 = vrot.lane.b32.xlu0 %v7614_v22, %s19177_s13  ;;  %7638 = vrot.lane.b32.xlu1 %v7629_v60, %s19177_s13  ;;  %v7729_v56 = vrot.slane %v7722_v52, %v14962_v5  ;;  %v7812_v22 = vrot.slane %v7784_v34, %v14962_v5  ;;  %v7826_v60 = vrot.slane %v14143_v14, %v14962_v5 }
 0x2ff   : > { %v6558_v45 = vsel %vm427_vm1, %v6553_v20, %v6554_v25  ;;  %v7881_v20 = vcombine.low %v16654_v27, %v16654_v27 }
 0x300   : > { %v6548_v40 = vpop.permute.xlu0 %6547  ;;  %v6550_v46 = vpop.permute.xlu1 %6549  ;;  %v6560_v44 = vsel %vm6559_vm15, %v6544_v1, %v6558_v45 }
 0x301   : > { %v6555_v21 = vrot.slane %v6548_v40, 4  ;;  %v6556_v48 = vrot.slane %v6550_v46, 4  ;;  %6573 = vst [vmem:[#allocation2 + $0x21c] sm:$0x88] %v6560_v44  ;;  %v7902_v44 = vrot.slane %v7881_v20, %v14962_v5 }
 0x302   : > { %7730 = vrot.lane.b32.xlu0 %v16620_v33, %s14836_s20  ;;  %7732 = vrot.lane.b32.xlu1 %v16624_v54, %s14836_s20 }
 0x303   : > { %v6561_v38 = vsel %vm427_vm1, %v6554_v25, %v6555_v21  ;;  %v6563_v53 = vsel %vm427_vm1, %v6555_v21, %v6556_v48  ;;  %v7917_v21 = vcombine.low %v14143_v14, %v14143_v14 }
 0x304   : > { %v6552_v9 = vpop.permute.xlu0 %6551  ;;  %v6562_v23 = vsel %vm6559_vm15, %v6546_v43, %v6561_v38  ;;  %v6564_v18 = vsel %vm6559_vm15, %v6548_v40, %v6563_v53  ;;  %v6642_v8 = vpop.permute.xlu1 %6641 }
 0x305   : > { %v6557_v59 = vrot.slane %v6552_v9, 4  ;;  %6574 = vst [vmem:[#allocation2 + $0x224] sm:$0x88] %v6562_v23  ;;  %6575 = vst [vmem:[#allocation2 + $0x22c] sm:$0x88] %v6564_v18  ;;  %v6651_v6 = vrot.slane %v6642_v8, 4  ;;  %v7924_v18 = vrot.slane %v7917_v21, %v14962_v5 }
 0x306   : > { %7734 = vrot.lane.b32.xlu0 %v16630_v4, %s14836_s20  ;;  %7736 = vrot.lane.b32.xlu1 %v16638_v50, %s14836_s20 }
 0x307   : > { %v6565_v36 = vsel %vm427_vm1, %v6556_v48, %v6557_v59  ;;  %v6567_v30 = vsel %vm6559_vm15, %v6552_v9, %v6557_v59 }
 0x308   : > { %v6566_v49 = vsel %vm6559_vm15, %v6550_v46, %v6565_v36  ;;  %6577 = vst [vmem:[#allocation2 + $0x23c] sm:$0x8] %v6567_v30  ;;  %v6644_v13 = vpop.permute.xlu0 %6643  ;;  %v6646_v62 = vpop.permute.xlu1 %6645  ;;  %v14589_v63 = vld [vmem:[#allocation2 + $0x1fc] ss:$36 sps:$4 sm:$0xff]   ;;  %vm19136_vm15 = vcmask 457728  }
 0x309   : > { %v14591_v0 = vld [vmem:[#allocation2 + $0x1f8] ss:$36 sps:$4 sm:$0xff]   ;;  %6576 = vst [vmem:[#allocation2 + $0x234] sm:$0x88] %v6566_v49  ;;  %v6652_v2 = vrot.slane %v6644_v13, 4  ;;  %v6653_v58 = vrot.slane %v6646_v62, 4  ;;  %13541 = vmatprep.subr.bf16.mxu0 %v14589_v63 }
 0x30a   : > { %7738 = vrot.lane.b32.xlu0 %v7729_v56, %s14836_s20  ;;  %7827 = vrot.lane.b32.xlu1 %v16638_v50, %s14837_s21  ;;  %s19240_s20 = smov 67  }
 0x30b   : > { %v6656_v29 = vsel %vm427_vm1, %v6651_v6, %v6652_v2  ;;  %v6659_v10 = vsel %vm427_vm1, %v6652_v2, %v6653_v58  ;;  %13542 = vmatpush1.bf16.msra.mxu0 %v14591_v0 }
 0x30c   : > { %v6658_v11 = vsel %vm19294_vm12, %v6642_v8, %v6656_v29  ;;  %v6660_v16 = vsel %vm19294_vm12, %v6644_v13, %v6659_v10  ;;  %v6648_v28 = vpop.permute.xlu0 %6647  ;;  %v6650_v42 = vpop.permute.xlu1 %6649  ;;  %v14593_v24 = vld [vmem:[#allocation2 + $0x204] ss:$36 sps:$4 sm:$0xff]   ;;  %v7978_v8 = vcombine.high %v16592_v32, %v16592_v32 }
 0x30d   : > { %v14595_v35 = vld [vmem:[#allocation2 + $0x200] ss:$36 sps:$4 sm:$0xff]   ;;  %6671 = vst [vmem:[#allocation2 + $0x240] sm:$0x11] %v6658_v11  ;;  %6672 = vst [vmem:[#allocation2 + $0x248] sm:$0x11] %v6660_v16  ;;  %13584 = vmatprep.subr.bf16.mxu1 %v14593_v24 }
 0x30e   : > { %v6654_v12 = vrot.slane %v6648_v28, 4  ;;  %v6655_v15 = vrot.slane %v6650_v42, 4  ;;  %7829 = vrot.lane.b32.xlu0 %v16663_v37, %s14837_s21  ;;  %7831 = vrot.lane.b32.xlu1 %v7805_v7, %s14837_s21  ;;  %v16711_v32 = vrot.slane %v7978_v8, %v14962_v5 }
 0x30f   : > { %13585 = vmatpush1.bf16.msra.mxu1 %v14595_v35 }
 0x310   : > { %v6661_v19 = vsel %vm427_vm1, %v6653_v58, %v6654_v12  ;;  %v6663_v61 = vsel %vm427_vm1, %v6654_v12, %v6655_v15  ;;  %v6665_v47 = vsel %vm19294_vm12, %v6650_v42, %v6655_v15  ;;  %v6741_v17 = vpop.permute.xlu0 %6740  ;;  %v6743_v31 = vpop.permute.xlu1 %6742 }
 0x311   : > { %v6662_v41 = vsel %vm19294_vm12, %v6646_v62, %v6661_v19  ;;  %v6664_v26 = vsel %vm19294_vm12, %v6648_v28, %v6663_v61  ;;  %6675 = vst [vmem:[#allocation2 + $0x260] sm:$0x1] %v6665_v47  ;;  %v6750_v1 = vrot.slane %v6741_v17, 4  ;;  %v6751_v43 = vrot.slane %v6743_v31, 4 }
 0x312   : > { %6673 = vst [vmem:[#allocation2 + $0x250] sm:$0x11] %v6662_v41  ;;  %6674 = vst [vmem:[#allocation2 + $0x258] sm:$0x11] %v6664_v26  ;;  %7833 = vrot.lane.b32.xlu0 %v7812_v22, %s14837_s21  ;;  %7835 = vrot.lane.b32.xlu1 %v7826_v60, %s14837_s21  ;;  %s19236_s21 = smov 66  }
 0x313   : > { %v6755_v25 = vsel %vm427_vm1, %v6750_v1, %v6751_v43 }
 0x314   : > { %v6756_v39 = vsel %vm19195_vm0, %v6741_v17, %v6755_v25  ;;  %v6745_v55 = vpop.permute.xlu0 %6744  ;;  %v6747_v45 = vpop.permute.xlu1 %6746 }
 0x315   : > { %6769 = vst [vmem:[#allocation2 + $0x240] sm:$0x22] %v6756_v39  ;;  %v6752_v40 = vrot.slane %v6745_v55, 4  ;;  %v6753_v46 = vrot.slane %v6747_v45, 4 }
 0x316   : > { %7925 = vrot.lane.b32.xlu0 %v16630_v4, %s14838_s23  ;;  %7927 = vrot.lane.b32.xlu1 %v16638_v50, %s14838_s23 }
 0x317   : > { %v6757_v48 = vsel %vm427_vm1, %v6751_v43, %v6752_v40  ;;  %v6759_v52 = vsel %vm427_vm1, %v6752_v40, %v6753_v46 }
 0x318   : > { %v6758_v57 = vsel %vm19195_vm0, %v6743_v31, %v6757_v48  ;;  %v6760_v38 = vsel %vm19195_vm0, %v6745_v55, %v6759_v52  ;;  %v6749_v53 = vpop.permute.xlu0 %6748  ;;  %v6839_v9 = vpop.permute.xlu1 %6838 }
 0x319   : > { %6770 = vst [vmem:[#allocation2 + $0x248] sm:$0x22] %v6758_v57  ;;  %6771 = vst [vmem:[#allocation2 + $0x250] sm:$0x22] %v6760_v38  ;;  %v6754_v23 = vrot.slane %v6749_v53, 4  ;;  %v6848_v30 = vrot.slane %v6839_v9, 4 }
 0x31a   : > { %7929 = vrot.lane.b32.xlu0 %v7902_v44, %s14838_s23  ;;  %7931 = vrot.lane.b32.xlu1 %v7805_v7, %s14838_s23 }
 0x31b   : > { %v6761_v59 = vsel %vm427_vm1, %v6753_v46, %v6754_v23  ;;  %v6763_v56 = vsel %vm19195_vm0, %v6749_v53, %v6754_v23 }
 0x31c   : > { %v6762_v51 = vsel %vm19195_vm0, %v6747_v45, %v6761_v59  ;;  %6773 = vst [vmem:[#allocation2 + $0x260] sm:$0x2] %v6763_v56  ;;  %v6841_v27 = vpop.permute.xlu0 %6840  ;;  %v6843_v36 = vpop.permute.xlu1 %6842 }
 0x31d   : > { %6772 = vst [vmem:[#allocation2 + $0x258] sm:$0x22] %v6762_v51  ;;  %v6849_v49 = vrot.slane %v6841_v27, 4  ;;  %v6850_v13 = vrot.slane %v6843_v36, 4 }
 0x31e   : > { %7933 = vrot.lane.b32.xlu0 %v7924_v18, %s14838_s23  ;;  %8023 = vrot.lane.b32.xlu1 %v16624_v54, %s19161_s24  ;;  %s19229_s23 = smov 65  }
 0x31f   : > { %v6853_v62 = vsel %vm427_vm1, %v6848_v30, %v6849_v49  ;;  %v6856_v63 = vsel %vm427_vm1, %v6849_v49, %v6850_v13 }
 0x320   : > { %v6845_v0 = vpop.permute.xlu0 %6844  ;;  %v6855_v6 = vsel %vm6854_vm3, %v6839_v9, %v6853_v62  ;;  %v6857_v2 = vsel %vm6854_vm3, %v6841_v27, %v6856_v63  ;;  %v6847_v58 = vpop.permute.xlu1 %6846 }
 0x321   : > { %v6851_v7 = vrot.slane %v6845_v0, 4  ;;  %6868 = vst [vmem:[#allocation2 + $0x240] sm:$0x44] %v6855_v6  ;;  %6869 = vst [vmem:[#allocation2 + $0x248] sm:$0x44] %v6857_v2  ;;  %v6852_v34 = vrot.slane %v6847_v58, 4 }
 0x322   : > { %8025 = vrot.lane.b32.xlu0 %v16711_v32, %s19161_s24  ;;  %8122 = vrot.lane.b32.xlu1 %v16620_v33, %s19247_s25 }
 0x323   : > { %v6858_v29 = vsel %vm427_vm1, %v6850_v13, %v6851_v7  ;;  %v6860_v10 = vsel %vm427_vm1, %v6851_v7, %v6852_v34  ;;  %v6862_v14 = vsel %vm6854_vm3, %v6847_v58, %v6852_v34 }
 0x324   : > { %v6859_v11 = vsel %vm6854_vm3, %v6843_v36, %v6858_v29  ;;  %v6861_v16 = vsel %vm6854_vm3, %v6845_v0, %v6860_v10  ;;  %6872 = vst [vmem:[#allocation2 + $0x260] sm:$0x4] %v6862_v14  ;;  %v6939_v28 = vpop.permute.xlu0 %6938  ;;  %v6941_v42 = vpop.permute.xlu1 %6940  ;;  %vm19213_vm3 = vcmask 392192  }
 0x325   : > { %6870 = vst [vmem:[#allocation2 + $0x250] sm:$0x44] %v6859_v11  ;;  %6871 = vst [vmem:[#allocation2 + $0x258] sm:$0x44] %v6861_v16  ;;  %v6948_v24 = vrot.slane %v6939_v28, 4  ;;  %v6949_v35 = vrot.slane %v6941_v42, 4 }
 0x326   : > { %8124 = vrot.lane.b32.xlu0 %v16624_v54, %s19247_s25  ;;  %8219 = vrot.lane.b32.xlu1 %v16638_v50, %s19245_s19 }
 0x327   : > { %v6953_v12 = vsel %vm427_vm1, %v6948_v24, %v6949_v35 }
 0x328   : > { %v6943_v15 = vpop.permute.xlu0 %6942  ;;  %v6945_v22 = vpop.permute.xlu1 %6944  ;;  %v6955_v60 = vsel %vm6954_vm14, %v6939_v28, %v6953_v12 }
 0x329   : > { %v6950_v19 = vrot.slane %v6943_v15, 4  ;;  %v6951_v61 = vrot.slane %v6945_v22, 4  ;;  %6968 = vst [vmem:[#allocation2 + $0x240] sm:$0x88] %v6955_v60 }
 0x32a   : > { %8221 = vrot.lane.b32.xlu0 %v16663_v37, %s19245_s19  ;;  %8317 = vrot.lane.b32.xlu1 %v16630_v4, %s19240_s20 }
 0x32b   : > { %v6956_v47 = vsel %vm427_vm1, %v6949_v35, %v6950_v19  ;;  %v6958_v41 = vsel %vm427_vm1, %v6950_v19, %v6951_v61 }
 0x32c   : > { %v6947_v26 = vpop.permute.xlu0 %6946  ;;  %v6957_v17 = vsel %vm6954_vm14, %v6941_v42, %v6956_v47  ;;  %v6959_v31 = vsel %vm6954_vm14, %v6943_v15, %v6958_v41  ;;  %v7037_v1 = vpop.permute.xlu1 %7036 }
 0x32d   : > { %v6952_v43 = vrot.slane %v6947_v26, 4  ;;  %6969 = vst [vmem:[#allocation2 + $0x248] sm:$0x88] %v6957_v17  ;;  %6970 = vst [vmem:[#allocation2 + $0x250] sm:$0x88] %v6959_v31  ;;  %v7046_v40 = vrot.slane %v7037_v1, 4 }
 0x32e   : > { %8319 = vrot.lane.b32.xlu0 %v16638_v50, %s19240_s20  ;;  %8416 = vrot.lane.b32.xlu1 %v16624_v54, %s19236_s21 }
 0x32f   : > { %v6960_v20 = vsel %vm427_vm1, %v6951_v61, %v6952_v43  ;;  %v6962_v25 = vsel %vm6954_vm14, %v6947_v26, %v6952_v43 }
 0x330   : > { %v6961_v39 = vsel %vm6954_vm14, %v6945_v22, %v6960_v20  ;;  %6972 = vst [vmem:[#allocation2 + $0x260] sm:$0x8] %v6962_v25  ;;  %v7039_v55 = vpop.permute.xlu0 %7038  ;;  %v7041_v45 = vpop.permute.xlu1 %7040  ;;  %vm7350_vm14 = vcmask 384000  }
 0x331   : > { %6971 = vst [vmem:[#allocation2 + $0x258] sm:$0x88] %v6961_v39  ;;  %v7047_v46 = vrot.slane %v7039_v55, 4  ;;  %v7048_v44 = vrot.slane %v7041_v45, 4 }
 0x332   : > { %8418 = vrot.lane.b32.xlu0 %v16711_v32, %s19236_s21  ;;  %8516 = vrot.lane.b32.xlu1 %v16620_v33, %s19229_s23 }
 0x333   : > { %v7051_v21 = vsel %vm427_vm1, %v7046_v40, %v7047_v46  ;;  %v7054_v48 = vsel %vm427_vm1, %v7047_v46, %v7048_v44 }
 0x334   : > { %v7043_v52 = vpop.permute.xlu0 %7042  ;;  %v7053_v57 = vsel %vm7052_vm2, %v7037_v1, %v7051_v21  ;;  %v7055_v38 = vsel %vm7052_vm2, %v7039_v55, %v7054_v48  ;;  %v7045_v53 = vpop.permute.xlu1 %7044 }
 0x335   : > { %v7049_v9 = vrot.slane %v7043_v52, 4  ;;  %7066 = vst [vmem:[#allocation2 + $0x264] sm:$0x11] %v7053_v57  ;;  %7067 = vst [vmem:[#allocation2 + $0x26c] sm:$0x11] %v7055_v38  ;;  %v7050_v23 = vrot.slane %v7045_v53, 4 }
 0x336   : > { %8518 = vrot.lane.b32.xlu0 %v16624_v54, %s19229_s23  ;;  %8614 = vrot.lane.b32.xlu1 %v16638_v50, %s19222_s27 }
 0x337   : > { %v7056_v18 = vsel %vm427_vm1, %v7048_v44, %v7049_v9  ;;  %v7058_v8 = vsel %vm427_vm1, %v7049_v9, %v7050_v23  ;;  %v7060_v59 = vsel %vm7052_vm2, %v7045_v53, %v7050_v23 }
 0x338   : > { %v7057_v56 = vsel %vm7052_vm2, %v7041_v45, %v7056_v18  ;;  %v7059_v51 = vsel %vm7052_vm2, %v7043_v52, %v7058_v8  ;;  %7070 = vst [vmem:[#allocation2 + $0x284] sm:$0x1] %v7060_v59  ;;  %v7136_v27 = vpop.permute.xlu0 %7135  ;;  %v7138_v36 = vpop.permute.xlu1 %7137  ;;  %vm7448_vm2 = vcmask 375808  }
 0x339   : > { %7068 = vst [vmem:[#allocation2 + $0x274] sm:$0x11] %v7057_v56  ;;  %7069 = vst [vmem:[#allocation2 + $0x27c] sm:$0x11] %v7059_v51  ;;  %v7145_v30 = vrot.slane %v7136_v27, 4  ;;  %v7146_v49 = vrot.slane %v7138_v36, 4 }
 0x33a   : > { %8616 = vrot.lane.b32.xlu0 %v16663_v37, %s19222_s27  ;;  %8712 = vrot.lane.b32.xlu1 %v16630_v4, %s19215_s8 }
 0x33b   : > { %v7150_v13 = vsel %vm427_vm1, %v7145_v30, %v7146_v49 }
 0x33c   : > { %v7152_v62 = vsel %vm19136_vm15, %v7136_v27, %v7150_v13  ;;  %v7140_v63 = vpop.permute.xlu0 %7139  ;;  %v7142_v0 = vpop.permute.xlu1 %7141 }
 0x33d   : > { %7165 = vst [vmem:[#allocation2 + $0x264] sm:$0x22] %v7152_v62  ;;  %v7147_v6 = vrot.slane %v7140_v63, 4  ;;  %v7148_v2 = vrot.slane %v7142_v0, 4 }
 0x33e   : > { %8714 = vrot.lane.b32.xlu0 %v16638_v50, %s19215_s8  ;;  %8810 = vrot.lane.b32.xlu1 %v16624_v54, %s19191_s14 }
 0x33f   : > { %v7153_v58 = vsel %vm427_vm1, %v7146_v49, %v7147_v6  ;;  %v7155_v7 = vsel %vm427_vm1, %v7147_v6, %v7148_v2 }
 0x340   : > { %v7154_v34 = vsel %vm19136_vm15, %v7138_v36, %v7153_v58  ;;  %v7156_v29 = vsel %vm19136_vm15, %v7140_v63, %v7155_v7  ;;  %v7144_v10 = vpop.permute.xlu0 %7143  ;;  %v7235_v14 = vpop.permute.xlu1 %7234 }
 0x341   : > { %7166 = vst [vmem:[#allocation2 + $0x26c] sm:$0x22] %v7154_v34  ;;  %7167 = vst [vmem:[#allocation2 + $0x274] sm:$0x22] %v7156_v29  ;;  %v7149_v11 = vrot.slane %v7144_v10, 4  ;;  %v7244_v12 = vrot.slane %v7235_v14, 4 }
 0x342   : > { %8812 = vrot.lane.b32.xlu0 %v16711_v32, %s19191_s14  ;;  %8910 = vrot.lane.b32.xlu1 %v16620_v33, %s19186_s26 }
 0x343   : > { %v7157_v16 = vsel %vm427_vm1, %v7148_v2, %v7149_v11  ;;  %v7159_v28 = vsel %vm19136_vm15, %v7144_v10, %v7149_v11 }
 0x344   : > { %v7158_v42 = vsel %vm19136_vm15, %v7142_v0, %v7157_v16  ;;  %7169 = vst [vmem:[#allocation2 + $0x284] sm:$0x2] %v7159_v28  ;;  %v7237_v24 = vpop.permute.xlu0 %7236  ;;  %v7239_v35 = vpop.permute.xlu1 %7238 }
 0x345   : > { %7168 = vst [vmem:[#allocation2 + $0x27c] sm:$0x22] %v7158_v42  ;;  %v7245_v15 = vrot.slane %v7237_v24, 4  ;;  %v7246_v22 = vrot.slane %v7239_v35, 4 }
 0x346   : > { %8912 = vrot.lane.b32.xlu0 %v16624_v54, %s19186_s26  ;;  %9008 = vrot.lane.b32.xlu1 %v16638_v50, %s19184_s6 }
 0x347   : > { %v7249_v60 = vsel %vm427_vm1, %v7244_v12, %v7245_v15  ;;  %v7252_v19 = vsel %vm427_vm1, %v7245_v15, %v7246_v22  ;;  %v9933_v12 = vld [vmem:[%s14967_s22 + $0x3] sm:$0xff] }
 0x348   : > { %v7251_v61 = vsel %vm19213_vm3, %v7235_v14, %v7249_v60  ;;  %v7253_v47 = vsel %vm19213_vm3, %v7237_v24, %v7252_v19  ;;  %v7241_v41 = vpop.permute.xlu0 %7240  ;;  %v7243_v26 = vpop.permute.xlu1 %7242 }
 0x349   : > { %7264 = vst [vmem:[#allocation2 + $0x264] sm:$0x44] %v7251_v61  ;;  %7265 = vst [vmem:[#allocation2 + $0x26c] sm:$0x44] %v7253_v47  ;;  %v7247_v17 = vrot.slane %v7241_v41, 4  ;;  %v7248_v31 = vrot.slane %v7243_v26, 4 }
 0x34a   : > { %9010 = vrot.lane.b32.xlu0 %v16663_v37, %s19184_s6  ;;  %9107 = vrot.lane.b32.xlu1 %v16630_v4, %s19210_s7 }
 0x34b   : > { %v7254_v1 = vsel %vm427_vm1, %v7246_v22, %v7247_v17  ;;  %v7256_v43 = vsel %vm427_vm1, %v7247_v17, %v7248_v31  ;;  %v7258_v20 = vsel %vm19213_vm3, %v7243_v26, %v7248_v31 }
 0x34c   : > { %v7255_v25 = vsel %vm19213_vm3, %v7239_v35, %v7254_v1  ;;  %v7257_v39 = vsel %vm19213_vm3, %v7241_v41, %v7256_v43  ;;  %7268 = vst [vmem:[#allocation2 + $0x284] sm:$0x4] %v7258_v20  ;;  %v7335_v55 = vpop.permute.xlu0 %7334  ;;  %v7337_v45 = vpop.permute.xlu1 %7336  ;;  %v9937_v41 = vcombine.low %v9933_v12, %v9933_v12 }
 0x34d   : > { %7266 = vst [vmem:[#allocation2 + $0x274] sm:$0x44] %v7255_v25  ;;  %7267 = vst [vmem:[#allocation2 + $0x27c] sm:$0x44] %v7257_v39  ;;  %v7344_v40 = vrot.slane %v7335_v55, 4  ;;  %v7345_v46 = vrot.slane %v7337_v45, 4 }
 0x34e   : > { %9109 = vrot.lane.b32.xlu0 %v16638_v50, %s19210_s7  ;;  %9206 = vrot.lane.b32.xlu1 %v16624_v54, %s19177_s13 }
 0x34f   : > { %v7349_v44 = vsel %vm427_vm1, %v7344_v40, %v7345_v46 }
 0x350   : > { %v7339_v21 = vpop.permute.xlu0 %7338  ;;  %v7341_v48 = vpop.permute.xlu1 %7340  ;;  %v7351_v52 = vsel %vm7350_vm14, %v7335_v55, %v7349_v44 }
 0x351   : > { %v7346_v57 = vrot.slane %v7339_v21, 4  ;;  %v7347_v38 = vrot.slane %v7341_v48, 4  ;;  %7364 = vst [vmem:[#allocation2 + $0x264] sm:$0x88] %v7351_v52 }
 0x352   : > { %9208 = vrot.lane.b32.xlu0 %v16711_v32, %s19177_s13  ;;  %9305 = vrot.lane.b32.xlu1 %v16620_v33, %s19112_s9 }
 0x353   : > { %v7352_v53 = vsel %vm427_vm1, %v7345_v46, %v7346_v57  ;;  %v7354_v9 = vsel %vm427_vm1, %v7346_v57, %v7347_v38 }
 0x354   : > { %v7343_v23 = vpop.permute.xlu0 %7342  ;;  %v7353_v18 = vsel %vm7350_vm14, %v7337_v45, %v7352_v53  ;;  %v7355_v8 = vsel %vm7350_vm14, %v7339_v21, %v7354_v9  ;;  %v7433_v59 = vpop.permute.xlu1 %7432 }
 0x355   : > { %v7348_v56 = vrot.slane %v7343_v23, 4  ;;  %7365 = vst [vmem:[#allocation2 + $0x26c] sm:$0x88] %v7353_v18  ;;  %7366 = vst [vmem:[#allocation2 + $0x274] sm:$0x88] %v7355_v8  ;;  %v7442_v63 = vrot.slane %v7433_v59, 4 }
 0x356   : > { %9307 = vrot.lane.b32.xlu0 %v16624_v54, %s19112_s9  ;;  %9403 = vrot.lane.b32.xlu1 %v16638_v50, %s19108_s10  ;;  %s19116_s9 = smov 31  }
 0x357   : > { %v7356_v51 = vsel %vm427_vm1, %v7347_v38, %v7348_v56  ;;  %v7358_v27 = vsel %vm7350_vm14, %v7343_v23, %v7348_v56 }
 0x358   : > { %v7357_v36 = vsel %vm7350_vm14, %v7341_v48, %v7356_v51  ;;  %7368 = vst [vmem:[#allocation2 + $0x284] sm:$0x8] %v7358_v27  ;;  %v7435_v30 = vpop.permute.xlu0 %7434  ;;  %v7437_v49 = vpop.permute.xlu1 %7436  ;;  %v14596_v13 = vld [vmem:[#allocation2 + $0x244] ss:$36 sps:$4 sm:$0xff]   ;;  %vm7547_vm14 = vcmask 367616  }
 0x359   : > { %v14598_v62 = vld [vmem:[#allocation2 + $0x240] ss:$36 sps:$4 sm:$0xff]   ;;  %7367 = vst [vmem:[#allocation2 + $0x27c] sm:$0x88] %v7357_v36  ;;  %v7443_v0 = vrot.slane %v7435_v30, 4  ;;  %v7444_v6 = vrot.slane %v7437_v49, 4  ;;  %13543 = vmatprep.subr.bf16.mxu0 %v14596_v13 }
 0x35a   : > { %9405 = vrot.lane.b32.xlu0 %v16663_v37, %s19108_s10  ;;  %9502 = vrot.lane.b32.xlu1 %v16630_v4, %s19110_s12  ;;  %s19227_s10 = smov 40   ;;  %v16862_v48 = vld [vmem:[%s14967_s22 + $0x4] sm:$0xff] }
 0x35b   : > { %v7447_v2 = vsel %vm427_vm1, %v7442_v63, %v7443_v0  ;;  %v7450_v58 = vsel %vm427_vm1, %v7443_v0, %v7444_v6  ;;  %13544 = vmatpush1.bf16.msra.mxu0 %v14598_v62  ;;  %v10143_v18 = vrot.slane %v16862_v48, %v14962_v5 }
 0x35c   : > { %v7439_v7 = vpop.permute.xlu0 %7438  ;;  %v7449_v34 = vsel %vm7448_vm2, %v7433_v59, %v7447_v2  ;;  %v7451_v29 = vsel %vm7448_vm2, %v7435_v30, %v7450_v58  ;;  %v7441_v10 = vpop.permute.xlu1 %7440  ;;  %v14599_v14 = vld [vmem:[#allocation2 + $0x24c] ss:$36 sps:$4 sm:$0xff]  }
 0x35d   : > { %v14601_v11 = vld [vmem:[#allocation2 + $0x248] ss:$36 sps:$4 sm:$0xff]   ;;  %v7445_v16 = vrot.slane %v7439_v7, 4  ;;  %7462 = vst [vmem:[#allocation2 + $0x288] sm:$0x11] %v7449_v34  ;;  %v7446_v28 = vrot.slane %v7441_v10, 4  ;;  %13586 = vmatprep.subr.bf16.mxu1 %v14599_v14  ;;  %v16879_v62 = vrot.slane %v10143_v18, %v14962_v5  ;;  %v10151_v63 = vcombine.high %v10143_v18, %v10143_v18 }
 0x35e   : > { %7463 = vst [vmem:[#allocation2 + $0x290] sm:$0x11] %v7451_v29  ;;  %9504 = vrot.lane.b32.xlu0 %v16638_v50, %s19110_s12  ;;  %9601 = vrot.lane.b32.xlu1 %v16624_v54, %s19227_s10  ;;  %s19114_s12 = smov 32   ;;  %v10248_v0 = vcombine.low %v10143_v18, %v10143_v18 }
 0x35f   : > { %v7452_v42 = vsel %vm427_vm1, %v7444_v6, %v7445_v16  ;;  %v7454_v24 = vsel %vm427_vm1, %v7445_v16, %v7446_v28  ;;  %v7456_v35 = vsel %vm7448_vm2, %v7441_v10, %v7446_v28  ;;  %13587 = vmatpush1.bf16.msra.mxu1 %v14601_v11  ;;  %v10331_v6 = vcombine.low %v16862_v48, %v16862_v48 }
 0x360   : > { %v7453_v15 = vsel %vm7448_vm2, %v7437_v49, %v7452_v42  ;;  %v7455_v22 = vsel %vm7448_vm2, %v7439_v7, %v7454_v24  ;;  %7466 = vst [vmem:[#allocation2 + $0x2a8] sm:$0x1] %v7456_v35  ;;  %v7532_v60 = vpop.permute.xlu0 %7531  ;;  %v7534_v19 = vpop.permute.xlu1 %7533  ;;  %vm19150_vm2 = vcmask 359424   ;;  %v16894_v28 = vrot.slane %v10151_v63, %v14962_v5 }
 0x361   : > { %7464 = vst [vmem:[#allocation2 + $0x298] sm:$0x11] %v7453_v15  ;;  %7465 = vst [vmem:[#allocation2 + $0x2a0] sm:$0x11] %v7455_v22  ;;  %v7541_v61 = vrot.slane %v7532_v60, 4  ;;  %v7542_v47 = vrot.slane %v7534_v19, 4  ;;  %v16897_v42 = vrot.slane %v10248_v0, %v14962_v5  ;;  %v10338_v24 = vrot.slane %v10331_v6, %v14962_v5 }
 0x362   : > { %9603 = vrot.lane.b32.xlu0 %v16711_v32, %s19227_s10  ;;  %9701 = vrot.lane.b32.xlu1 %v16620_v33, %s19114_s12  ;;  %v9944_v32 = vrot.slane %v9937_v41, %v14962_v5 }
 0x363   : > { %v7546_v26 = vsel %vm427_vm1, %v7541_v61, %v7542_v47  ;;  %v16907_v61 = vrot.slane %v10338_v24, %v14962_v5  ;;  %v10444_v41 = vcombine.low %v10338_v24, %v10338_v24 }
 0x364   : > { %v7536_v17 = vpop.permute.xlu0 %7535  ;;  %v7538_v31 = vpop.permute.xlu1 %7537  ;;  %v7548_v1 = vsel %vm7547_vm14, %v7532_v60, %v7546_v26  ;;  %v9952_v44 = vcombine.high %v9944_v32, %v9944_v32  ;;  %v10051_v21 = vcombine.low %v9944_v32, %v9944_v32 }
 0x365   : > { %v7543_v43 = vrot.slane %v7536_v17, 4  ;;  %v7544_v20 = vrot.slane %v7538_v31, 4  ;;  %7561 = vst [vmem:[#allocation2 + $0x288] sm:$0x22] %v7548_v1 }
 0x366   : > { %9703 = vrot.lane.b32.xlu0 %v16624_v54, %s19114_s12  ;;  %9799 = vrot.lane.b32.xlu1 %v16638_v50, %s19116_s9  ;;  %s19118_s12 = smov 30   ;;  %v9960_v54 = vrot.slane %v9944_v32, %v14962_v5  ;;  %v9967_v8 = vrot.slane %v9952_v44, %v14962_v5  ;;  %v10059_v59 = vrot.slane %v10051_v21, %v14962_v5 }
 0x367   : > { %v7549_v33 = vsel %vm427_vm1, %v7542_v47, %v7543_v43  ;;  %v7551_v25 = vsel %vm427_vm1, %v7543_v43, %v7544_v20  ;;  %v10346_v47 = vcombine.high %v10338_v24, %v10338_v24 }
 0x368   : > { %v7540_v39 = vpop.permute.xlu0 %7539  ;;  %v7550_v55 = vsel %vm7547_vm14, %v7534_v19, %v7549_v33  ;;  %v7552_v45 = vsel %vm7547_vm14, %v7536_v17, %v7551_v25  ;;  %v7631_v40 = vpop.permute.xlu1 %7630  ;;  %v16921_v25 = vrot.slane %v10444_v41, %v14962_v5 }
 0x369   : > { %v7545_v46 = vrot.slane %v7540_v39, 4  ;;  %7562 = vst [vmem:[#allocation2 + $0x290] sm:$0x22] %v7550_v55  ;;  %7563 = vst [vmem:[#allocation2 + $0x298] sm:$0x22] %v7552_v45  ;;  %v7640_v9 = vrot.slane %v7631_v40, 4  ;;  %v16918_v33 = vrot.slane %v10346_v47, %v14962_v5 }
 0x36a   : > { %9801 = vrot.lane.b32.xlu0 %v16663_v37, %s19116_s9  ;;  %9898 = vrot.lane.b32.xlu1 %v16630_v4, %s19118_s12  ;;  %s19201_s9 = smov 29  }
 0x36b   : > { %v7553_v52 = vsel %vm427_vm1, %v7544_v20, %v7545_v46  ;;  %v7555_v57 = vsel %vm7547_vm14, %v7540_v39, %v7545_v46 }
 0x36c   : > { %v7554_v38 = vsel %vm7547_vm14, %v7538_v31, %v7553_v52  ;;  %7565 = vst [vmem:[#allocation2 + $0x2a8] sm:$0x2] %v7555_v57  ;;  %v7633_v53 = vpop.permute.xlu0 %7632  ;;  %v7635_v37 = vpop.permute.xlu1 %7634  ;;  %vm19139_vm14 = vcmask 449536  }
 0x36d   : > { %7564 = vst [vmem:[#allocation2 + $0x2a0] sm:$0x22] %v7554_v38  ;;  %v7641_v23 = vrot.slane %v7633_v53, 4  ;;  %v7642_v4 = vrot.slane %v7635_v37, 4 }
 0x36e   : > { %9900 = vrot.lane.b32.xlu0 %v16638_v50, %s19118_s12  ;;  %9997 = vrot.lane.b32.xlu1 %v9960_v54, %s19201_s9  ;;  %s19242_s12 = smov 28  }
 0x36f   : > { %v7645_v56 = vsel %vm427_vm1, %v7640_v9, %v7641_v23  ;;  %v7648_v51 = vsel %vm427_vm1, %v7641_v23, %v7642_v4 }
 0x370   : > { %v7647_v27 = vsel %vm19150_vm2, %v7631_v40, %v7645_v56  ;;  %v7649_v36 = vsel %vm19150_vm2, %v7633_v53, %v7648_v51  ;;  %v7637_v30 = vpop.permute.xlu0 %7636  ;;  %v7639_v49 = vpop.permute.xlu1 %7638 }
 0x371   : > { %7660 = vst [vmem:[#allocation2 + $0x288] sm:$0x44] %v7647_v27  ;;  %7661 = vst [vmem:[#allocation2 + $0x290] sm:$0x44] %v7649_v36  ;;  %v7643_v50 = vrot.slane %v7637_v30, 4  ;;  %v7644_v13 = vrot.slane %v7639_v49, 4 }
 0x372   : > { %9999 = vrot.lane.b32.xlu0 %v9967_v8, %s19201_s9  ;;  %10097 = vrot.lane.b32.xlu1 %v10059_v59, %s19242_s12 }
 0x373   : > { %v7650_v2 = vsel %vm427_vm1, %v7642_v4, %v7643_v50  ;;  %v7652_v58 = vsel %vm427_vm1, %v7643_v50, %v7644_v13  ;;  %v7654_v7 = vsel %vm19150_vm2, %v7639_v49, %v7644_v13 }
 0x374   : > { %v7651_v34 = vsel %vm19150_vm2, %v7635_v37, %v7650_v2  ;;  %v7653_v29 = vsel %vm19150_vm2, %v7637_v30, %v7652_v58  ;;  %7664 = vst [vmem:[#allocation2 + $0x2a8] sm:$0x4] %v7654_v7  ;;  %v7731_v10 = vpop.permute.xlu0 %7730  ;;  %v7733_v14 = vpop.permute.xlu1 %7732 }
 0x375   : > { %7662 = vst [vmem:[#allocation2 + $0x298] sm:$0x44] %v7651_v34  ;;  %7663 = vst [vmem:[#allocation2 + $0x2a0] sm:$0x44] %v7653_v29  ;;  %v7740_v11 = vrot.slane %v7731_v10, 4  ;;  %v7741_v16 = vrot.slane %v7733_v14, 4 }
 0x376   : > { %10099 = vrot.lane.b32.xlu0 %v9960_v54, %s19242_s12  ;;  %10195 = vrot.lane.b32.xlu1 %v16879_v62, %s19222_s27 }
 0x377   : > { %v7745_v35 = vsel %vm427_vm1, %v7740_v11, %v7741_v16 }
 0x378   : > { %v7746_v12 = vsel %vm2310_vm5, %v7731_v10, %v7745_v35  ;;  %v7735_v15 = vpop.permute.xlu0 %7734  ;;  %v7737_v22 = vpop.permute.xlu1 %7736 }
 0x379   : > { %7759 = vst [vmem:[#allocation2 + $0x288] sm:$0x88] %v7746_v12  ;;  %v7742_v60 = vrot.slane %v7735_v15, 4  ;;  %v7743_v19 = vrot.slane %v7737_v22, 4 }
 0x37a   : > { %10197 = vrot.lane.b32.xlu0 %v16894_v28, %s19222_s27  ;;  %10293 = vrot.lane.b32.xlu1 %v16897_v42, %s19203_s28 }
 0x37b   : > { %v7747_v26 = vsel %vm427_vm1, %v7741_v16, %v7742_v60  ;;  %v7749_v17 = vsel %vm427_vm1, %v7742_v60, %v7743_v19 }
 0x37c   : > { %v7748_v31 = vsel %vm2310_vm5, %v7733_v14, %v7747_v26  ;;  %v7750_v1 = vsel %vm2310_vm5, %v7735_v15, %v7749_v17  ;;  %v7739_v43 = vpop.permute.xlu0 %7738  ;;  %v7828_v20 = vpop.permute.xlu1 %7827 }
 0x37d   : > { %7760 = vst [vmem:[#allocation2 + $0x290] sm:$0x88] %v7748_v31  ;;  %7761 = vst [vmem:[#allocation2 + $0x298] sm:$0x88] %v7750_v1  ;;  %v7744_v32 = vrot.slane %v7739_v43, 4  ;;  %v7837_v54 = vrot.slane %v7828_v20, 4 }
 0x37e   : > { %10295 = vrot.lane.b32.xlu0 %v16879_v62, %s19203_s28  ;;  %10391 = vrot.lane.b32.xlu1 %v16907_v61, %s19206_s29 }
 0x37f   : > { %v7751_v39 = vsel %vm427_vm1, %v7743_v19, %v7744_v32  ;;  %v7753_v55 = vsel %vm2310_vm5, %v7739_v43, %v7744_v32 }
 0x380   : > { %v7752_v45 = vsel %vm2310_vm5, %v7737_v22, %v7751_v39  ;;  %7763 = vst [vmem:[#allocation2 + $0x2a8] sm:$0x8] %v7753_v55  ;;  %v7830_v40 = vpop.permute.xlu0 %7829  ;;  %v7832_v46 = vpop.permute.xlu1 %7831  ;;  %vm19360_vm5 = vcmask 547840  }
 0x381   : > { %7762 = vst [vmem:[#allocation2 + $0x2a0] sm:$0x88] %v7752_v45  ;;  %v7838_v44 = vrot.slane %v7830_v40, 4  ;;  %v7839_v21 = vrot.slane %v7832_v46, 4 }
 0x382   : > { %10393 = vrot.lane.b32.xlu0 %v16918_v33, %s19206_s29  ;;  %10490 = vrot.lane.b32.xlu1 %v16921_v25, %s19120_s30 }
 0x383   : > { %v7842_v52 = vsel %vm427_vm1, %v7837_v54, %v7838_v44  ;;  %v7844_v57 = vsel %vm427_vm1, %v7838_v44, %v7839_v21 }
 0x384   : > { %v7843_v38 = vsel %vm2409_vm6, %v7828_v20, %v7842_v52  ;;  %v7845_v53 = vsel %vm2409_vm6, %v7830_v40, %v7844_v57  ;;  %v7834_v37 = vpop.permute.xlu0 %7833  ;;  %v7836_v9 = vpop.permute.xlu1 %7835 }
 0x385   : > { %7856 = vst [vmem:[#allocation2 + $0x2ac] sm:$0x11] %v7843_v38  ;;  %7857 = vst [vmem:[#allocation2 + $0x2b4] sm:$0x11] %v7845_v53  ;;  %v7840_v23 = vrot.slane %v7834_v37, 4  ;;  %v7841_v4 = vrot.slane %v7836_v9, 4 }
 0x386   : > { %10492 = vrot.lane.b32.xlu0 %v16907_v61, %s19120_s30  ;;  %10587 = vrot.lane.b32.xlu1 %v16879_v62, %s19122_s5  ;;  %s19124_s30 = smov 51  }
 0x387   : > { %v7846_v18 = vsel %vm427_vm1, %v7839_v21, %v7840_v23  ;;  %v7848_v8 = vsel %vm427_vm1, %v7840_v23, %v7841_v4  ;;  %v7850_v59 = vsel %vm2409_vm6, %v7836_v9, %v7841_v4 }
 0x388   : > { %v7847_v56 = vsel %vm2409_vm6, %v7832_v46, %v7846_v18  ;;  %v7849_v51 = vsel %vm2409_vm6, %v7834_v37, %v7848_v8  ;;  %7860 = vst [vmem:[#allocation2 + $0x2cc] sm:$0x1] %v7850_v59  ;;  %v7926_v27 = vpop.permute.xlu0 %7925  ;;  %v7928_v36 = vpop.permute.xlu1 %7927  ;;  %vm19166_vm6 = vcmask 539648  }
 0x389   : > { %7858 = vst [vmem:[#allocation2 + $0x2bc] sm:$0x11] %v7847_v56  ;;  %7859 = vst [vmem:[#allocation2 + $0x2c4] sm:$0x11] %v7849_v51  ;;  %v7935_v30 = vrot.slane %v7926_v27, 4  ;;  %v7936_v49 = vrot.slane %v7928_v36, 4 }
 0x38a   : > { %10589 = vrot.lane.b32.xlu0 %v16894_v28, %s19122_s5  ;;  %10685 = vrot.lane.b32.xlu1 %v16897_v42, %s19210_s7  ;;  %s19220_s5 = smov 50  }
 0x38b   : > { %v7940_v50 = vsel %vm427_vm1, %v7935_v30, %v7936_v49 }
 0x38c   : > { %v7941_v13 = vsel %vm2508_vm7, %v7926_v27, %v7940_v50  ;;  %v7930_v63 = vpop.permute.xlu0 %7929  ;;  %v7932_v0 = vpop.permute.xlu1 %7931 }
 0x38d   : > { %7954 = vst [vmem:[#allocation2 + $0x2ac] sm:$0x22] %v7941_v13  ;;  %v7937_v6 = vrot.slane %v7930_v63, 4  ;;  %v7938_v2 = vrot.slane %v7932_v0, 4 }
 0x38e   : > { %10687 = vrot.lane.b32.xlu0 %v16879_v62, %s19210_s7  ;;  %10783 = vrot.lane.b32.xlu1 %v16907_v61, %s19124_s30 }
 0x38f   : > { %v7942_v58 = vsel %vm427_vm1, %v7936_v49, %v7937_v6  ;;  %v7944_v7 = vsel %vm427_vm1, %v7937_v6, %v7938_v2 }
 0x390   : > { %v7943_v34 = vsel %vm2508_vm7, %v7928_v36, %v7942_v58  ;;  %v7945_v29 = vsel %vm2508_vm7, %v7930_v63, %v7944_v7  ;;  %v7934_v10 = vpop.permute.xlu0 %7933  ;;  %v8024_v14 = vpop.permute.xlu1 %8023 }
 0x391   : > { %7955 = vst [vmem:[#allocation2 + $0x2b4] sm:$0x22] %v7943_v34  ;;  %7956 = vst [vmem:[#allocation2 + $0x2bc] sm:$0x22] %v7945_v29  ;;  %v7939_v11 = vrot.slane %v7934_v10, 4  ;;  %v8033_v22 = vrot.slane %v8024_v14, 4 }
 0x392   : > { %10785 = vrot.lane.b32.xlu0 %v16918_v33, %s19124_s30  ;;  %10883 = vrot.lane.b32.xlu1 %v16921_v25, %s19220_s5  ;;  %s19128_s30 = smov 49  }
 0x393   : > { %v7946_v16 = vsel %vm427_vm1, %v7938_v2, %v7939_v11  ;;  %v7948_v24 = vsel %vm2508_vm7, %v7934_v10, %v7939_v11 }
 0x394   : > { %v7947_v35 = vsel %vm2508_vm7, %v7932_v0, %v7946_v16  ;;  %7958 = vst [vmem:[#allocation2 + $0x2cc] sm:$0x2] %v7948_v24  ;;  %v16964_v12 = vpop.permute.xlu0 %8025  ;;  %v8123_v15 = vpop.permute.xlu1 %8122  ;;  %vm19160_vm7 = vcmask 531456  }
 0x395   : > { %7957 = vst [vmem:[#allocation2 + $0x2c4] sm:$0x22] %v7947_v35  ;;  %v19239_v60 = vrot.slane %v16964_v12, 4  ;;  %v8132_v17 = vrot.slane %v8123_v15, 4 }
 0x396   : > { %10885 = vrot.lane.b32.xlu0 %v16907_v61, %s19220_s5  ;;  %10981 = vrot.lane.b32.xlu1 %v16879_v62, %s19128_s30 }
 0x397   : > { %v8038_v19 = vsel %vm427_vm1, %v8033_v22, %v19239_v60 }
 0x398   : > { %v8039_v47 = vsel %vm2608_vm8, %v8024_v14, %v8038_v19  ;;  %v16975_v41 = vpop.permute.xlu0 %8124  ;;  %v8220_v26 = vpop.permute.xlu1 %8219 }
 0x399   : > { %8052 = vst [vmem:[#allocation2 + $0x2ac] sm:$0x44] %v8039_v47  ;;  %v19235_v31 = vrot.slane %v16975_v41, 4  ;;  %v8229_v39 = vrot.slane %v8220_v26, 4 }
 0x39a   : > { %10983 = vrot.lane.b32.xlu0 %v16894_v28, %s19128_s30  ;;  %11080 = vrot.lane.b32.xlu1 %v16897_v42, %s19126_s11  ;;  %s19132_s30 = smov 38  }
 0x39b   : > { %v8137_v1 = vsel %vm427_vm1, %v8132_v17, %v19235_v31 }
 0x39c   : > { %v8138_v43 = vsel %vm19297_vm10, %v8123_v15, %v8137_v1  ;;  %v16986_v20 = vpop.permute.xlu0 %8221  ;;  %v8318_v32 = vpop.permute.xlu1 %8317 }
 0x39d   : > { %8151 = vst [vmem:[#allocation2 + $0x2ac] sm:$0x88] %v8138_v43  ;;  %v19233_v55 = vrot.slane %v16986_v20, 4  ;;  %v8327_v44 = vrot.slane %v8318_v32, 4 }
 0x39e   : > { %11082 = vrot.lane.b32.xlu0 %v16879_v62, %s19126_s11  ;;  %11178 = vrot.lane.b32.xlu1 %v16907_v61, %s19227_s10  ;;  %s19130_s11 = smov 39  }
 0x39f   : > { %v8234_v45 = vsel %vm427_vm1, %v8229_v39, %v19233_v55 }
 0x3a0   : > { %v8235_v40 = vsel %vm19294_vm12, %v8220_v26, %v8234_v45  ;;  %v16997_v46 = vpop.permute.xlu0 %8319  ;;  %v8417_v54 = vpop.permute.xlu1 %8416 }
 0x3a1   : > { %8248 = vst [vmem:[#allocation2 + $0x2d0] sm:$0x11] %v8235_v40  ;;  %v19232_v21 = vrot.slane %v16997_v46, 4  ;;  %v8426_v23 = vrot.slane %v8417_v54, 4 }
 0x3a2   : > { %11180 = vrot.lane.b32.xlu0 %v16918_v33, %s19227_s10  ;;  %11277 = vrot.lane.b32.xlu1 %v16921_v25, %s19130_s11 }
 0x3a3   : > { %v8332_v52 = vsel %vm427_vm1, %v8327_v44, %v19232_v21 }
 0x3a4   : > { %v8334_v57 = vsel %vm19360_vm5, %v8318_v32, %v8332_v52  ;;  %v17008_v38 = vpop.permute.xlu0 %8418  ;;  %v8517_v53 = vpop.permute.xlu1 %8516  ;;  %v14604_v37 = vld [vmem:[#allocation2 + $0x28c] ss:$36 sps:$4 sm:$0xff]  }
 0x3a5   : > { %v14606_v9 = vld [vmem:[#allocation2 + $0x288] ss:$36 sps:$4 sm:$0xff]   ;;  %8347 = vst [vmem:[#allocation2 + $0x2d0] sm:$0x22] %v8334_v57  ;;  %v19226_v4 = vrot.slane %v17008_v38, 4  ;;  %13545 = vmatprep.subr.bf16.mxu0 %v14604_v37  ;;  %v8526_v51 = vrot.slane %v8517_v53, 4 }
 0x3a6   : > { %11279 = vrot.lane.b32.xlu0 %v16907_v61, %s19130_s11  ;;  %11375 = vrot.lane.b32.xlu1 %v16879_v62, %s19132_s30  ;;  %s19137_s11 = smov 37  }
 0x3a7   : > { %v8431_v18 = vsel %vm427_vm1, %v8426_v23, %v19226_v4  ;;  %13546 = vmatpush1.bf16.msra.mxu0 %v14606_v9 }
 0x3a8   : > { %v8433_v8 = vsel %vm19166_vm6, %v8417_v54, %v8431_v18  ;;  %v17019_v59 = vpop.permute.xlu0 %8518  ;;  %v8615_v56 = vpop.permute.xlu1 %8614  ;;  %vm19169_vm6 = vcmask 244736  }
 0x3a9   : > { %8446 = vst [vmem:[#allocation2 + $0x2d0] sm:$0x44] %v8433_v8  ;;  %v19219_v27 = vrot.slane %v17019_v59, 4  ;;  %v8624_v13 = vrot.slane %v8615_v56, 4 }
 0x3aa   : > { %11377 = vrot.lane.b32.xlu0 %v16894_v28, %s19132_s30  ;;  %11474 = vrot.lane.b32.xlu1 %v16897_v42, %s19137_s11  ;;  %s19134_s30 = smov 36  }
 0x3ab   : > { %v8531_v36 = vsel %vm427_vm1, %v8526_v51, %v19219_v27 }
 0x3ac   : > { %v8533_v30 = vsel %vm19160_vm7, %v8517_v53, %v8531_v36  ;;  %v17030_v49 = vpop.permute.xlu0 %8616  ;;  %v8713_v50 = vpop.permute.xlu1 %8712  ;;  %vm19167_vm7 = vcmask 252928  }
 0x3ad   : > { %8546 = vst [vmem:[#allocation2 + $0x2d0] sm:$0x88] %v8533_v30  ;;  %v19212_v63 = vrot.slane %v17030_v49, 4  ;;  %v8722_v7 = vrot.slane %v8713_v50, 4 }
 0x3ae   : > { %11476 = vrot.lane.b32.xlu0 %v16879_v62, %s19137_s11  ;;  %11573 = vrot.lane.b32.xlu1 %v16907_v61, %s19134_s30  ;;  %s19143_s11 = smov 26  }
 0x3af   : > { %v8629_v0 = vsel %vm427_vm1, %v8624_v13, %v19212_v63 }
 0x3b0   : > { %v8630_v6 = vsel %vm4781_vm11, %v8615_v56, %v8629_v0  ;;  %v17041_v2 = vpop.permute.xlu0 %8714  ;;  %v8811_v58 = vpop.permute.xlu1 %8810 }
 0x3b1   : > { %8643 = vst [vmem:[#allocation2 + $0x2f4] sm:$0x11] %v8630_v6  ;;  %v19197_v34 = vrot.slane %v17041_v2, 4  ;;  %v8820_v16 = vrot.slane %v8811_v58, 4 }
 0x3b2   : > { %11575 = vrot.lane.b32.xlu0 %v16918_v33, %s19134_s30  ;;  %11673 = vrot.lane.b32.xlu1 %v16921_v25, %s19242_s12  ;;  %s19140_s30 = smov 27  }
 0x3b3   : > { %v8727_v29 = vsel %vm427_vm1, %v8722_v7, %v19197_v34 }
 0x3b4   : > { %v8728_v10 = vsel %vm19136_vm15, %v8713_v50, %v8727_v29  ;;  %v17052_v14 = vpop.permute.xlu0 %8812  ;;  %v8911_v11 = vpop.permute.xlu1 %8910  ;;  %vm19142_vm15 = vcmask 441344  }
 0x3b5   : > { %8741 = vst [vmem:[#allocation2 + $0x2f4] sm:$0x22] %v8728_v10  ;;  %v19196_v24 = vrot.slane %v17052_v14, 4  ;;  %v8920_v47 = vrot.slane %v8911_v11, 4 }
 0x3b6   : > { %11675 = vrot.lane.b32.xlu0 %v16907_v61, %s19242_s12  ;;  %11770 = vrot.lane.b32.xlu1 %v16879_v62, %s19140_s30 }
 0x3b7   : > { %v8825_v35 = vsel %vm427_vm1, %v8820_v16, %v19196_v24 }
 0x3b8   : > { %v8827_v15 = vsel %vm19139_vm14, %v8811_v58, %v8825_v35  ;;  %v17063_v22 = vpop.permute.xlu0 %8912  ;;  %v9009_v19 = vpop.permute.xlu1 %9008  ;;  %vm19147_vm14 = vcmask 433152  }
 0x3b9   : > { %8840 = vst [vmem:[#allocation2 + $0x2f4] sm:$0x44] %v8827_v15  ;;  %v19194_v26 = vrot.slane %v17063_v22, 4  ;;  %v9018_v39 = vrot.slane %v9009_v19, 4 }
 0x3ba   : > { %11772 = vrot.lane.b32.xlu0 %v16894_v28, %s19140_s30  ;;  %11869 = vrot.lane.b32.xlu1 %v16897_v42, %s19143_s11  ;;  %s19145_s30 = smov 25  }
 0x3bb   : > { %v8925_v17 = vsel %vm427_vm1, %v8920_v47, %v19194_v26 }
 0x3bc   : > { %v8927_v1 = vsel %vm19142_vm15, %v8911_v11, %v8925_v17  ;;  %v17074_v43 = vpop.permute.xlu0 %9010  ;;  %v9108_v32 = vpop.permute.xlu1 %9107  ;;  %vm9123_vm15 = vcmask 424960  }
 0x3bd   : > { %8940 = vst [vmem:[#allocation2 + $0x2f4] sm:$0x88] %v8927_v1  ;;  %v19190_v45 = vrot.slane %v17074_v43, 4  ;;  %v9117_v57 = vrot.slane %v9108_v32, 4 }
 0x3be   : > { %11871 = vrot.lane.b32.xlu0 %v16879_v62, %s19143_s11  ;;  %11968 = vrot.lane.b32.xlu1 %v16907_v61, %s19145_s30  ;;  %s19148_s11 = smov 24  }
 0x3bf   : > { %v9023_v40 = vsel %vm427_vm1, %v9018_v39, %v19190_v45  ;;  %v14787_v39 = vld [vmem:[%s14967_s22 + $0x3] sm:$0xff] }
 0x3c0   : > { %v9025_v54 = vsel %vm19147_vm14, %v9009_v19, %v9023_v40  ;;  %v17085_v44 = vpop.permute.xlu0 %9109  ;;  %v9207_v52 = vpop.permute.xlu1 %9206  ;;  %vm19153_vm14 = vcmask 351232   ;;  %v17138_v40 = vrot.slane %v14787_v39, %v14962_v5 }
 0x3c1   : > { %9038 = vst [vmem:[#allocation2 + $0x318] sm:$0x11] %v9025_v54  ;;  %v19189_v53 = vrot.slane %v17085_v44, 4  ;;  %v9216_v51 = vrot.slane %v9207_v52, 4  ;;  %v8160_v54 = vcombine.high %v14787_v39, %v14787_v39 }
 0x3c2   : > { %11970 = vrot.lane.b32.xlu0 %v16918_v33, %s19145_s30  ;;  %12068 = vrot.lane.b32.xlu1 %v16921_v25, %s19148_s11  ;;  %s19151_s30 = smov 16   ;;  %v7979_v3 = vcombine.high %v17138_v40, %v17138_v40 }
 0x3c3   : > { %v9122_v37 = vsel %vm427_vm1, %v9117_v57, %v19189_v53 }
 0x3c4   : > { %v9124_v9 = vsel %vm9123_vm15, %v9108_v32, %v9122_v37  ;;  %v17096_v23 = vpop.permute.xlu0 %9208  ;;  %v9306_v18 = vpop.permute.xlu1 %9305  ;;  %v14607_v8 = vld [vmem:[#allocation2 + $0x2d4] ss:$36 sps:$4 sm:$0xff]  }
 0x3c5   : > { %v14609_v56 = vld [vmem:[#allocation2 + $0x2d0] ss:$36 sps:$4 sm:$0xff]   ;;  %9137 = vst [vmem:[#allocation2 + $0x318] sm:$0x22] %v9124_v9  ;;  %v19183_v36 = vrot.slane %v17096_v23, 4  ;;  %13547 = vmatprep.subr.bf16.mxu0 %v14607_v8  ;;  %v9315_v6 = vrot.slane %v9306_v18, 4  ;;  %v8077_v8 = vcombine.low %v17138_v40, %v17138_v40 }
 0x3c6   : > { %12070 = vrot.lane.b32.xlu0 %v16907_v61, %s19148_s11  ;;  %12166 = vrot.lane.b32.xlu1 %v16879_v62, %s19151_s30  ;;  %s19154_s11 = smov 15  }
 0x3c7   : > { %v9221_v30 = vsel %vm427_vm1, %v9216_v51, %v19183_v36  ;;  %13548 = vmatpush1.bf16.msra.mxu0 %v14609_v56  ;;  %v17158_v56 = vrot.slane %v8160_v54, %v14962_v5 }
 0x3c8   : > { %v9222_v50 = vsel %vm19150_vm2, %v9207_v52, %v9221_v30  ;;  %v17107_v13 = vpop.permute.xlu0 %9307  ;;  %v9404_v0 = vpop.permute.xlu1 %9403  ;;  %vm19156_vm2 = vcmask 343040  }
 0x3c9   : > { %9235 = vst [vmem:[#allocation2 + $0x318] sm:$0x44] %v9222_v50  ;;  %v19182_v58 = vrot.slane %v17107_v13, 4  ;;  %v9413_v16 = vrot.slane %v9404_v0, 4 }
 0x3ca   : > { %12168 = vrot.lane.b32.xlu0 %v16894_v28, %s19151_s30  ;;  %12265 = vrot.lane.b32.xlu1 %v16897_v42, %s19154_s11  ;;  %s19157_s30 = smov 14  }
 0x3cb   : > { %v9320_v7 = vsel %vm427_vm1, %v9315_v6, %v19182_v58 }
 0x3cc   : > { %v9322_v29 = vsel %vm19153_vm14, %v9306_v18, %v9320_v7  ;;  %v17118_v10 = vpop.permute.xlu0 %9405  ;;  %v9503_v11 = vpop.permute.xlu1 %9502  ;;  %vm19159_vm14 = vcmask 334848   ;;  %v17172_v7 = vrot.slane %v8077_v8, %v14962_v5 }
 0x3cd   : > { %9335 = vst [vmem:[#allocation2 + $0x318] sm:$0x88] %v9322_v29  ;;  %v19181_v35 = vrot.slane %v17118_v10, 4  ;;  %v9512_v1 = vrot.slane %v9503_v11, 4  ;;  %v17176_v29 = vrot.slane %v17158_v56, %v14962_v5 }
 0x3ce   : > { %12267 = vrot.lane.b32.xlu0 %v16879_v62, %s19154_s11  ;;  %12364 = vrot.lane.b32.xlu1 %v16907_v61, %s19157_s30  ;;  %s19252_s11 = smov 13  }
 0x3cf   : > { %v9418_v15 = vsel %vm427_vm1, %v9413_v16, %v19181_v35 }
 0x3d0   : > { %v9420_v19 = vsel %vm19156_vm2, %v9404_v0, %v9418_v15  ;;  %v17129_v47 = vpop.permute.xlu0 %9504  ;;  %v9602_v17 = vpop.permute.xlu1 %9601  ;;  %vm9617_vm2 = vcmask 326656  }
 0x3d1   : > { %9433 = vst [vmem:[#allocation2 + $0x33c] sm:$0x11] %v9420_v19  ;;  %v19179_v32 = vrot.slane %v17129_v47, 4 }
 0x3d2   : > { %12366 = vrot.lane.b32.xlu0 %v16918_v33, %s19157_s30  ;;  %12464 = vrot.lane.b32.xlu1 %v16921_v25, %s19252_s11  ;;  %v9611_v33 = vrot.slane %v9602_v17, 4  ;;  %s19163_s30 = smov 12   ;;  %v17153_v25 = vrot.slane %v17138_v40, %v14962_v5  ;;  %v17471_v40 = vrot.slane %v7979_v3, %v14962_v5 }
 0x3d3   : > { %v9517_v52 = vsel %vm427_vm1, %v9512_v1, %v19179_v32  ;;  %v17281_v32 = vld.sshfl [vmem:[%s14967_s22 + $0x3] sm:$0xff pattern:$0x73625140] }
 0x3d4   : > { %v9519_v57 = vsel %vm19159_vm14, %v9503_v11, %v9517_v52  ;;  %v17144_v37 = vpop.permute.xlu0 %9603  ;;  %v9702_v9 = vpop.permute.xlu1 %9701  ;;  %vm19165_vm14 = vcmask 261120   ;;  %v8273_v11 = vcombine.low %v17158_v56, %v17158_v56  ;;  %v17197_v52 = vld [vmem:[%s19104_s1 + $0x4] ss:$8 sps:$4 sm:$0xff]   ;;  %v10052_v36 = vcombine.low %v17281_v32, %v17281_v32 }
 0x3d5   : > { %9532 = vst [vmem:[#allocation2 + $0x33c] sm:$0x22] %v9519_v57  ;;  %v19176_v18 = vrot.slane %v17144_v37, 4  ;;  %v9711_v0 = vrot.slane %v9702_v9, 4 }
 0x3d6   : > { %12466 = vrot.lane.b32.xlu0 %v16907_v61, %s19252_s11  ;;  %12562 = vrot.lane.b32.xlu1 %v16879_v62, %s19163_s30  ;;  %v17192_v54 = vrot.slane %v8273_v11, %v14962_v5  ;;  %v10073_v45 = vrot.slane %v10052_v36, %v14962_v5  ;;  %s19439_s11 = smov 15  }
 0x3d7   : > { %v9616_v51 = vsel %vm427_vm1, %v9611_v33, %v19176_v18 }
 0x3d8   : > { %v9618_v61 = vsel %vm9617_vm2, %v9602_v17, %v9616_v51  ;;  %v17164_v30 = vpop.permute.xlu0 %9703  ;;  %v9800_v50 = vpop.permute.xlu1 %9799 }
 0x3d9   : > { %9631 = vst [vmem:[#allocation2 + $0x33c] sm:$0x44] %v9618_v61  ;;  %v19173_v6 = vrot.slane %v17164_v30, 4  ;;  %v9809_v1 = vrot.slane %v9800_v50, 4 }
 0x3da   : > { %12564 = vrot.lane.b32.xlu0 %v16894_v28, %s19163_s30  ;;  %8027 = vrot.lane.b32.xlu1 %v17153_v25, %s19161_s24  ;;  %s19418_s24 = smov 43   ;;  %s19419_s30 = smov 42  }
 0x3db   : > { %v9716_v16 = vsel %vm427_vm1, %v9711_v0, %v19173_v6 }
 0x3dc   : > { %v9718_v15 = vsel %vm19165_vm14, %v9702_v9, %v9716_v16  ;;  %v17184_v19 = vpop.permute.xlu0 %9801  ;;  %v9899_v17 = vpop.permute.xlu1 %9898  ;;  %vm13495_vm14 = vcmask 998400  }
 0x3dd   : > { %9731 = vst [vmem:[#allocation2 + $0x33c] sm:$0x88] %v9718_v15  ;;  %v19170_v39 = vrot.slane %v17184_v19, 4  ;;  %14315 = vmatprep.mubr.msk.bf16.mxu0 %vm13495_vm14, %v17197_v52  ;;  %14317 = vmatprep.mubr.msk.bf16.mxu1 %vm13495_vm14, %v17197_v52  ;;  %v9908_v51 = vrot.slane %v9899_v17, 4 }
 0x3de   : > { %8126 = vrot.lane.b32.xlu0 %v17172_v7, %s19247_s25  ;;  %8223 = vrot.lane.b32.xlu1 %v17176_v29, %s19245_s19  ;;  %s19436_s19 = smov 24   ;;  %s19437_s25 = smov 16  }
 0x3df   : > { %v9814_v57 = vsel %vm427_vm1, %v9809_v1, %v19170_v39 }
 0x3e0   : > { %v9816_v9 = vsel %vm19167_vm7, %v9800_v50, %v9814_v57  ;;  %v17203_v33 = vpop.permute.xlu0 %9900  ;;  %v9998_v8 = vpop.permute.xlu1 %9997  ;;  %vm10013_vm7 = vcmask 236544  }
 0x3e1   : > { %9829 = vst [vmem:[#allocation2 + $0x360] sm:$0x11] %v9816_v9  ;;  %v19168_v61 = vrot.slane %v17203_v33, 4  ;;  %v10007_v57 = vrot.slane %v9998_v8, 4 }
 0x3e2   : > { %8321 = vrot.lane.b32.xlu0 %v17192_v54, %s19240_s20  ;;  %8420 = vrot.lane.b32.xlu1 %v17153_v25, %s19236_s21  ;;  %s19433_s21 = smov 27   ;;  %s19434_s20 = smov 26  }
 0x3e3   : > { %v9913_v50 = vsel %vm427_vm1, %v9908_v51, %v19168_v61 }
 0x3e4   : > { %v9915_v0 = vsel %vm19169_vm6, %v9899_v17, %v9913_v50  ;;  %v17218_v11 = vpop.permute.xlu0 %9999  ;;  %v10098_v16 = vpop.permute.xlu1 %10097  ;;  %v14611_v15 = vld [vmem:[#allocation2 + $0x31c] ss:$36 sps:$4 sm:$0xff]   ;;  %vm10113_vm6 = vcmask 228352  }
 0x3e5   : > { %v14613_v1 = vld [vmem:[#allocation2 + $0x318] ss:$36 sps:$4 sm:$0xff]   ;;  %9928 = vst [vmem:[#allocation2 + $0x360] sm:$0x22] %v9915_v0  ;;  %v19171_v9 = vrot.slane %v17218_v11, 4  ;;  %13549 = vmatprep.subr.bf16.mxu0 %v14611_v15  ;;  %v10107_v61 = vrot.slane %v10098_v16, 4 }
 0x3e6   : > { %8520 = vrot.lane.b32.xlu0 %v17172_v7, %s19229_s23  ;;  %8618 = vrot.lane.b32.xlu1 %v17176_v29, %s19222_s27  ;;  %s19432_s23 = smov 36  }
 0x3e7   : > { %v10012_v17 = vsel %vm427_vm1, %v10007_v57, %v19171_v9  ;;  %13550 = vmatpush1.bf16.msra.mxu0 %v14613_v1 }
 0x3e8   : > { %v10014_v51 = vsel %vm10013_vm7, %v9998_v8, %v10012_v17  ;;  %v17229_v50 = vpop.permute.xlu0 %10099  ;;  %v10196_v0 = vpop.permute.xlu1 %10195 }
 0x3e9   : > { %10027 = vst [vmem:[#allocation2 + $0x360] sm:$0x44] %v10014_v51  ;;  %v19172_v39 = vrot.slane %v17229_v50, 4  ;;  %v10205_v17 = vrot.slane %v10196_v0, 4 }
 0x3ea   : > { %8716 = vrot.lane.b32.xlu0 %v17192_v54, %s19215_s8  ;;  %8814 = vrot.lane.b32.xlu1 %v17153_v25, %s19191_s14  ;;  %s19423_s14 = smov 30   ;;  %s19428_s8 = smov 48  }
 0x3eb   : > { %v10112_v15 = vsel %vm427_vm1, %v10107_v61, %v19172_v39 }
 0x3ec   : > { %v10114_v8 = vsel %vm10113_vm6, %v10098_v16, %v10112_v15  ;;  %v17240_v57 = vpop.permute.xlu0 %10197  ;;  %v10294_v1 = vpop.permute.xlu1 %10293 }
 0x3ed   : > { %10127 = vst [vmem:[#allocation2 + $0x360] sm:$0x88] %v10114_v8  ;;  %v19174_v51 = vrot.slane %v17240_v57, 4  ;;  %v10303_v8 = vrot.slane %v10294_v1, 4 }
 0x3ee   : > { %8914 = vrot.lane.b32.xlu0 %v17172_v7, %s19186_s26  ;;  %9012 = vrot.lane.b32.xlu1 %v17176_v29, %s19184_s6  ;;  %s19421_s6 = smov 32   ;;  %s19422_s26 = smov 31  }
 0x3ef   : > { %v10210_v9 = vsel %vm427_vm1, %v10205_v17, %v19174_v51 }
 0x3f0   : > { %v10211_v61 = vsel %vm4781_vm11, %v10196_v0, %v10210_v9  ;;  %v17251_v16 = vpop.permute.xlu0 %10295  ;;  %v10392_v15 = vpop.permute.xlu1 %10391 }
 0x3f1   : > { %10224 = vst [vmem:[#allocation2 + $0x384] sm:$0x11] %v10211_v61  ;;  %v19175_v39 = vrot.slane %v17251_v16, 4  ;;  %v10401_v61 = vrot.slane %v10392_v15, 4 }
 0x3f2   : > { %9111 = vrot.lane.b32.xlu0 %v17192_v54, %s19210_s7  ;;  %9210 = vrot.lane.b32.xlu1 %v17153_v25, %s19177_s13  ;;  %s19420_s13 = smov 41  }
 0x3f3   : > { %v10308_v6 = vsel %vm427_vm1, %v10303_v8, %v19175_v39 }
 0x3f4   : > { %v10309_v17 = vsel %vm4880_vm4, %v10294_v1, %v10308_v6  ;;  %v17262_v9 = vpop.permute.xlu0 %10393  ;;  %v10491_v0 = vpop.permute.xlu1 %10490 }
 0x3f5   : > { %10322 = vst [vmem:[#allocation2 + $0x384] sm:$0x22] %v10309_v17  ;;  %v19180_v51 = vrot.slane %v17262_v9, 4  ;;  %v10500_v17 = vrot.slane %v10491_v0, 4 }
 0x3f6   : > { %9309 = vrot.lane.b32.xlu0 %v17172_v7, %s19418_s24  ;;  %9407 = vrot.lane.b32.xlu1 %v17176_v29, %s19419_s30 }
 0x3f7   : > { %v10406_v8 = vsel %vm427_vm1, %v10401_v61, %v19180_v51  ;;  %v10136_v61 = vcombine.high %v16862_v48, %v16862_v48  ;;  %v17300_v48 = vrot.slane %v17281_v32, %v14962_v5 }
 0x3f8   : > { %v10407_v6 = vsel %vm4980_vm9, %v10392_v15, %v10406_v8  ;;  %v17273_v1 = vpop.permute.xlu0 %10492  ;;  %v10588_v39 = vpop.permute.xlu1 %10587 }
 0x3f9   : > { %10420 = vst [vmem:[#allocation2 + $0x384] sm:$0x44] %v10407_v6  ;;  %v19188_v18 = vrot.slane %v17273_v1, 4  ;;  %v10597_v35 = vrot.slane %v10588_v39, 4 }
 0x3fa   : > { %9506 = vrot.lane.b32.xlu0 %v17192_v54, %s19420_s13  ;;  %9605 = vrot.lane.b32.xlu1 %v17153_v25, %s19227_s10 }
 0x3fb   : > { %v10505_v15 = vsel %vm427_vm1, %v10500_v17, %v19188_v18 }
 0x3fc   : > { %v10506_v8 = vsel %vm19199_vm13, %v10491_v0, %v10505_v15  ;;  %v17289_v6 = vpop.permute.xlu0 %10589  ;;  %v10686_v51 = vpop.permute.xlu1 %10685  ;;  %v17303_v0 = vrot.slane %v10136_v61, %v14962_v5  ;;  %vm10899_vm13 = vcmask 408576  }
 0x3fd   : > { %10519 = vst [vmem:[#allocation2 + $0x384] sm:$0x88] %v10506_v8  ;;  %v19193_v58 = vrot.slane %v17289_v6, 4 }
 0x3fe   : > { %9705 = vrot.lane.b32.xlu0 %v17172_v7, %s19421_s6  ;;  %9803 = vrot.lane.b32.xlu1 %v17176_v29, %s19422_s26  ;;  %v10695_v7 = vrot.slane %v10686_v51, 4 }
 0x3ff   : > { %v10602_v17 = vsel %vm427_vm1, %v10597_v35, %v19193_v58  ;;  %v17319_v35 = vrot.slane %v17303_v0, %v14962_v5 }
 0x400   : > { %v10603_v15 = vsel %vm19195_vm0, %v10588_v39, %v10602_v17  ;;  %v17309_v8 = vpop.permute.xlu0 %10687  ;;  %v10784_v18 = vpop.permute.xlu1 %10783  ;;  %v10249_v39 = vcombine.low %v17303_v0, %v17303_v0  ;;  %vm19200_vm0 = vcmask 416768  }
 0x401   : > { %10616 = vst [vmem:[#allocation2 + $0x3a8] sm:$0x11] %v10603_v15  ;;  %v19198_v53 = vrot.slane %v17309_v8, 4  ;;  %v10793_v26 = vrot.slane %v10784_v18, 4 }
 0x402   : > { %9902 = vrot.lane.b32.xlu0 %v17192_v54, %s19423_s14  ;;  %10001 = vrot.lane.b32.xlu1 %v17300_v48, %s19201_s9  ;;  %v17334_v34 = vrot.slane %v10249_v39, %v14962_v5  ;;  %s19424_s9 = smov 61  }
 0x403   : > { %v10700_v61 = vsel %vm427_vm1, %v10695_v7, %v19198_v53 }
 0x404   : > { %v10701_v17 = vsel %vm9123_vm15, %v10686_v51, %v10700_v61  ;;  %v17327_v36 = vpop.permute.xlu0 %10785  ;;  %v10884_v15 = vpop.permute.xlu1 %10883  ;;  %v14615_v54 = vld [vmem:[#allocation2 + $0x364] ss:$36 sps:$4 sm:$0xff]  }
 0x405   : > { %v14617_v58 = vld [vmem:[#allocation2 + $0x360] ss:$36 sps:$4 sm:$0xff]   ;;  %10714 = vst [vmem:[#allocation2 + $0x3a8] sm:$0x22] %v10701_v17  ;;  %v19208_v24 = vrot.slane %v17327_v36, 4  ;;  %13551 = vmatprep.subr.bf16.mxu0 %v14615_v54  ;;  %v10893_v53 = vrot.slane %v10884_v15, 4 }
 0x406   : > { %10101 = vrot.lane.b32.xlu0 %v10073_v45, %s19242_s12  ;;  %10199 = vrot.lane.b32.xlu1 %v17319_v35, %s19222_s27  ;;  %s19430_s27 = smov 38  }
 0x407   : > { %v10798_v51 = vsel %vm427_vm1, %v10793_v26, %v19208_v24  ;;  %13552 = vmatpush1.bf16.msra.mxu0 %v14617_v58 }
 0x408   : > { %v10800_v7 = vsel %vm19200_vm0, %v10784_v18, %v10798_v51  ;;  %v17340_v61 = vpop.permute.xlu0 %10885  ;;  %v10982_v17 = vpop.permute.xlu1 %10981  ;;  %vm19218_vm0 = vcmask 400384  }
 0x409   : > { %10813 = vst [vmem:[#allocation2 + $0x3a8] sm:$0x44] %v10800_v7  ;;  %v19205_v45 = vrot.slane %v17340_v61, 4  ;;  %v10991_v54 = vrot.slane %v10982_v17, 4 }
 0x40a   : > { %10297 = vrot.lane.b32.xlu0 %v17334_v34, %s19203_s28  ;;  %10395 = vrot.lane.b32.xlu1 %v16879_v62, %s19206_s29  ;;  %s19425_s28 = smov 60   ;;  %s19426_s29 = smov 51  }
 0x40b   : > { %v10898_v26 = vsel %vm427_vm1, %v10893_v53, %v19205_v45 }
 0x40c   : > { %v10900_v18 = vsel %vm10899_vm13, %v10884_v15, %v10898_v26  ;;  %v17351_v39 = vpop.permute.xlu0 %10983  ;;  %v11081_v58 = vpop.permute.xlu1 %11080 }
 0x40d   : > { %10913 = vst [vmem:[#allocation2 + $0x3a8] sm:$0x88] %v10900_v18  ;;  %v19209_v51 = vrot.slane %v17351_v39, 4  ;;  %v11090_v18 = vrot.slane %v11081_v58, 4 }
 0x40e   : > { %10494 = vrot.lane.b32.xlu0 %v16897_v42, %s19424_s9  ;;  %10591 = vrot.lane.b32.xlu1 %v17319_v35, %s19425_s28 }
 0x40f   : > { %v10996_v53 = vsel %vm427_vm1, %v10991_v54, %v19209_v51 }
 0x410   : > { %v10998_v15 = vsel %vm19218_vm0, %v10982_v17, %v10996_v53  ;;  %v17362_v7 = vpop.permute.xlu0 %11082  ;;  %v11179_v26 = vpop.permute.xlu1 %11178  ;;  %vm19234_vm0 = vcmask 310272  }
 0x411   : > { %11011 = vst [vmem:[#allocation2 + $0x3cc] sm:$0x11] %v10998_v15  ;;  %v19214_v45 = vrot.slane %v17362_v7, 4  ;;  %v11188_v15 = vrot.slane %v11179_v26, 4 }
 0x412   : > { %10689 = vrot.lane.b32.xlu0 %v17334_v34, %s19210_s7  ;;  %10787 = vrot.lane.b32.xlu1 %v16879_v62, %s19426_s29  ;;  %s19427_s7 = smov 49  }
 0x413   : > { %v11095_v24 = vsel %vm427_vm1, %v11090_v18, %v19214_v45 }
 0x414   : > { %v11096_v54 = vsel %vm19213_vm3, %v11081_v58, %v11095_v24  ;;  %v17373_v17 = vpop.permute.xlu0 %11180  ;;  %v11278_v53 = vpop.permute.xlu1 %11277  ;;  %vm19225_vm3 = vcmask 318464  }
 0x415   : > { %11109 = vst [vmem:[#allocation2 + $0x3cc] sm:$0x22] %v11096_v54  ;;  %v19217_v51 = vrot.slane %v17373_v17, 4  ;;  %v11287_v54 = vrot.slane %v11278_v53, 4 }
 0x416   : > { %10887 = vrot.lane.b32.xlu0 %v16897_v42, %s19220_s5  ;;  %10985 = vrot.lane.b32.xlu1 %v17319_v35, %s19427_s7  ;;  %s19429_s5 = smov 39  }
 0x417   : > { %v11193_v63 = vsel %vm427_vm1, %v11188_v15, %v19217_v51 }
 0x418   : > { %v11194_v18 = vsel %vm9617_vm2, %v11179_v26, %v11193_v63  ;;  %v17384_v24 = vpop.permute.xlu0 %11279  ;;  %v11376_v58 = vpop.permute.xlu1 %11375 }
 0x419   : > { %11207 = vst [vmem:[#allocation2 + $0x3cc] sm:$0x44] %v11194_v18  ;;  %v19224_v45 = vrot.slane %v17384_v24, 4  ;;  %v11385_v18 = vrot.slane %v11376_v58, 4 }
 0x41a   : > { %11084 = vrot.lane.b32.xlu0 %v17334_v34, %s19428_s8  ;;  %11182 = vrot.lane.b32.xlu1 %v16879_v62, %s19227_s10  ;;  %s19431_s10 = smov 37  }
 0x41b   : > { %v11292_v15 = vsel %vm427_vm1, %v11287_v54, %v19224_v45 }
 0x41c   : > { %v11294_v63 = vsel %vm19225_vm3, %v11278_v53, %v11292_v15  ;;  %v17395_v26 = vpop.permute.xlu0 %11377  ;;  %v11475_v51 = vpop.permute.xlu1 %11474  ;;  %vm19250_vm3 = vcmask 302080  }
 0x41d   : > { %11307 = vst [vmem:[#allocation2 + $0x3cc] sm:$0x88] %v11294_v63  ;;  %v19231_v27 = vrot.slane %v17395_v26, 4  ;;  %v11484_v63 = vrot.slane %v11475_v51, 4 }
 0x41e   : > { %11281 = vrot.lane.b32.xlu0 %v16897_v42, %s19429_s5  ;;  %11379 = vrot.lane.b32.xlu1 %v17319_v35, %s19430_s27 }
 0x41f   : > { %v11390_v54 = vsel %vm427_vm1, %v11385_v18, %v19231_v27 }
 0x420   : > { %v11392_v53 = vsel %vm19234_vm0, %v11376_v58, %v11390_v54  ;;  %v17406_v15 = vpop.permute.xlu0 %11476  ;;  %v11574_v45 = vpop.permute.xlu1 %11573  ;;  %vm19244_vm0 = vcmask 293888  }
 0x421   : > { %11405 = vst [vmem:[#allocation2 + $0x3f0] sm:$0x11] %v11392_v53  ;;  %v19238_v4 = vrot.slane %v17406_v15, 4  ;;  %v11583_v55 = vrot.slane %v11574_v45, 4 }
 0x422   : > { %11478 = vrot.lane.b32.xlu0 %v17334_v34, %s19431_s10  ;;  %11577 = vrot.lane.b32.xlu1 %v16879_v62, %s19432_s23 }
 0x423   : > { %v11489_v18 = vsel %vm427_vm1, %v11484_v63, %v19238_v4 }
 0x424   : > { %v11491_v58 = vsel %vm19250_vm3, %v11475_v51, %v11489_v18  ;;  %v17417_v54 = vpop.permute.xlu0 %11575  ;;  %v11674_v27 = vpop.permute.xlu1 %11673  ;;  %v14618_v53 = vld [vmem:[#allocation2 + $0x3ac] ss:$36 sps:$4 sm:$0xff]   ;;  %vm19260_vm3 = vcmask 211968  }
 0x425   : > { %v14620_v21 = vld [vmem:[#allocation2 + $0x3a8] ss:$36 sps:$4 sm:$0xff]   ;;  %11504 = vst [vmem:[#allocation2 + $0x3f0] sm:$0x22] %v11491_v58  ;;  %v19251_v31 = vrot.slane %v17417_v54, 4  ;;  %13553 = vmatprep.subr.bf16.mxu0 %v14618_v53  ;;  %v11683_v4 = vrot.slane %v11674_v27, 4 }
 0x426   : > { %11677 = vrot.lane.b32.xlu0 %v16897_v42, %s19242_s12  ;;  %11774 = vrot.lane.b32.xlu1 %v17319_v35, %s19433_s21  ;;  %s19435_s12 = smov 25  }
 0x427   : > { %v11588_v51 = vsel %vm427_vm1, %v11583_v55, %v19251_v31  ;;  %13554 = vmatpush1.bf16.msra.mxu0 %v14620_v21 }
 0x428   : > { %v11590_v63 = vsel %vm19244_vm0, %v11574_v45, %v11588_v51  ;;  %v17428_v18 = vpop.permute.xlu0 %11675  ;;  %v11771_v58 = vpop.permute.xlu1 %11770  ;;  %vm19257_vm0 = vcmask 220160  }
 0x429   : > { %11603 = vst [vmem:[#allocation2 + $0x3f0] sm:$0x44] %v11590_v63  ;;  %v19249_v60 = vrot.slane %v17428_v18, 4  ;;  %v11780_v21 = vrot.slane %v11771_v58, 4 }
 0x42a   : > { %11873 = vrot.lane.b32.xlu0 %v17334_v34, %s19434_s20  ;;  %11972 = vrot.lane.b32.xlu1 %v16879_v62, %s19435_s12 }
 0x42b   : > { %v11688_v55 = vsel %vm427_vm1, %v11683_v4, %v19249_v60 }
 0x42c   : > { %v11689_v45 = vsel %vm10113_vm6, %v11674_v27, %v11688_v55  ;;  %v17439_v53 = vpop.permute.xlu0 %11772  ;;  %v11870_v51 = vpop.permute.xlu1 %11869 }
 0x42d   : > { %11702 = vst [vmem:[#allocation2 + $0x3f0] sm:$0x88] %v11689_v45  ;;  %v19256_v63 = vrot.slane %v17439_v53, 4  ;;  %v11879_v45 = vrot.slane %v11870_v51, 4 }
 0x42e   : > { %12072 = vrot.lane.b32.xlu0 %v16897_v42, %s19436_s19  ;;  %12170 = vrot.lane.b32.xlu1 %v17319_v35, %s19437_s25 }
 0x42f   : > { %v11785_v4 = vsel %vm427_vm1, %v11780_v21, %v19256_v63 }
 0x430   : > { %v11787_v27 = vsel %vm19257_vm0, %v11771_v58, %v11785_v4  ;;  %v17450_v55 = vpop.permute.xlu0 %11871  ;;  %v11969_v60 = vpop.permute.xlu1 %11968  ;;  %vm19264_vm0 = vcmask 203776  }
 0x431   : > { %19438 = vst [vmem:[#allocation8_spill] sm:$0xff] %v17450_v55  ;;  %11800 = vst [vmem:[#allocation2 + $0x414] sm:$0x11] %v11787_v27  ;;  %v19259_v31 = vrot.slane %v17450_v55, 4  ;;  %v11978_v63 = vrot.slane %v11969_v60, 4 }
 0x432   : > { %12269 = vrot.lane.b32.xlu0 %v17334_v34, %s19439_s11  ;;  %12368 = vrot.lane.b32.xlu1 %v16879_v62, %s19440_s0 }
 0x433   : > { %v11884_v58 = vsel %vm427_vm1, %v11879_v45, %v19259_v31 }
 0x434   : > { %v11886_v21 = vsel %vm19260_vm3, %v11870_v51, %v11884_v58  ;;  %v17463_v4 = vpop.permute.xlu0 %11970  ;;  %v12069_v27 = vpop.permute.xlu1 %12068  ;;  %v8176_v51 = vcombine.high %v17158_v56, %v17158_v56  ;;  %vm19267_vm3 = vcmask 195584  }
 0x435   : > { %19441 = vst [vmem:[#allocation9_spill] sm:$0xff] %v17463_v4  ;;  %11899 = vst [vmem:[#allocation2 + $0x414] sm:$0x22] %v11886_v21  ;;  %v19265_v34 = vrot.slane %v17463_v4, 4 }
 0x436   : > { %12468 = vrot.lane.b32.xlu0 %v16897_v42, %s19442_s18  ;;  %12566 = vrot.lane.b32.xlu1 %v17319_v35, %s19443_s16  ;;  %v12078_v42 = vrot.slane %v12069_v27, 4  ;;  %v17487_v3 = vrot.slane %v8176_v51, %v14962_v5 }
 0x437   : > { %v11983_v45 = vsel %vm427_vm1, %v11978_v63, %v19265_v34 }
 0x438   : > { %v11985_v58 = vsel %vm19264_vm0, %v11969_v60, %v11983_v45  ;;  %v17479_v21 = vpop.permute.xlu0 %12070  ;;  %v12167_v31 = vpop.permute.xlu1 %12166  ;;  %vm19276_vm0 = vcmask 130048  }
 0x439   : > { %19444 = vst [vmem:[#allocation10_spill] sm:$0xff] %v17479_v21  ;;  %11998 = vst [vmem:[#allocation2 + $0x414] sm:$0x44] %v11985_v58  ;;  %v19268_v55 = vrot.slane %v17479_v21, 4  ;;  %v12176_v58 = vrot.slane %v12167_v31, 4 }
 0x43a   : > { %8029 = vrot.lane.b32.xlu0 %v17471_v40, %s19445_s17  ;;  %8128 = vrot.lane.b32.xlu1 %v17153_v25, %s19446_s4 }
 0x43b   : > { %v12083_v60 = vsel %vm427_vm1, %v12078_v42, %v19268_v55 }
 0x43c   : > { %v12085_v56 = vsel %vm19267_vm3, %v12069_v27, %v12083_v60  ;;  %v17493_v63 = vpop.permute.xlu0 %12168  ;;  %v12266_v45 = vpop.permute.xlu1 %12265  ;;  %vm19280_vm3 = vcmask 121856  }
 0x43d   : > { %19447 = vst [vmem:[#allocation11_spill] sm:$0xff] %v17493_v63  ;;  %12098 = vst [vmem:[#allocation2 + $0x414] sm:$0x88] %v12085_v56  ;;  %v19271_v34 = vrot.slane %v17493_v63, 4  ;;  %v12275_v56 = vrot.slane %v12266_v45, 4 }
 0x43e   : > { %8225 = vrot.lane.b32.xlu0 %v17487_v3, %s19448_s3  ;;  %8323 = vrot.lane.b32.xlu1 %v17176_v29, %s19449_s2  ;;  %s19452_s3 = smov 65   ;;  %s19457_s2 = smov 55  }
 0x43f   : > { %v12181_v51 = vsel %vm427_vm1, %v12176_v58, %v19271_v34 }
 0x440   : > { %v12183_v27 = vsel %vm19276_vm0, %v12167_v31, %v12181_v51  ;;  %v17504_v42 = vpop.permute.xlu0 %12267  ;;  %v12365_v60 = vpop.permute.xlu1 %12364  ;;  %vm19283_vm0 = vcmask 113664  }
 0x441   : > { %19450 = vst [vmem:[#allocation12_spill] sm:$0xff] %v17504_v42  ;;  %12196 = vst [vmem:[#allocation2 + $0x438] sm:$0x11] %v12183_v27  ;;  %v19279_v55 = vrot.slane %v17504_v42, 4  ;;  %v12374_v21 = vrot.slane %v12365_v60, 4 }
 0x442   : > { %8422 = vrot.lane.b32.xlu0 %v17471_v40, %s19451_s15  ;;  %8522 = vrot.lane.b32.xlu1 %v17153_v25, %s19452_s3  ;;  %s19454_s15 = smov 64   ;;  %s19455_s3 = smov 56  }
 0x443   : > { %v12280_v58 = vsel %vm427_vm1, %v12275_v56, %v19279_v55 }
 0x444   : > { %v12282_v31 = vsel %vm19280_vm3, %v12266_v45, %v12280_v58  ;;  %v17515_v51 = vpop.permute.xlu0 %12366  ;;  %v12465_v34 = vpop.permute.xlu1 %12464  ;;  %v14621_v27 = vld [vmem:[#allocation2 + $0x3f4] ss:$36 sps:$4 sm:$0xff]   ;;  %vm12480_vm3 = vcmask 105472  }
 0x445   : > { %19453 = vst [vmem:[#allocation13_spill] sm:$0xff] %v17515_v51  ;;  %v14623_v63 = vld [vmem:[#allocation2 + $0x3f0] ss:$36 sps:$4 sm:$0xff]   ;;  %12295 = vst [vmem:[#allocation2 + $0x438] sm:$0x22] %v12282_v31  ;;  %v19284_v4 = vrot.slane %v17515_v51, 4  ;;  %13555 = vmatprep.subr.bf16.mxu0 %v14621_v27 }
 0x446   : > { %8620 = vrot.lane.b32.xlu0 %v17487_v3, %s19454_s15  ;;  %8718 = vrot.lane.b32.xlu1 %v17176_v29, %s19455_s3  ;;  %v12474_v55 = vrot.slane %v12465_v34, 4  ;;  %s19458_s3 = smov 54  }
 0x447   : > { %v12379_v45 = vsel %vm427_vm1, %v12374_v21, %v19284_v4  ;;  %13556 = vmatpush1.bf16.msra.mxu0 %v14623_v63 }
 0x448   : > { %v12381_v56 = vsel %vm19283_vm0, %v12365_v60, %v12379_v45  ;;  %v17526_v58 = vpop.permute.xlu0 %12466  ;;  %v12563_v31 = vpop.permute.xlu1 %12562  ;;  %vm19361_vm0 = vcmask 97280  }
 0x449   : > { %19456 = vst [vmem:[#allocation14_spill] sm:$0xff] %v17526_v58  ;;  %12394 = vst [vmem:[#allocation2 + $0x438] sm:$0x44] %v12381_v56  ;;  %v19285_v42 = vrot.slane %v17526_v58, 4  ;;  %v12572_v45 = vrot.slane %v12563_v31, 4 }
 0x44a   : > { %8816 = vrot.lane.b32.xlu0 %v17471_v40, %s19457_s2  ;;  %8916 = vrot.lane.b32.xlu1 %v17153_v25, %s19458_s3  ;;  %s19460_s2 = smov 53   ;;  %s19461_s3 = smov 52  }
 0x44b   : > { %v12479_v21 = vsel %vm427_vm1, %v12474_v55, %v19285_v42 }
 0x44c   : > { %v12481_v60 = vsel %vm12480_vm3, %v12465_v34, %v12479_v21  ;;  %v17537_v27 = vpop.permute.xlu0 %12564  ;;  %v17539_v63 = vpop.permute.xlu1 %8027  ;;  %v19462_v34 = vrot.slane %v16964_v12, 4 }
 0x44d   : > { %19459 = vst [vmem:[#allocation15_spill] sm:$0xff] %v17537_v27  ;;  %12494 = vst [vmem:[#allocation2 + $0x438] sm:$0x88] %v12481_v60  ;;  %v19296_v56 = vrot.slane %v17537_v27, 4  ;;  %v19292_v4 = vrot.slane %v17539_v63, 4 }
 0x44e   : > { %9014 = vrot.lane.b32.xlu0 %v17487_v3, %s19460_s2  ;;  %9113 = vrot.lane.b32.xlu1 %v17176_v29, %s19461_s3  ;;  %s19463_s2 = smov 44  }
 0x44f   : > { %v12577_v55 = vsel %vm427_vm1, %v12572_v45, %v19296_v56  ;;  %v8040_v21 = vsel %vm427_vm1, %v19462_v34, %v19292_v4 }
 0x450   : > { %v12579_v60 = vsel %vm19361_vm0, %v12563_v31, %v12577_v55  ;;  %v8041_v42 = vsel %vm2608_vm8, %v16964_v12, %v8040_v21  ;;  %v17558_v58 = vpop.permute.xlu0 %8126  ;;  %v17560_v51 = vpop.permute.xlu1 %8223  ;;  %v19464_v12 = vrot.slane %v16975_v41, 4 }
 0x451   : > { %12592 = vst [vmem:[#allocation2 + $0x45c] sm:$0x11] %v12579_v60  ;;  %8053 = vst [vmem:[#allocation2 + $0x2b4] sm:$0x44] %v8041_v42  ;;  %v19293_v27 = vrot.slane %v17558_v58, 4  ;;  %v19295_v45 = vrot.slane %v17560_v51, 4 }
 0x452   : > { %9212 = vrot.lane.b32.xlu0 %v17471_v40, %s19463_s2  ;;  %9311 = vrot.lane.b32.xlu1 %v17153_v25, %s19418_s24  ;;  %v19465_v42 = vrot.slane %v16986_v20, 4 }
 0x453   : > { %v8139_v31 = vsel %vm427_vm1, %v19464_v12, %v19293_v27 }
 0x454   : > { %v8236_v55 = vsel %vm427_vm1, %v19465_v42, %v19295_v45  ;;  %v8140_v34 = vsel %vm19297_vm10, %v16975_v41, %v8139_v31  ;;  %v17582_v60 = vpop.permute.xlu0 %8321  ;;  %v17584_v4 = vpop.permute.xlu1 %8420  ;;  %v19467_v41 = vrot.slane %v16997_v46, 4  ;;  %v19468_v31 = vrot.slane %v17008_v38, 4 }
 0x455   : > { %v8237_v21 = vsel %vm19294_vm12, %v16986_v20, %v8236_v55  ;;  %19466 = vst [vmem:[#allocation16_spill] sm:$0xff] %v17584_v4  ;;  %8152 = vst [vmem:[#allocation2 + $0x2b4] sm:$0x88] %v8140_v34  ;;  %v19298_v12 = vrot.slane %v17582_v60, 4  ;;  %v19306_v27 = vrot.slane %v17584_v4, 4  ;;  %vm19469_vm12 = vcmask 539648  }
 0x456   : > { %8249 = vst [vmem:[#allocation2 + $0x2d8] sm:$0x11] %v8237_v21  ;;  %9409 = vrot.lane.b32.xlu0 %v17487_v3, %s19419_s30  ;;  %9508 = vrot.lane.b32.xlu1 %v17176_v29, %s19420_s13  ;;  %vm19307_vm10 = vcmask 1044480   ;;  %s19470_s13 = smov 40   ;;  %s19479_s30 = smov 28  }
 0x457   : > { %v8335_v20 = vsel %vm427_vm1, %v19467_v41, %v19298_v12  ;;  %v8434_v42 = vsel %vm427_vm1, %v19468_v31, %v19306_v27  ;;  %v19472_v31 = vrot.slane %v17030_v49, 4  ;;  %v14627_v27 = vld [vmem:[#allocation2 + $0x10] ss:$36 sps:$4 sm:$0xff]  }
 0x458   : > { %v8336_v55 = vsel %vm19360_vm5, %v16997_v46, %v8335_v20  ;;  %v8435_v34 = vsel %vm19469_vm12, %v17008_v38, %v8434_v42  ;;  %v17606_v21 = vpop.permute.xlu0 %8520  ;;  %v17608_v45 = vpop.permute.xlu1 %8618  ;;  %v14624_v56 = vld [vmem:[#allocation2 + $0x43c] ss:$36 sps:$4 sm:$0x1f]   ;;  %v9953_v46 = vcombine.high %v17281_v32, %v17281_v32  ;;  %v19471_v38 = vrot.slane %v17019_v59, 4 }
 0x459   : > { %8348 = vst [vmem:[#allocation2 + $0x2d8] sm:$0x22] %v8336_v55  ;;  %8447 = vst [vmem:[#allocation2 + $0x2d8] sm:$0x44] %v8435_v34  ;;  %v19304_v41 = vrot.slane %v17606_v21, 4  ;;  %v19305_v12 = vrot.slane %v17608_v45, 4  ;;  %14314 = vmatprep.subr.msk.bf16.mxu0 %vm19307_vm10, %v14624_v56 }
 0x45a   : > { %v14626_v4 = vld [vmem:[#allocation2 + $0x438] ss:$36 sps:$4 sm:$0x1f]   ;;  %9607 = vrot.lane.b32.xlu0 %v17471_v40, %s19470_s13  ;;  %9707 = vrot.lane.b32.xlu1 %v17153_v25, %s19421_s6  ;;  %v17633_v32 = vld [vmem:[%s19104_s1] ss:$8 sps:$4 sm:$0xff]   ;;  %vm19473_vm12 = vcmask 531456  }
 0x45b   : > { %v8534_v20 = vsel %vm427_vm1, %v19471_v38, %v19304_v41  ;;  %v8631_v42 = vsel %vm427_vm1, %v19472_v31, %v19305_v12  ;;  %v13501_v40 = vsel %vm19307_vm10, %v14626_v4, 0  ;;  %v14629_v25 = vld [vmem:[#allocation2 + $0x14] ss:$36 sps:$4 sm:$0xff]   ;;  %vm19477_vm10 = vcmask 449536   ;;  %s19478_s6 = smov 29  }
 0x45c   : > { %v8535_v55 = vsel %vm19473_vm12, %v17019_v59, %v8534_v20  ;;  %v8632_v34 = vsel %vm4781_vm11, %v17030_v49, %v8631_v42  ;;  %v17639_v38 = vpop.permute.xlu0 %8716  ;;  %v17641_v41 = vpop.permute.xlu1 %8814  ;;  %13558 = vmatpush1.bf16.msra.mxu0 %v13501_v40  ;;  %v14632_v56 = vld [vmem:[#allocation2 + $0x294] ss:$36 sps:$4 sm:$0xff]   ;;  %v9981_v59 = vrot.slane %v9953_v46, %v14962_v5  ;;  %v10152_v49 = vcombine.high %v17303_v0, %v17303_v0 }
 0x45d   : > { %v14635_v31 = vld [vmem:[#allocation2 + $0x290] ss:$36 sps:$4 sm:$0xff]   ;;  %8547 = vst [vmem:[#allocation2 + $0x2d8] sm:$0x88] %v8535_v55  ;;  %8644 = vst [vmem:[#allocation2 + $0x2fc] sm:$0x11] %v8632_v34  ;;  %13613 = vmatprep.subr.bf16.mxu0 %v14629_v25  ;;  %13588 = vmatprep.subr.bf16.mxu1 %v14632_v56 }
 0x45e   : > { %v19346_v4 = vrot.slane %v17639_v38, 4  ;;  %v19343_v12 = vrot.slane %v17641_v41, 4  ;;  %9805 = vrot.lane.b32.xlu0 %v17487_v3, %s19422_s26  ;;  %9904 = vrot.lane.b32.xlu1 %v17176_v29, %s19423_s14  ;;  %v19474_v20 = vrot.slane %v17041_v2, 4  ;;  %v19475_v40 = vrot.slane %v17052_v14, 4  ;;  %v14638_v29 = vld [vmem:[#allocation2 + $0x5c] ss:$36 sps:$4 sm:$0xff]  }
 0x45f   : > { %13560 = vmatmul.mubr.bf16.vlgmr.msra.gmra.mrb[0].mxu0 %v17633_v32  ;;  %vm19476_vm12 = vcmask 457728   ;;  %13589 = vmatpush1.bf16.msra.mxu1 %v14635_v31 }
 0x460   : > { %v8729_v42 = vsel %vm427_vm1, %v19474_v20, %v19346_v4  ;;  %v8828_v3 = vsel %vm427_vm1, %v19475_v40, %v19343_v12  ;;  %v17667_v25 = vpop.permute.xlu0 %8914  ;;  %v17669_v55 = vpop.permute.xlu1 %9012  ;;  %13614 = vmatpush1.bf16.msra.mxu0 %v14627_v27  ;;  %14319 = vmatprep.mubr.msk.bf16.mxu0 %vm13495_vm14, %v17197_v52  ;;  %v19480_v27 = vrot.slane %v17063_v22, 4  ;;  %v19481_v20 = vrot.slane %v17074_v43, 4 }
 0x461   : > { %v8730_v46 = vsel %vm19476_vm12, %v17041_v2, %v8729_v42  ;;  %v8829_v0 = vsel %vm19477_vm10, %v17052_v14, %v8828_v3  ;;  %v19340_v34 = vrot.slane %v17667_v25, 4  ;;  %v19337_v56 = vrot.slane %v17669_v55, 4  ;;  %13615 = vmatprep.subr.bf16.mxu0 %v14638_v29  ;;  %v14636_v2 = vld [vmem:[#allocation2 + $0x58] ss:$36 sps:$4 sm:$0xff]   ;;  %v14641_v42 = vld [vmem:[#allocation2 + $0xa4] ss:$36 sps:$4 sm:$0xff]  }
 0x462   : > { %8742 = vst [vmem:[#allocation2 + $0x2fc] sm:$0x22] %v8730_v46  ;;  %8841 = vst [vmem:[#allocation2 + $0x2fc] sm:$0x44] %v8829_v0  ;;  %10003 = vrot.lane.b32.xlu0 %v9981_v59, %s19478_s6  ;;  %10103 = vrot.lane.b32.xlu1 %v17300_v48, %s19479_s30  ;;  %v17679_v14 = vrot.slane %v10152_v49, %v14962_v5  ;;  %vm19482_vm10 = vcmask 441344   ;;  %vm19483_vm12 = vcmask 433152  }
 0x463   : > { %v8928_v31 = vsel %vm427_vm1, %v19480_v27, %v19340_v34  ;;  %v9026_v52 = vsel %vm427_vm1, %v19481_v20, %v19337_v56  ;;  %v14639_v46 = vld [vmem:[#allocation2 + $0xa0] ss:$36 sps:$4 sm:$0xff]   ;;  %s19484_s6 = smov 63   ;;  %v19486_v0 = vrot.slane %v17096_v23, 4  ;;  %v14644_v27 = vld [vmem:[#allocation2 + $0xec] ss:$36 sps:$4 sm:$0xff]  }
 0x464   : > { %v8929_v59 = vsel %vm19482_vm10, %v17063_v22, %v8928_v31  ;;  %v9027_v48 = vsel %vm19483_vm12, %v17074_v43, %v9026_v52  ;;  %v17695_v49 = vpop.permute.xlu0 %9111  ;;  %v17697_v40 = vpop.permute.xlu1 %9210  ;;  %13616 = vmatpush1.bf16.msra.mxu0 %v14636_v2  ;;  %v19485_v22 = vrot.slane %v17085_v44, 4  ;;  %vm19487_vm10 = vcmask 359424  }
 0x465   : > { %8941 = vst [vmem:[#allocation2 + $0x2fc] sm:$0x88] %v8929_v59  ;;  %9039 = vst [vmem:[#allocation2 + $0x320] sm:$0x11] %v9027_v48  ;;  %v19311_v3 = vrot.slane %v17695_v49, 4  ;;  %v19308_v29 = vrot.slane %v17697_v40, 4  ;;  %13617 = vmatprep.subr.bf16.mxu0 %v14641_v42 }
 0x466   : > { %10201 = vrot.lane.b32.xlu0 %v17679_v14, %s19454_s15  ;;  %10299 = vrot.lane.b32.xlu1 %v17319_v35, %s19484_s6  ;;  %s19488_s6 = smov 62   ;;  %vm19491_vm12 = vcmask 351232  }
 0x467   : > { %v9125_v43 = vsel %vm427_vm1, %v19485_v22, %v19311_v3  ;;  %v9223_v2 = vsel %vm427_vm1, %v19486_v0, %v19308_v29  ;;  %v14642_v22 = vld [vmem:[#allocation2 + $0xe8] ss:$36 sps:$4 sm:$0xff]   ;;  %v14647_v0 = vld [vmem:[#allocation2 + $0x134] ss:$36 sps:$4 sm:$0xff]  }
 0x468   : > { %v9126_v31 = vsel %vm9123_vm15, %v17085_v44, %v9125_v43  ;;  %v9224_v20 = vsel %vm19487_vm10, %v17096_v23, %v9223_v2  ;;  %v17719_v52 = vpop.permute.xlu0 %9309  ;;  %v17721_v42 = vpop.permute.xlu1 %9407  ;;  %13618 = vmatpush1.bf16.msra.mxu0 %v14639_v46  ;;  %v19489_v44 = vrot.slane %v17107_v13, 4  ;;  %v19490_v46 = vrot.slane %v17118_v10, 4 }
 0x469   : > { %9138 = vst [vmem:[#allocation2 + $0x320] sm:$0x22] %v9126_v31  ;;  %9236 = vst [vmem:[#allocation2 + $0x320] sm:$0x44] %v9224_v20  ;;  %v19309_v59 = vrot.slane %v17719_v52, 4  ;;  %v19310_v48 = vrot.slane %v17721_v42, 4  ;;  %13619 = vmatprep.subr.bf16.mxu0 %v14644_v27 }
 0x46a   : > { %10397 = vrot.lane.b32.xlu0 %v16894_v28, %s19488_s6  ;;  %10496 = vrot.lane.b32.xlu1 %v16879_v62, %s19424_s9  ;;  %vm19492_vm10 = vcmask 343040  }
 0x46b   : > { %v9323_v23 = vsel %vm427_vm1, %v19489_v44, %v19309_v59  ;;  %v9421_v43 = vsel %vm427_vm1, %v19490_v46, %v19310_v48  ;;  %v14645_v48 = vld [vmem:[#allocation2 + $0x130] ss:$36 sps:$4 sm:$0xff]  }
 0x46c   : > { %v9324_v2 = vsel %vm19491_vm12, %v17107_v13, %v9323_v23  ;;  %v9422_v27 = vsel %vm19492_vm10, %v17118_v10, %v9421_v43  ;;  %v17743_v31 = vpop.permute.xlu0 %9506  ;;  %v17745_v20 = vpop.permute.xlu1 %9605  ;;  %13620 = vmatpush1.bf16.msra.mxu0 %v14642_v22  ;;  %v14648_v29 = vld [vmem:[#allocation2 + $0x2dc] ss:$36 sps:$4 sm:$0xff]   ;;  %v19493_v13 = vrot.slane %v17129_v47, 4  ;;  %v19494_v22 = vrot.slane %v17144_v37, 4 }
 0x46d   : > { %v14650_v44 = vld [vmem:[#allocation2 + $0x2d8] ss:$36 sps:$4 sm:$0xff]   ;;  %9336 = vst [vmem:[#allocation2 + $0x320] sm:$0x88] %v9324_v2  ;;  %9434 = vst [vmem:[#allocation2 + $0x344] sm:$0x11] %v9422_v27  ;;  %13621 = vmatprep.subr.bf16.mxu0 %v14647_v0  ;;  %13590 = vmatprep.subr.bf16.mxu1 %v14648_v29 }
 0x46e   : > { %v19326_v59 = vrot.slane %v17743_v31, 4  ;;  %v19317_v46 = vrot.slane %v17745_v20, 4  ;;  %10593 = vrot.lane.b32.xlu0 %v17679_v14, %s19425_s28  ;;  %10691 = vrot.lane.b32.xlu1 %v17319_v35, %s19461_s3  ;;  %v14653_v43 = vld [vmem:[#allocation2 + $0x17c] ss:$36 sps:$4 sm:$0xff]   ;;  %vm19495_vm12 = vcmask 334848   ;;  %s19496_s28 = smov 50  }
 0x46f   : > { %13591 = vmatpush1.bf16.msra.mxu1 %v14650_v44  ;;  %v14651_v29 = vld [vmem:[#allocation2 + $0x178] ss:$36 sps:$4 sm:$0xff]   ;;  %vm19499_vm10 = vcmask 261120  }
 0x470   : > { %v9520_v10 = vsel %vm427_vm1, %v19493_v13, %v19326_v59  ;;  %v9619_v23 = vsel %vm427_vm1, %v19494_v22, %v19317_v46  ;;  %v17767_v27 = vpop.permute.xlu0 %9705  ;;  %v17769_v3 = vpop.permute.xlu1 %9803  ;;  %13622 = vmatpush1.bf16.msra.mxu0 %v14645_v48  ;;  %v19498_v48 = vrot.slane %v17184_v19, 4 }
 0x471   : > { %v9521_v0 = vsel %vm19495_vm12, %v17129_v47, %v9520_v10  ;;  %v9620_v2 = vsel %vm9617_vm2, %v17144_v37, %v9619_v23  ;;  %v19313_v13 = vrot.slane %v17767_v27, 4  ;;  %v19314_v22 = vrot.slane %v17769_v3, 4  ;;  %13623 = vmatprep.subr.bf16.mxu0 %v14653_v43  ;;  %v14656_v10 = vld [vmem:[#allocation2 + $0x1c4] ss:$36 sps:$4 sm:$0xff]  }
 0x472   : > { %9533 = vst [vmem:[#allocation2 + $0x344] sm:$0x22] %v9521_v0  ;;  %9632 = vst [vmem:[#allocation2 + $0x344] sm:$0x44] %v9620_v2  ;;  %10789 = vrot.lane.b32.xlu0 %v16894_v28, %s19426_s29  ;;  %10889 = vrot.lane.b32.xlu1 %v16879_v62, %s19496_s28  ;;  %v19497_v47 = vrot.slane %v17164_v30, 4  ;;  %vm19500_vm12 = vcmask 252928  }
 0x473   : > { %v9817_v44 = vsel %vm427_vm1, %v19498_v48, %v19314_v22  ;;  %v14654_v48 = vld [vmem:[#allocation2 + $0x1c0] ss:$36 sps:$4 sm:$0xff]  }
 0x474   : > { %v9719_v37 = vsel %vm427_vm1, %v19497_v47, %v19313_v13  ;;  %v9818_v43 = vsel %vm19500_vm12, %v17184_v19, %v9817_v44  ;;  %v17791_v0 = vpop.permute.xlu0 %9902  ;;  %v17793_v2 = vpop.permute.xlu1 %10001  ;;  %13624 = vmatpush1.bf16.msra.mxu0 %v14651_v29  ;;  %v19502_v29 = vrot.slane %v17218_v11, 4  ;;  %v14659_v44 = vld [vmem:[#allocation2 + $0x20c] ss:$36 sps:$4 sm:$0xff]   ;;  %vm19510_vm12 = vcmask 498688  }
 0x475   : > { %v9720_v23 = vsel %vm19499_vm10, %v17164_v30, %v9719_v37  ;;  %9830 = vst [vmem:[#allocation2 + $0x368] sm:$0x11] %v9818_v43  ;;  %v19315_v47 = vrot.slane %v17791_v0, 4  ;;  %v19316_v13 = vrot.slane %v17793_v2, 4  ;;  %13625 = vmatprep.subr.bf16.mxu0 %v14656_v10  ;;  %v19501_v30 = vrot.slane %v17203_v33, 4 }
 0x476   : > { %9732 = vst [vmem:[#allocation2 + $0x344] sm:$0x88] %v9720_v23  ;;  %10987 = vrot.lane.b32.xlu0 %v17679_v14, %s19427_s7  ;;  %11086 = vrot.lane.b32.xlu1 %v17319_v35, %s19428_s8  ;;  %vm19503_vm10 = vcmask 244736  }
 0x477   : > { %v9916_v19 = vsel %vm427_vm1, %v19501_v30, %v19315_v47  ;;  %v10015_v37 = vsel %vm427_vm1, %v19502_v29, %v19316_v13  ;;  %v14657_v29 = vld [vmem:[#allocation2 + $0x208] ss:$36 sps:$4 sm:$0xff]  }
 0x478   : > { %v9917_v10 = vsel %vm19503_vm10, %v17203_v33, %v9916_v19  ;;  %v10016_v23 = vsel %vm10013_vm7, %v17218_v11, %v10015_v37  ;;  %v17815_v43 = vpop.permute.xlu0 %10101  ;;  %v17817_v22 = vpop.permute.xlu1 %10199  ;;  %13626 = vmatpush1.bf16.msra.mxu0 %v14654_v48  ;;  %v19504_v33 = vrot.slane %v17229_v50, 4  ;;  %v19505_v48 = vrot.slane %v17240_v57, 4  ;;  %v14662_v37 = vld [vmem:[#allocation2 + $0x254] ss:$36 sps:$4 sm:$0xff]  }
 0x479   : > { %9929 = vst [vmem:[#allocation2 + $0x368] sm:$0x22] %v9917_v10  ;;  %10028 = vst [vmem:[#allocation2 + $0x368] sm:$0x44] %v10016_v23  ;;  %v19318_v30 = vrot.slane %v17815_v43, 4  ;;  %v19319_v47 = vrot.slane %v17817_v22, 4  ;;  %13627 = vmatprep.subr.bf16.mxu0 %v14659_v44 }
 0x47a   : > { %11184 = vrot.lane.b32.xlu0 %v16894_v28, %s19470_s13  ;;  %11283 = vrot.lane.b32.xlu1 %v16879_v62, %s19429_s5  ;;  %vm19511_vm10 = vcmask 490496  }
 0x47b   : > { %v10115_v11 = vsel %vm427_vm1, %v19504_v33, %v19318_v30  ;;  %v10212_v19 = vsel %vm427_vm1, %v19505_v48, %v19319_v47  ;;  %v14660_v47 = vld [vmem:[#allocation2 + $0x250] ss:$36 sps:$4 sm:$0xff]  }
 0x47c   : > { %v10116_v44 = vsel %vm10113_vm6, %v17229_v50, %v10115_v11  ;;  %v10213_v10 = vsel %vm4781_vm11, %v17240_v57, %v10212_v19  ;;  %v17839_v23 = vpop.permute.xlu0 %10297  ;;  %v17841_v13 = vpop.permute.xlu1 %10395  ;;  %13628 = vmatpush1.bf16.msra.mxu0 %v14657_v29  ;;  %v19506_v50 = vrot.slane %v17251_v16, 4  ;;  %v19507_v29 = vrot.slane %v17262_v9, 4 }
 0x47d   : > { %v14663_v46 = vld [vmem:[#allocation2 + $0x324] ss:$36 sps:$4 sm:$0xff]   ;;  %10128 = vst [vmem:[#allocation2 + $0x368] sm:$0x88] %v10116_v44  ;;  %10225 = vst [vmem:[#allocation2 + $0x38c] sm:$0x11] %v10213_v10  ;;  %13629 = vmatprep.subr.bf16.mxu0 %v14662_v37 }
 0x47e   : > { %v14665_v33 = vld [vmem:[#allocation2 + $0x320] ss:$36 sps:$4 sm:$0xff]   ;;  %v19320_v30 = vrot.slane %v17839_v23, 4  ;;  %v19325_v48 = vrot.slane %v17841_v13, 4  ;;  %11381 = vrot.lane.b32.xlu0 %v17679_v14, %s19430_s27  ;;  %11480 = vrot.lane.b32.xlu1 %v17319_v35, %s19431_s10 }
 0x47f   : > { %13592 = vmatprep.subr.bf16.mxu1 %v14663_v46  ;;  %v19509_v46 = vrot.slane %v17289_v6, 4 }
 0x480   : > { %v10310_v57 = vsel %vm427_vm1, %v19506_v50, %v19320_v30  ;;  %v10408_v11 = vsel %vm427_vm1, %v19507_v29, %v19325_v48  ;;  %v17863_v44 = vpop.permute.xlu0 %10494  ;;  %v17865_v10 = vpop.permute.xlu1 %10591  ;;  %13593 = vmatpush1.bf16.msra.mxu1 %v14665_v33  ;;  %13630 = vmatpush1.bf16.msra.mxu0 %v14660_v47 }
 0x481   : > { %v10311_v19 = vsel %vm4880_vm4, %v17251_v16, %v10310_v57  ;;  %v10409_v37 = vsel %vm4980_vm9, %v17262_v9, %v10408_v11  ;;  %v19324_v50 = vrot.slane %v17863_v44, 4  ;;  %v19322_v30 = vrot.slane %v17865_v10, 4 }
 0x482   : > { %10323 = vst [vmem:[#allocation2 + $0x38c] sm:$0x22] %v10311_v19  ;;  %10421 = vst [vmem:[#allocation2 + $0x38c] sm:$0x44] %v10409_v37  ;;  %11579 = vrot.lane.b32.xlu0 %v16894_v28, %s19432_s23  ;;  %11679 = vrot.lane.b32.xlu1 %v16879_v62, %s19479_s30  ;;  %v19508_v16 = vrot.slane %v17273_v1, 4 }
 0x483   : > { %v10604_v47 = vsel %vm427_vm1, %v19509_v46, %v19322_v30  ;;  %v14670_v30 = vld [vmem:[%s14967_s22 + $0xb] ss:$0 sps:$4 sm:$0x33]  }
 0x484   : > { %v10507_v9 = vsel %vm427_vm1, %v19508_v16, %v19324_v50  ;;  %v10605_v57 = vsel %vm19511_vm10, %v17289_v6, %v10604_v47  ;;  %v17887_v29 = vpop.permute.xlu0 %10689  ;;  %v17889_v11 = vpop.permute.xlu1 %10787  ;;  %v19513_v16 = vrot.slane %v17327_v36, 4  ;;  %vm19517_vm10 = vcmask 400384  }
 0x485   : > { %v10508_v33 = vsel %vm19510_vm12, %v17273_v1, %v10507_v9  ;;  %10617 = vst [vmem:[#allocation2 + $0x3b0] sm:$0x11] %v10605_v57  ;;  %v19321_v19 = vrot.slane %v17887_v29, 4  ;;  %v19323_v37 = vrot.slane %v17889_v11, 4  ;;  %v19512_v1 = vrot.slane %v17309_v8, 4 }
 0x486   : > { %10520 = vst [vmem:[#allocation2 + $0x38c] sm:$0x88] %v10508_v33  ;;  %11776 = vrot.lane.b32.xlu0 %v17679_v14, %s19433_s21  ;;  %11875 = vrot.lane.b32.xlu1 %v17319_v35, %s19434_s20  ;;  %vm19514_vm12 = vcmask 416768  }
 0x487   : > { %v10702_v6 = vsel %vm427_vm1, %v19512_v1, %v19321_v19  ;;  %v10801_v9 = vsel %vm427_vm1, %v19513_v16, %v19323_v37  ;;  %v19516_v16 = vrot.slane %v17351_v39, 4 }
 0x488   : > { %v10703_v46 = vsel %vm9123_vm15, %v17309_v8, %v10702_v6  ;;  %v10802_v47 = vsel %vm19514_vm12, %v17327_v36, %v10801_v9  ;;  %v17911_v33 = vpop.permute.xlu0 %10887  ;;  %v17913_v57 = vpop.permute.xlu1 %10985  ;;  %v14669_v8 = vld [vmem:[%s14967_s22 + $0xb] ss:$0 sps:$4 sm:$0x33]   ;;  %v19515_v36 = vrot.slane %v17340_v61, 4  ;;  %vm19520_vm12 = vcmask 392192  }
 0x489   : > { %10715 = vst [vmem:[#allocation2 + $0x3b0] sm:$0x22] %v10703_v46  ;;  %10814 = vst [vmem:[#allocation2 + $0x3b0] sm:$0x44] %v10802_v47  ;;  %v19327_v1 = vrot.slane %v17911_v33, 4  ;;  %v19334_v19 = vrot.slane %v17913_v57, 4 }
 0x48a   : > { %11974 = vrot.lane.b32.xlu0 %v16894_v28, %s19435_s12  ;;  %12074 = vrot.lane.b32.xlu1 %v16879_v62, %s19436_s19 }
 0x48b   : > { %v10901_v6 = vsel %vm427_vm1, %v19515_v36, %v19327_v1  ;;  %v10999_v9 = vsel %vm427_vm1, %v19516_v16, %v19334_v19  ;;  %v8113_v16 = vrot.slane %v14670_v30, %v14962_v5 }
 0x48c   : > { %v10902_v46 = vsel %vm10899_vm13, %v17340_v61, %v10901_v6  ;;  %v11000_v47 = vsel %vm19517_vm10, %v17351_v39, %v10999_v9  ;;  %v17937_v37 = vpop.permute.xlu0 %11084  ;;  %v17939_v50 = vpop.permute.xlu1 %11182  ;;  %v8015_v61 = vrot.slane %v14669_v8, %v14962_v5  ;;  %v19518_v39 = vrot.slane %v17362_v7, 4 }
 0x48d   : > { %v14666_v48 = vld [vmem:[#allocation2 + $0x36c] ss:$36 sps:$4 sm:$0xff]   ;;  %10914 = vst [vmem:[#allocation2 + $0x3b0] sm:$0x88] %v10902_v46  ;;  %11012 = vst [vmem:[#allocation2 + $0x3d4] sm:$0x11] %v11000_v47 }
 0x48e   : > { %v14668_v59 = vld [vmem:[#allocation2 + $0x368] ss:$36 sps:$4 sm:$0xff]   ;;  %v19330_v36 = vrot.slane %v17937_v37, 4  ;;  %v19328_v1 = vrot.slane %v17939_v50, 4  ;;  %12172 = vrot.lane.b32.xlu0 %v17679_v14, %s19437_s25  ;;  %12271 = vrot.lane.b32.xlu1 %v17319_v35, %s19439_s11  ;;  %v19519_v9 = vrot.slane %v17373_v17, 4  ;;  %vm19523_vm10 = vcmask 318464  }
 0x48f   : > { %13594 = vmatprep.subr.bf16.mxu1 %v14666_v48  ;;  %v14145_v48 = vld.sshfl [vmem:[%s14967_s22 + $0xb] sm:$0x5 pattern:$0x73625140] }
 0x490   : > { %v11097_v6 = vsel %vm427_vm1, %v19518_v39, %v19330_v36  ;;  %v11195_v30 = vsel %vm427_vm1, %v19519_v9, %v19328_v1  ;;  %v17963_v46 = vpop.permute.xlu0 %11281  ;;  %v17965_v47 = vpop.permute.xlu1 %11379  ;;  %13595 = vmatpush1.bf16.msra.mxu1 %v14668_v59  ;;  %v8114_v1 = vcombine.low %v8113_v16, %v8113_v16  ;;  %v19521_v59 = vrot.slane %v17384_v24, 4 }
 0x491   : > { %v11098_v35 = vsel %vm19520_vm12, %v17362_v7, %v11097_v6  ;;  %v11196_v8 = vsel %vm9617_vm2, %v17373_v17, %v11195_v30  ;;  %v19329_v39 = vrot.slane %v17963_v46, 4  ;;  %v19333_v9 = vrot.slane %v17965_v47, 4  ;;  %v14671_v17 = vld [vmem:[%s14967_s22 + $0xb] ss:$0 sps:$4 sm:$0x33]  }
 0x492   : > { %11110 = vst [vmem:[#allocation2 + $0x3d4] sm:$0x22] %v11098_v35  ;;  %11208 = vst [vmem:[#allocation2 + $0x3d4] sm:$0x44] %v11196_v8  ;;  %12370 = vrot.lane.b32.xlu0 %v16894_v28, %s19440_s0  ;;  %12470 = vrot.lane.b32.xlu1 %v16879_v62, %s19442_s18  ;;  %v8022_v7 = vrot.slane %v8015_v61, %v14962_v5  ;;  %v19522_v16 = vrot.slane %v17395_v26, 4  ;;  %vm19524_vm12 = vcmask 310272   ;;  %v8121_v36 = vrot.slane %v8114_v1, %v14962_v5 }
 0x493   : > { %v14675_v6 = vld [vmem:[%s14967_s22 + $0xb] ss:$0 sps:$4 sm:$0x33]   ;;  %v11295_v30 = vsel %vm427_vm1, %v19521_v59, %v19329_v39 }
 0x494   : > { %v11393_v35 = vsel %vm427_vm1, %v19522_v16, %v19333_v9  ;;  %v11296_v28 = vsel %vm19523_vm10, %v17384_v24, %v11295_v30  ;;  %v17991_v61 = vpop.permute.xlu0 %11478  ;;  %v17993_v8 = vpop.permute.xlu1 %11577  ;;  %v17999_v16 = vrot.slane %v14145_v48, %v14962_v5  ;;  %v8309_v24 = vcombine.low %v14145_v48, %v14145_v48 }
 0x495   : > { %v11394_v62 = vsel %vm19524_vm12, %v17395_v26, %v11393_v35  ;;  %11308 = vst [vmem:[#allocation2 + $0x3d4] sm:$0x88] %v11296_v28  ;;  %v19332_v59 = vrot.slane %v17991_v61, 4  ;;  %v19331_v39 = vrot.slane %v17993_v8, 4  ;;  %v8408_v26 = vrot.slane %v14671_v17, %v14962_v5 }
 0x496   : > { %11406 = vst [vmem:[#allocation2 + $0x3f8] sm:$0x11] %v11394_v62  ;;  %12568 = vrot.lane.b32.xlu0 %v17679_v14, %s19443_s16  ;;  %8031 = vrot.lane.b32.xlu1 %v8022_v7, %s19445_s17  ;;  %v8507_v30 = vrot.slane %v14675_v6, %v14962_v5  ;;  %v19525_v35 = vrot.slane %v17406_v15, 4  ;;  %v19526_v28 = vrot.slane %v17417_v54, 4  ;;  %vm19527_vm10 = vcmask 302080   ;;  %s19529_s17 = smov 68  }
 0x497   : > { %vm19528_vm12 = vcmask 293888  }
 0x498   : > { %v11492_v1 = vsel %vm427_vm1, %v19525_v35, %v19332_v59  ;;  %v11591_v14 = vsel %vm427_vm1, %v19526_v28, %v19331_v39  ;;  %v18020_v17 = vpop.permute.xlu0 %11677  ;;  %v18022_v6 = vpop.permute.xlu1 %11774  ;;  %v14676_v28 = vld [vmem:[%s14967_s22 + $0xb] ss:$0 sps:$4 sm:$0x33]  }
 0x499   : > { %v11493_v48 = vsel %vm19527_vm10, %v17406_v15, %v11492_v1  ;;  %v11592_v7 = vsel %vm19528_vm12, %v17417_v54, %v11591_v14  ;;  %v19335_v62 = vrot.slane %v18020_v17, 4  ;;  %v19336_v35 = vrot.slane %v18022_v6, 4  ;;  %v14677_v14 = vld [vmem:[%s14967_s22 + $0xb] ss:$0 sps:$4 sm:$0x33]  }
 0x49a   : > { %11505 = vst [vmem:[#allocation2 + $0x3f8] sm:$0x22] %v11493_v48  ;;  %11604 = vst [vmem:[#allocation2 + $0x3f8] sm:$0x44] %v11592_v7  ;;  %8130 = vrot.lane.b32.xlu0 %v8121_v36, %s19446_s4  ;;  %8227 = vrot.lane.b32.xlu1 %v17999_v16, %s19529_s17  ;;  %v18030_v15 = vrot.slane %v8309_v24, %v14962_v5  ;;  %v8415_v54 = vrot.slane %v8408_v26, %v14962_v5  ;;  %v19530_v48 = vrot.slane %v17428_v18, 4  ;;  %vm19532_vm10 = vcmask 220160  }
 0x49b   : > { %v8508_v1 = vcombine.low %v8507_v30, %v8507_v30  ;;  %v19531_v36 = vrot.slane %v17439_v53, 4  ;;  %s19533_s4 = smov 67   ;;  %s19534_s17 = smov 66   ;;  %vm19539_vm12 = vcmask 211968  }
 0x49c   : > { %v11690_v7 = vsel %vm427_vm1, %v19530_v48, %v19335_v62  ;;  %v18049_v30 = vpop.permute.xlu0 %11873  ;;  %v18051_v59 = vpop.permute.xlu1 %11972  ;;  %v14672_v9 = vld [vmem:[#allocation2 + $0x3b4] ss:$36 sps:$4 sm:$0xff]  }
 0x49d   : > { %v11788_v39 = vsel %vm427_vm1, %v19531_v36, %v19336_v35  ;;  %v11691_v24 = vsel %vm10113_vm6, %v17428_v18, %v11690_v7  ;;  %v14674_v19 = vld [vmem:[#allocation2 + $0x3b0] ss:$36 sps:$4 sm:$0xff]   ;;  %v19338_v48 = vrot.slane %v18049_v30, 4  ;;  %v19339_v62 = vrot.slane %v18051_v59, 4  ;;  %v19535_v7 = vld [vmem:[#allocation8_spill] sm:$0xff]  ;;  %13596 = vmatprep.subr.bf16.mxu1 %v14672_v9 }
 0x49e   : > { %v11789_v26 = vsel %vm19532_vm10, %v17439_v53, %v11788_v39  ;;  %11703 = vst [vmem:[#allocation2 + $0x3f8] sm:$0x88] %v11691_v24  ;;  %8325 = vrot.lane.b32.xlu0 %v18030_v15, %s19533_s4  ;;  %8424 = vrot.lane.b32.xlu1 %v8415_v54, %s19534_s17  ;;  %v8515_v18 = vrot.slane %v8508_v1, %v14962_v5  ;;  %v19536_v36 = vrot.slane %v19535_v7, 4  ;;  %vm19540_vm10 = vcmask 203776   ;;  %s19542_s4 = smov 65   ;;  %s19551_s17 = smov 56  }
 0x49f   : > { %11801 = vst [vmem:[#allocation2 + $0x41c] sm:$0x11] %v11789_v26  ;;  %v8802_v53 = vrot.slane %v14676_v28, %v14962_v5  ;;  %v8901_v39 = vrot.slane %v14677_v14, %v14962_v5  ;;  %v19537_v26 = vld [vmem:[#allocation9_spill] sm:$0xff]  ;;  %13597 = vmatpush1.bf16.msra.mxu1 %v14674_v19 }
 0x4a0   : > { %v11887_v24 = vsel %vm427_vm1, %v19536_v36, %v19338_v48  ;;  %v19538_v35 = vrot.slane %v19537_v26, 4  ;;  %v18075_v28 = vpop.permute.xlu0 %12072  ;;  %v18077_v14 = vpop.permute.xlu1 %12170 }
 0x4a1   : > { %v11888_v54 = vsel %vm19539_vm12, %v19535_v7, %v11887_v24  ;;  %19541 = vst [vmem:[#allocation8_spill] sm:$0xff] %v18077_v14  ;;  %v19341_v36 = vrot.slane %v18075_v28, 4  ;;  %v19342_v48 = vrot.slane %v18077_v14, 4  ;;  %v8809_v9 = vrot.slane %v8802_v53, %v14962_v5  ;;  %v14682_v7 = vld [vmem:[%s14967_s22 + $0xb] ss:$0 sps:$4 sm:$0x33]  }
 0x4a2   : > { %v11986_v56 = vsel %vm427_vm1, %v19538_v35, %v19339_v62  ;;  %11900 = vst [vmem:[#allocation2 + $0x41c] sm:$0x22] %v11888_v54  ;;  %8524 = vrot.lane.b32.xlu0 %v8515_v18, %s19542_s4  ;;  %8622 = vrot.lane.b32.xlu1 %v17999_v16, %s19454_s15  ;;  %v8902_v35 = vcombine.low %v8901_v39, %v8901_v39  ;;  %v19543_v24 = vld [vmem:[#allocation10_spill] sm:$0xff]  ;;  %v19545_v54 = vld [vmem:[#allocation11_spill] sm:$0xff]  ;;  %vm19547_vm12 = vcmask 195584   ;;  %s19552_s4 = smov 55  }
 0x4a3   : > { %v11987_v1 = vsel %vm19540_vm10, %v19537_v26, %v11986_v56  ;;  %v14678_v56 = vld [vmem:[%s14967_s22 + $0xb] ss:$0 sps:$4 sm:$0x33]   ;;  %v19544_v19 = vrot.slane %v19543_v24, 4  ;;  %vm19548_vm10 = vcmask 130048  }
 0x4a4   : > { %11999 = vst [vmem:[#allocation2 + $0x41c] sm:$0x44] %v11987_v1  ;;  %v19546_v1 = vrot.slane %v19545_v54, 4  ;;  %v18101_v39 = vpop.permute.xlu0 %12269  ;;  %v18103_v34 = vpop.permute.xlu1 %12368 }
 0x4a5   : > { %v12086_v26 = vsel %vm427_vm1, %v19544_v19, %v19341_v36  ;;  %19549 = vst [vmem:[#allocation9_spill] sm:$0xff] %v18101_v39  ;;  %19550 = vst [vmem:[#allocation10_spill] sm:$0xff] %v18103_v34  ;;  %v19344_v19 = vrot.slane %v18101_v39, 4  ;;  %v19345_v36 = vrot.slane %v18103_v34, 4 }
 0x4a6   : > { %v12184_v18 = vsel %vm427_vm1, %v19546_v1, %v19342_v48  ;;  %v12087_v62 = vsel %vm19547_vm12, %v19543_v24, %v12086_v26  ;;  %8720 = vrot.lane.b32.xlu0 %v18030_v15, %s19551_s17  ;;  %8818 = vrot.lane.b32.xlu1 %v8809_v9, %s19552_s4  ;;  %v8909_v24 = vrot.slane %v8902_v35, %v14962_v5  ;;  %vm19557_vm12 = vcmask 121856   ;;  %s19560_s17 = smov 54   ;;  %s19561_s4 = smov 53  }
 0x4a7   : > { %v12185_v53 = vsel %vm19548_vm10, %v19545_v54, %v12184_v18  ;;  %12099 = vst [vmem:[#allocation2 + $0x41c] sm:$0x88] %v12087_v62  ;;  %v9198_v26 = vrot.slane %v14678_v56, %v14962_v5  ;;  %v9296_v54 = vrot.slane %v14682_v7, %v14962_v5  ;;  %v19553_v62 = vld [vmem:[#allocation12_spill] sm:$0xff]  ;;  %vm19558_vm10 = vcmask 113664  }
 0x4a8   : > { %12197 = vst [vmem:[#allocation2 + $0x440] sm:$0x11] %v12185_v53  ;;  %v19554_v1 = vrot.slane %v19553_v62, 4  ;;  %v19555_v53 = vld [vmem:[#allocation13_spill] sm:$0xff]  ;;  %v18127_v7 = vpop.permute.xlu0 %12468  ;;  %v18129_v12 = vpop.permute.xlu1 %12566 }
 0x4a9   : > { %v19556_v48 = vrot.slane %v19555_v53, 4  ;;  %19559 = vst [vmem:[#allocation11_spill] sm:$0xff] %v18127_v7 }
 0x4aa   : > { %v12283_v18 = vsel %vm427_vm1, %v19554_v1, %v19344_v19  ;;  %v19355_v1 = vrot.slane %v18127_v7, 4  ;;  %v19359_v19 = vrot.slane %v18129_v12, 4  ;;  %8918 = vrot.lane.b32.xlu0 %v8909_v24, %s19560_s17  ;;  %9016 = vrot.lane.b32.xlu1 %v17999_v16, %s19561_s4  ;;  %s19584_s17 = smov 32  }
 0x4ab   : > { %v12382_v9 = vsel %vm427_vm1, %v19556_v48, %v19345_v36  ;;  %v12284_v35 = vsel %vm19557_vm12, %v19553_v62, %v12283_v18  ;;  %v9205_v48 = vrot.slane %v9198_v26, %v14962_v5  ;;  %v9297_v62 = vcombine.low %v9296_v54, %v9296_v54  ;;  %v14683_v18 = vld [vmem:[%s14967_s22 + $0xb] ss:$0 sps:$4 sm:$0x33]  }
 0x4ac   : > { %v12383_v56 = vsel %vm19558_vm10, %v19555_v53, %v12382_v9  ;;  %12296 = vst [vmem:[#allocation2 + $0x440] sm:$0x22] %v12284_v35  ;;  %v14690_v53 = vld [vmem:[%s14967_s22 + $0xb] ss:$0 sps:$4 sm:$0x33]   ;;  %v19562_v9 = vld [vmem:[#allocation14_spill] sm:$0xff]  ;;  %v18153_v54 = vpop.permute.xlu0 %8029  ;;  %v18155_v39 = vpop.permute.xlu1 %8128 }
 0x4ad   : > { %12395 = vst [vmem:[#allocation2 + $0x440] sm:$0x44] %v12383_v56  ;;  %v19563_v36 = vrot.slane %v19562_v9, 4  ;;  %v19564_v56 = vld [vmem:[#allocation15_spill] sm:$0xff]  ;;  %vm19568_vm12 = vcmask 621568   ;;  %vm19572_vm10 = vcmask 556032  }
 0x4ae   : > { %v19565_v4 = vrot.slane %v19564_v56, 4  ;;  %v14679_v7 = vld [vmem:[#allocation2 + $0x3fc] ss:$36 sps:$4 sm:$0xff]   ;;  %9115 = vrot.lane.b32.xlu0 %v18030_v15, %s19461_s3  ;;  %9214 = vrot.lane.b32.xlu1 %v9205_v48, %s19463_s2  ;;  %s19569_s2 = smov 42  }
 0x4af   : > { %v12482_v35 = vsel %vm427_vm1, %v19563_v36, %v19355_v1  ;;  %v14681_v14 = vld [vmem:[#allocation2 + $0x3f8] ss:$36 sps:$4 sm:$0xff]   ;;  %v19356_v36 = vrot.slane %v18153_v54, 4  ;;  %v19357_v1 = vrot.slane %v18155_v39, 4  ;;  %13598 = vmatprep.subr.bf16.mxu1 %v14679_v7 }
 0x4b0   : > { %v12580_v24 = vsel %vm427_vm1, %v19565_v4, %v19359_v19  ;;  %v12483_v34 = vsel %vm12480_vm3, %v19562_v9, %v12482_v35  ;;  %v9304_v4 = vrot.slane %v9297_v62, %v14962_v5  ;;  %v9593_v9 = vrot.slane %v14683_v18, %v14962_v5  ;;  %v18179_v18 = vpop.permute.xlu0 %8225  ;;  %13599 = vmatpush1.bf16.msra.mxu1 %v14681_v14  ;;  %v14697_v7 = vld [vmem:[%s14967_s22 + $0xb] ss:$0 sps:$4 sm:$0x33]  }
 0x4b1   : > { %v12581_v26 = vsel %vm19361_vm0, %v19564_v56, %v12580_v24  ;;  %12495 = vst [vmem:[#allocation2 + $0x440] sm:$0x88] %v12483_v34  ;;  %v9692_v35 = vrot.slane %v14690_v53, %v14962_v5  ;;  %v19566_v34 = vrot.slane %v17539_v63, 4  ;;  %v19567_v24 = vrot.slane %v17558_v58, 4  ;;  %v18181_v53 = vpop.permute.xlu1 %8323 }
 0x4b2   : > { %12593 = vst [vmem:[#allocation2 + $0x464] sm:$0x11] %v12581_v26  ;;  %9313 = vrot.lane.b32.xlu0 %v9304_v4, %s19418_s24  ;;  %9411 = vrot.lane.b32.xlu1 %v17999_v16, %s19569_s2  ;;  %v19570_v14 = vrot.slane %v17560_v51, 4  ;;  %s19575_s24 = smov 41   ;;  %vm19582_vm0 = vcmask 531456   ;;  %s19588_s2 = smov 29  }
 0x4b3   : > { %v8042_v56 = vsel %vm427_vm1, %v19566_v34, %v19356_v36  ;;  %v8141_v26 = vsel %vm427_vm1, %v19567_v24, %v19357_v1  ;;  %v19358_v34 = vrot.slane %v18179_v18, 4  ;;  %v19362_v36 = vrot.slane %v18181_v53, 4  ;;  %v14701_v24 = vld [vmem:[%s14967_s22 + $0xb] ss:$0 sps:$4 sm:$0x33]  }
 0x4b4   : > { %v8043_v48 = vsel %vm2608_vm8, %v17539_v63, %v8042_v56  ;;  %v8142_v62 = vsel %vm19568_vm12, %v17558_v58, %v8141_v26  ;;  %v9600_v63 = vrot.slane %v9593_v9, %v14962_v5  ;;  %v9693_v58 = vcombine.low %v9692_v35, %v9692_v35  ;;  %v18205_v35 = vpop.permute.xlu0 %8422 }
 0x4b5   : > { %8054 = vst [vmem:[#allocation2 + $0x2bc] sm:$0x44] %v8043_v48  ;;  %8153 = vst [vmem:[#allocation2 + $0x2bc] sm:$0x88] %v8142_v62  ;;  %v8238_v56 = vsel %vm427_vm1, %v19570_v14, %v19358_v34  ;;  %v19571_v26 = vrot.slane %v17582_v60, 4  ;;  %v18207_v62 = vpop.permute.xlu1 %8522  ;;  %v19366_v14 = vrot.slane %v18205_v35, 4 }
 0x4b6   : > { %v8239_v4 = vsel %vm19572_vm10, %v17560_v51, %v8238_v56  ;;  %19573 = vst [vmem:[#allocation12_spill] sm:$0xff] %v18205_v35  ;;  %19574 = vst [vmem:[#allocation13_spill] sm:$0xff] %v18207_v62  ;;  %v19365_v34 = vrot.slane %v18207_v62, 4  ;;  %9510 = vrot.lane.b32.xlu0 %v18030_v15, %s19575_s24  ;;  %9609 = vrot.lane.b32.xlu1 %v9600_v63, %s19470_s13  ;;  %v9700_v51 = vrot.slane %v9693_v58, %v14962_v5  ;;  %v19576_v56 = vld [vmem:[#allocation16_spill] sm:$0xff]  ;;  %vm19579_vm12 = vcmask 1044480  }
 0x4b7   : > { %v8337_v48 = vsel %vm427_vm1, %v19571_v26, %v19362_v36  ;;  %8250 = vst [vmem:[#allocation2 + $0x2e0] sm:$0x11] %v8239_v4  ;;  %v10088_v26 = vrot.slane %v14701_v24, %v14962_v5  ;;  %vm19580_vm10 = vmmov %vm19579_vm12  ;;  %v14689_v58 = vld [vmem:[#allocation2 + $0x1c] ss:$36 sps:$4 sm:$0xff]  }
 0x4b8   : > { %v8338_v9 = vsel %vm19360_vm5, %v17582_v60, %v8337_v48  ;;  %v9989_v60 = vrot.slane %v14697_v7, %v14962_v5  ;;  %v19577_v48 = vrot.slane %v19576_v56, 4  ;;  %vm19581_vm5 = vcmask 539648   ;;  %v18233_v35 = vpop.permute.xlu0 %8620 }
 0x4b9   : > { %v14684_v1 = vld [vmem:[#allocation2 + $0x444] ss:$36 sps:$4 sm:$0x1f]   ;;  %8349 = vst [vmem:[#allocation2 + $0x2e0] sm:$0x22] %v8338_v9  ;;  %v19578_v9 = vrot.slane %v17606_v21, 4 }
 0x4ba   : > { %v14686_v19 = vld [vmem:[#allocation2 + $0x440] ss:$36 sps:$4 sm:$0x1f]   ;;  %v8436_v4 = vsel %vm427_vm1, %v19577_v48, %v19366_v14  ;;  %14316 = vmatprep.subr.msk.bf16.mxu1 %vm19579_vm12, %v14684_v1  ;;  %19583 = vst [vmem:[#allocation14_spill] sm:$0xff] %v18233_v35  ;;  %v18235_v48 = vpop.permute.xlu1 %8718  ;;  %9709 = vrot.lane.b32.xlu0 %v9700_v51, %s19584_s17  ;;  %vm19592_vm12 = vcmask 441344  }
 0x4bb   : > { %v8536_v24 = vsel %vm427_vm1, %v19578_v9, %v19365_v34  ;;  %v13507_v63 = vsel %vm19580_vm10, %v14686_v19, 0  ;;  %v8437_v7 = vsel %vm19581_vm5, %v19576_v56, %v8436_v4  ;;  %v14687_v9 = vld [vmem:[#allocation2 + $0x18] ss:$36 sps:$4 sm:$0xff]   ;;  %v19378_v19 = vrot.slane %v18233_v35, 4  ;;  %9807 = vrot.lane.b32.xlu1 %v17999_v16, %s19422_s26  ;;  %v14696_v16 = vld [vmem:[#allocation2 + $0x64] ss:$36 sps:$4 sm:$0xff]  }
 0x4bc   : > { %v8537_v36 = vsel %vm19582_vm0, %v17606_v21, %v8536_v24  ;;  %13601 = vmatpush1.bf16.msra.mxu1 %v13507_v63  ;;  %v14691_v34 = vld [vmem:[#allocation2 + $0x298] ss:$36 sps:$4 sm:$0xff]   ;;  %8448 = vst [vmem:[#allocation2 + $0x2e0] sm:$0x44] %v8437_v7  ;;  %v19377_v14 = vrot.slane %v18235_v48, 4  ;;  %v10089_v56 = vcombine.low %v10088_v26, %v10088_v26  ;;  %v9996_v21 = vrot.slane %v9989_v60, %v14962_v5  ;;  %v18261_v35 = vpop.permute.xlu0 %8816 }
 0x4bd   : > { %v14693_v1 = vld [vmem:[#allocation2 + $0x29c] ss:$36 sps:$4 sm:$0xff]   ;;  %8548 = vst [vmem:[#allocation2 + $0x2e0] sm:$0x88] %v8537_v36  ;;  %13656 = vmatprep.subr.bf16.mxu1 %v14689_v58  ;;  %v19585_v36 = vrot.slane %v17608_v45, 4  ;;  %v19586_v26 = vrot.slane %v17639_v38, 4 }
 0x4be   : > { %v14155_v4 = vld.sshfl [vmem:[%s14967_s22 + $0xc] sm:$0x5 pattern:$0x73625140]  ;;  %13631 = vmatprep.subr.bf16.mxu0 %v14693_v1  ;;  %vm19587_vm0 = vcmask 457728   ;;  %v18263_v62 = vpop.permute.xlu1 %8916  ;;  %9906 = vrot.lane.b32.xlu0 %v18030_v15, %s19423_s14  ;;  %vm19591_vm5 = vcmask 449536  }
 0x4bf   : > { %v14705_v24 = vld [vmem:[%s14967_s22 + $0xc] ss:$0 sps:$4 sm:$0x33]   ;;  %v8633_v7 = vsel %vm427_vm1, %v19585_v36, %v19378_v19  ;;  %v8731_v58 = vsel %vm427_vm1, %v19586_v26, %v19377_v14  ;;  %13603 = vmatmul.mubr.bf16.vlgmr.msra.gmra.mrb[0].mxu1 %v17633_v32  ;;  %13632 = vmatpush1.bf16.msra.mxu0 %v14691_v34  ;;  %v19372_v36 = vrot.slane %v18261_v35, 4  ;;  %v19371_v1 = vrot.slane %v18263_v62, 4  ;;  %s19601_s14 = smov 60  }
 0x4c0   : > { %v14709_v63 = vld [vmem:[%s14967_s22 + $0xc] ss:$0 sps:$4 sm:$0x33]   ;;  %v8634_v51 = vsel %vm4781_vm11, %v17608_v45, %v8633_v7  ;;  %v8732_v60 = vsel %vm19587_vm0, %v17639_v38, %v8731_v58  ;;  %13657 = vmatpush1.bf16.msra.mxu1 %v14687_v9  ;;  %v10096_v32 = vrot.slane %v10089_v56, %v14962_v5  ;;  %v18269_v45 = vrot.slane %v14155_v4, %v14962_v5  ;;  %v14694_v34 = vld [vmem:[#allocation2 + $0x60] ss:$36 sps:$4 sm:$0xff]  }
 0x4c1   : > { %8645 = vst [vmem:[#allocation2 + $0x304] sm:$0x11] %v8634_v51  ;;  %8743 = vst [vmem:[#allocation2 + $0x304] sm:$0x22] %v8732_v60  ;;  %13658 = vmatprep.subr.bf16.mxu1 %v14696_v16  ;;  %v18274_v38 = vld [vmem:[%s19104_s1 + $0x4] ss:$8 sps:$4 sm:$0xff]   ;;  %10005 = vrot.lane.b32.xlu1 %v9996_v21, %s19588_s2  ;;  %v10285_v9 = vcombine.low %v14155_v4, %v14155_v4  ;;  %v10383_v56 = vrot.slane %v14705_v24, %v14962_v5  ;;  %v18297_v24 = vpop.permute.xlu0 %9014 }
 0x4c2   : > { %14321 = vmatprep.mubr.msk.bf16.mxu1 %vm13495_vm14, %v18274_v38  ;;  %v10481_v7 = vrot.slane %v14709_v63, %v14962_v5  ;;  %v19589_v26 = vrot.slane %v17641_v41, 4  ;;  %v19590_v16 = vrot.slane %v17667_v25, 4  ;;  %v14700_v15 = vld [vmem:[#allocation2 + $0xac] ss:$36 sps:$4 sm:$0xff]   ;;  %v18299_v63 = vpop.permute.xlu1 %9113  ;;  %v19373_v60 = vrot.slane %v18297_v24, 4  ;;  %10105 = vrot.lane.b32.xlu0 %v10096_v32, %s19479_s30 }
 0x4c3   : > { %v19594_v32 = vrot.slane %v17695_v49, 4  ;;  %vm19595_vm10 = vcmask 433152   ;;  %vm19599_vm0 = vcmask 359424  }
 0x4c4   : > { %v8830_v58 = vsel %vm427_vm1, %v19589_v26, %v19372_v36  ;;  %v8930_v51 = vsel %vm427_vm1, %v19590_v16, %v19371_v1  ;;  %13659 = vmatpush1.bf16.msra.mxu1 %v14694_v34  ;;  %v19376_v26 = vrot.slane %v18299_v63, 4  ;;  %v14698_v16 = vld [vmem:[#allocation2 + $0xa8] ss:$36 sps:$4 sm:$0xff]   ;;  %v14704_v1 = vld [vmem:[#allocation2 + $0xf4] ss:$36 sps:$4 sm:$0xff]  }
 0x4c5   : > { %v8831_v4 = vsel %vm19591_vm5, %v17641_v41, %v8830_v58  ;;  %v8931_v21 = vsel %vm19592_vm12, %v17667_v25, %v8930_v51  ;;  %13660 = vmatprep.subr.bf16.mxu1 %v14700_v15  ;;  %10203 = vrot.lane.b32.xlu1 %v18269_v45, %s19454_s15  ;;  %v18307_v41 = vrot.slane %v10285_v9, %v14962_v5  ;;  %v14716_v34 = vld [vmem:[%s14967_s22 + $0xc] ss:$0 sps:$4 sm:$0x33]   ;;  %s19596_s15 = smov 63   ;;  %vm19600_vm5 = vcmask 351232  }
 0x4c6   : > { %8842 = vst [vmem:[#allocation2 + $0x304] sm:$0x44] %v8831_v4  ;;  %8942 = vst [vmem:[#allocation2 + $0x304] sm:$0x88] %v8931_v21  ;;  %v10390_v25 = vrot.slane %v10383_v56, %v14962_v5  ;;  %v10482_v58 = vcombine.low %v10481_v7, %v10481_v7  ;;  %v19593_v4 = vrot.slane %v17669_v55, 4  ;;  %v9127_v15 = vsel %vm427_vm1, %v19594_v32, %v19376_v26  ;;  %v18326_v7 = vpop.permute.xlu0 %9212  ;;  %v18328_v36 = vpop.permute.xlu1 %9311 }
 0x4c7   : > { %v14720_v51 = vld [vmem:[%s14967_s22 + $0xc] ss:$0 sps:$4 sm:$0x33]   ;;  %v9128_v56 = vsel %vm9123_vm15, %v17695_v49, %v9127_v15  ;;  %v14702_v32 = vld [vmem:[#allocation2 + $0xf0] ss:$36 sps:$4 sm:$0xff]   ;;  %10301 = vrot.lane.b32.xlu0 %v18307_v41, %s19596_s15  ;;  %v10775_v49 = vrot.slane %v14716_v34, %v14962_v5  ;;  %vm19604_vm12 = vcmask 343040  }
 0x4c8   : > { %v9028_v21 = vsel %vm427_vm1, %v19593_v4, %v19373_v60  ;;  %13661 = vmatpush1.bf16.msra.mxu1 %v14698_v16  ;;  %9139 = vst [vmem:[#allocation2 + $0x328] sm:$0x22] %v9128_v56  ;;  %v19374_v4 = vrot.slane %v18326_v7, 4  ;;  %v19375_v60 = vrot.slane %v18328_v36, 4  ;;  %v19597_v16 = vrot.slane %v17697_v40, 4 }
 0x4c9   : > { %v9029_v9 = vsel %vm19595_vm10, %v17669_v55, %v9028_v21  ;;  %13662 = vmatprep.subr.bf16.mxu1 %v14704_v1  ;;  %10399 = vrot.lane.b32.xlu1 %v10390_v25, %s19488_s6  ;;  %v10489_v55 = vrot.slane %v10482_v58, %v14962_v5  ;;  %v10874_v21 = vrot.slane %v14720_v51, %v14962_v5  ;;  %v19598_v1 = vrot.slane %v17719_v52, 4  ;;  %v14708_v56 = vld [vmem:[#allocation2 + $0x13c] ss:$36 sps:$4 sm:$0xff]  }
 0x4ca   : > { %9040 = vst [vmem:[#allocation2 + $0x328] sm:$0x11] %v9029_v9  ;;  %v9225_v15 = vsel %vm427_vm1, %v19597_v16, %v19374_v4  ;;  %v18352_v34 = vpop.permute.xlu0 %9409  ;;  %v18354_v51 = vpop.permute.xlu1 %9508  ;;  %v14706_v26 = vld [vmem:[#allocation2 + $0x138] ss:$36 sps:$4 sm:$0xff]   ;;  %vm19605_vm10 = vcmask 334848  }
 0x4cb   : > { %v9325_v9 = vsel %vm427_vm1, %v19598_v1, %v19375_v60  ;;  %v9226_v25 = vsel %vm19599_vm0, %v17697_v40, %v9225_v15  ;;  %v9416_v1 = vrot.slane %v18352_v34, 4  ;;  %v19385_v60 = vrot.slane %v18354_v51, 4  ;;  %10498 = vrot.lane.b32.xlu0 %v10489_v55, %s19424_s9  ;;  %v14724_v15 = vld [vmem:[%s14967_s22 + $0xc] ss:$0 sps:$4 sm:$0x33]  }
 0x4cc   : > { %v9326_v58 = vsel %vm19600_vm5, %v17719_v52, %v9325_v9  ;;  %13663 = vmatpush1.bf16.msra.mxu1 %v14702_v32  ;;  %9237 = vst [vmem:[#allocation2 + $0x328] sm:$0x44] %v9226_v25  ;;  %v10782_v40 = vrot.slane %v10775_v49, %v14962_v5  ;;  %v10875_v52 = vcombine.low %v10874_v21, %v10874_v21  ;;  %v14728_v32 = vld [vmem:[%s14967_s22 + $0xc] ss:$0 sps:$4 sm:$0x33]   ;;  %v19602_v9 = vrot.slane %v17721_v42, 4 }
 0x4cd   : > { %v14710_v16 = vld [vmem:[#allocation2 + $0x2e0] ss:$36 sps:$4 sm:$0xff]   ;;  %9337 = vst [vmem:[#allocation2 + $0x328] sm:$0x88] %v9326_v58  ;;  %13664 = vmatprep.subr.bf16.mxu1 %v14708_v56  ;;  %10595 = vrot.lane.b32.xlu1 %v18269_v45, %s19601_s14  ;;  %v19603_v56 = vrot.slane %v17743_v31, 4  ;;  %vm19608_vm0 = vcmask 261120  }
 0x4ce   : > { %v14712_v4 = vld [vmem:[#allocation2 + $0x2e4] ss:$36 sps:$4 sm:$0xff]   ;;  %v9423_v25 = vsel %vm427_vm1, %v19602_v9, %v9416_v1  ;;  %v18378_v14 = vpop.permute.xlu0 %9607  ;;  %v18380_v19 = vpop.permute.xlu1 %9707  ;;  %vm19611_vm5 = vcmask 252928  }
 0x4cf   : > { %v9522_v55 = vsel %vm427_vm1, %v19603_v56, %v19385_v60  ;;  %13633 = vmatprep.subr.bf16.mxu0 %v14712_v4  ;;  %v14715_v58 = vld [vmem:[#allocation2 + $0x184] ss:$36 sps:$4 sm:$0xff]   ;;  %v9424_v49 = vsel %vm19604_vm12, %v17721_v42, %v9423_v25  ;;  %v19380_v9 = vrot.slane %v18378_v14, 4  ;;  %v19379_v56 = vrot.slane %v18380_v19, 4  ;;  %10693 = vrot.lane.b32.xlu0 %v18307_v41, %s19461_s3 }
 0x4d0   : > { %v9523_v21 = vsel %vm19605_vm10, %v17743_v31, %v9522_v55  ;;  %13634 = vmatpush1.bf16.msra.mxu0 %v14710_v16  ;;  %13665 = vmatpush1.bf16.msra.mxu1 %v14706_v26  ;;  %9435 = vst [vmem:[#allocation2 + $0x34c] sm:$0x11] %v9424_v49  ;;  %v14713_v4 = vld [vmem:[#allocation2 + $0x180] ss:$36 sps:$4 sm:$0xff]   ;;  %v10882_v42 = vrot.slane %v10875_v52, %v14962_v5  ;;  %v19606_v26 = vrot.slane %v17745_v20, 4  ;;  %v19607_v55 = vrot.slane %v17767_v27, 4 }
 0x4d1   : > { %9534 = vst [vmem:[#allocation2 + $0x34c] sm:$0x22] %v9523_v21  ;;  %13666 = vmatprep.subr.bf16.mxu1 %v14715_v58  ;;  %10791 = vrot.lane.b32.xlu1 %v10782_v40, %s19426_s29  ;;  %v11170_v31 = vrot.slane %v14724_v15, %v14962_v5  ;;  %v11268_v16 = vrot.slane %v14728_v32, %v14962_v5  ;;  %v14719_v49 = vld [vmem:[#allocation2 + $0x1cc] ss:$36 sps:$4 sm:$0xff]   ;;  %vm19612_vm12 = vcmask 244736   ;;  %vm19619_vm10 = vcmask 498688  }
 0x4d2   : > { %v9621_v25 = vsel %vm427_vm1, %v19606_v26, %v19380_v9  ;;  %v9721_v58 = vsel %vm427_vm1, %v19607_v55, %v19379_v56  ;;  %v18404_v15 = vpop.permute.xlu0 %9805  ;;  %v18406_v32 = vpop.permute.xlu1 %9904  ;;  %v14717_v55 = vld [vmem:[#allocation2 + $0x1c8] ss:$36 sps:$4 sm:$0xff]  }
 0x4d3   : > { %v9622_v40 = vsel %vm9617_vm2, %v17745_v20, %v9621_v25  ;;  %v9722_v52 = vsel %vm19608_vm0, %v17767_v27, %v9721_v58  ;;  %v19381_v21 = vrot.slane %v18404_v15, 4  ;;  %v19384_v26 = vrot.slane %v18406_v32, 4  ;;  %10891 = vrot.lane.b32.xlu0 %v10882_v42, %s19496_s28  ;;  %v14732_v25 = vld [vmem:[%s14967_s22 + $0xc] ss:$0 sps:$4 sm:$0x33]  }
 0x4d4   : > { %13667 = vmatpush1.bf16.msra.mxu1 %v14713_v4  ;;  %9633 = vst [vmem:[#allocation2 + $0x34c] sm:$0x44] %v9622_v40  ;;  %9733 = vst [vmem:[#allocation2 + $0x34c] sm:$0x88] %v9722_v52  ;;  %v11177_v20 = vrot.slane %v11170_v31, %v14962_v5  ;;  %v11269_v27 = vcombine.low %v11268_v16, %v11268_v16  ;;  %v19609_v4 = vrot.slane %v17769_v3, 4  ;;  %vm19622_vm0 = vcmask 490496  }
 0x4d5   : > { %13668 = vmatprep.subr.bf16.mxu1 %v14719_v49  ;;  %10989 = vrot.lane.b32.xlu1 %v18269_v45, %s19427_s7  ;;  %v14733_v58 = vld [vmem:[%s14967_s22 + $0xc] ss:$0 sps:$4 sm:$0x33]   ;;  %v19610_v49 = vrot.slane %v17791_v0, 4  ;;  %v14723_v52 = vld [vmem:[#allocation2 + $0x214] ss:$36 sps:$4 sm:$0xff]  }
 0x4d6   : > { %v9819_v40 = vsel %vm427_vm1, %v19609_v4, %v19381_v21  ;;  %v18430_v16 = vpop.permute.xlu0 %10003  ;;  %v18432_v9 = vpop.permute.xlu1 %10103 }
 0x4d7   : > { %v9918_v42 = vsel %vm427_vm1, %v19610_v49, %v19384_v26  ;;  %v9820_v56 = vsel %vm19611_vm5, %v17769_v3, %v9819_v40  ;;  %v19382_v4 = vrot.slane %v18430_v16, 4  ;;  %v19383_v21 = vrot.slane %v18432_v9, 4  ;;  %v14721_v49 = vld [vmem:[#allocation2 + $0x210] ss:$36 sps:$4 sm:$0xff]   ;;  %11088 = vrot.lane.b32.xlu0 %v18307_v41, %s19428_s8  ;;  %v14725_v26 = vld [vmem:[#allocation2 + $0x258] ss:$36 sps:$4 sm:$0xff]  }
 0x4d8   : > { %v9919_v31 = vsel %vm19612_vm12, %v17791_v0, %v9918_v42  ;;  %13669 = vmatpush1.bf16.msra.mxu1 %v14717_v55  ;;  %9831 = vst [vmem:[#allocation2 + $0x370] sm:$0x11] %v9820_v56  ;;  %v11276_v3 = vrot.slane %v11269_v27, %v14962_v5  ;;  %v11565_v0 = vrot.slane %v14732_v25, %v14962_v5  ;;  %v19613_v56 = vrot.slane %v17793_v2, 4 }
 0x4d9   : > { %9930 = vst [vmem:[#allocation2 + $0x370] sm:$0x22] %v9919_v31  ;;  %13670 = vmatprep.subr.bf16.mxu1 %v14723_v52  ;;  %11186 = vrot.lane.b32.xlu1 %v11177_v20, %s19470_s13  ;;  %v11664_v40 = vrot.slane %v14733_v58, %v14962_v5  ;;  %v19614_v42 = vrot.slane %v17815_v43, 4  ;;  %v14727_v31 = vld [vmem:[#allocation2 + $0x25c] ss:$36 sps:$4 sm:$0xff]   ;;  %vm19625_vm5 = vcmask 416768  }
 0x4da   : > { %v10017_v55 = vsel %vm427_vm1, %v19613_v56, %v19382_v4  ;;  %v18456_v25 = vpop.permute.xlu0 %10201  ;;  %v18458_v58 = vpop.permute.xlu1 %10299  ;;  %vm19628_vm12 = vcmask 400384  }
 0x4db   : > { %v10117_v52 = vsel %vm427_vm1, %v19614_v42, %v19383_v21  ;;  %v10018_v20 = vsel %vm10013_vm7, %v17793_v2, %v10017_v55  ;;  %v14729_v56 = vld [vmem:[#allocation2 + $0x328] ss:$36 sps:$4 sm:$0xff]   ;;  %v19386_v42 = vrot.slane %v18456_v25, 4  ;;  %v10306_v21 = vrot.slane %v18458_v58, 4  ;;  %11285 = vrot.lane.b32.xlu0 %v11276_v3, %s19429_s5  ;;  %s19721_s5 = sld [smem:[#allocation19_spill]] }
 0x4dc   : > { %v10118_v27 = vsel %vm10113_vm6, %v17815_v43, %v10117_v52  ;;  %13671 = vmatpush1.bf16.msra.mxu1 %v14721_v49  ;;  %v14731_v4 = vld [vmem:[#allocation2 + $0x32c] ss:$36 sps:$4 sm:$0xff]   ;;  %10029 = vst [vmem:[#allocation2 + $0x370] sm:$0x44] %v10018_v20  ;;  %v11572_v2 = vrot.slane %v11565_v0, %v14962_v5  ;;  %v11665_v43 = vcombine.low %v11664_v40, %v11664_v40  ;;  %v19615_v52 = vrot.slane %v17817_v22, 4 }
 0x4dd   : > { %10129 = vst [vmem:[#allocation2 + $0x370] sm:$0x88] %v10118_v27  ;;  %13672 = vmatprep.subr.bf16.mxu1 %v14727_v31  ;;  %11383 = vrot.lane.b32.xlu1 %v18269_v45, %s19430_s27  ;;  %v14734_v55 = vld [vmem:[%s14967_s22 + $0xc] ss:$0 sps:$4 sm:$0x33]   ;;  %v19616_v31 = vrot.slane %v17839_v23, 4 }
 0x4de   : > { %v14735_v49 = vld [vmem:[%s14967_s22 + $0xc] ss:$0 sps:$4 sm:$0x33]   ;;  %v10214_v20 = vsel %vm427_vm1, %v19615_v52, %v19386_v42  ;;  %13635 = vmatprep.subr.bf16.mxu0 %v14731_v4  ;;  %v18482_v40 = vpop.permute.xlu0 %10397  ;;  %v18484_v60 = vpop.permute.xlu1 %10496 }
 0x4df   : > { %v10312_v3 = vsel %vm427_vm1, %v19616_v31, %v10306_v21  ;;  %v10215_v27 = vsel %vm4781_vm11, %v17817_v22, %v10214_v20  ;;  %13636 = vmatpush1.bf16.msra.mxu0 %v14729_v56  ;;  %v10404_v52 = vrot.slane %v18482_v40, 4  ;;  %v19389_v42 = vrot.slane %v18484_v60, 4  ;;  %11482 = vrot.lane.b32.xlu0 %v18307_v41, %s19431_s10 }
 0x4e0   : > { %v10313_v0 = vsel %vm4880_vm4, %v17839_v23, %v10312_v3  ;;  %13673 = vmatpush1.bf16.msra.mxu1 %v14725_v26  ;;  %10226 = vst [vmem:[#allocation2 + $0x394] sm:$0x11] %v10215_v27  ;;  %v11672_v22 = vrot.slane %v11665_v43, %v14962_v5  ;;  %v11960_v23 = vrot.slane %v14734_v55, %v14962_v5  ;;  %v19617_v26 = vrot.slane %v17841_v13, 4 }
 0x4e1   : > { %10324 = vst [vmem:[#allocation2 + $0x394] sm:$0x22] %v10313_v0  ;;  %11581 = vrot.lane.b32.xlu1 %v11572_v2, %s19432_s23  ;;  %v12059_v4 = vrot.slane %v14735_v49, %v14962_v5  ;;  %v19618_v20 = vrot.slane %v17863_v44, 4  ;;  %s19782_s23 = sld [smem:[#allocation20_spill]] }
 0x4e2   : > { %v10410_v56 = vsel %vm427_vm1, %v19617_v26, %v10404_v52  ;;  %v18508_v49 = vpop.permute.xlu0 %10593  ;;  %v18510_v31 = vpop.permute.xlu1 %10691  ;;  %v14739_v26 = vld [vmem:[%s14967_s22 + $0xc] ss:$0 sps:$4 sm:$0x33]  }
 0x4e3   : > { %v10509_v2 = vsel %vm427_vm1, %v19618_v20, %v19389_v42  ;;  %v10411_v43 = vsel %vm4980_vm9, %v17841_v13, %v10410_v56  ;;  %v19387_v3 = vrot.slane %v18508_v49, 4  ;;  %v19388_v27 = vrot.slane %v18510_v31, 4  ;;  %11681 = vrot.lane.b32.xlu0 %v11672_v22, %s19479_s30 }
 0x4e4   : > { %v10510_v55 = vsel %vm19619_vm10, %v17863_v44, %v10509_v2  ;;  %10422 = vst [vmem:[#allocation2 + $0x394] sm:$0x44] %v10411_v43  ;;  %v11967_v13 = vrot.slane %v11960_v23, %v14962_v5  ;;  %v12060_v0 = vcombine.low %v12059_v4, %v12059_v4  ;;  %v14740_v44 = vld [vmem:[%s14967_s22 + $0xc] ss:$0 sps:$4 sm:$0x33]   ;;  %v19620_v56 = vrot.slane %v17865_v10, 4 }
 0x4e5   : > { %10521 = vst [vmem:[#allocation2 + $0x394] sm:$0x88] %v10510_v55  ;;  %11778 = vrot.lane.b32.xlu1 %v18269_v45, %s19433_s21  ;;  %v19621_v2 = vrot.slane %v17887_v29, 4  ;;  %vm19629_vm10 = vcmask 392192  }
 0x4e6   : > { %v10606_v20 = vsel %vm427_vm1, %v19620_v56, %v19387_v3  ;;  %v18534_v4 = vpop.permute.xlu0 %10789  ;;  %v18536_v55 = vpop.permute.xlu1 %10889 }
 0x4e7   : > { %v10704_v22 = vsel %vm427_vm1, %v19621_v2, %v19388_v27  ;;  %v10607_v43 = vsel %vm19622_vm0, %v17865_v10, %v10606_v20  ;;  %v19390_v56 = vrot.slane %v18534_v4, 4  ;;  %v10896_v3 = vrot.slane %v18536_v55, 4  ;;  %11877 = vrot.lane.b32.xlu0 %v18307_v41, %s19434_s20 }
 0x4e8   : > { %v10705_v23 = vsel %vm9123_vm15, %v17887_v29, %v10704_v22  ;;  %10618 = vst [vmem:[#allocation2 + $0x3b8] sm:$0x11] %v10607_v43  ;;  %v12067_v10 = vrot.slane %v12060_v0, %v14962_v5  ;;  %v12356_v20 = vrot.slane %v14739_v26, %v14962_v5  ;;  %v12455_v29 = vrot.slane %v14740_v44, %v14962_v5 }
 0x4e9   : > { %10716 = vst [vmem:[#allocation2 + $0x3b8] sm:$0x22] %v10705_v23  ;;  %11976 = vrot.lane.b32.xlu1 %v11967_v13, %s19435_s12  ;;  %v19623_v2 = vrot.slane %v17889_v11, 4  ;;  %v19624_v43 = vrot.slane %v17911_v33, 4  ;;  %vm19632_vm0 = vcmask 318464  }
 0x4ea   : > { %v18560_v26 = vpop.permute.xlu0 %10987  ;;  %v18562_v44 = vpop.permute.xlu1 %11086 }
 0x4eb   : > { %v10803_v22 = vsel %vm427_vm1, %v19623_v2, %v19390_v56  ;;  %v10903_v23 = vsel %vm427_vm1, %v19624_v43, %v10896_v3  ;;  %v19391_v2 = vrot.slane %v18560_v26, 4  ;;  %v19406_v56 = vrot.slane %v18562_v44, 4  ;;  %12076 = vrot.lane.b32.xlu0 %v12067_v10, %s19436_s19 }
 0x4ec   : > { %v10804_v13 = vsel %vm19625_vm5, %v17889_v11, %v10803_v22  ;;  %v10904_v0 = vsel %vm10899_vm13, %v17911_v33, %v10903_v23  ;;  %v14736_v27 = vld [vmem:[#allocation2 + $0x370] ss:$36 sps:$4 sm:$0xff]   ;;  %v12363_v11 = vrot.slane %v12356_v20, %v14962_v5  ;;  %v12456_v33 = vcombine.low %v12455_v29, %v12455_v29 }
 0x4ed   : > { %v14738_v42 = vld [vmem:[#allocation2 + $0x374] ss:$36 sps:$4 sm:$0xff]   ;;  %10815 = vst [vmem:[#allocation2 + $0x3b8] sm:$0x44] %v10804_v13  ;;  %10915 = vst [vmem:[#allocation2 + $0x3b8] sm:$0x88] %v10904_v0  ;;  %12174 = vrot.lane.b32.xlu1 %v18269_v45, %s19437_s25 }
 0x4ee   : > { %v19626_v22 = vrot.slane %v17913_v57, 4  ;;  %v19627_v23 = vrot.slane %v17937_v37, 4  ;;  %13637 = vmatprep.subr.bf16.mxu0 %v14738_v42  ;;  %v18584_v29 = vpop.permute.xlu0 %11184  ;;  %v18586_v0 = vpop.permute.xlu1 %11283  ;;  %vm19635_vm5 = vcmask 310272   ;;  %s19710_s25 = sld [smem:[#allocation18_spill]] }
 0x4ef   : > { %13638 = vmatpush1.bf16.msra.mxu0 %v14736_v27  ;;  %12273 = vrot.lane.b32.xlu0 %v18307_v41, %s19439_s11  ;;  %v19631_v27 = vrot.slane %v17963_v46, 4 }
 0x4f0   : > { %v11001_v43 = vsel %vm427_vm1, %v19626_v22, %v19391_v2  ;;  %v11099_v13 = vsel %vm427_vm1, %v19627_v23, %v19406_v56  ;;  %v19403_v22 = vrot.slane %v18584_v29, 4  ;;  %v19402_v2 = vrot.slane %v18586_v0, 4 }
 0x4f1   : > { %v11002_v10 = vsel %vm19628_vm12, %v17913_v57, %v11001_v43  ;;  %v11100_v20 = vsel %vm19629_vm10, %v17937_v37, %v11099_v13  ;;  %12372 = vrot.lane.b32.xlu1 %v12363_v11, %s19440_s0  ;;  %v12463_v57 = vrot.slane %v12456_v33, %v14962_v5  ;;  %v19630_v37 = vrot.slane %v17939_v50, 4 }
 0x4f2   : > { %11013 = vst [vmem:[#allocation2 + $0x3dc] sm:$0x11] %v11002_v10  ;;  %11111 = vst [vmem:[#allocation2 + $0x3dc] sm:$0x22] %v11100_v20  ;;  %v11297_v43 = vsel %vm427_vm1, %v19631_v27, %v19402_v2  ;;  %v18608_v11 = vpop.permute.xlu0 %11381  ;;  %v18610_v5 = vpop.permute.xlu1 %11480  ;;  %v19634_v10 = vrot.slane %v17991_v61, 4  ;;  %vm19636_vm12 = vcmask 302080  }
 0x4f3   : > { %v11197_v42 = vsel %vm427_vm1, %v19630_v37, %v19403_v22  ;;  %v11298_v41 = vsel %vm19632_vm0, %v17963_v46, %v11297_v43  ;;  %v19401_v33 = vrot.slane %v18608_v11, 4  ;;  %v19399_v13 = vrot.slane %v18610_v5, 4  ;;  %12472 = vrot.lane.b32.xlu0 %v12463_v57, %s19442_s18 }
 0x4f4   : > { %v11198_v23 = vsel %vm9617_vm2, %v17939_v50, %v11197_v42  ;;  %11309 = vst [vmem:[#allocation2 + $0x3dc] sm:$0x88] %v11298_v41  ;;  %v19633_v50 = vrot.slane %v17965_v47, 4  ;;  %vm19639_vm10 = vcmask 293888   ;;  %vm19642_vm0 = vcmask 220160  }
 0x4f5   : > { %11209 = vst [vmem:[#allocation2 + $0x3dc] sm:$0x44] %v11198_v23  ;;  %12570 = vrot.lane.b32.xlu1 %v18269_v45, %s19443_s16  ;;  %v11494_v20 = vsel %vm427_vm1, %v19634_v10, %v19399_v13  ;;  %v19637_v23 = vrot.slane %v17993_v8, 4  ;;  %v19654_v13 = vld [vmem:[#allocation10_spill] sm:$0xff]  ;;  %s19709_s16 = sld [smem:[#allocation6_spill]] }
 0x4f6   : > { %v11395_v46 = vsel %vm427_vm1, %v19633_v50, %v19401_v33  ;;  %v11495_v57 = vsel %vm19636_vm12, %v17991_v61, %v11494_v20  ;;  %v18631_v42 = vpop.permute.xlu0 %11579  ;;  %v18633_v45 = vpop.permute.xlu1 %11679  ;;  %vm19646_vm12 = vcmask 203776  }
 0x4f7   : > { %v11396_v37 = vsel %vm19635_vm5, %v17965_v47, %v11395_v46  ;;  %11506 = vst [vmem:[#allocation2 + $0x400] sm:$0x22] %v11495_v57  ;;  %v19392_v27 = vrot.slane %v18631_v42, 4  ;;  %v19397_v43 = vrot.slane %v18633_v45, 4  ;;  %v19638_v47 = vrot.slane %v18020_v17, 4 }
 0x4f8   : > { %11407 = vst [vmem:[#allocation2 + $0x400] sm:$0x11] %v11396_v37  ;;  %vm19643_vm5 = vcmask 211968  }
 0x4f9   : > { %v11593_v41 = vsel %vm427_vm1, %v19637_v23, %v19392_v27  ;;  %v11692_v61 = vsel %vm427_vm1, %v19638_v47, %v19397_v43 }
 0x4fa   : > { %v11594_v50 = vsel %vm19639_vm10, %v17993_v8, %v11593_v41  ;;  %v11693_v46 = vsel %vm10113_vm6, %v18020_v17, %v11692_v61  ;;  %v18651_v10 = vpop.permute.xlu0 %11776  ;;  %v18653_v20 = vpop.permute.xlu1 %11875  ;;  %v19640_v8 = vrot.slane %v18022_v6, 4  ;;  %v19641_v17 = vrot.slane %v18049_v30, 4 }
 0x4fb   : > { %11605 = vst [vmem:[#allocation2 + $0x400] sm:$0x44] %v11594_v50  ;;  %11704 = vst [vmem:[#allocation2 + $0x400] sm:$0x88] %v11693_v46  ;;  %v19393_v23 = vrot.slane %v18651_v10, 4  ;;  %v19395_v27 = vrot.slane %v18653_v20, 4 }
 0x4fc   : > { %v14741_v37 = vld [vmem:[#allocation2 + $0x3b8] ss:$36 sps:$4 sm:$0xff]   ;;  %vm19647_vm10 = vcmask 195584   ;;  %s14371_s27 = smul.u32 72, %s19709_s16  ;;  %s14336_s13 = sshll.u32 %s19709_s16, 4 }
 0x4fd   : > { %v14743_v57 = vld [vmem:[#allocation2 + $0x3bc] ss:$36 sps:$4 sm:$0xff]   ;;  %v11790_v41 = vsel %vm427_vm1, %v19640_v8, %v19393_v23  ;;  %v11889_v47 = vsel %vm427_vm1, %v19641_v17, %v19395_v27  ;;  %v19648_v27 = vld [vmem:[#allocation8_spill] sm:$0xff]  ;;  %s273_s7 = scalar_lea.vmem %s19782_s23, %s14336_s13 }
 0x4fe   : > { %13639 = vmatprep.subr.bf16.mxu0 %v14743_v57  ;;  %v11791_v61 = vsel %vm19642_vm0, %v18022_v6, %v11790_v41  ;;  %v11890_v50 = vsel %vm19643_vm5, %v18049_v30, %v11889_v47  ;;  %v18671_v46 = vpop.permute.xlu0 %11974  ;;  %v18673_v57 = vpop.permute.xlu1 %12074  ;;  %v19645_v6 = vrot.slane %v18075_v28, 4  ;;  %vm19652_vm0 = vcmask 130048   ;;  %s18890_s19 = scalar_lea.vmem %s19721_s5, %s14371_s27 }
 0x4ff   : > { %13640 = vmatpush1.bf16.msra.mxu0 %v14741_v37  ;;  %11802 = vst [vmem:[#allocation2 + $0x424] sm:$0x11] %v11791_v61  ;;  %11901 = vst [vmem:[#allocation2 + $0x424] sm:$0x22] %v11890_v50  ;;  %v19394_v8 = vrot.slane %v18671_v46, 4  ;;  %v19396_v23 = vrot.slane %v18673_v57, 4 }
 0x500   : > { %v19644_v37 = vrot.slane %v18051_v59, 4  ;;  %vm19653_vm5 = vcmask 121856  }
 0x501   : > { %v12088_v30 = vsel %vm427_vm1, %v19645_v6, %v19396_v23  ;;  %v19649_v6 = vrot.slane %v19648_v27, 4 }
 0x502   : > { %v11988_v17 = vsel %vm427_vm1, %v19644_v37, %v19394_v8  ;;  %v12089_v47 = vsel %vm19647_vm10, %v18075_v28, %v12088_v30  ;;  %v18691_v61 = vpop.permute.xlu0 %12172  ;;  %v18693_v50 = vpop.permute.xlu1 %12271  ;;  %vm19661_vm10 = vcmask 97280  }
 0x503   : > { %v11989_v41 = vsel %vm19646_vm12, %v18051_v59, %v11988_v17  ;;  %12100 = vst [vmem:[#allocation2 + $0x424] sm:$0x88] %v12089_v47  ;;  %v19398_v37 = vrot.slane %v18691_v61, 4  ;;  %v19400_v8 = vrot.slane %v18693_v50, 4  ;;  %v19650_v59 = vld [vmem:[#allocation9_spill] sm:$0xff]  ;;  %vm19658_vm12 = vcmask 113664  }
 0x504   : > { %12000 = vst [vmem:[#allocation2 + $0x424] sm:$0x44] %v11989_v41  ;;  %v19651_v28 = vrot.slane %v19650_v59, 4 }
 0x505   : > { %v12186_v23 = vsel %vm427_vm1, %v19649_v6, %v19398_v37 }
 0x506   : > { %v12285_v17 = vsel %vm427_vm1, %v19651_v28, %v19400_v8  ;;  %v12187_v30 = vsel %vm19652_vm0, %v19648_v27, %v12186_v23  ;;  %v18711_v47 = vpop.permute.xlu0 %12370  ;;  %v18713_v43 = vpop.permute.xlu1 %12470  ;;  %v19655_v28 = vrot.slane %v19654_v13, 4  ;;  %v19656_v27 = vld [vmem:[#allocation11_spill] sm:$0xff]  ;;  %vm19663_vm0 = vcmask 621568  }
 0x507   : > { %v12286_v41 = vsel %vm19653_vm5, %v19650_v59, %v12285_v17  ;;  %12198 = vst [vmem:[#allocation2 + $0x448] sm:$0x11] %v12187_v30  ;;  %v19404_v6 = vrot.slane %v18711_v47, 4  ;;  %v19405_v37 = vrot.slane %v18713_v43, 4  ;;  %v19657_v23 = vrot.slane %v19656_v27, 4 }
 0x508   : > { %12297 = vst [vmem:[#allocation2 + $0x448] sm:$0x22] %v12286_v41  ;;  %vm19665_vm5 = vcmask 556032  }
 0x509   : > { %v12384_v8 = vsel %vm427_vm1, %v19655_v28, %v19404_v6  ;;  %v12484_v59 = vsel %vm427_vm1, %v19657_v23, %v19405_v37  ;;  %v19659_v23 = vrot.slane %v18129_v12, 4 }
 0x50a   : > { %v12385_v17 = vsel %vm19658_vm12, %v19654_v13, %v12384_v8  ;;  %v12485_v30 = vsel %vm12480_vm3, %v19656_v27, %v12484_v59  ;;  %v18731_v41 = vpop.permute.xlu0 %12568  ;;  %v8032_v33 = vpop.permute.xlu1 %8031  ;;  %v19660_v8 = vrot.slane %v18153_v54, 4  ;;  %vm19667_vm12 = vmmov %vm19665_vm5 }
 0x50b   : > { %v14744_v2 = vld [vmem:[#allocation2 + $0x400] ss:$36 sps:$4 sm:$0xff]   ;;  %12396 = vst [vmem:[#allocation2 + $0x448] sm:$0x44] %v12385_v17  ;;  %12496 = vst [vmem:[#allocation2 + $0x448] sm:$0x88] %v12485_v30 }
 0x50c   : > { %v14746_v22 = vld [vmem:[#allocation2 + $0x404] ss:$36 sps:$4 sm:$0xff]   ;;  %v19407_v28 = vrot.slane %v18731_v41, 4  ;;  %v8037_v6 = vrot.slane %v8032_v33, 4 }
 0x50d   : > { %13641 = vmatprep.subr.bf16.mxu0 %v14746_v22 }
 0x50e   : > { %v12582_v13 = vsel %vm427_vm1, %v19659_v23, %v19407_v28  ;;  %v8044_v27 = vsel %vm427_vm1, %v19660_v8, %v8037_v6  ;;  %v8046_v59 = vsel %vm2608_vm8, %v8032_v33, %v8037_v6  ;;  %13642 = vmatpush1.bf16.msra.mxu0 %v14744_v2  ;;  %v8131_v22 = vpop.permute.xlu0 %8130  ;;  %v8228_v37 = vpop.permute.xlu1 %8227  ;;  %v19662_v28 = vrot.slane %v18155_v39, 4 }
 0x50f   : > { %v12583_v17 = vsel %vm19661_vm10, %v18129_v12, %v12582_v13  ;;  %v8045_v30 = vsel %vm2608_vm8, %v18153_v54, %v8044_v27  ;;  %8056 = vst [vmem:[#allocation2 + $0x2cc] sm:$0x4] %v8046_v59  ;;  %v8136_v56 = vrot.slane %v8131_v22, 4  ;;  %v8233_v23 = vrot.slane %v8228_v37, 4  ;;  %vm19666_vm8 = vmmov %vm19663_vm0 }
 0x510   : > { %12594 = vst [vmem:[#allocation2 + $0x46c] sm:$0x11] %v12583_v17  ;;  %8055 = vst [vmem:[#allocation2 + $0x2c4] sm:$0x44] %v8045_v30  ;;  %v19664_v2 = vrot.slane %v18179_v18, 4  ;;  %v19668_v17 = vrot.slane %v18181_v53, 4 }
 0x511   : > { %v8143_v8 = vsel %vm427_vm1, %v19662_v28, %v8136_v56  ;;  %v8145_v33 = vsel %vm19663_vm0, %v8131_v22, %v8136_v56  ;;  %v8242_v6 = vsel %vm19665_vm5, %v8228_v37, %v8233_v23  ;;  %vm19669_vm10 = vcmask 547840   ;;  %v19670_v22 = vld [vmem:[#allocation12_spill] sm:$0xff] }
 0x512   : > { %v8240_v12 = vsel %vm427_vm1, %v19664_v2, %v8233_v23  ;;  %v8144_v54 = vsel %vm19666_vm8, %v18155_v39, %v8143_v8  ;;  %8155 = vst [vmem:[#allocation2 + $0x2cc] sm:$0x8] %v8145_v33  ;;  %8252 = vst [vmem:[#allocation2 + $0x2f0] sm:$0x1] %v8242_v6  ;;  %v8326_v27 = vpop.permute.xlu0 %8325  ;;  %v8425_v59 = vpop.permute.xlu1 %8424  ;;  %v19671_v23 = vrot.slane %v19670_v22, 4  ;;  %vm19672_vm0 = vcmask 539648  }
 0x513   : > { %v8241_v13 = vsel %vm19667_vm12, %v18179_v18, %v8240_v12  ;;  %8154 = vst [vmem:[#allocation2 + $0x2c4] sm:$0x88] %v8144_v54  ;;  %v8331_v28 = vrot.slane %v8326_v27, 4  ;;  %v8430_v56 = vrot.slane %v8425_v59, 4  ;;  %vm19673_vm5 = vmmov %vm19669_vm10  ;;  %vm19675_vm12 = vcmask 1044480  }
 0x514   : > { %8251 = vst [vmem:[#allocation2 + $0x2e8] sm:$0x11] %v8241_v13  ;;  %vm19674_vm8 = vmmov %vm19672_vm0 }
 0x515   : > { %v8339_v30 = vsel %vm427_vm1, %v19668_v17, %v8331_v28  ;;  %v8341_v37 = vsel %vm19669_vm10, %v8326_v27, %v8331_v28  ;;  %v8438_v39 = vsel %vm427_vm1, %v19671_v23, %v8430_v56  ;;  %v8440_v8 = vsel %vm19672_vm0, %v8425_v59, %v8430_v56  ;;  %v19676_v28 = vld [vmem:[#allocation13_spill] sm:$0xff]  ;;  %v19679_v17 = vld [vmem:[#allocation14_spill] sm:$0xff]  ;;  %v14750_v23 = vld [vmem:[#allocation2 + $0x260] ss:$36 sps:$4 sm:$0xff]  }
 0x516   : > { %v8340_v18 = vsel %vm19673_vm5, %v18181_v53, %v8339_v30  ;;  %8351 = vst [vmem:[#allocation2 + $0x2f0] sm:$0x2] %v8341_v37  ;;  %v8439_v33 = vsel %vm19674_vm8, %v19670_v22, %v8438_v39  ;;  %8450 = vst [vmem:[#allocation2 + $0x2f0] sm:$0x4] %v8440_v8  ;;  %v8525_v2 = vpop.permute.xlu0 %8524  ;;  %v8623_v12 = vpop.permute.xlu1 %8622  ;;  %v19677_v59 = vrot.slane %v19676_v28, 4  ;;  %vm19678_vm10 = vcmask 531456  }
 0x517   : > { %v14747_v6 = vld [vmem:[#allocation2 + $0x44c] ss:$36 sps:$4 sm:$0x1f]   ;;  %8350 = vst [vmem:[#allocation2 + $0x2e8] sm:$0x22] %v8340_v18  ;;  %v8530_v54 = vrot.slane %v8525_v2, 4  ;;  %vm19681_vm0 = vmmov %vm19678_vm10 }
 0x518   : > { %8449 = vst [vmem:[#allocation2 + $0x2e8] sm:$0x44] %v8439_v33  ;;  %v8628_v13 = vrot.slane %v8623_v12, 4  ;;  %v14749_v27 = vld [vmem:[#allocation2 + $0x448] ss:$36 sps:$4 sm:$0x1f]   ;;  %14318 = vmatprep.subr.msk.bf16.mxu0 %vm19675_vm12, %v14747_v6  ;;  %vm19682_vm5 = vmmov %vm19675_vm12 }
 0x519   : > { %v8538_v56 = vsel %vm427_vm1, %v19677_v59, %v8530_v54  ;;  %v8540_v53 = vsel %vm19678_vm10, %v8525_v2, %v8530_v54  ;;  %v19680_v30 = vrot.slane %v19679_v17, 4  ;;  %v13513_v6 = vsel %vm19682_vm5, %v14749_v27, 0 }
 0x51a   : > { %v8637_v22 = vsel %vm4781_vm11, %v8623_v12, %v8628_v13  ;;  %v8539_v39 = vsel %vm19681_vm0, %v19676_v28, %v8538_v56  ;;  %8550 = vst [vmem:[#allocation2 + $0x2f0] sm:$0x8] %v8540_v53  ;;  %v8721_v18 = vpop.permute.xlu0 %8720  ;;  %v8819_v33 = vpop.permute.xlu1 %8818  ;;  %v14751_v2 = vld [vmem:[#allocation2 + $0x2a0] ss:$36 sps:$4 sm:$0xff]   ;;  %13644 = vmatpush1.bf16.msra.mxu0 %v13513_v6  ;;  %v19683_v12 = vrot.slane %v18235_v48, 4  ;;  %vm19684_vm8 = vcmask 457728  }
 0x51b   : > { %v8635_v37 = vsel %vm427_vm1, %v19680_v30, %v8628_v13  ;;  %8647 = vst [vmem:[#allocation2 + $0x314] sm:$0x1] %v8637_v22  ;;  %v14753_v54 = vld [vmem:[#allocation2 + $0x2a4] ss:$36 sps:$4 sm:$0xff]   ;;  %8549 = vst [vmem:[#allocation2 + $0x2e8] sm:$0x88] %v8539_v39  ;;  %14347 = vmatprep.subr.bf16.mxu0 %v14750_v23 }
 0x51c   : > { %v8636_v8 = vsel %vm4781_vm11, %v19679_v17, %v8635_v37  ;;  %v8726_v59 = vrot.slane %v8721_v18, 4  ;;  %v8824_v30 = vrot.slane %v8819_v33, 4  ;;  %13674 = vmatprep.subr.bf16.mxu1 %v14753_v54  ;;  %v19685_v56 = vrot.slane %v18261_v35, 4  ;;  %v14754_v17 = vld [vmem:[#allocation2 + $0x20] ss:$36 sps:$4 sm:$0xff]   ;;  %vm19687_vm10 = vmmov %vm19684_vm8 }
 0x51d   : > { %8646 = vst [vmem:[#allocation2 + $0x30c] sm:$0x11] %v8636_v8  ;;  %vm19686_vm12 = vcmask 449536   ;;  %13675 = vmatpush1.bf16.msra.mxu1 %v14751_v2  ;;  %v18800_v23 = vld [vmem:[%s19104_s1] ss:$8 sps:$4 sm:$0xff]   ;;  %vm19690_vm5 = vcmask 441344  }
 0x51e   : > { %v8733_v13 = vsel %vm427_vm1, %v19683_v12, %v8726_v59  ;;  %v8735_v28 = vsel %vm19684_vm8, %v8721_v18, %v8726_v59  ;;  %v8832_v53 = vsel %vm427_vm1, %v19685_v56, %v8824_v30  ;;  %v8834_v27 = vsel %vm19686_vm12, %v8819_v33, %v8824_v30  ;;  %vm19688_vm0 = vmmov %vm19686_vm12  ;;  %13646 = vmatmul.mubr.bf16.vlgmr.msra.gmra.mrb[4].mxu0 %v18800_v23  ;;  %v8919_v39 = vpop.permute.xlu0 %8918  ;;  %v9017_v8 = vpop.permute.xlu1 %9016  ;;  %v14755_v18 = vld [vmem:[#allocation2 + $0x2a8] ss:$36 sps:$4 sm:$0xff]  }
 0x51f   : > { %v8734_v37 = vsel %vm19687_vm10, %v18235_v48, %v8733_v13  ;;  %8745 = vst [vmem:[#allocation2 + $0x314] sm:$0x2] %v8735_v28  ;;  %v8833_v22 = vsel %vm19688_vm0, %v18261_v35, %v8832_v53  ;;  %8844 = vst [vmem:[#allocation2 + $0x314] sm:$0x4] %v8834_v27  ;;  %v8924_v33 = vrot.slane %v8919_v39, 4  ;;  %v9022_v6 = vrot.slane %v9017_v8, 4  ;;  %14348 = vmatpush3.bf16.msra.mxu0 %v14754_v17 }
 0x520   : > { %8744 = vst [vmem:[#allocation2 + $0x30c] sm:$0x22] %v8734_v37  ;;  %8843 = vst [vmem:[#allocation2 + $0x30c] sm:$0x44] %v8833_v22  ;;  %14322 = vmatprep.mubr.msk.bf16.mxu0 %vm13495_vm14, %v18274_v38  ;;  %14349 = vmatprep.subr.bf16.mxu0 %v14755_v18  ;;  %v19689_v35 = vrot.slane %v18263_v62, 4  ;;  %v19691_v54 = vrot.slane %v18297_v24, 4 }
 0x521   : > { %v8934_v2 = vsel %vm19690_vm5, %v8919_v39, %v8924_v33  ;;  %vm19692_vm8 = vcmask 433152   ;;  %v14756_v12 = vld [vmem:[#allocation2 + $0x68] ss:$36 sps:$4 sm:$0xff]   ;;  %vm19693_vm12 = vmmov %vm19690_vm5  ;;  %v19695_v17 = vrot.slane %v18299_v63, 4  ;;  %vm19697_vm10 = vcmask 359424  }
 0x522   : > { %v8932_v48 = vsel %vm427_vm1, %v19689_v35, %v8924_v33  ;;  %v9030_v59 = vsel %vm427_vm1, %v19691_v54, %v9022_v6  ;;  %v9032_v30 = vsel %vm19692_vm8, %v9017_v8, %v9022_v6  ;;  %8944 = vst [vmem:[#allocation2 + $0x314] sm:$0x8] %v8934_v2  ;;  %vm19694_vm14 = vmmov %vm19692_vm8  ;;  %v9116_v28 = vpop.permute.xlu0 %9115  ;;  %v9215_v56 = vpop.permute.xlu1 %9214  ;;  %v19699_v2 = vrot.slane %v18328_v36, 4 }
 0x523   : > { %v8933_v13 = vsel %vm19693_vm12, %v18263_v62, %v8932_v48  ;;  %v9031_v38 = vsel %vm19694_vm14, %v18297_v24, %v9030_v59  ;;  %9042 = vst [vmem:[#allocation2 + $0x338] sm:$0x1] %v9032_v30  ;;  %v9121_v53 = vrot.slane %v9116_v28, 4  ;;  %v9220_v27 = vrot.slane %v9215_v56, 4  ;;  %14350 = vmatpush3.bf16.msra.mxu0 %v14756_v12  ;;  %vm19698_vm0 = vmmov %vm19697_vm10  ;;  %v14761_v12 = vld [vmem:[#allocation2 + $0xb0] ss:$36 sps:$4 sm:$0xff]  }
 0x524   : > { %8943 = vst [vmem:[#allocation2 + $0x30c] sm:$0x88] %v8933_v13  ;;  %9041 = vst [vmem:[#allocation2 + $0x330] sm:$0x11] %v9031_v38  ;;  %v19696_v62 = vrot.slane %v18326_v7, 4  ;;  %vm19700_vm5 = vcmask 351232  }
 0x525   : > { %v9129_v37 = vsel %vm427_vm1, %v19695_v17, %v9121_v53  ;;  %v9131_v22 = vsel %vm9123_vm15, %v9116_v28, %v9121_v53  ;;  %v9229_v24 = vsel %vm19697_vm10, %v9215_v56, %v9220_v27  ;;  %vm19701_vm8 = vcmask 343040   ;;  %vm19702_vm12 = vmmov %vm19700_vm5 }
 0x526   : > { %v9227_v39 = vsel %vm427_vm1, %v19696_v62, %v9220_v27  ;;  %v9130_v8 = vsel %vm9123_vm15, %v18299_v63, %v9129_v37  ;;  %9141 = vst [vmem:[#allocation2 + $0x338] sm:$0x2] %v9131_v22  ;;  %9239 = vst [vmem:[#allocation2 + $0x338] sm:$0x4] %v9229_v24  ;;  %v9314_v33 = vpop.permute.xlu0 %9313  ;;  %v9412_v6 = vpop.permute.xlu1 %9411  ;;  %v19704_v37 = vrot.slane %v18354_v51, 4  ;;  %vm19705_vm10 = vcmask 334848  }
 0x527   : > { %v9228_v18 = vsel %vm19698_vm0, %v18326_v7, %v9227_v39  ;;  %9140 = vst [vmem:[#allocation2 + $0x330] sm:$0x22] %v9130_v8  ;;  %v9319_v35 = vrot.slane %v9314_v33, 4  ;;  %v9417_v48 = vrot.slane %v9412_v6, 4  ;;  %vm19703_vm14 = vmmov %vm19701_vm8 }
 0x528   : > { %9238 = vst [vmem:[#allocation2 + $0x330] sm:$0x44] %v9228_v18  ;;  %vm19707_vm0 = vmmov %vm19705_vm10 }
 0x529   : > { %v9327_v54 = vsel %vm427_vm1, %v19699_v2, %v9319_v35  ;;  %v9329_v59 = vsel %vm19700_vm5, %v9314_v33, %v9319_v35  ;;  %v9425_v63 = vsel %vm427_vm1, %v9416_v1, %v9417_v48  ;;  %v9427_v30 = vsel %vm19701_vm8, %v9412_v6, %v9417_v48  ;;  %v14757_v7 = vld [vmem:[#allocation2 + $0x2f0] ss:$36 sps:$4 sm:$0xff]   ;;  %v19708_v6 = vld [vmem:[#allocation7_spill] sm:$0xff] }
 0x52a   : > { %v9328_v13 = vsel %vm19702_vm12, %v18328_v36, %v9327_v54  ;;  %9339 = vst [vmem:[#allocation2 + $0x338] sm:$0x8] %v9329_v59  ;;  %v9426_v38 = vsel %vm19703_vm14, %v18352_v34, %v9425_v63  ;;  %9437 = vst [vmem:[#allocation2 + $0x35c] sm:$0x1] %v9427_v30  ;;  %v9511_v28 = vpop.permute.xlu0 %9510  ;;  %v9610_v56 = vpop.permute.xlu1 %9609  ;;  %14351 = vmatprep.subr.bf16.mxu0 %v14757_v7  ;;  %v19706_v34 = vrot.slane %v18378_v14, 4  ;;  %v13746_v35 = vsub.s32 0, %v19708_v6 }
 0x52b   : > { %v14758_v53 = vld [vmem:[#allocation2 + $0x2e8] ss:$36 sps:$4 sm:$0xff]   ;;  %9338 = vst [vmem:[#allocation2 + $0x330] sm:$0x88] %v9328_v13  ;;  %9436 = vst [vmem:[#allocation2 + $0x354] sm:$0x11] %v9426_v38  ;;  %14352 = vmatpush3.bf16.msra.mxu0 %v14761_v12 }
 0x52c   : > { %v14760_v27 = vld [vmem:[#allocation2 + $0x2ec] ss:$36 sps:$4 sm:$0xff]   ;;  %v9516_v17 = vrot.slane %v9511_v28, 4  ;;  %v9615_v1 = vrot.slane %v9610_v56, 4  ;;  %v13750_v48 = vsub.s32 1, %v19708_v6  ;;  %v19711_v59 = vrot.slane %v18380_v19, 4 }
 0x52d   : > { %13676 = vmatprep.subr.bf16.mxu1 %v14760_v27  ;;  %vm19712_vm5 = vcmask 261120   ;;  %v19713_v30 = vrot.slane %v18404_v15, 4  ;;  %vm19714_vm8 = vcmask 252928  }
 0x52e   : > { %v9524_v36 = vsel %vm427_vm1, %v19704_v37, %v9516_v17  ;;  %v9526_v22 = vsel %vm19705_vm10, %v9511_v28, %v9516_v17  ;;  %v9623_v62 = vsel %vm427_vm1, %v19706_v34, %v9615_v1  ;;  %v9625_v39 = vsel %vm9617_vm2, %v9610_v56, %v9615_v1  ;;  %13677 = vmatpush1.bf16.msra.mxu1 %v14758_v53  ;;  %v9710_v18 = vpop.permute.xlu0 %9709  ;;  %v9808_v33 = vpop.permute.xlu1 %9807  ;;  %vm19715_vm12 = vmmov %vm19712_vm5 }
 0x52f   : > { %v9525_v24 = vsel %vm19707_vm0, %v18354_v51, %v9524_v36  ;;  %9536 = vst [vmem:[#allocation2 + $0x35c] sm:$0x2] %v9526_v22  ;;  %v9624_v8 = vsel %vm9617_vm2, %v18378_v14, %v9623_v62  ;;  %9635 = vst [vmem:[#allocation2 + $0x35c] sm:$0x4] %v9625_v39  ;;  %v9715_v2 = vrot.slane %v9710_v18, 4  ;;  %v9813_v54 = vrot.slane %v9808_v33, 4 }
 0x530   : > { %9535 = vst [vmem:[#allocation2 + $0x354] sm:$0x22] %v9525_v24  ;;  %9634 = vst [vmem:[#allocation2 + $0x354] sm:$0x44] %v9624_v8  ;;  %v18858_v51 = vld [vmem:[%s19710_s25] sm:$0xff]  ;;  %v19717_v36 = vrot.slane %v18406_v32, 4 }
 0x531   : > { %v9723_v14 = vsel %vm427_vm1, %v19711_v59, %v9715_v2  ;;  %v9725_v63 = vsel %vm19712_vm5, %v9710_v18, %v9715_v2  ;;  %v9821_v7 = vsel %vm427_vm1, %v19713_v30, %v9813_v54  ;;  %v9823_v12 = vsel %vm19714_vm8, %v9808_v33, %v9813_v54  ;;  %vm19716_vm14 = vmmov %vm19714_vm8 }
 0x532   : > { %v9724_v13 = vsel %vm19715_vm12, %v18380_v19, %v9723_v14  ;;  %9735 = vst [vmem:[#allocation2 + $0x35c] sm:$0x8] %v9725_v63  ;;  %v9822_v38 = vsel %vm19716_vm14, %v18404_v15, %v9821_v7  ;;  %9833 = vst [vmem:[#allocation2 + $0x380] sm:$0x1] %v9823_v12  ;;  %v9907_v28 = vpop.permute.xlu0 %9906  ;;  %v13747_v53 = vrot.slane %v18858_v51, %v13746_v35  ;;  %v13561_v37 = vpop.f32.mrb[0].mxu0  ;;  %vm19718_vm10 = vcmask 244736  }
 0x533   : > { %v10006_v56 = vpop.permute.xlu1 %10005  ;;  %v13751_v27 = vrot.slane %v18858_v51, %v13750_v48  ;;  %9734 = vst [vmem:[#allocation2 + $0x354] sm:$0x88] %v9724_v13  ;;  %9832 = vst [vmem:[#allocation2 + $0x378] sm:$0x11] %v9822_v38  ;;  %v9912_v17 = vrot.slane %v9907_v28, 4  ;;  %v19719_v15 = vrot.slane %v18430_v16, 4 }
 0x534   : > { %v10011_v1 = vrot.slane %v10006_v56, 4  ;;  %v13563_v39 = vpop.f32.mrb[1].mxu0  ;;  %vm19720_vm0 = vmmov %vm19718_vm10  ;;  %v13789_v35 = vmul.f32 %v13747_v53, %v13561_v37  ;;  %v19722_v12 = vrot.slane %v18432_v9, 4  ;;  %vm19732_vm5 = vcmask 416768  }
 0x535   : > { %v9920_v19 = vsel %vm427_vm1, %v19717_v36, %v9912_v17  ;;  %v9922_v22 = vsel %vm19718_vm10, %v9907_v28, %v9912_v17  ;;  %v13790_v48 = vmul.f32 %v13751_v27, %v13563_v39  ;;  %v13565_v59 = vpop.f32.mrb[2].mxu0  ;;  %v19723_v28 = vrot.slane %v18456_v25, 4  ;;  %v14766_v36 = vld [vmem:[#allocation2 + $0xf8] ss:$36 sps:$4 sm:$0xff]   ;;  %vm19733_vm8 = vmmov %vm19732_vm5 }
 0x536   : > { %v10019_v34 = vsel %vm427_vm1, %v19719_v15, %v10011_v1  ;;  %v10021_v62 = vsel %vm10013_vm7, %v10006_v56, %v10011_v1  ;;  %v9921_v24 = vsel %vm19720_vm0, %v18406_v32, %v9920_v19  ;;  %9932 = vst [vmem:[#allocation2 + $0x380] sm:$0x2] %v9922_v22  ;;  %v10106_v18 = vpop.permute.xlu0 %10105  ;;  %v14337_v32 = vpack.c.bf16 %v13563_v39, %v13561_v37  ;;  %v13567_v7 = vpop.f32.mrb[3].mxu0 }
 0x537   : > { %v10020_v8 = vsel %vm10013_vm7, %v18430_v16, %v10019_v34  ;;  %10031 = vst [vmem:[#allocation2 + $0x380] sm:$0x4] %v10021_v62  ;;  %v10204_v33 = vpop.permute.xlu1 %10203  ;;  %9931 = vst [vmem:[#allocation2 + $0x378] sm:$0x22] %v9921_v24  ;;  %v10111_v2 = vrot.slane %v10106_v18, 4  ;;  %v13827_v14 = vmul.f32 %v13789_v35, %v13561_v37  ;;  %v18892_v63 = vadd.f32 %v13790_v48, %v13789_v35 }
 0x538   : > { %10030 = vst [vmem:[#allocation2 + $0x378] sm:$0x44] %v10020_v8  ;;  %v10209_v54 = vrot.slane %v10204_v33, 4  ;;  %v13828_v16 = vmul.f32 %v13790_v48, %v13563_v39  ;;  %v13798_v30 = vmul.f32 %v13747_v53, %v13565_v59  ;;  %13929 = vst [vmem:[%s18890_s19] sm:$0xff] %v14337_v32  ;;  %v13799_v8 = vmul.f32 %v13751_v27, %v13567_v7 }
 0x539   : > { %v10119_v13 = vsel %vm427_vm1, %v19722_v12, %v10111_v2  ;;  %v10121_v38 = vsel %vm10113_vm6, %v10106_v18, %v10111_v2  ;;  %v14762_v1 = vld [vmem:[#allocation2 + $0x338] ss:$36 sps:$4 sm:$0xff]   ;;  %v14342_v18 = vpack.c.bf16 %v13567_v7, %v13565_v59  ;;  %v19724_v12 = vrot.slane %v18484_v60, 4 }
 0x53a   : > { %v10216_v56 = vsel %vm427_vm1, %v19723_v28, %v10209_v54  ;;  %v10218_v17 = vsel %vm4781_vm11, %v10204_v33, %v10209_v54  ;;  %v10120_v37 = vsel %vm10113_vm6, %v18432_v9, %v10119_v13  ;;  %10131 = vst [vmem:[#allocation2 + $0x380] sm:$0x8] %v10121_v38  ;;  %v10302_v19 = vpop.permute.xlu0 %10301  ;;  %v14763_v15 = vld [vmem:[#allocation2 + $0x330] ss:$36 sps:$4 sm:$0xff]   ;;  %v18907_v62 = vadd.f32 %v13828_v16, %v13827_v14 }
 0x53b   : > { %v10217_v53 = vsel %vm4781_vm11, %v18456_v25, %v10216_v56  ;;  %10228 = vst [vmem:[#allocation2 + $0x3a4] sm:$0x1] %v10218_v17  ;;  %v10400_v22 = vpop.permute.xlu1 %10399  ;;  %v14765_v34 = vld [vmem:[#allocation2 + $0x334] ss:$36 sps:$4 sm:$0xff]   ;;  %10130 = vst [vmem:[#allocation2 + $0x378] sm:$0x88] %v10120_v37  ;;  %14353 = vmatprep.subr.bf16.mxu0 %v14762_v1  ;;  %v13836_v9 = vmul.f32 %v13798_v30, %v13565_v59  ;;  %v18922_v32 = vadd.f32 %v13799_v8, %v13798_v30 }
 0x53c   : > { %10227 = vst [vmem:[#allocation2 + $0x39c] sm:$0x11] %v10217_v53  ;;  %v10307_v39 = vrot.slane %v10302_v19, 4  ;;  %v10405_v24 = vrot.slane %v10400_v22, 4  ;;  %13678 = vmatprep.subr.bf16.mxu1 %v14765_v34  ;;  %14354 = vmatpush3.bf16.msra.mxu0 %v14766_v36  ;;  %13934 = vst [vmem:[%s18890_s19 + $0x24] sm:$0xff] %v14342_v18  ;;  %v13837_v59 = vmul.f32 %v13799_v8, %v13567_v7  ;;  %vm19725_vm11 = vcmask 498688  }
 0x53d   : > { %13679 = vmatpush1.bf16.msra.mxu1 %v14763_v15  ;;  %v19730_v37 = vrot.slane %v18510_v31, 4  ;;  %vm19742_vm10 = vcmask 318464   ;;  %vm19744_vm0 = vcmask 310272  }
 0x53e   : > { %v10314_v25 = vsel %vm427_vm1, %v10306_v21, %v10307_v39  ;;  %v10316_v33 = vsel %vm4880_vm4, %v10302_v19, %v10307_v39  ;;  %v10412_v35 = vsel %vm427_vm1, %v10404_v52, %v10405_v24  ;;  %v10414_v48 = vsel %vm4980_vm9, %v10400_v22, %v10405_v24  ;;  %v10499_v54 = vpop.permute.xlu0 %10498 }
 0x53f   : > { %v10315_v27 = vsel %vm4880_vm4, %v18458_v58, %v10314_v25  ;;  %10326 = vst [vmem:[#allocation2 + $0x3a4] sm:$0x2] %v10316_v33  ;;  %v10413_v2 = vsel %vm4980_vm9, %v18482_v40, %v10412_v35  ;;  %10424 = vst [vmem:[#allocation2 + $0x3a4] sm:$0x4] %v10414_v48  ;;  %v10596_v21 = vpop.permute.xlu1 %10595  ;;  %v10504_v52 = vrot.slane %v10499_v54, 4  ;;  %v18924_v16 = vadd.f32 %v13837_v59, %v13836_v9 }
 0x540   : > { %10325 = vst [vmem:[#allocation2 + $0x39c] sm:$0x22] %v10315_v27  ;;  %10423 = vst [vmem:[#allocation2 + $0x39c] sm:$0x44] %v10413_v2  ;;  %v10601_v14 = vrot.slane %v10596_v21, 4  ;;  %v19726_v40 = vrot.slane %v18508_v49, 4 }
 0x541   : > { %v10511_v58 = vsel %vm427_vm1, %v19724_v12, %v10504_v52  ;;  %v10513_v13 = vsel %vm19725_vm11, %v10499_v54, %v10504_v52  ;;  %vm19727_vm4 = vcmask 490496   ;;  %vm19728_vm9 = vmmov %vm19725_vm11  ;;  %v19731_v22 = vrot.slane %v18534_v4, 4  ;;  %v14771_v48 = vld [vmem:[#allocation2 + $0x140] ss:$36 sps:$4 sm:$0xff]  }
 0x542   : > { %v10608_v38 = vsel %vm427_vm1, %v19726_v40, %v10601_v14  ;;  %v10610_v30 = vsel %vm19727_vm4, %v10596_v21, %v10601_v14  ;;  %v10512_v7 = vsel %vm19728_vm9, %v18484_v60, %v10511_v58  ;;  %10523 = vst [vmem:[#allocation2 + $0x3a4] sm:$0x8] %v10513_v13  ;;  %vm19729_vm7 = vmmov %vm19727_vm4  ;;  %v10694_v56 = vpop.permute.xlu0 %10693  ;;  %v19734_v33 = vrot.slane %v18560_v26, 4 }
 0x543   : > { %v10609_v28 = vsel %vm19729_vm7, %v18508_v49, %v10608_v38  ;;  %10620 = vst [vmem:[#allocation2 + $0x3c8] sm:$0x1] %v10610_v30  ;;  %v10792_v17 = vpop.permute.xlu1 %10791  ;;  %10522 = vst [vmem:[#allocation2 + $0x39c] sm:$0x88] %v10512_v7  ;;  %v10699_v1 = vrot.slane %v10694_v56, 4  ;;  %v19737_v12 = vrot.slane %v18562_v44, 4 }
 0x544   : > { %10619 = vst [vmem:[#allocation2 + $0x3c0] sm:$0x11] %v10609_v28  ;;  %v10797_v36 = vrot.slane %v10792_v17, 4  ;;  %vm19746_vm11 = vmmov %vm19744_vm0  ;;  %vm19748_vm4 = vcmask 302080   ;;  %vm19750_vm9 = vcmask 293888  }
 0x545   : > { %v10706_v53 = vsel %vm427_vm1, %v19730_v37, %v10699_v1  ;;  %v10708_v19 = vsel %vm9123_vm15, %v10694_v56, %v10699_v1  ;;  %v19741_v1 = vrot.slane %v18586_v0, 4  ;;  %vm19751_vm7 = vmmov %vm19748_vm4 }
 0x546   : > { %v10805_v60 = vsel %vm427_vm1, %v19731_v22, %v10797_v36  ;;  %v10807_v15 = vsel %vm19732_vm5, %v10792_v17, %v10797_v36  ;;  %v10707_v49 = vsel %vm9123_vm15, %v18510_v31, %v10706_v53  ;;  %10718 = vst [vmem:[#allocation2 + $0x3c8] sm:$0x2] %v10708_v19  ;;  %v10892_v39 = vpop.permute.xlu0 %10891  ;;  %vm19735_vm15 = vcmask 400384   ;;  %vm19752_vm5 = vmmov %vm19750_vm9 }
 0x547   : > { %v10806_v34 = vsel %vm19733_vm8, %v18534_v4, %v10805_v60  ;;  %10817 = vst [vmem:[#allocation2 + $0x3c8] sm:$0x4] %v10807_v15  ;;  %v10990_v24 = vpop.permute.xlu1 %10989  ;;  %10717 = vst [vmem:[#allocation2 + $0x3c0] sm:$0x22] %v10707_v49  ;;  %v10897_v8 = vrot.slane %v10892_v39, 4  ;;  %v19743_v53 = vrot.slane %v18608_v11, 4 }
 0x548   : > { %10816 = vst [vmem:[#allocation2 + $0x3c0] sm:$0x44] %v10806_v34  ;;  %v10995_v18 = vrot.slane %v10990_v24, 4  ;;  %vm19736_vm12 = vmmov %vm19735_vm15  ;;  %vm19755_vm8 = vcmask 220160  }
 0x549   : > { %v10905_v9 = vsel %vm427_vm1, %v10896_v3, %v10897_v8  ;;  %v10907_v25 = vsel %vm10899_vm13, %v10892_v39, %v10897_v8  ;;  %v14767_v4 = vld [vmem:[#allocation2 + $0x380] ss:$36 sps:$4 sm:$0xff]   ;;  %v19747_v39 = vrot.slane %v18610_v5, 4 }
 0x54a   : > { %v11003_v31 = vsel %vm427_vm1, %v19734_v33, %v10995_v18  ;;  %v11005_v35 = vsel %vm19735_vm15, %v10990_v24, %v10995_v18  ;;  %v10906_v27 = vsel %vm10899_vm13, %v18536_v55, %v10905_v9  ;;  %10917 = vst [vmem:[#allocation2 + $0x3c8] sm:$0x8] %v10907_v25  ;;  %v11089_v54 = vpop.permute.xlu0 %11088  ;;  %v14768_v21 = vld [vmem:[#allocation2 + $0x378] ss:$36 sps:$4 sm:$0xff]   ;;  %14355 = vmatprep.subr.bf16.mxu0 %v14767_v4  ;;  %vm19738_vm13 = vcmask 392192   ;;  %vm19756_vm15 = vmmov %vm19755_vm8 }
 0x54b   : > { %v11004_v2 = vsel %vm19736_vm12, %v18560_v26, %v11003_v31  ;;  %11015 = vst [vmem:[#allocation2 + $0x3ec] sm:$0x1] %v11005_v35  ;;  %v11187_v3 = vpop.permute.xlu1 %11186  ;;  %v14770_v59 = vld [vmem:[#allocation2 + $0x37c] ss:$36 sps:$4 sm:$0xff]   ;;  %10916 = vst [vmem:[#allocation2 + $0x3c0] sm:$0x88] %v10906_v27  ;;  %14356 = vmatpush3.bf16.msra.mxu0 %v14771_v48 }
 0x54c   : > { %11014 = vst [vmem:[#allocation2 + $0x3e4] sm:$0x11] %v11004_v2  ;;  %v11094_v52 = vrot.slane %v11089_v54, 4  ;;  %v11192_v14 = vrot.slane %v11187_v3, 4  ;;  %13680 = vmatprep.subr.bf16.mxu1 %v14770_v59  ;;  %v19739_v26 = vrot.slane %v18584_v29, 4  ;;  %vm19740_vm14 = vmmov %vm19738_vm13  ;;  %v19749_v18 = vrot.slane %v18631_v42, 4 }
 0x54d   : > { %13681 = vmatpush1.bf16.msra.mxu1 %v14768_v21  ;;  %v19753_v48 = vrot.slane %v18633_v45, 4  ;;  %v14776_v21 = vld [vmem:[#allocation2 + $0x188] ss:$36 sps:$4 sm:$0xff]   ;;  %vm19760_vm12 = vcmask 203776  }
 0x54e   : > { %v11101_v55 = vsel %vm427_vm1, %v19737_v12, %v11094_v52  ;;  %v11103_v58 = vsel %vm19738_vm13, %v11089_v54, %v11094_v52  ;;  %v11199_v13 = vsel %vm427_vm1, %v19739_v26, %v11192_v14  ;;  %v11201_v40 = vsel %vm9617_vm2, %v11187_v3, %v11192_v14  ;;  %v11286_v7 = vpop.permute.xlu0 %11285 }
 0x54f   : > { %v11102_v38 = vsel %vm19740_vm14, %v18562_v44, %v11101_v55  ;;  %11113 = vst [vmem:[#allocation2 + $0x3ec] sm:$0x2] %v11103_v58  ;;  %v11200_v30 = vsel %vm9617_vm2, %v18584_v29, %v11199_v13  ;;  %11211 = vst [vmem:[#allocation2 + $0x3ec] sm:$0x4] %v11201_v40  ;;  %v11384_v28 = vpop.permute.xlu1 %11383  ;;  %v11291_v56 = vrot.slane %v11286_v7, 4  ;;  %v19754_v54 = vrot.slane %v18651_v10, 4 }
 0x550   : > { %11112 = vst [vmem:[#allocation2 + $0x3e4] sm:$0x22] %v11102_v38  ;;  %11210 = vst [vmem:[#allocation2 + $0x3e4] sm:$0x44] %v11200_v30  ;;  %v11389_v17 = vrot.slane %v11384_v28, 4  ;;  %v19757_v40 = vrot.slane %v18653_v20, 4 }
 0x551   : > { %v11299_v36 = vsel %vm427_vm1, %v19741_v1, %v11291_v56  ;;  %v11301_v37 = vsel %vm19742_vm10, %v11286_v7, %v11291_v56  ;;  %vm19745_vm2 = vmmov %vm19742_vm10  ;;  %vm19764_vm10 = vcmask 195584  }
 0x552   : > { %v11397_v44 = vsel %vm427_vm1, %v19743_v53, %v11389_v17  ;;  %v11399_v19 = vsel %vm19744_vm0, %v11384_v28, %v11389_v17  ;;  %v11300_v29 = vsel %vm19745_vm2, %v18586_v0, %v11299_v36  ;;  %11311 = vst [vmem:[#allocation2 + $0x3ec] sm:$0x8] %v11301_v37  ;;  %v11483_v60 = vpop.permute.xlu0 %11482  ;;  %vm19762_vm14 = vmmov %vm19760_vm12  ;;  %v19763_v53 = vrot.slane %v18673_v57, 4 }
 0x553   : > { %v11398_v22 = vsel %vm19746_vm11, %v18608_v11, %v11397_v44  ;;  %11409 = vst [vmem:[#allocation2 + $0x410] sm:$0x1] %v11399_v19  ;;  %v11582_v15 = vpop.permute.xlu1 %11581  ;;  %11310 = vst [vmem:[#allocation2 + $0x3e4] sm:$0x88] %v11300_v29  ;;  %v11488_v49 = vrot.slane %v11483_v60, 4  ;;  %v19765_v29 = vrot.slane %v18691_v61, 4 }
 0x554   : > { %11408 = vst [vmem:[#allocation2 + $0x408] sm:$0x11] %v11398_v22  ;;  %v11587_v34 = vrot.slane %v11582_v15, 4  ;;  %vm19766_vm0 = vcmask 130048   ;;  %vm19767_vm2 = vmmov %vm19764_vm10 }
 0x555   : > { %v11496_v24 = vsel %vm427_vm1, %v19747_v39, %v11488_v49  ;;  %v11498_v8 = vsel %vm19748_vm4, %v11483_v60, %v11488_v49  ;;  %vm19768_vm11 = vmmov %vm19766_vm0  ;;  %vm19770_vm4 = vcmask 121856  }
 0x556   : > { %v11595_v0 = vsel %vm427_vm1, %v19749_v18, %v11587_v34  ;;  %v11597_v9 = vsel %vm19750_vm9, %v11582_v15, %v11587_v34  ;;  %v11497_v11 = vsel %vm19751_vm7, %v18610_v5, %v11496_v24  ;;  %11508 = vst [vmem:[#allocation2 + $0x410] sm:$0x2] %v11498_v8  ;;  %v11682_v33 = vpop.permute.xlu0 %11681  ;;  %v19769_v24 = vrot.slane %v18693_v50, 4  ;;  %vm19773_vm7 = vmmov %vm19770_vm4 }
 0x557   : > { %v11596_v25 = vsel %vm19752_vm5, %v18631_v42, %v11595_v0  ;;  %11607 = vst [vmem:[#allocation2 + $0x410] sm:$0x4] %v11597_v9  ;;  %v11779_v31 = vpop.permute.xlu1 %11778  ;;  %11507 = vst [vmem:[#allocation2 + $0x408] sm:$0x22] %v11497_v11  ;;  %v11687_v35 = vrot.slane %v11682_v33, 4  ;;  %v19771_v0 = vrot.slane %v18711_v47, 4 }
 0x558   : > { %11606 = vst [vmem:[#allocation2 + $0x408] sm:$0x44] %v11596_v25  ;;  %v11784_v4 = vrot.slane %v11779_v31, 4  ;;  %vm19772_vm9 = vcmask 113664  }
 0x559   : > { %v11694_v27 = vsel %vm427_vm1, %v19753_v48, %v11687_v35  ;;  %v11696_v2 = vsel %vm10113_vm6, %v11682_v33, %v11687_v35  ;;  %v14772_v42 = vld [vmem:[#allocation2 + $0x3c8] ss:$36 sps:$4 sm:$0xff]   ;;  %vm19774_vm5 = vmmov %vm19772_vm9 }
 0x55a   : > { %v11792_v5 = vsel %vm427_vm1, %v19754_v54, %v11784_v4  ;;  %v11794_v3 = vsel %vm19755_vm8, %v11779_v31, %v11784_v4  ;;  %v11695_v59 = vsel %vm10113_vm6, %v18633_v45, %v11694_v27  ;;  %11706 = vst [vmem:[#allocation2 + $0x410] sm:$0x8] %v11696_v2  ;;  %v11878_v14 = vpop.permute.xlu0 %11877  ;;  %v14773_v55 = vld [vmem:[#allocation2 + $0x3c0] ss:$36 sps:$4 sm:$0xff]   ;;  %14357 = vmatprep.subr.bf16.mxu0 %v14772_v42  ;;  %vm19758_vm6 = vcmask 211968  }
 0x55b   : > { %v11793_v52 = vsel %vm19756_vm15, %v18651_v10, %v11792_v5  ;;  %11804 = vst [vmem:[#allocation2 + $0x434] sm:$0x1] %v11794_v3  ;;  %v11977_v12 = vpop.permute.xlu1 %11976  ;;  %v14775_v58 = vld [vmem:[#allocation2 + $0x3c4] ss:$36 sps:$4 sm:$0xff]   ;;  %11705 = vst [vmem:[#allocation2 + $0x408] sm:$0x88] %v11695_v59  ;;  %14358 = vmatpush3.bf16.msra.mxu0 %v14776_v21 }
 0x55c   : > { %11803 = vst [vmem:[#allocation2 + $0x42c] sm:$0x11] %v11793_v52  ;;  %v11883_v26 = vrot.slane %v11878_v14, 4  ;;  %v11982_v13 = vrot.slane %v11977_v12, 4  ;;  %13682 = vmatprep.subr.bf16.mxu1 %v14775_v58  ;;  %v19759_v10 = vrot.slane %v18671_v46, 4  ;;  %vm19761_vm13 = vmmov %vm19758_vm6  ;;  %v19775_v4 = vrot.slane %v18713_v43, 4 }
 0x55d   : > { %13683 = vmatpush1.bf16.msra.mxu1 %v14773_v55  ;;  %v19776_v2 = vrot.slane %v18731_v41, 4  ;;  %vm19777_vm8 = vcmask 97280   ;;  %v14781_v5 = vld [vmem:[#allocation2 + $0x1d0] ss:$36 sps:$4 sm:$0xff]   ;;  %v14785_v52 = vld [vmem:[#allocation2 + $0x218] ss:$36 sps:$4 sm:$0xff]  }
 0x55e   : > { %v11891_v45 = vsel %vm427_vm1, %v19757_v40, %v11883_v26  ;;  %v11893_v38 = vsel %vm19758_vm6, %v11878_v14, %v11883_v26  ;;  %v11990_v30 = vsel %vm427_vm1, %v19759_v10, %v11982_v13  ;;  %v11992_v7 = vsel %vm19760_vm12, %v11977_v12, %v11982_v13  ;;  %v12077_v17 = vpop.permute.xlu0 %12076  ;;  %vm19778_vm15 = vmmov %vm19777_vm8 }
 0x55f   : > { %v11892_v28 = vsel %vm19761_vm13, %v18653_v20, %v11891_v45  ;;  %11903 = vst [vmem:[#allocation2 + $0x434] sm:$0x2] %v11893_v38  ;;  %v11991_v56 = vsel %vm19762_vm14, %v18671_v46, %v11990_v30  ;;  %12002 = vst [vmem:[#allocation2 + $0x434] sm:$0x4] %v11992_v7  ;;  %v12175_v1 = vpop.permute.xlu1 %12174  ;;  %v12082_v36 = vrot.slane %v12077_v17, 4  ;;  %v13758_v58 = vsub.s32 3, %v19708_v6 }
 0x560   : > { %11902 = vst [vmem:[#allocation2 + $0x42c] sm:$0x22] %v11892_v28  ;;  %12001 = vst [vmem:[#allocation2 + $0x42c] sm:$0x44] %v11991_v56  ;;  %v12180_v37 = vrot.slane %v12175_v1, 4  ;;  %vm13865_vm12 = vcmask 7168  }
 0x561   : > { %v12090_v44 = vsel %vm427_vm1, %v19763_v53, %v12082_v36  ;;  %v12092_v19 = vsel %vm19764_vm10, %v12077_v17, %v12082_v36  ;;  %v13759_v13 = vrot.slane %v18858_v51, %v13758_v58  ;;  %vm13868_vm13 = vcmask 15360  }
 0x562   : > { %v12188_v20 = vsel %vm427_vm1, %v19765_v29, %v12180_v37  ;;  %v12190_v22 = vsel %vm19766_vm0, %v12175_v1, %v12180_v37  ;;  %v12091_v46 = vsel %vm19767_vm2, %v18673_v57, %v12090_v44  ;;  %12102 = vst [vmem:[#allocation2 + $0x434] sm:$0x8] %v12092_v19  ;;  %v12274_v15 = vpop.permute.xlu0 %12273 }
 0x563   : > { %v12189_v60 = vsel %vm19768_vm11, %v18691_v61, %v12188_v20  ;;  %12200 = vst [vmem:[#allocation2 + $0x458] sm:$0x1] %v12190_v22  ;;  %v12373_v49 = vpop.permute.xlu1 %12372  ;;  %12101 = vst [vmem:[#allocation2 + $0x42c] sm:$0x88] %v12091_v46  ;;  %v12279_v34 = vrot.slane %v12274_v15, 4 }
 0x564   : > { %12199 = vst [vmem:[#allocation2 + $0x450] sm:$0x11] %v12189_v60  ;;  %v12378_v39 = vrot.slane %v12373_v49, 4 }
 0x565   : > { %v12287_v8 = vsel %vm427_vm1, %v19769_v24, %v12279_v34  ;;  %v12289_v18 = vsel %vm19770_vm4, %v12274_v15, %v12279_v34  ;;  %v13762_v15 = vsub.s32 4, %v19708_v6 }
 0x566   : > { %v12386_v57 = vsel %vm427_vm1, %v19771_v0, %v12378_v39  ;;  %v12388_v9 = vsel %vm19772_vm9, %v12373_v49, %v12378_v39  ;;  %v12288_v61 = vsel %vm19773_vm7, %v18693_v50, %v12287_v8  ;;  %12299 = vst [vmem:[#allocation2 + $0x458] sm:$0x2] %v12289_v18  ;;  %v12473_v25 = vpop.permute.xlu0 %12472  ;;  %v13766_v49 = vsub.s32 5, %v19708_v6 }
 0x567   : > { %v12387_v11 = vsel %vm19774_vm5, %v18711_v47, %v12386_v57  ;;  %12398 = vst [vmem:[#allocation2 + $0x458] sm:$0x4] %v12388_v9  ;;  %v12571_v33 = vpop.permute.xlu1 %12570  ;;  %12298 = vst [vmem:[#allocation2 + $0x450] sm:$0x22] %v12288_v61  ;;  %v12478_v31 = vrot.slane %v12473_v25, 4  ;;  %v13763_v34 = vrot.slane %v18858_v51, %v13762_v15 }
 0x568   : > { %12397 = vst [vmem:[#allocation2 + $0x450] sm:$0x44] %v12387_v11  ;;  %v12576_v35 = vrot.slane %v12571_v33, 4 }
 0x569   : > { %v12486_v48 = vsel %vm427_vm1, %v19775_v4, %v12478_v31  ;;  %v12488_v27 = vsel %vm12480_vm3, %v12473_v25, %v12478_v31  ;;  %v14777_v47 = vld [vmem:[#allocation2 + $0x410] ss:$36 sps:$4 sm:$0xff]  }
 0x56a   : > { %v12584_v50 = vsel %vm427_vm1, %v19776_v2, %v12576_v35  ;;  %v12586_v54 = vsel %vm19777_vm8, %v12571_v33, %v12576_v35  ;;  %v12487_v3 = vsel %vm12480_vm3, %v18713_v43, %v12486_v48  ;;  %12498 = vst [vmem:[#allocation2 + $0x458] sm:$0x8] %v12488_v27  ;;  %v14778_v21 = vld [vmem:[#allocation2 + $0x408] ss:$36 sps:$4 sm:$0xff]   ;;  %14359 = vmatprep.subr.bf16.mxu0 %v14777_v47  ;;  %vm19779_vm1 = vcmask 1044480  }
 0x56b   : > { %v12585_v42 = vsel %vm19778_vm15, %v18731_v41, %v12584_v50  ;;  %12596 = vst [vmem:[#allocation2 + $0x47c] sm:$0x1] %v12586_v54  ;;  %v14780_v59 = vld [vmem:[#allocation2 + $0x40c] ss:$36 sps:$4 sm:$0xff]   ;;  %12497 = vst [vmem:[#allocation2 + $0x450] sm:$0x88] %v12487_v3  ;;  %14360 = vmatpush3.bf16.msra.mxu0 %v14781_v5 }
 0x56c   : > { %12595 = vst [vmem:[#allocation2 + $0x474] sm:$0x11] %v12585_v42  ;;  %13684 = vmatprep.subr.bf16.mxu1 %v14780_v59  ;;  %vm19780_vm3 = vmmov %vm19779_vm1  ;;  %v13754_v41 = vsub.s32 2, %v19708_v6  ;;  %v13770_v5 = vsub.s32 6, %v19708_v6  ;;  %v13774_v3 = vsub.s32 7, %v19708_v6 }
 0x56d   : > { %13685 = vmatpush1.bf16.msra.mxu1 %v14778_v21  ;;  %vm19781_vm6 = vmmov %vm19779_vm1 }
 0x56e   : > { %v13755_v26 = vrot.slane %v18858_v51, %v13754_v41  ;;  %v13771_v42 = vrot.slane %v18858_v51, %v13770_v5  ;;  %v13775_v21 = vrot.slane %v18858_v51, %v13774_v3 }
 0x572   : > { %v14782_v14 = vld [vmem:[#allocation2 + $0x458] ss:$36 sps:$4 sm:$0x1f]  }
 0x573   : > { %v14783_v12 = vld [vmem:[#allocation2 + $0x454] ss:$36 sps:$4 sm:$0x1f]   ;;  %14369 = vmatprep.subr.msk.bf16.mxu0 %vm19779_vm1, %v14782_v14 }
 0x574   : > { %v14786_v55 = vld [vmem:[#allocation2 + $0x450] ss:$36 sps:$4 sm:$0x1f]   ;;  %14320 = vmatprep.subr.msk.bf16.mxu1 %vm19780_vm3, %v14783_v12  ;;  %14362 = vmatpush3.bf16.msra.mxu0 %v14785_v52  ;;  %v14323_v12 = vld [vmem:[%s19710_s25 + $0x8] ss:$0 sm:$0xff] }
 0x575   : > { %v13519_v43 = vsel %vm19781_vm6, %v14786_v55, 0 }
 0x576   : > { %13687 = vmatpush1.bf16.msra.mxu1 %v13519_v43 }
 0x577   : > { %13732 = vmatmul.mubr.bf16.vlgmr.msra.gmra.mrb[8].mxu0 %v18800_v23 }
 0x579   : > { %13689 = vmatmul.mubr.bf16.vlgmr.msra.gmra.mrb[4].mxu1 %v18800_v23 }
 0x592   : > { %v13604_v40 = vpop.f32.mrb[0].mxu1 }
 0x593   : > { %v13791_v45 = vmul.f32 %v13755_v26, %v13604_v40  ;;  %v13606_v38 = vpop.f32.mrb[1].mxu1 }
 0x594   : > { %v13792_v10 = vmul.f32 %v13759_v13, %v13606_v38  ;;  %v14338_v30 = vpack.c.bf16 %v13606_v38, %v13604_v40  ;;  %v13608_v7 = vpop.f32.mrb[2].mxu1 }
 0x595   : > { %v13808_v28 = vadd.f32 %v18892_v63, %v13791_v45  ;;  %v13829_v56 = vmul.f32 %v13791_v45, %v13604_v40  ;;  %v13800_v23 = vmul.f32 %v13755_v26, %v13608_v7  ;;  %v13610_v17 = vpop.f32.mrb[3].mxu1 }
 0x596   : > { %v13830_v1 = vmul.f32 %v13792_v10, %v13606_v38  ;;  %13930 = vst [vmem:[%s18890_s19 + $0x8] sm:$0xff] %v14338_v30  ;;  %v13801_v36 = vmul.f32 %v13759_v13, %v13610_v17  ;;  %v14343_v37 = vpack.c.bf16 %v13610_v17, %v13608_v7 }
 0x597   : > { %v13846_v53 = vadd.f32 %v18907_v62, %v13829_v56  ;;  %v13809_v44 = vadd.f32 %v13808_v28, %v13792_v10  ;;  %v13818_v19 = vadd.f32 %v18922_v32, %v13800_v23  ;;  %v13838_v29 = vmul.f32 %v13800_v23, %v13608_v7 }
 0x598   : > { %v13839_v20 = vmul.f32 %v13801_v36, %v13610_v17  ;;  %13935 = vst [vmem:[%s18890_s19 + $0x2c] sm:$0xff] %v14343_v37  ;;  %v13767_v62 = vrot.slane %v18858_v51, %v13766_v49 }
 0x599   : > { %v13847_v22 = vadd.f32 %v13846_v53, %v13830_v1  ;;  %v13856_v46 = vadd.f32 %v18924_v16, %v13838_v29  ;;  %v13819_v60 = vadd.f32 %v13818_v19, %v13801_v36 }
 0x59b   : > { %v13857_v63 = vadd.f32 %v13856_v46, %v13839_v20 }
 0x5f1   : > { %v13647_v39 = vpop.f32.mrb[4].mxu0 }
 0x5f2   : > { %v13793_v24 = vmul.f32 %v13763_v34, %v13647_v39  ;;  %v13649_v32 = vpop.f32.mrb[5].mxu0 }
 0x5f3   : > { %v13794_v8 = vmul.f32 %v13767_v62, %v13649_v32  ;;  %v14339_v18 = vpack.c.bf16 %v13649_v32, %v13647_v39  ;;  %v13651_v0 = vpop.f32.mrb[6].mxu0 }
 0x5f4   : > { %v13810_v57 = vadd.f32 %v13809_v44, %v13793_v24  ;;  %v13831_v16 = vmul.f32 %v13793_v24, %v13647_v39  ;;  %v13802_v9 = vmul.f32 %v13763_v34, %v13651_v0  ;;  %v13653_v61 = vpop.f32.mrb[7].mxu0 }
 0x5f5   : > { %v13832_v11 = vmul.f32 %v13794_v8, %v13649_v32  ;;  %13931 = vst [vmem:[%s18890_s19 + $0x10] sm:$0xff] %v14339_v18  ;;  %v13803_v25 = vmul.f32 %v13767_v62, %v13653_v61  ;;  %v14344_v33 = vpack.c.bf16 %v13653_v61, %v13651_v0 }
 0x5f6   : > { %v13848_v31 = vadd.f32 %v13847_v22, %v13831_v16  ;;  %v13811_v35 = vadd.f32 %v13810_v57, %v13794_v8  ;;  %v13820_v4 = vadd.f32 %v13819_v60, %v13802_v9  ;;  %v13840_v48 = vmul.f32 %v13802_v9, %v13651_v0 }
 0x5f7   : > { %v13841_v27 = vmul.f32 %v13803_v25, %v13653_v61  ;;  %13936 = vst [vmem:[%s18890_s19 + $0x34] sm:$0xff] %v14344_v33 }
 0x5f8   : > { %v13849_v2 = vadd.f32 %v13848_v31, %v13832_v11  ;;  %v13858_v50 = vadd.f32 %v13857_v63, %v13840_v48  ;;  %v13821_v54 = vadd.f32 %v13820_v4, %v13803_v25 }
 0x5fa   : > { %v13859_v47 = vadd.f32 %v13858_v50, %v13841_v27 }
 0x64a   : > { %v14363_v59 = vpop.f32.mrb[8].mxu0 }
 0x64b   : > { %v14364_v14 = vpop.f32.mrb[9].mxu0 }
 0x64c   : > { %v13690_v52 = vpop.f32.mrb[4].mxu1  ;;  %v14365_v43 = vadd.f32 %v14364_v14, %v14363_v59  ;;  %v14366_v58 = vpop.f32.mrb[10].mxu0 }
 0x64d   : > { %v13795_v55 = vmul.f32 %v13771_v42, %v13690_v52  ;;  %v13692_v41 = vpop.f32.mrb[5].mxu1  ;;  %v14367_v40 = vpop.f32.mrb[11].mxu0 }
 0x64e   : > { %v13796_v26 = vmul.f32 %v13775_v21, %v13692_v41  ;;  %v14340_v13 = vpack.c.bf16 %v13692_v41, %v13690_v52  ;;  %v13694_v6 = vpop.f32.mrb[6].mxu1  ;;  %v13797_v51 = vmul.f32 %v14365_v43, %v14323_v12  ;;  %v14341_v10 = vpack.c.bf16 %v14365_v43, %v14365_v43 }
 0x64f   : > { %v13812_v45 = vadd.f32 %v13811_v35, %v13795_v55  ;;  %v13833_v38 = vmul.f32 %v13795_v55, %v13690_v52  ;;  %v13696_v30 = vpop.f32.mrb[7].mxu1  ;;  %v13804_v28 = vmul.f32 %v13771_v42, %v13694_v6  ;;  %v14368_v56 = vadd.f32 %v14367_v40, %v14366_v58 }
 0x650   : > { %v13834_v7 = vmul.f32 %v13796_v26, %v13692_v41  ;;  %13932 = vst [vmem:[%s18890_s19 + $0x18] sm:$0xff] %v14340_v13  ;;  %v13805_v23 = vmul.f32 %v13775_v21, %v13696_v30  ;;  %13933 = vst [vmem:[%s18890_s19 + $0x20] sm:$0xf] %v14341_v10  ;;  %v14345_v36 = vpack.c.bf16 %v13696_v30, %v13694_v6 }
 0x651   : > { %v13850_v17 = vadd.f32 %v13849_v2, %v13833_v38  ;;  %v13813_v1 = vadd.f32 %v13812_v45, %v13796_v26  ;;  %v13822_v37 = vadd.f32 %v13821_v54, %v13804_v28  ;;  %v13842_v53 = vmul.f32 %v13804_v28, %v13694_v6 }
 0x652   : > { %v13806_v44 = vmul.f32 %v14368_v56, %v14323_v12  ;;  %v14346_v19 = vpack.c.bf16 %v14368_v56, %v14368_v56  ;;  %v13835_v29 = vmul.f32 %v14365_v43, %v13797_v51  ;;  %v13843_v22 = vmul.f32 %v13805_v23, %v13696_v30  ;;  %13937 = vst [vmem:[%s18890_s19 + $0x3c] sm:$0xff] %v14345_v36 }
 0x653   : > { %v13851_v20 = vadd.f32 %v13850_v17, %v13834_v7  ;;  %v13814_v46 = vadd.f32 %v13813_v1, %v13797_v51  ;;  %v13860_v60 = vadd.f32 %v13859_v47, %v13842_v53  ;;  %v13823_v63 = vadd.f32 %v13822_v37, %v13805_v23 }
 0x654   : > { %13938 = vst [vmem:[%s18890_s19 + $0x44] sm:$0xf] %v14346_v19  ;;  %v13844_v49 = vmul.f32 %v14368_v56, %v13806_v44 }
 0x655   : > { %13815 = vadd.xlane.f32.xlu0 %v13814_v46  ;;  %v13852_v15 = vadd.f32 %v13851_v20, %v13835_v29  ;;  %v13861_v34 = vadd.f32 %v13860_v60, %v13843_v22  ;;  %v13824_v62 = vadd.f32 %v13823_v63, %v13806_v44 }
 0x657   : > { %13825 = vadd.xlane.f32.xlu1 %v13824_v62  ;;  %v13862_v39 = vadd.f32 %v13861_v34, %v13844_v49 }
 0x659   : > { %13853 = vadd.xlane.f32.xlu0 %v13852_v15 }
 0x65d   : > { %13863 = vadd.xlane.f32.xlu0 %v13862_v39 }
 0x6e2   : > { %v13816_v24 = vpop.xlane.xlu0 %13815 }
 0x6e4   : > { %v13826_v0 = vpop.xlane.xlu1 %13825 }
 0x6e6   : > { %v13854_v32 = vpop.xlane.xlu0 %13853 }
 0x6e7   : > { %v13866_v8 = vsel %vm13865_vm12, %v13816_v24, %v13854_v32 }
 0x6e8   : > { %v13869_v18 = vsel %vm13868_vm13, %v13866_v8, 0.0 }
 0x6e9   : > { %13871 = vst [vmem:[%s273_s7] sm:$0xff] %v13869_v18 }
 0x6ea   : > { %v13864_v57 = vpop.xlane.xlu0 %13863 }
 0x6eb   : > { %v13867_v16 = vsel %vm13865_vm12, %v13826_v0, %v13864_v57 }
 0x6ec   : > { %v13870_v9 = vsel %vm13868_vm13, %v13867_v16, 0.0 }
 0x6ed   : > { %13872 = vst [vmem:[%s273_s7 + $0x8] sm:$0xff] %v13870_v9 }
 0x6ee PF: > { %s19783_s9 = sld [smem:[#allocation4_spill]]  ;;  %s19784_s15 = sld [smem:[#allocation3_spill]] }
 0x6ef   : > { %s19785_s16 = sld [smem:[#allocation5_spill]] }
 0x6f4   : > { %s15_s17 = sadd.s32 1, %s19783_s9  }
 0x6f5   : > { %p12_p5 = scmp.ge.s32.totalorder %s15_s17, 4  }
 0x6f7   :  { %14 = sbr.rel (!%p12_p5) target bundleno = 5 (0x5), region = 77 }

</bundles_post_ra>
